<compile_context>
chip_gen: v7x
topology: tpu7x:2x2x1
jax: 0.10.0
libtpu: 0.0.40
codegen_flags: <defaults>
</compile_context>

<pallas_src>
import jax
import jax.numpy as jnp
from jax.experimental import pallas as pl
from jax.experimental.pallas import tpu as pltpu

# ---------------- model dims (small but consistent with the module) ---------
B = 2          # batch
N = 128        # number of points
F = 16         # in_channels (per-point feature dim)
E = 256        # attention embed dim (128 local + 128 global)
H = 4          # attention heads
HD = E // H    # head dim = 64
P = 50         # num_parts
P_PAD = 128    # lane-dense padded classifier width
C1 = 256       # local conv1 output width


# ---------------- Pallas kernel ---------------------------------------------
def pcs_head_kernel(
    x_ref,                      # (BB*N, F)     input point features (BB batches)
    qkvb_ref,                   # (BB, 1, 3E)   per-batch qkv bias (global fold, Q pre-scaled)
    wxl_ref,                    # (F, C1+P_PAD) bf16  [w1 | wr@wc_pad]
    b1_ref,                     # (1, C1)       f32   conv1 bias (BN folded)
    w2_ref,                     # (C1, 128)     bf16  conv2 (BN folded)
    b2_ref,                     # (1, 128)      f32
    winl_ref,                   # (128, 3E)     bf16  in_proj rows for the local half (Q cols pre-scaled)
    woc_ref,                    # (E, P_PAD)    bf16  wout @ wc_pad
    btot_ref,                   # (1, P_PAD)    f32   bc_pad + (bout + br) @ wc_pad
    out_ref,                    # (BB*N, P_PAD)
    head_ref,                   # VMEM (BB*N, E) f32 scratch: concatenated head outputs
):
    bb = qkvb_ref.shape[0]
    bf16 = jnp.bfloat16

    x = x_ref[...]                                             # (M, F) f32

    # ---- merged K=16 matmul: conv1 columns + residual-through-classifier ----
    xw = jnp.dot(x.astype(bf16), wxl_ref[...],
                 preferred_element_type=jnp.float32)           # (M, C1+P_PAD)
    h1 = jnp.maximum(xw[:, :C1] + b1_ref[...], 0.0)            # (M, 256)
    res_cls = xw[:, C1:]                                       # (M, P_PAD) = x @ (wr @ wc_pad)

    # ---- local MLP conv2 (Conv1d -> BN -> ReLU), Dropout = identity ---------
    # TODO(synk): Dropout is identity (eval mode); no stochastic masking here.
    local = jnp.maximum(
        jnp.dot(h1.astype(bf16), w2_ref[...],
                preferred_element_type=jnp.float32) + b2_ref[...], 0.0)   # (M, 128)

    # ---- in_proj, global branch folded in as a per-batch bias row -----------
    # qkv = [local | global] @ W_in + b_in
    #     = local @ W_in[:128] + (g2 @ W_in[128:] + b_in)   (per-batch row)
    # (Q columns of both terms pre-scaled by 1/sqrt(HD) in the wrapper.)
    qkv = jnp.dot(local.astype(bf16), winl_ref[...],
                  preferred_element_type=jnp.float32)          # (M, 3E)

    # ---- MultiheadAttention (4 heads); head outputs -> VMEM slab -------------
    for b in range(bb):
        qkv_b = qkv[b * N:(b + 1) * N, :] + qkvb_ref[b]        # (N, 3E)
        for h in range(H):
            qh = qkv_b[:, 0 * E + h * HD:0 * E + (h + 1) * HD].astype(bf16)
            kh = qkv_b[:, 1 * E + h * HD:1 * E + (h + 1) * HD].astype(bf16)
            vh = qkv_b[:, 2 * E + h * HD:2 * E + (h + 1) * HD].astype(bf16)
            s = jnp.dot(qh, kh.T, preferred_element_type=jnp.float32)   # (N, N), scale folded
            s = s - jnp.max(s, axis=-1, keepdims=True)
            pexp = jnp.exp(s)
            pw = pexp * pl.reciprocal(jnp.sum(pexp, axis=-1, keepdims=True),
                                      approx=True)
            oh = jnp.dot(pw.astype(bf16), vh,
                         preferred_element_type=jnp.float32)            # (N, 64)
            head_ref[b * N:(b + 1) * N, h * HD:(h + 1) * HD] = oh

    # ---- single fused epilogue: out_proj + residual + classifier ------------
    out = (jnp.dot(head_ref[...].astype(bf16), woc_ref[...],
                   preferred_element_type=jnp.float32)
           + res_cls + btot_ref[...])                          # (M, P_PAD)
    out_ref[...] = out.astype(out_ref.dtype)


# ---------------- wrapper -----------------------------------------------------
def _batches_per_grid_step():
    """v7x has 2 TensorCores -> keep grid=(B,) 'parallel'; single-TC chips fold
    the batch into the M dimension and use one grid step."""
    try:
        kind = jax.devices()[0].device_kind.lower()
    except Exception:
        kind = ""
    return 1 if "v7" in kind else B


def pcs_head_forward(x, params, *, batch_block=None):
    """x: (B, N, F) float32 -> (B, N, P) float32."""
    if batch_block is None:
        batch_block = _batches_per_grid_step()
    assert B % batch_block == 0
    grid = (B // batch_block,)
    BB = batch_block
    M = BB * N
    bf16 = jnp.bfloat16

    # Hoisted global branch: two M=1 matmuls + a cross-point max are cheaper in
    # XLA than as dedicated (nearly empty) MXU passes inside the kernel.
    gmax = jnp.max(x, axis=1, keepdims=True)                       # (B, 1, F)
    g1 = jax.nn.relu(gmax @ params["wg1"] + params["bg1"])         # (B, 1, 256)
    g2 = jax.nn.relu(g1 @ params["wg2"] + params["bg2"])           # (B, 1, 128)

    win = params["win"]                                            # (256, 3E)
    win_local = win[:128, :]                                       # (128, 3E)
    win_global = win[128:, :]                                      # (128, 3E)
    qkv_bias = g2 @ win_global + params["bin"]                     # (B, 1, 3E)

    # Fold the attention scale 1/sqrt(HD) into the Q columns (exact: 0.125).
    scale = 1.0 / (HD ** 0.5)
    col_scale = jnp.concatenate(
        [jnp.full((E,), scale, jnp.float32), jnp.ones((2 * E,), jnp.float32)])
    win_local = win_local * col_scale[None, :]
    qkv_bias = qkv_bias * col_scale[None, None, :]

    # Pad the 50-wide classifier to 128 lanes and fuse out_proj / residual /
    # classifier:  out = heads @ (wout@wc) + x @ (wr@wc) + (bout+br)@wc + bc.
    wc_pad = jnp.zeros((E, P_PAD), jnp.float32).at[:, :P].set(params["wc"])
    bc_pad = jnp.zeros((1, P_PAD), jnp.float32).at[:, :P].set(params["bc"])
    woc = params["wout"] @ wc_pad                                  # (E, P_PAD)
    wrc = params["wr"] @ wc_pad                                    # (F, P_PAD)
    btot = bc_pad + (params["bout"] + params["br"]) @ wc_pad       # (1, P_PAD)

    # Merge the two K=16 matmuls on x into one (slice at lane 256 in-kernel).
    wxl = jnp.concatenate([params["w1"], wrc], axis=1)             # (F, C1+P_PAD)

    # bf16 weights for full-rate MXU; biases stay f32 (added to f32 acc).
    weight_args = [
        wxl.astype(bf16), params["b1"],
        params["w2"].astype(bf16), params["b2"],
        win_local.astype(bf16),
        woc.astype(bf16), btot,
    ]

    def full_spec(a):
        nd = a.ndim
        return pl.BlockSpec(a.shape, lambda b, _nd=nd: (0,) * _nd)

    in_specs = ([pl.BlockSpec((M, F), lambda b: (b, 0)),
                 pl.BlockSpec((BB, 1, 3 * E), lambda b: (b, 0, 0))]
                + [full_spec(a) for a in weight_args])

    x2d = x.reshape(B * N, F)

    cost = pl.CostEstimate(flops=121_000_000, transcendentals=132_000,
                           bytes_accessed=500_000)

    out_full = pl.pallas_call(
        pcs_head_kernel,
        out_shape=jax.ShapeDtypeStruct((B * N, P_PAD), jnp.float32),
        grid_spec=pltpu.PrefetchScalarGridSpec(
            num_scalar_prefetch=0,
            grid=grid,
            in_specs=in_specs,
            out_specs=pl.BlockSpec((M, P_PAD), lambda b: (b, 0)),
            scratch_shapes=[pltpu.VMEM((M, E), jnp.float32)],
        ),
        compiler_params=pltpu.CompilerParams(
            dimension_semantics=("parallel",)),   # 2x on v7x; trivial loop otherwise
        cost_estimate=cost,
    )(x2d, qkv_bias, *weight_args)

    return out_full.reshape(B, N, P_PAD)[..., :P]


# ---------------- deterministic parameter init --------------------------------
def init_params(key):
    ks = jax.random.split(key, 20)
    std = 0.05

    def conv(kw, kb, cout, cin):
        w = jax.random.normal(kw, (cout, cin), jnp.float32) * std
        b = jax.random.normal(kb, (cout,), jnp.float32) * 0.01
        return w, b

    # local MLP convs + BN (eval-mode running stats; default affine params)
    w_l1, b_l1 = conv(ks[0], ks[1], 256, F)
    w_l2, b_l2 = conv(ks[2], ks[3], 128, 256)
    eps = 1e-5
    gamma1, beta1, mean1, var1 = jnp.ones(256), jnp.zeros(256), jnp.zeros(256), jnp.ones(256)
    gamma2, beta2, mean2, var2 = jnp.ones(128), jnp.zeros(128), jnp.zeros(128), jnp.ones(128)
    s1 = gamma1 / jnp.sqrt(var1 + eps)
    s2 = gamma2 / jnp.sqrt(var2 + eps)
    w1f = w_l1 * s1[:, None]
    b1f = (b_l1 - mean1) * s1 + beta1
    w2f = w_l2 * s2[:, None]
    b2f = (b_l2 - mean2) * s2 + beta2

    # global MLP
    w_g1, b_g1 = conv(ks[4], ks[5], 256, F)
    w_g2, b_g2 = conv(ks[6], ks[7], 128, 256)

    # MultiheadAttention in/out projections
    w_in = jax.random.normal(ks[8], (3 * E, E), jnp.float32) * std
    b_in = jax.random.normal(ks[9], (3 * E,), jnp.float32) * 0.01
    w_out = jax.random.normal(ks[10], (E, E), jnp.float32) * std
    b_out = jax.random.normal(ks[11], (E,), jnp.float32) * 0.01

    # residual conv + classifier
    w_r, b_r = conv(ks[12], ks[13], 256, F)
    w_c, b_c = conv(ks[14], ks[15], P, 256)

    # kernel-friendly layout: (in, out) weights, (1, out) biases
    return dict(
        w1=w1f.T, b1=b1f[None, :],
        w2=w2f.T, b2=b2f[None, :],
        wg1=w_g1.T, bg1=b_g1[None, :],
        wg2=w_g2.T, bg2=b_g2[None, :],
        win=w_in.T, bin=b_in[None, :],
        wout=w_out.T, bout=b_out[None, :],
        wr=w_r.T, br=b_r[None, :],
        wc=w_c.T, bc=b_c[None, :],
    )


# ---------------- pure-JAX reference (original un-fused f32 math) -------------
def ref_forward(x, p):
    def lin(a, w, b):
        return a @ w + b
    h1 = jnp.maximum(lin(x, p["w1"], p["b1"]), 0.0)
    local = jnp.maximum(lin(h1, p["w2"], p["b2"]), 0.0)                 # (B,N,128)
    gmax = jnp.max(x, axis=1, keepdims=True)                            # (B,1,F)
    g1 = jnp.maximum(lin(gmax, p["wg1"], p["bg1"]), 0.0)
    g2 = jnp.maximum(lin(g1, p["wg2"], p["bg2"]), 0.0)                  # (B,1,128)
    fused = jnp.concatenate([local, jnp.broadcast_to(g2, local.shape)], axis=-1)
    qkv = lin(fused, p["win"], p["bin"])
    q, k, v = qkv[..., :E], qkv[..., E:2 * E], qkv[..., 2 * E:]
    qh = q.reshape(B, N, H, HD).transpose(0, 2, 1, 3)
    kh = k.reshape(B, N, H, HD).transpose(0, 2, 1, 3)
    vh = v.reshape(B, N, H, HD).transpose(0, 2, 1, 3)
    s = jnp.einsum("bhqd,bhkd->bhqk", qh, kh) / (HD ** 0.5)
    pw = jax.nn.softmax(s, axis=-1)
    a = jnp.einsum("bhqk,bhkd->bhqd", pw, vh).transpose(0, 2, 1, 3).reshape(B, N, E)
    attn = lin(a, p["wout"], p["bout"])
    y = attn + lin(x, p["wr"], p["br"])
    return lin(y, p["wc"], p["bc"])


if __name__ == "__main__":
    key = jax.random.PRNGKey(0)
    kx, kp = jax.random.split(key)
    x = jax.random.normal(kx, (B, N, F), jnp.float32)
    params = init_params(kp)

    out = pcs_head_forward(x, params)
    out = jax.block_until_ready(out)

    ref = ref_forward(x, params)
    assert out.shape == (B, N, P), out.shape
    # Loosened vs f32 (bf16 MXU inputs + approx reciprocal in the softmax denom,
    # fused weight products); still far below the O(0.1-1) scale of real bugs.
    assert jnp.allclose(out, ref, atol=2e-2, rtol=2e-2), \
        float(jnp.max(jnp.abs(out - ref)))
    print("KERNEL_OK")
</pallas_src>

<mosaic_0001>
module attributes {stable_mosaic.version = 11 : i64} {
  func.func @pcs_head_kernel(%arg0: i32, %arg1: memref<256x16xf32, #tpu.memory_space<vmem>>, %arg2: memref<2x1x768xf32, #tpu.memory_space<vmem>>, %arg3: memref<16x384xbf16, #tpu.memory_space<vmem>>, %arg4: memref<1x256xf32, #tpu.memory_space<vmem>>, %arg5: memref<256x128xbf16, #tpu.memory_space<vmem>>, %arg6: memref<1x128xf32, #tpu.memory_space<vmem>>, %arg7: memref<128x768xbf16, #tpu.memory_space<vmem>>, %arg8: memref<256x128xbf16, #tpu.memory_space<vmem>>, %arg9: memref<1x128xf32, #tpu.memory_space<vmem>>, %arg10: memref<256x128xf32, #tpu.memory_space<vmem>>, %arg11: memref<256x256xf32, #tpu.memory_space<vmem>>) attributes {dimension_semantics = [#tpu.dimension_semantics<parallel>], iteration_bounds = array<i64: 1>, scalar_prefetch = 0 : i64, scratch_operands = 1 : i64, tpu.core_type = #tpu.core_type<tc>, window_params = [{transform_indices = @transform_0, window_bounds = array<i64: 256, 16>}, {transform_indices = @transform_1, window_bounds = array<i64: 2, 1, 768>}, {pipeline_mode = #tpu.pipeline_mode<synchronous>, transform_indices = @transform_2, window_bounds = array<i64: 16, 384>}, {pipeline_mode = #tpu.pipeline_mode<synchronous>, transform_indices = @transform_3, window_bounds = array<i64: 1, 256>}, {pipeline_mode = #tpu.pipeline_mode<synchronous>, transform_indices = @transform_4, window_bounds = array<i64: 256, 128>}, {pipeline_mode = #tpu.pipeline_mode<synchronous>, transform_indices = @transform_5, window_bounds = array<i64: 1, 128>}, {pipeline_mode = #tpu.pipeline_mode<synchronous>, transform_indices = @transform_6, window_bounds = array<i64: 128, 768>}, {pipeline_mode = #tpu.pipeline_mode<synchronous>, transform_indices = @transform_7, window_bounds = array<i64: 256, 128>}, {pipeline_mode = #tpu.pipeline_mode<synchronous>, transform_indices = @transform_8, window_bounds = array<i64: 1, 128>}, {transform_indices = @transform_9, window_bounds = array<i64: 256, 128>}]} {
    %c0 = arith.constant 0 : index
    %c0_0 = arith.constant 0 : index
    %0 = vector.load %arg1[%c0, %c0_0] : memref<256x16xf32, #tpu.memory_space<vmem>>, vector<256x16xf32>
    %1 = arith.truncf %0 : vector<256x16xf32> to vector<256x16xbf16>
    %c0_1 = arith.constant 0 : index
    %c0_2 = arith.constant 0 : index
    %2 = vector.load %arg3[%c0_1, %c0_2] : memref<16x384xbf16, #tpu.memory_space<vmem>>, vector<16x384xbf16>
    %cst = arith.constant dense<0.000000e+00> : vector<256x384xf32>
    %3 = tpu.matmul %1, %2, %cst {dimension_numbers = #tpu.dot_dimension_numbers<[1], [0], [0], [1], [0, 0, 1, 1], [], []>} : vector<256x16xbf16>, vector<16x384xbf16>, vector<256x384xf32> -> vector<256x384xf32>
    %4 = vector.extract_strided_slice %3 {offsets = [0, 0], sizes = [256, 256], strides = [1, 1]} : vector<256x384xf32> to vector<256x256xf32>
    %c0_3 = arith.constant 0 : index
    %c0_4 = arith.constant 0 : index
    %5 = vector.load %arg4[%c0_3, %c0_4] : memref<1x256xf32, #tpu.memory_space<vmem>>, vector<1x256xf32>
    %6 = vector.broadcast %5 : vector<1x256xf32> to vector<256x256xf32>
    %7 = arith.addf %4, %6 : vector<256x256xf32>
    %cst_5 = arith.constant 0.000000e+00 : f32
    %8 = vector.broadcast %cst_5 : f32 to vector<256x256xf32>
    %9 = arith.maximumf %7, %8 : vector<256x256xf32>
    %10 = vector.extract_strided_slice %3 {offsets = [0, 256], sizes = [256, 128], strides = [1, 1]} : vector<256x384xf32> to vector<256x128xf32>
    %11 = arith.truncf %9 : vector<256x256xf32> to vector<256x256xbf16>
    %c0_6 = arith.constant 0 : index
    %c0_7 = arith.constant 0 : index
    %12 = vector.load %arg5[%c0_6, %c0_7] : memref<256x128xbf16, #tpu.memory_space<vmem>>, vector<256x128xbf16>
    %cst_8 = arith.constant dense<0.000000e+00> : vector<256x128xf32>
    %13 = tpu.matmul %11, %12, %cst_8 {dimension_numbers = #tpu.dot_dimension_numbers<[1], [0], [0], [1], [0, 0, 1, 1], [], []>} : vector<256x256xbf16>, vector<256x128xbf16>, vector<256x128xf32> -> vector<256x128xf32>
    %c0_9 = arith.constant 0 : index
    %c0_10 = arith.constant 0 : index
    %14 = vector.load %arg6[%c0_9, %c0_10] : memref<1x128xf32, #tpu.memory_space<vmem>>, vector<1x128xf32>
    %15 = vector.broadcast %14 : vector<1x128xf32> to vector<256x128xf32>
    %16 = arith.addf %13, %15 : vector<256x128xf32>
    %cst_11 = arith.constant 0.000000e+00 : f32
    %17 = vector.broadcast %cst_11 : f32 to vector<256x128xf32>
    %18 = arith.maximumf %16, %17 : vector<256x128xf32>
    %19 = arith.truncf %18 : vector<256x128xf32> to vector<256x128xbf16>
    %c0_12 = arith.constant 0 : index
    %c0_13 = arith.constant 0 : index
    %20 = vector.load %arg7[%c0_12, %c0_13] : memref<128x768xbf16, #tpu.memory_space<vmem>>, vector<128x768xbf16>
    %cst_14 = arith.constant dense<0.000000e+00> : vector<256x768xf32>
    %21 = tpu.matmul %19, %20, %cst_14 {dimension_numbers = #tpu.dot_dimension_numbers<[1], [0], [0], [1], [0, 0, 1, 1], [], []>} : vector<256x128xbf16>, vector<128x768xbf16>, vector<256x768xf32> -> vector<256x768xf32>
    %22 = vector.extract_strided_slice %21 {offsets = [0, 0], sizes = [128, 768], strides = [1, 1]} : vector<256x768xf32> to vector<128x768xf32>
    %c0_15 = arith.constant 0 : index
    %c0_16 = arith.constant 0 : index
    %c0_17 = arith.constant 0 : index
    %23 = vector.load %arg2[%c0_15, %c0_16, %c0_17] : memref<2x1x768xf32, #tpu.memory_space<vmem>>, vector<1x1x768xf32>
    %24 = vector.shape_cast %23 : vector<1x1x768xf32> to vector<1x768xf32>
    %25 = vector.broadcast %24 : vector<1x768xf32> to vector<128x768xf32>
    %26 = arith.addf %22, %25 : vector<128x768xf32>
    %27 = vector.extract_strided_slice %26 {offsets = [0, 0], sizes = [128, 64], strides = [1, 1]} : vector<128x768xf32> to vector<128x64xf32>
    %28 = arith.truncf %27 : vector<128x64xf32> to vector<128x64xbf16>
    %29 = vector.extract_strided_slice %26 {offsets = [0, 256], sizes = [128, 64], strides = [1, 1]} : vector<128x768xf32> to vector<128x64xf32>
    %30 = arith.truncf %29 : vector<128x64xf32> to vector<128x64xbf16>
    %31 = vector.extract_strided_slice %26 {offsets = [0, 512], sizes = [128, 64], strides = [1, 1]} : vector<128x768xf32> to vector<128x64xf32>
    %32 = arith.truncf %31 : vector<128x64xf32> to vector<128x64xbf16>
    %33 = tpu.transpose %30, [1, 0] : vector<128x64xbf16> -> vector<64x128xbf16>
    %cst_18 = arith.constant dense<0.000000e+00> : vector<128x128xf32>
    %34 = tpu.matmul %28, %33, %cst_18 {dimension_numbers = #tpu.dot_dimension_numbers<[1], [0], [0], [1], [0, 0, 1, 1], [], []>} : vector<128x64xbf16>, vector<64x128xbf16>, vector<128x128xf32> -> vector<128x128xf32>
    %cst_19 = arith.constant dense<0xFF800000> : vector<128xf32>
    %35 = vector.multi_reduction <maximumf>, %34, %cst_19 [1] : vector<128x128xf32> to vector<128xf32>
    %36 = vector.shape_cast %35 : vector<128xf32> to vector<128x1xf32>
    %37 = vector.broadcast %36 : vector<128x1xf32> to vector<128x128xf32>
    %38 = arith.subf %34, %37 : vector<128x128xf32>
    %39 = math.exp %38 : vector<128x128xf32>
    %cst_20 = arith.constant dense<0.000000e+00> : vector<128xf32>
    %40 = vector.multi_reduction <add>, %39, %cst_20 [1] : vector<128x128xf32> to vector<128xf32>
    %41 = vector.shape_cast %40 : vector<128xf32> to vector<128x1xf32>
    %42 = tpu.reciprocal %41 {approx = true} : vector<128x1xf32> -> vector<128x1xf32>
    %43 = vector.broadcast %42 : vector<128x1xf32> to vector<128x128xf32>
    %44 = arith.mulf %39, %43 : vector<128x128xf32>
    %45 = arith.truncf %44 : vector<128x128xf32> to vector<128x128xbf16>
    %cst_21 = arith.constant dense<0.000000e+00> : vector<128x64xf32>
    %46 = tpu.matmul %45, %32, %cst_21 {dimension_numbers = #tpu.dot_dimension_numbers<[1], [0], [0], [1], [0, 0, 1, 1], [], []>} : vector<128x128xbf16>, vector<128x64xbf16>, vector<128x64xf32> -> vector<128x64xf32>
    %c0_22 = arith.constant 0 : index
    %c0_23 = arith.constant 0 : index
    %47 = vector.load %arg11[%c0_22, %c0_23] : memref<256x256xf32, #tpu.memory_space<vmem>>, vector<128x64xf32>
    tpu.vector_store %arg11[%c0_22, %c0_23], %46 {strides = array<i32>} : memref<256x256xf32, #tpu.memory_space<vmem>>, vector<128x64xf32>,
    %48 = vector.extract_strided_slice %26 {offsets = [0, 64], sizes = [128, 64], strides = [1, 1]} : vector<128x768xf32> to vector<128x64xf32>
    %49 = arith.truncf %48 : vector<128x64xf32> to vector<128x64xbf16>
    %50 = vector.extract_strided_slice %26 {offsets = [0, 320], sizes = [128, 64], strides = [1, 1]} : vector<128x768xf32> to vector<128x64xf32>
    %51 = arith.truncf %50 : vector<128x64xf32> to vector<128x64xbf16>
    %52 = vector.extract_strided_slice %26 {offsets = [0, 576], sizes = [128, 64], strides = [1, 1]} : vector<128x768xf32> to vector<128x64xf32>
    %53 = arith.truncf %52 : vector<128x64xf32> to vector<128x64xbf16>
    %54 = tpu.transpose %51, [1, 0] : vector<128x64xbf16> -> vector<64x128xbf16>
    %cst_24 = arith.constant dense<0.000000e+00> : vector<128x128xf32>
    %55 = tpu.matmul %49, %54, %cst_24 {dimension_numbers = #tpu.dot_dimension_numbers<[1], [0], [0], [1], [0, 0, 1, 1], [], []>} : vector<128x64xbf16>, vector<64x128xbf16>, vector<128x128xf32> -> vector<128x128xf32>
    %cst_25 = arith.constant dense<0xFF800000> : vector<128xf32>
    %56 = vector.multi_reduction <maximumf>, %55, %cst_25 [1] : vector<128x128xf32> to vector<128xf32>
    %57 = vector.shape_cast %56 : vector<128xf32> to vector<128x1xf32>
    %58 = vector.broadcast %57 : vector<128x1xf32> to vector<128x128xf32>
    %59 = arith.subf %55, %58 : vector<128x128xf32>
    %60 = math.exp %59 : vector<128x128xf32>
    %cst_26 = arith.constant dense<0.000000e+00> : vector<128xf32>
    %61 = vector.multi_reduction <add>, %60, %cst_26 [1] : vector<128x128xf32> to vector<128xf32>
    %62 = vector.shape_cast %61 : vector<128xf32> to vector<128x1xf32>
    %63 = tpu.reciprocal %62 {approx = true} : vector<128x1xf32> -> vector<128x1xf32>
    %64 = vector.broadcast %63 : vector<128x1xf32> to vector<128x128xf32>
    %65 = arith.mulf %60, %64 : vector<128x128xf32>
    %66 = arith.truncf %65 : vector<128x128xf32> to vector<128x128xbf16>
    %cst_27 = arith.constant dense<0.000000e+00> : vector<128x64xf32>
    %67 = tpu.matmul %66, %53, %cst_27 {dimension_numbers = #tpu.dot_dimension_numbers<[1], [0], [0], [1], [0, 0, 1, 1], [], []>} : vector<128x128xbf16>, vector<128x64xbf16>, vector<128x64xf32> -> vector<128x64xf32>
    %c0_28 = arith.constant 0 : index
    %c64 = arith.constant 64 : index
    %68 = vector.load %arg11[%c0_28, %c64] : memref<256x256xf32, #tpu.memory_space<vmem>>, vector<128x64xf32>
    tpu.vector_store %arg11[%c0_28, %c64], %67 {strides = array<i32>} : memref<256x256xf32, #tpu.memory_space<vmem>>, vector<128x64xf32>,
    %69 = vector.extract_strided_slice %26 {offsets = [0, 128], sizes = [128, 64], strides = [1, 1]} : vector<128x768xf32> to vector<128x64xf32>
    %70 = arith.truncf %69 : vector<128x64xf32> to vector<128x64xbf16>
    %71 = vector.extract_strided_slice %26 {offsets = [0, 384], sizes = [128, 64], strides = [1, 1]} : vector<128x768xf32> to vector<128x64xf32>
    %72 = arith.truncf %71 : vector<128x64xf32> to vector<128x64xbf16>
    %73 = vector.extract_strided_slice %26 {offsets = [0, 640], sizes = [128, 64], strides = [1, 1]} : vector<128x768xf32> to vector<128x64xf32>
    %74 = arith.truncf %73 : vector<128x64xf32> to vector<128x64xbf16>
    %75 = tpu.transpose %72, [1, 0] : vector<128x64xbf16> -> vector<64x128xbf16>
    %cst_29 = arith.constant dense<0.000000e+00> : vector<128x128xf32>
    %76 = tpu.matmul %70, %75, %cst_29 {dimension_numbers = #tpu.dot_dimension_numbers<[1], [0], [0], [1], [0, 0, 1, 1], [], []>} : vector<128x64xbf16>, vector<64x128xbf16>, vector<128x128xf32> -> vector<128x128xf32>
    %cst_30 = arith.constant dense<0xFF800000> : vector<128xf32>
    %77 = vector.multi_reduction <maximumf>, %76, %cst_30 [1] : vector<128x128xf32> to vector<128xf32>
    %78 = vector.shape_cast %77 : vector<128xf32> to vector<128x1xf32>
    %79 = vector.broadcast %78 : vector<128x1xf32> to vector<128x128xf32>
    %80 = arith.subf %76, %79 : vector<128x128xf32>
    %81 = math.exp %80 : vector<128x128xf32>
    %cst_31 = arith.constant dense<0.000000e+00> : vector<128xf32>
    %82 = vector.multi_reduction <add>, %81, %cst_31 [1] : vector<128x128xf32> to vector<128xf32>
    %83 = vector.shape_cast %82 : vector<128xf32> to vector<128x1xf32>
    %84 = tpu.reciprocal %83 {approx = true} : vector<128x1xf32> -> vector<128x1xf32>
    %85 = vector.broadcast %84 : vector<128x1xf32> to vector<128x128xf32>
    %86 = arith.mulf %81, %85 : vector<128x128xf32>
    %87 = arith.truncf %86 : vector<128x128xf32> to vector<128x128xbf16>
    %cst_32 = arith.constant dense<0.000000e+00> : vector<128x64xf32>
    %88 = tpu.matmul %87, %74, %cst_32 {dimension_numbers = #tpu.dot_dimension_numbers<[1], [0], [0], [1], [0, 0, 1, 1], [], []>} : vector<128x128xbf16>, vector<128x64xbf16>, vector<128x64xf32> -> vector<128x64xf32>
    %c0_33 = arith.constant 0 : index
    %c128 = arith.constant 128 : index
    %89 = vector.load %arg11[%c0_33, %c128] : memref<256x256xf32, #tpu.memory_space<vmem>>, vector<128x64xf32>
    tpu.vector_store %arg11[%c0_33, %c128], %88 {strides = array<i32>} : memref<256x256xf32, #tpu.memory_space<vmem>>, vector<128x64xf32>,
    %90 = vector.extract_strided_slice %26 {offsets = [0, 192], sizes = [128, 64], strides = [1, 1]} : vector<128x768xf32> to vector<128x64xf32>
    %91 = arith.truncf %90 : vector<128x64xf32> to vector<128x64xbf16>
    %92 = vector.extract_strided_slice %26 {offsets = [0, 448], sizes = [128, 64], strides = [1, 1]} : vector<128x768xf32> to vector<128x64xf32>
    %93 = arith.truncf %92 : vector<128x64xf32> to vector<128x64xbf16>
    %94 = vector.extract_strided_slice %26 {offsets = [0, 704], sizes = [128, 64], strides = [1, 1]} : vector<128x768xf32> to vector<128x64xf32>
    %95 = arith.truncf %94 : vector<128x64xf32> to vector<128x64xbf16>
    %96 = tpu.transpose %93, [1, 0] : vector<128x64xbf16> -> vector<64x128xbf16>
    %cst_34 = arith.constant dense<0.000000e+00> : vector<128x128xf32>
    %97 = tpu.matmul %91, %96, %cst_34 {dimension_numbers = #tpu.dot_dimension_numbers<[1], [0], [0], [1], [0, 0, 1, 1], [], []>} : vector<128x64xbf16>, vector<64x128xbf16>, vector<128x128xf32> -> vector<128x128xf32>
    %cst_35 = arith.constant dense<0xFF800000> : vector<128xf32>
    %98 = vector.multi_reduction <maximumf>, %97, %cst_35 [1] : vector<128x128xf32> to vector<128xf32>
    %99 = vector.shape_cast %98 : vector<128xf32> to vector<128x1xf32>
    %100 = vector.broadcast %99 : vector<128x1xf32> to vector<128x128xf32>
    %101 = arith.subf %97, %100 : vector<128x128xf32>
    %102 = math.exp %101 : vector<128x128xf32>
    %cst_36 = arith.constant dense<0.000000e+00> : vector<128xf32>
    %103 = vector.multi_reduction <add>, %102, %cst_36 [1] : vector<128x128xf32> to vector<128xf32>
    %104 = vector.shape_cast %103 : vector<128xf32> to vector<128x1xf32>
    %105 = tpu.reciprocal %104 {approx = true} : vector<128x1xf32> -> vector<128x1xf32>
    %106 = vector.broadcast %105 : vector<128x1xf32> to vector<128x128xf32>
    %107 = arith.mulf %102, %106 : vector<128x128xf32>
    %108 = arith.truncf %107 : vector<128x128xf32> to vector<128x128xbf16>
    %cst_37 = arith.constant dense<0.000000e+00> : vector<128x64xf32>
    %109 = tpu.matmul %108, %95, %cst_37 {dimension_numbers = #tpu.dot_dimension_numbers<[1], [0], [0], [1], [0, 0, 1, 1], [], []>} : vector<128x128xbf16>, vector<128x64xbf16>, vector<128x64xf32> -> vector<128x64xf32>
    %c0_38 = arith.constant 0 : index
    %c192 = arith.constant 192 : index
    %110 = vector.load %arg11[%c0_38, %c192] : memref<256x256xf32, #tpu.memory_space<vmem>>, vector<128x64xf32>
    tpu.vector_store %arg11[%c0_38, %c192], %109 {strides = array<i32>} : memref<256x256xf32, #tpu.memory_space<vmem>>, vector<128x64xf32>,
    %111 = vector.extract_strided_slice %21 {offsets = [128, 0], sizes = [128, 768], strides = [1, 1]} : vector<256x768xf32> to vector<128x768xf32>
    %c1 = arith.constant 1 : index
    %c0_39 = arith.constant 0 : index
    %c0_40 = arith.constant 0 : index
    %112 = vector.load %arg2[%c1, %c0_39, %c0_40] : memref<2x1x768xf32, #tpu.memory_space<vmem>>, vector<1x1x768xf32>
    %113 = vector.shape_cast %112 : vector<1x1x768xf32> to vector<1x768xf32>
    %114 = vector.broadcast %113 : vector<1x768xf32> to vector<128x768xf32>
    %115 = arith.addf %111, %114 : vector<128x768xf32>
    %116 = vector.extract_strided_slice %115 {offsets = [0, 0], sizes = [128, 64], strides = [1, 1]} : vector<128x768xf32> to vector<128x64xf32>
    %117 = arith.truncf %116 : vector<128x64xf32> to vector<128x64xbf16>
    %118 = vector.extract_strided_slice %115 {offsets = [0, 256], sizes = [128, 64], strides = [1, 1]} : vector<128x768xf32> to vector<128x64xf32>
    %119 = arith.truncf %118 : vector<128x64xf32> to vector<128x64xbf16>
    %120 = vector.extract_strided_slice %115 {offsets = [0, 512], sizes = [128, 64], strides = [1, 1]} : vector<128x768xf32> to vector<128x64xf32>
    %121 = arith.truncf %120 : vector<128x64xf32> to vector<128x64xbf16>
    %122 = tpu.transpose %119, [1, 0] : vector<128x64xbf16> -> vector<64x128xbf16>
    %cst_41 = arith.constant dense<0.000000e+00> : vector<128x128xf32>
    %123 = tpu.matmul %117, %122, %cst_41 {dimension_numbers = #tpu.dot_dimension_numbers<[1], [0], [0], [1], [0, 0, 1, 1], [], []>} : vector<128x64xbf16>, vector<64x128xbf16>, vector<128x128xf32> -> vector<128x128xf32>
    %cst_42 = arith.constant dense<0xFF800000> : vector<128xf32>
    %124 = vector.multi_reduction <maximumf>, %123, %cst_42 [1] : vector<128x128xf32> to vector<128xf32>
    %125 = vector.shape_cast %124 : vector<128xf32> to vector<128x1xf32>
    %126 = vector.broadcast %125 : vector<128x1xf32> to vector<128x128xf32>
    %127 = arith.subf %123, %126 : vector<128x128xf32>
    %128 = math.exp %127 : vector<128x128xf32>
    %cst_43 = arith.constant dense<0.000000e+00> : vector<128xf32>
    %129 = vector.multi_reduction <add>, %128, %cst_43 [1] : vector<128x128xf32> to vector<128xf32>
    %130 = vector.shape_cast %129 : vector<128xf32> to vector<128x1xf32>
    %131 = tpu.reciprocal %130 {approx = true} : vector<128x1xf32> -> vector<128x1xf32>
    %132 = vector.broadcast %131 : vector<128x1xf32> to vector<128x128xf32>
    %133 = arith.mulf %128, %132 : vector<128x128xf32>
    %134 = arith.truncf %133 : vector<128x128xf32> to vector<128x128xbf16>
    %cst_44 = arith.constant dense<0.000000e+00> : vector<128x64xf32>
    %135 = tpu.matmul %134, %121, %cst_44 {dimension_numbers = #tpu.dot_dimension_numbers<[1], [0], [0], [1], [0, 0, 1, 1], [], []>} : vector<128x128xbf16>, vector<128x64xbf16>, vector<128x64xf32> -> vector<128x64xf32>
    %c128_45 = arith.constant 128 : index
    %c0_46 = arith.constant 0 : index
    %136 = vector.load %arg11[%c128_45, %c0_46] : memref<256x256xf32, #tpu.memory_space<vmem>>, vector<128x64xf32>
    tpu.vector_store %arg11[%c128_45, %c0_46], %135 {strides = array<i32>} : memref<256x256xf32, #tpu.memory_space<vmem>>, vector<128x64xf32>,
    %137 = vector.extract_strided_slice %115 {offsets = [0, 64], sizes = [128, 64], strides = [1, 1]} : vector<128x768xf32> to vector<128x64xf32>
    %138 = arith.truncf %137 : vector<128x64xf32> to vector<128x64xbf16>
    %139 = vector.extract_strided_slice %115 {offsets = [0, 320], sizes = [128, 64], strides = [1, 1]} : vector<128x768xf32> to vector<128x64xf32>
    %140 = arith.truncf %139 : vector<128x64xf32> to vector<128x64xbf16>
    %141 = vector.extract_strided_slice %115 {offsets = [0, 576], sizes = [128, 64], strides = [1, 1]} : vector<128x768xf32> to vector<128x64xf32>
    %142 = arith.truncf %141 : vector<128x64xf32> to vector<128x64xbf16>
    %143 = tpu.transpose %140, [1, 0] : vector<128x64xbf16> -> vector<64x128xbf16>
    %cst_47 = arith.constant dense<0.000000e+00> : vector<128x128xf32>
    %144 = tpu.matmul %138, %143, %cst_47 {dimension_numbers = #tpu.dot_dimension_numbers<[1], [0], [0], [1], [0, 0, 1, 1], [], []>} : vector<128x64xbf16>, vector<64x128xbf16>, vector<128x128xf32> -> vector<128x128xf32>
    %cst_48 = arith.constant dense<0xFF800000> : vector<128xf32>
    %145 = vector.multi_reduction <maximumf>, %144, %cst_48 [1] : vector<128x128xf32> to vector<128xf32>
    %146 = vector.shape_cast %145 : vector<128xf32> to vector<128x1xf32>
    %147 = vector.broadcast %146 : vector<128x1xf32> to vector<128x128xf32>
    %148 = arith.subf %144, %147 : vector<128x128xf32>
    %149 = math.exp %148 : vector<128x128xf32>
    %cst_49 = arith.constant dense<0.000000e+00> : vector<128xf32>
    %150 = vector.multi_reduction <add>, %149, %cst_49 [1] : vector<128x128xf32> to vector<128xf32>
    %151 = vector.shape_cast %150 : vector<128xf32> to vector<128x1xf32>
    %152 = tpu.reciprocal %151 {approx = true} : vector<128x1xf32> -> vector<128x1xf32>
    %153 = vector.broadcast %152 : vector<128x1xf32> to vector<128x128xf32>
    %154 = arith.mulf %149, %153 : vector<128x128xf32>
    %155 = arith.truncf %154 : vector<128x128xf32> to vector<128x128xbf16>
    %cst_50 = arith.constant dense<0.000000e+00> : vector<128x64xf32>
    %156 = tpu.matmul %155, %142, %cst_50 {dimension_numbers = #tpu.dot_dimension_numbers<[1], [0], [0], [1], [0, 0, 1, 1], [], []>} : vector<128x128xbf16>, vector<128x64xbf16>, vector<128x64xf32> -> vector<128x64xf32>
    %c128_51 = arith.constant 128 : index
    %c64_52 = arith.constant 64 : index
    %157 = vector.load %arg11[%c128_51, %c64_52] : memref<256x256xf32, #tpu.memory_space<vmem>>, vector<128x64xf32>
    tpu.vector_store %arg11[%c128_51, %c64_52], %156 {strides = array<i32>} : memref<256x256xf32, #tpu.memory_space<vmem>>, vector<128x64xf32>,
    %158 = vector.extract_strided_slice %115 {offsets = [0, 128], sizes = [128, 64], strides = [1, 1]} : vector<128x768xf32> to vector<128x64xf32>
    %159 = arith.truncf %158 : vector<128x64xf32> to vector<128x64xbf16>
    %160 = vector.extract_strided_slice %115 {offsets = [0, 384], sizes = [128, 64], strides = [1, 1]} : vector<128x768xf32> to vector<128x64xf32>
    %161 = arith.truncf %160 : vector<128x64xf32> to vector<128x64xbf16>
    %162 = vector.extract_strided_slice %115 {offsets = [0, 640], sizes = [128, 64], strides = [1, 1]} : vector<128x768xf32> to vector<128x64xf32>
    %163 = arith.truncf %162 : vector<128x64xf32> to vector<128x64xbf16>
    %164 = tpu.transpose %161, [1, 0] : vector<128x64xbf16> -> vector<64x128xbf16>
    %cst_53 = arith.constant dense<0.000000e+00> : vector<128x128xf32>
    %165 = tpu.matmul %159, %164, %cst_53 {dimension_numbers = #tpu.dot_dimension_numbers<[1], [0], [0], [1], [0, 0, 1, 1], [], []>} : vector<128x64xbf16>, vector<64x128xbf16>, vector<128x128xf32> -> vector<128x128xf32>
    %cst_54 = arith.constant dense<0xFF800000> : vector<128xf32>
    %166 = vector.multi_reduction <maximumf>, %165, %cst_54 [1] : vector<128x128xf32> to vector<128xf32>
    %167 = vector.shape_cast %166 : vector<128xf32> to vector<128x1xf32>
    %168 = vector.broadcast %167 : vector<128x1xf32> to vector<128x128xf32>
    %169 = arith.subf %165, %168 : vector<128x128xf32>
    %170 = math.exp %169 : vector<128x128xf32>
    %cst_55 = arith.constant dense<0.000000e+00> : vector<128xf32>
    %171 = vector.multi_reduction <add>, %170, %cst_55 [1] : vector<128x128xf32> to vector<128xf32>
    %172 = vector.shape_cast %171 : vector<128xf32> to vector<128x1xf32>
    %173 = tpu.reciprocal %172 {approx = true} : vector<128x1xf32> -> vector<128x1xf32>
    %174 = vector.broadcast %173 : vector<128x1xf32> to vector<128x128xf32>
    %175 = arith.mulf %170, %174 : vector<128x128xf32>
    %176 = arith.truncf %175 : vector<128x128xf32> to vector<128x128xbf16>
    %cst_56 = arith.constant dense<0.000000e+00> : vector<128x64xf32>
    %177 = tpu.matmul %176, %163, %cst_56 {dimension_numbers = #tpu.dot_dimension_numbers<[1], [0], [0], [1], [0, 0, 1, 1], [], []>} : vector<128x128xbf16>, vector<128x64xbf16>, vector<128x64xf32> -> vector<128x64xf32>
    %c128_57 = arith.constant 128 : index
    %c128_58 = arith.constant 128 : index
    %178 = vector.load %arg11[%c128_57, %c128_58] : memref<256x256xf32, #tpu.memory_space<vmem>>, vector<128x64xf32>
    tpu.vector_store %arg11[%c128_57, %c128_58], %177 {strides = array<i32>} : memref<256x256xf32, #tpu.memory_space<vmem>>, vector<128x64xf32>,
    %179 = vector.extract_strided_slice %115 {offsets = [0, 192], sizes = [128, 64], strides = [1, 1]} : vector<128x768xf32> to vector<128x64xf32>
    %180 = arith.truncf %179 : vector<128x64xf32> to vector<128x64xbf16>
    %181 = vector.extract_strided_slice %115 {offsets = [0, 448], sizes = [128, 64], strides = [1, 1]} : vector<128x768xf32> to vector<128x64xf32>
    %182 = arith.truncf %181 : vector<128x64xf32> to vector<128x64xbf16>
    %183 = vector.extract_strided_slice %115 {offsets = [0, 704], sizes = [128, 64], strides = [1, 1]} : vector<128x768xf32> to vector<128x64xf32>
    %184 = arith.truncf %183 : vector<128x64xf32> to vector<128x64xbf16>
    %185 = tpu.transpose %182, [1, 0] : vector<128x64xbf16> -> vector<64x128xbf16>
    %cst_59 = arith.constant dense<0.000000e+00> : vector<128x128xf32>
    %186 = tpu.matmul %180, %185, %cst_59 {dimension_numbers = #tpu.dot_dimension_numbers<[1], [0], [0], [1], [0, 0, 1, 1], [], []>} : vector<128x64xbf16>, vector<64x128xbf16>, vector<128x128xf32> -> vector<128x128xf32>
    %cst_60 = arith.constant dense<0xFF800000> : vector<128xf32>
    %187 = vector.multi_reduction <maximumf>, %186, %cst_60 [1] : vector<128x128xf32> to vector<128xf32>
    %188 = vector.shape_cast %187 : vector<128xf32> to vector<128x1xf32>
    %189 = vector.broadcast %188 : vector<128x1xf32> to vector<128x128xf32>
    %190 = arith.subf %186, %189 : vector<128x128xf32>
    %191 = math.exp %190 : vector<128x128xf32>
    %cst_61 = arith.constant dense<0.000000e+00> : vector<128xf32>
    %192 = vector.multi_reduction <add>, %191, %cst_61 [1] : vector<128x128xf32> to vector<128xf32>
    %193 = vector.shape_cast %192 : vector<128xf32> to vector<128x1xf32>
    %194 = tpu.reciprocal %193 {approx = true} : vector<128x1xf32> -> vector<128x1xf32>
    %195 = vector.broadcast %194 : vector<128x1xf32> to vector<128x128xf32>
    %196 = arith.mulf %191, %195 : vector<128x128xf32>
    %197 = arith.truncf %196 : vector<128x128xf32> to vector<128x128xbf16>
    %cst_62 = arith.constant dense<0.000000e+00> : vector<128x64xf32>
    %198 = tpu.matmul %197, %184, %cst_62 {dimension_numbers = #tpu.dot_dimension_numbers<[1], [0], [0], [1], [0, 0, 1, 1], [], []>} : vector<128x128xbf16>, vector<128x64xbf16>, vector<128x64xf32> -> vector<128x64xf32>
    %c128_63 = arith.constant 128 : index
    %c192_64 = arith.constant 192 : index
    %199 = vector.load %arg11[%c128_63, %c192_64] : memref<256x256xf32, #tpu.memory_space<vmem>>, vector<128x64xf32>
    tpu.vector_store %arg11[%c128_63, %c192_64], %198 {strides = array<i32>} : memref<256x256xf32, #tpu.memory_space<vmem>>, vector<128x64xf32>,
    %c0_65 = arith.constant 0 : index
    %c0_66 = arith.constant 0 : index
    %200 = vector.load %arg11[%c0_65, %c0_66] : memref<256x256xf32, #tpu.memory_space<vmem>>, vector<256x256xf32>
    %201 = arith.truncf %200 : vector<256x256xf32> to vector<256x256xbf16>
    %c0_67 = arith.constant 0 : index
    %c0_68 = arith.constant 0 : index
    %202 = vector.load %arg8[%c0_67, %c0_68] : memref<256x128xbf16, #tpu.memory_space<vmem>>, vector<256x128xbf16>
    %cst_69 = arith.constant dense<0.000000e+00> : vector<256x128xf32>
    %203 = tpu.matmul %201, %202, %cst_69 {dimension_numbers = #tpu.dot_dimension_numbers<[1], [0], [0], [1], [0, 0, 1, 1], [], []>} : vector<256x256xbf16>, vector<256x128xbf16>, vector<256x128xf32> -> vector<256x128xf32>
    %204 = arith.addf %203, %10 : vector<256x128xf32>
    %c0_70 = arith.constant 0 : index
    %c0_71 = arith.constant 0 : index
    %205 = vector.load %arg9[%c0_70, %c0_71] : memref<1x128xf32, #tpu.memory_space<vmem>>, vector<1x128xf32>
    %206 = vector.broadcast %205 : vector<1x128xf32> to vector<256x128xf32>
    %207 = arith.addf %204, %206 : vector<256x128xf32>
    %c0_72 = arith.constant 0 : index
    %c0_73 = arith.constant 0 : index
    %208 = vector.load %arg10[%c0_72, %c0_73] : memref<256x128xf32, #tpu.memory_space<vmem>>, vector<256x128xf32>
    tpu.vector_store %arg10[%c0_72, %c0_73], %207 {strides = array<i32>} : memref<256x128xf32, #tpu.memory_space<vmem>>, vector<256x128xf32>,
    return
  }
  func.func @transform_0(%arg0: i32) -> (i32, i32) {
    %c0_i32 = arith.constant 0 : i32
    %c0_i32_0 = arith.constant 0 : i32
    return %arg0, %c0_i32 : i32, i32
  }
  func.func @transform_1(%arg0: i32) -> (i32, i32, i32) {
    %c0_i32 = arith.constant 0 : i32
    %c0_i32_0 = arith.constant 0 : i32
    %c0_i32_1 = arith.constant 0 : i32
    return %arg0, %c0_i32, %c0_i32_0 : i32, i32, i32
  }
  func.func @transform_2(%arg0: i32) -> (i32, i32) {
    %c0_i32 = arith.constant 0 : i32
    %c0_i32_0 = arith.constant 0 : i32
    %c0_i32_1 = arith.constant 0 : i32
    return %c0_i32, %c0_i32_0 : i32, i32
  }
  func.func @transform_3(%arg0: i32) -> (i32, i32) {
    %c0_i32 = arith.constant 0 : i32
    %c0_i32_0 = arith.constant 0 : i32
    %c0_i32_1 = arith.constant 0 : i32
    return %c0_i32, %c0_i32_0 : i32, i32
  }
  func.func @transform_4(%arg0: i32) -> (i32, i32) {
    %c0_i32 = arith.constant 0 : i32
    %c0_i32_0 = arith.constant 0 : i32
    %c0_i32_1 = arith.constant 0 : i32
    return %c0_i32, %c0_i32_0 : i32, i32
  }
  func.func @transform_5(%arg0: i32) -> (i32, i32) {
    %c0_i32 = arith.constant 0 : i32
    %c0_i32_0 = arith.constant 0 : i32
    %c0_i32_1 = arith.constant 0 : i32
    return %c0_i32, %c0_i32_0 : i32, i32
  }
  func.func @transform_6(%arg0: i32) -> (i32, i32) {
    %c0_i32 = arith.constant 0 : i32
    %c0_i32_0 = arith.constant 0 : i32
    %c0_i32_1 = arith.constant 0 : i32
    return %c0_i32, %c0_i32_0 : i32, i32
  }
  func.func @transform_7(%arg0: i32) -> (i32, i32) {
    %c0_i32 = arith.constant 0 : i32
    %c0_i32_0 = arith.constant 0 : i32
    %c0_i32_1 = arith.constant 0 : i32
    return %c0_i32, %c0_i32_0 : i32, i32
  }
  func.func @transform_8(%arg0: i32) -> (i32, i32) {
    %c0_i32 = arith.constant 0 : i32
    %c0_i32_0 = arith.constant 0 : i32
    %c0_i32_1 = arith.constant 0 : i32
    return %c0_i32, %c0_i32_0 : i32, i32
  }
  func.func @transform_9(%arg0: i32) -> (i32, i32) {
    %c0_i32 = arith.constant 0 : i32
    %c0_i32_0 = arith.constant 0 : i32
    return %arg0, %c0_i32 : i32, i32
  }
}

</mosaic_0001>

<bundles_post_ra>
// kernel: tpu_custom_call.1
= control target key start
LH: loop header
LB: loop body
LE: loop exit
PB: predicated region body
PF: predicated region fallthrough
CT: control target
= control target key end

     0   :  { %14 = vsyncpa [#allocation4], 0  ;;  %s11618_s0 = inlined_call_operand.vmem [shape: f32[256,16], index: 0, kind: input, shape index: {}]   ;;  %s11619_s1 = inlined_call_operand.hbm [shape: f32[2,1,768], index: 1, kind: input, shape index: {}]   ;;  %s11620_s2 = inlined_call_operand.vmem [shape: bf16[16,384], index: 2, kind: input, shape index: {}]   ;;  %s11621_s3 = inlined_call_operand.vmem [shape: f32[1,256], index: 3, kind: input, shape index: {}]   ;;  %s11622_s4 = inlined_call_operand.vmem [shape: bf16[256,128], index: 4, kind: input, shape index: {}]   ;;  %s11623_s5 = inlined_call_operand.vmem [shape: f32[1,128], index: 5, kind: input, shape index: {}]   ;;  %s11624_s6 = inlined_call_operand.hbm [shape: bf16[128,768], index: 6, kind: input, shape index: {}]   ;;  %s11625_s7 = inlined_call_operand.vmem [shape: bf16[256,128], index: 7, kind: input, shape index: {}]   ;;  %s11626_s8 = inlined_call_operand.vmem [shape: f32[1,128], index: 8, kind: input, shape index: {}]   ;;  %s11627_s9 = inlined_call_operand.hbm [shape: f32[256,128], index: 9, kind: output, shape index: {}]  }
   0x1   :  { %15 = vsyncpa [#allocation7], 0 }
   0x2   :  { %16 = vsyncpa [#allocation5], 0  ;;  %s8594_s30 = smov [#allocation3]   ;;  %s8522_s13 = scalar_lea.hbm %s11619_s1, 192 }
   0x3   :  { %s24_s10 = sshll.u32 %s8594_s30, 4  ;;  %p8523_p0 = scmp.ne.s32.totalorder %s11619_s1, %s8522_s13  ;;  %s25_s10 = int_to_ptr.vmem [resolvable:$true] %s24_s10 }
   0x4   :  { %p8526_p1 = scmp.lt.u32.totalorder %s8522_s13, %s11619_s1 }
   0x6   :  { %p8528_p2 = pnand %p8526_p1, %p8523_p0 }
   0x8   :  { %8531 = shalt.err (!%p8528_p2)
}
   0x9   :  { %s8532_s18 = scalar_lea.vmem %s25_s10, 192  ;;  %p8537_p4 = scmp.lt.s32.totalorder %s25_s10, %s25_s10 }
   0xa   :  { %p8533_p3 = scmp.ne.s32.totalorder %s25_s10, %s8532_s18  ;;  %p8538_p5 = scmp.lt.s32.totalorder %s8532_s18, %s8532_s18 }
   0xc   :  { %p8539_p6 = por %p8538_p5, %p8537_p4 }
   0xe   :  { %p8540_p7 = pnand %p8539_p6, %p8533_p3 }
  0x10   :  { %8543 = shalt.err (!%p8540_p7)
}
  0x11   :  { %s8595_s19 = smov 96   ;;  %s8596_s20 = smov 6  }
  0x12   :  { %30 = dma.hbm_to_vmem [thread:$0]  %s11619_s1, 192, %s25_s10, [#allocation4], %s8595_s19, %s8595_s19, %s8596_s20  }
  0x13   :  { %s8597_s23 = smov [#allocation6]   ;;  %s8544_s27 = scalar_lea.hbm %s11624_s6, 6144 }
  0x14   :  { %s44_s24 = sshll.u32 %s8597_s23, 4  ;;  %p8545_p8 = scmp.ne.s32.totalorder %s11624_s6, %s8544_s27  ;;  %s45_s24 = int_to_ptr.vmem [resolvable:$true] %s44_s24 }
  0x15   :  { %p8548_p9 = scmp.lt.u32.totalorder %s8544_s27, %s11624_s6 }
  0x17   :  { %p8550_p10 = pnand %p8548_p9, %p8545_p8 }
  0x19   :  { %8553 = shalt.err (!%p8550_p10)
}
  0x1a   :  { %s8554_s12 = scalar_lea.vmem %s45_s24, 6144  ;;  %p8559_p12 = scmp.lt.s32.totalorder %s45_s24, %s45_s24 }
  0x1b   :  { %p8555_p11 = scmp.ne.s32.totalorder %s45_s24, %s8554_s12  ;;  %p8560_p13 = scmp.lt.s32.totalorder %s8554_s12, %s8554_s12 }
  0x1d   :  { %p8561_p0 = por %p8560_p13, %p8559_p12 }
  0x1f   :  { %p8562_p1 = pnand %p8561_p0, %p8555_p11 }
  0x21   :  { %8565 = shalt.err (!%p8562_p1)
}
  0x22   :  { %s8598_s1 = smov 384   ;;  %s8599_s10 = smov 24  }
  0x23   :  { %50 = dma.hbm_to_vmem [thread:$0]  %s11624_s6, 6144, %s45_s24, [#allocation7], %s8598_s1, %s8598_s1, %s8599_s10  }
  0x24   :  { %8588 = dma.done.wait [#allocation4], 192  }
  0x25   :  { %8589 = vsyncadd [#allocation4], 4294967104 }
  0x26   :  { %8590 = dma.done.wait [#allocation7], 6144  }
  0x27   :  { %8591 = vsyncadd [#allocation7], 4294961152  ;;  %v11630_v0 = vmov 0   ;;  %v7902_v1 = vld [vmem:[%s11620_s2 + $0x4] ss:$12 sps:$4 sm:$0xff]   ;;  %v63_v4 = vld [vmem:[%s11618_s0 + $0x8] sm:$0xff] }
  0x28   :  { %211 = vmatprep.mubr.bf16.mxu0 %v11630_v0  ;;  %291 = vmatprep.mubr.bf16.mxu1 %v11630_v0  ;;  %v7904_v2 = vld [vmem:[%s11620_s2] ss:$12 sps:$4 sm:$0xff]   ;;  %vm130_vm0 = vcmask 130048   ;;  %v64_v7 = vld [vmem:[%s11618_s0 + $0x10] sm:$0xff]  ;;  %v65_v8 = vld [vmem:[%s11618_s0 + $0x18] sm:$0xff]  ;;  %vm2068_vm1 = vcmask 523264  }
  0x29   :  { %v62_v3 = vld [vmem:[%s11618_s0] sm:$0xff]  ;;  %179 = vmatprep.subr.bf16.mxu0 %v7902_v1  ;;  %7825 = vmatprep.subr.bf16.mxu1 %v7902_v1  ;;  %v79_v9 = vld [vmem:[%s11618_s0 + $0x88] sm:$0xff]  ;;  %v8712_v11 = vpack.c.bf16 %v65_v8, %v64_v7  ;;  %v80_v12 = vld [vmem:[%s11618_s0 + $0x90] sm:$0xff]  ;;  %vm3017_vm2 = vcmask 1048064  }
  0x2a   :  { %v8693_v5 = vpack.c.bf16 %v63_v4, %v62_v3  ;;  %180 = vmatpush1.bf16.msra.mxu0 %v7904_v2  ;;  %7826 = vmatpush1.bf16.msra.mxu1 %v7904_v2  ;;  %v78_v6 = vld [vmem:[%s11618_s0 + $0x80] sm:$0xff]  ;;  %v81_v13 = vld [vmem:[%s11618_s0 + $0x98] sm:$0xff]  ;;  %v7905_v14 = vld [vmem:[%s11620_s2 + $0x8] ss:$12 sps:$4 sm:$0xff]  }
  0x2b   :  { %v8710_v10 = vpack.c.bf16 %v79_v9, %v78_v6  ;;  %v7906_v15 = vld [vmem:[%s11622_s4 + $0x40] sm:$0xff]   ;;  %v8734_v17 = vpack.c.bf16 %v81_v13, %v80_v12  ;;  %7279 = vmatprep.subr.bf16.mxu1 %v7905_v14  ;;  %v67_v18 = vld [vmem:[%s11618_s0 + $0x28] sm:$0xff]  ;;  %v68_v22 = vld [vmem:[%s11618_s0 + $0x30] sm:$0xff] }
  0x2c   :  { %v66_v16 = vld [vmem:[%s11618_s0 + $0x20] sm:$0xff]  ;;  %v83_v21 = vld [vmem:[%s11618_s0 + $0xa8] sm:$0xff]  ;;  %v69_v24 = vld [vmem:[%s11618_s0 + $0x38] sm:$0xff] }
  0x2d   :  { %6604 = vmatmul.mubr.msk.bf16.vlgmr.msra.gmra.mrb[0].mxu0 %vm130_vm0, %v8693_v5  ;;  %6612 = vmatmul.mubr.msk.bf16.vlgmr.msra.gmra.mrb[0].mxu1 %vm130_vm0, %v8710_v10  ;;  %v8740_v19 = vpack.c.bf16 %v67_v18, %v66_v16  ;;  %v82_v20 = vld [vmem:[%s11618_s0 + $0xa0] sm:$0xff]  ;;  %v84_v25 = vld [vmem:[%s11618_s0 + $0xb0] sm:$0xff]  ;;  %v85_v26 = vld [vmem:[%s11618_s0 + $0xb8] sm:$0xff]  ;;  %v97_v27 = vpack.c.bf16 %v69_v24, %v68_v22 }
  0x2e   :  { %221 = vmatprep.mubr.bf16.mxu0 %v11630_v0  ;;  %301 = vmatprep.mubr.bf16.mxu1 %v11630_v0  ;;  %v8756_v23 = vpack.c.bf16 %v83_v21, %v82_v20  ;;  %v70_v28 = vld [vmem:[%s11618_s0 + $0x40] sm:$0xff]  ;;  %v71_v29 = vld [vmem:[%s11618_s0 + $0x48] sm:$0xff]  ;;  %v8778_v30 = vpack.c.bf16 %v85_v26, %v84_v25  ;;  %v72_v34 = vld [vmem:[%s11618_s0 + $0x50] sm:$0xff] }
  0x2f   :  { %7280 = vmatpush3.bf16.msra.mxu1 %v7905_v14  ;;  %v86_v31 = vld [vmem:[%s11618_s0 + $0xc0] sm:$0xff]  ;;  %v87_v32 = vld [vmem:[%s11618_s0 + $0xc8] sm:$0xff]  ;;  %v98_v33 = vpack.c.bf16 %v71_v29, %v70_v28  ;;  %v73_v35 = vld [vmem:[%s11618_s0 + $0x58] sm:$0xff] }
  0x30   :  { %6799 = vmatprep.subr.bf16.mxu1 %v7906_v15  ;;  %v8797_v36 = vpack.c.bf16 %v87_v32, %v86_v31  ;;  %v88_v37 = vld [vmem:[%s11618_s0 + $0xd0] sm:$0xff]  ;;  %v89_v38 = vld [vmem:[%s11618_s0 + $0xd8] sm:$0xff]  ;;  %v99_v39 = vpack.c.bf16 %v73_v35, %v72_v34  ;;  %v74_v40 = vld [vmem:[%s11618_s0 + $0x60] sm:$0xff] }
  0x31   :  { %v75_v41 = vld [vmem:[%s11618_s0 + $0x68] sm:$0xff]  ;;  %v8816_v42 = vpack.c.bf16 %v89_v38, %v88_v37  ;;  %v90_v43 = vld [vmem:[%s11618_s0 + $0xe0] sm:$0xff]  ;;  %v76_v47 = vld [vmem:[%s11618_s0 + $0x70] sm:$0xff] }
  0x32   :  { %v91_v44 = vld [vmem:[%s11618_s0 + $0xe8] sm:$0xff]  ;;  %v100_v45 = vpack.c.bf16 %v75_v41, %v74_v40  ;;  %v77_v48 = vld [vmem:[%s11618_s0 + $0x78] sm:$0xff]  ;;  %v92_v50 = vld [vmem:[%s11618_s0 + $0xf0] sm:$0xff] }
  0x33   :  { %v108_v46 = vpack.c.bf16 %v91_v44, %v90_v43  ;;  %v101_v49 = vpack.c.bf16 %v77_v48, %v76_v47  ;;  %v93_v51 = vld [vmem:[%s11618_s0 + $0xf8] sm:$0xff]  ;;  %v7907_v53 = vld [vmem:[%s11622_s4] sm:$0xff]   ;;  %v7908_v54 = vld [vmem:[%s11622_s4 + $0x48] sm:$0xff]  }
  0x34   :  { %v109_v52 = vpack.c.bf16 %v93_v51, %v92_v50  ;;  %v7909_v55 = vld [vmem:[%s11622_s4 + $0x8] sm:$0xff]   ;;  %v7910_v56 = vld [vmem:[%s11622_s4 + $0x50] sm:$0xff]   ;;  %v7912_v58 = vld [vmem:[%s11622_s4 + $0x58] sm:$0xff]  }
  0x35   :  { %6605 = vmatmul.mubr.msk.bf16.gmra.mrb[4].mxu0 %vm130_vm0, %v8712_v11  ;;  %6613 = vmatmul.mubr.msk.bf16.gmra.mrb[4].mxu1 %vm130_vm0, %v8734_v17  ;;  %v7911_v57 = vld [vmem:[%s11622_s4 + $0x10] sm:$0xff]   ;;  %v7913_v59 = vld [vmem:[%s11622_s4 + $0x18] sm:$0xff]   ;;  %v7914_v60 = vld [vmem:[%s11622_s4 + $0x60] sm:$0xff]  }
  0x36   :  { %231 = vmatprep.mubr.bf16.mxu0 %v11630_v0  ;;  %311 = vmatprep.mubr.bf16.mxu1 %v11630_v0  ;;  %v7915_v61 = vld [vmem:[%s11622_s4 + $0x20] sm:$0xff]   ;;  %v7916_v62 = vld [vmem:[%s11622_s4 + $0x68] sm:$0xff]   ;;  %v7918_v1 = vld [vmem:[%s11622_s4 + $0x70] sm:$0xff]  }
  0x37   :  { %v7917_v63 = vld [vmem:[%s11622_s4 + $0x28] sm:$0xff]   ;;  %v7919_v2 = vld [vmem:[%s11622_s4 + $0x30] sm:$0xff]   ;;  %v7920_v3 = vld [vmem:[%s11622_s4 + $0x78] sm:$0xff]  }
  0x38   :  { %v7921_v4 = vld [vmem:[%s11622_s4 + $0x38] sm:$0xff]   ;;  %v533_v8 = vld [vmem:[%s11621_s3] sm:$0x3]  ;;  %v7928_v26 = vld [vmem:[#allocation6] ss:$24 sps:$4 sm:$0xff]  }
  0x39   :  { %v7922_v41 = vld [vmem:[#allocation6 + $0x8] ss:$24 sps:$4 sm:$0xff]   ;;  %v7939_v47 = vld [vmem:[#allocation6 + $0x64] ss:$24 sps:$4 sm:$0xff]  }
  0x3d   :  { %6606 = vmatmul.mubr.msk.bf16.gmra.mrb[8].mxu0 %vm130_vm0, %v8740_v19  ;;  %6614 = vmatmul.mubr.msk.bf16.gmra.mrb[8].mxu1 %vm130_vm0, %v8756_v23 }
  0x3e   :  { %241 = vmatprep.mubr.bf16.mxu0 %v11630_v0  ;;  %321 = vmatprep.mubr.bf16.mxu1 %v11630_v0 }
  0x45   :  { %6607 = vmatmul.mubr.msk.bf16.gmra.mrb[12].mxu0 %vm130_vm0, %v97_v27  ;;  %6615 = vmatmul.mubr.msk.bf16.gmra.mrb[12].mxu1 %vm130_vm0, %v8778_v30 }
  0x46   :  { %251 = vmatprep.mubr.bf16.mxu0 %v11630_v0  ;;  %331 = vmatprep.mubr.bf16.mxu1 %v11630_v0 }
  0x4d   :  { %6608 = vmatmul.mubr.msk.bf16.gmra.mrb[16].mxu0 %vm130_vm0, %v98_v33  ;;  %6616 = vmatmul.mubr.msk.bf16.gmra.mrb[16].mxu1 %vm130_vm0, %v8797_v36 }
  0x4e   :  { %261 = vmatprep.mubr.bf16.mxu0 %v11630_v0  ;;  %341 = vmatprep.mubr.bf16.mxu1 %v11630_v0 }
  0x55   :  { %6609 = vmatmul.mubr.msk.bf16.gmra.mrb[20].mxu0 %vm130_vm0, %v99_v39  ;;  %6617 = vmatmul.mubr.msk.bf16.gmra.mrb[20].mxu1 %vm130_vm0, %v8816_v42 }
  0x56   :  { %271 = vmatprep.mubr.bf16.mxu0 %v11630_v0  ;;  %351 = vmatprep.mubr.bf16.mxu1 %v11630_v0 }
  0x5d   :  { %6610 = vmatmul.mubr.msk.bf16.gmra.mrb[24].mxu0 %vm130_vm0, %v100_v45  ;;  %6618 = vmatmul.mubr.msk.bf16.gmra.mrb[24].mxu1 %vm130_vm0, %v108_v46 }
  0x5e   :  { %281 = vmatprep.mubr.bf16.mxu0 %v11630_v0  ;;  %361 = vmatprep.mubr.bf16.mxu1 %v11630_v0 }
  0x65   :  { %6611 = vmatmul.mubr.msk.bf16.gmra.mrb[28].mxu0 %vm130_vm0, %v101_v49  ;;  %6619 = vmatmul.mubr.msk.bf16.gmra.mrb[28].mxu1 %vm130_vm0, %v109_v52 }
  0x66   :  { %1369 = vmatprep.mubr.bf16.mxu0 %v11630_v0  ;;  %7281 = vmatprep.mubr.msk.bf16.mxu1 %vm130_vm0, %v8693_v5  ;;  %v535_v5 = vlaneseq }
  0x68   :  { %v8917_v6 = vshrl.u32 %v535_v5, 7 }
  0x6a   :  { %v8920_v7 = vsub.s32 0, %v8917_v6  ;;  %v8926_v9 = vsub.s32 1, %v8917_v6 }
  0x6d   :  { %7282 = vmatmul.mubr.msk.bf16.vlgmr.msra.gmra.mrb[32].mxu1 %vm130_vm0, %v8712_v11  ;;  %v8932_v11 = vrot.slane %v533_v8, %v8926_v9 }
  0x6e   :  { %7285 = vmatprep.mubr.msk.bf16.mxu1 %vm130_vm0, %v8740_v19  ;;  %6800 = vmatpush3.bf16.msra.mxu1 %v7907_v53  ;;  %v7924_v19 = vld [vmem:[#allocation6 + $0xc] ss:$24 sps:$4 sm:$0xff]  }
  0x6f   :  { %6801 = vmatprep.subr.bf16.mxu1 %v7908_v54  ;;  %v7925_v54 = vld [vmem:[#allocation6 + $0x38] ss:$24 sps:$4 sm:$0xff]  }
  0x72   :  { %6802 = vmatpush3.bf16.msra.mxu1 %v7909_v55 }
  0x73   :  { %6803 = vmatprep.subr.bf16.mxu1 %v7910_v56 }
  0x75   :  { %7286 = vmatmul.mubr.msk.bf16.gmra.mrb[36].mxu1 %vm130_vm0, %v97_v27  ;;  %v7930_v27 = vld [vmem:[#allocation6 + $0x4] ss:$24 sps:$4 sm:$0xff]  }
  0x76   :  { %7289 = vmatprep.mubr.msk.bf16.mxu1 %vm130_vm0, %v98_v33  ;;  %6804 = vmatpush3.bf16.msra.mxu1 %v7911_v57 }
  0x77   :  { %6805 = vmatprep.subr.bf16.mxu1 %v7912_v58  ;;  %1337 = vmatprep.subr.bf16.mxu0 %v7930_v27  ;;  %v7933_v58 = vld [vmem:[#allocation6 + $0x6c] ss:$24 sps:$4 sm:$0xff]  }
  0x78   :  { %1338 = vmatpush1.bf16.msra.mxu0 %v7928_v26 }
  0x7a   :  { %6806 = vmatpush3.bf16.msra.mxu1 %v7913_v59  ;;  %v7937_v59 = vld [vmem:[#allocation6 + $0x60] ss:$24 sps:$4 sm:$0xff]  }
  0x7b   :  { %6807 = vmatprep.subr.bf16.mxu1 %v7914_v60 }
  0x7d   :  { %7290 = vmatmul.mubr.msk.bf16.gmra.mrb[40].mxu1 %vm130_vm0, %v99_v39 }
  0x7e   :  { %7293 = vmatprep.mubr.msk.bf16.mxu1 %vm130_vm0, %v100_v45  ;;  %6808 = vmatpush3.bf16.msra.mxu1 %v7915_v61 }
  0x7f   :  { %6809 = vmatprep.subr.bf16.mxu1 %v7916_v62 }
  0x82   :  { %6810 = vmatpush3.bf16.msra.mxu1 %v7917_v63 }
  0x83   :  { %6811 = vmatprep.subr.bf16.mxu1 %v7918_v1  ;;  %v7942_v1 = vld [vmem:[#allocation6 + $0x94] ss:$24 sps:$4 sm:$0xff]  }
  0x85   :  { %7294 = vmatmul.mubr.msk.bf16.gmra.mrb[44].mxu1 %vm130_vm0, %v101_v49 }
  0x86   :  { %7297 = vmatprep.mubr.msk.bf16.mxu1 %vm130_vm0, %v8710_v10  ;;  %6812 = vmatpush3.bf16.msra.mxu1 %v7919_v2  ;;  %v8929_v10 = vrot.slane %v533_v8, %v8920_v7 }
  0x87   :  { %6813 = vmatprep.subr.bf16.mxu1 %v7920_v3 }
  0x8a   :  { %6814 = vmatpush3.bf16.msra.mxu1 %v7921_v4 }
  0x8b   :  { %1530 = vmatprep.subr.bf16.mxu1 %v7924_v19  ;;  %v7931_v19 = vld [vmem:[#allocation6 + $0x68] ss:$24 sps:$4 sm:$0xff]  }
  0x8d   :  { %7298 = vmatmul.mubr.msk.bf16.gmra.mrb[48].mxu1 %vm130_vm0, %v8734_v17 }
  0x8e   :  { %7301 = vmatprep.mubr.msk.bf16.mxu1 %vm130_vm0, %v8756_v23 }
  0x95   :  { %7302 = vmatmul.mubr.msk.bf16.gmra.mrb[52].mxu1 %vm130_vm0, %v8778_v30 }
  0x96   :  { %7305 = vmatprep.mubr.msk.bf16.mxu1 %vm130_vm0, %v8797_v36  ;;  %v7936_v36 = vld [vmem:[#allocation6 + $0x34] ss:$24 sps:$4 sm:$0xff]  }
  0x97   :  { %1339 = vmatprep.subr.bf16.mxu0 %v7936_v36  ;;  %v7946_v36 = vld [vmem:[#allocation6 + $0xc0] ss:$24 sps:$4 sm:$0xff]  }
  0x9d   :  { %7306 = vmatmul.mubr.msk.bf16.gmra.mrb[56].mxu1 %vm130_vm0, %v8816_v42  ;;  %v7934_v42 = vld [vmem:[#allocation6 + $0x30] ss:$24 sps:$4 sm:$0xff]  }
  0x9e   :  { %7309 = vmatprep.mubr.msk.bf16.mxu1 %vm130_vm0, %v108_v46  ;;  %v7927_v46 = vld [vmem:[#allocation6 + $0x3c] ss:$24 sps:$4 sm:$0xff]   ;;  %1340 = vmatpush1.bf16.msra.mxu0 %v7934_v42 }
  0x9f   :  { %1341 = vmatprep.subr.bf16.mxu0 %v7939_v47 }
  0xa2   :  { %1342 = vmatpush1.bf16.msra.mxu0 %v7937_v59 }
  0xa3   :  { %1343 = vmatprep.subr.bf16.mxu0 %v7942_v1 }
  0xa5   :  { %7310 = vmatmul.mubr.msk.bf16.gmra.mrb[60].mxu1 %vm130_vm0, %v109_v52 }
 0x100   :  { %v213_v12 = vpop.f32.mrb[0].mxu0  ;;  %v293_v22 = vpop.f32.mrb[0].mxu1 }
 0x101   :  { %v545_v13 = vadd.f32 %v8929_v10, %v213_v12  ;;  %v215_v14 = vpop.f32.mrb[1].mxu0  ;;  %v577_v24 = vadd.f32 %v8929_v10, %v293_v22  ;;  %v295_v25 = vpop.f32.mrb[1].mxu1 }
 0x102   :  { %v546_v15 = vadd.f32 %v8932_v11, %v215_v14  ;;  %v217_v16 = vpop.f32.mrb[2].mxu0  ;;  %v578_v30 = vadd.f32 %v8932_v11, %v295_v25  ;;  %v297_v31 = vpop.f32.mrb[2].mxu1  ;;  %v7948_v25 = vld [vmem:[#allocation6 + $0xc4] ss:$24 sps:$4 sm:$0xff]  }
 0x103   :  { %v547_v17 = vadd.f32 %v8929_v10, %v217_v16  ;;  %v219_v18 = vpop.f32.mrb[3].mxu0  ;;  %v609_v20 = vmax.f32 %v545_v13, 0.0  ;;  %v641_v33 = vmax.f32 %v577_v24, 0.0  ;;  %v579_v34 = vadd.f32 %v8929_v10, %v297_v31  ;;  %v299_v35 = vpop.f32.mrb[3].mxu1  ;;  %v7945_v24 = vld [vmem:[#allocation6 + $0x9c] ss:$24 sps:$4 sm:$0xff]  }
 0x104   :  { %v548_v21 = vadd.f32 %v8932_v11, %v219_v18  ;;  %v610_v28 = vmax.f32 %v546_v15, 0.0  ;;  %v642_v39 = vmax.f32 %v578_v30, 0.0  ;;  %v580_v40 = vadd.f32 %v8932_v11, %v299_v35  ;;  %v7943_v35 = vld [vmem:[#allocation6 + $0x98] ss:$24 sps:$4 sm:$0xff]  }
 0x105   :  { %v611_v23 = vmax.f32 %v547_v17, 0.0  ;;  %v643_v45 = vmax.f32 %v579_v34, 0.0 }
 0x106   :  { %v612_v29 = vmax.f32 %v548_v21, 0.0  ;;  %v644_v50 = vmax.f32 %v580_v40, 0.0 }
 0x107   :  { %v673_v32 = vpack.c.bf16 %v611_v23, %v609_v20  ;;  %v8945_v53 = vpack.c.bf16 %v643_v45, %v641_v33  ;;  %v7940_v20 = vld [vmem:[#allocation6 + $0x90] ss:$24 sps:$4 sm:$0xff]  }
 0x108   :  { %v223_v37 = vpop.f32.mrb[4].mxu0  ;;  %v674_v38 = vpack.c.bf16 %v612_v29, %v610_v28  ;;  %v303_v56 = vpop.f32.mrb[4].mxu1  ;;  %v8948_v57 = vpack.c.bf16 %v644_v50, %v642_v39  ;;  %1344 = vmatpush1.bf16.msra.mxu0 %v7940_v20 }
 0x109   :  { %v549_v43 = vadd.f32 %v8929_v10, %v223_v37  ;;  %v225_v44 = vpop.f32.mrb[5].mxu0  ;;  %v581_v62 = vadd.f32 %v8929_v10, %v303_v56  ;;  %v305_v63 = vpop.f32.mrb[5].mxu1  ;;  %1345 = vmatprep.subr.bf16.mxu0 %v7948_v25 }
 0x10a   :  { %v550_v48 = vadd.f32 %v8932_v11, %v225_v44  ;;  %v227_v49 = vpop.f32.mrb[6].mxu0  ;;  %872 = vmatprep.mubr.bf16.mxu1 %v674_v38  ;;  %v582_v4 = vadd.f32 %v8932_v11, %v305_v63  ;;  %v307_v5 = vpop.f32.mrb[6].mxu1 }
 0x10b   :  { %v551_v51 = vadd.f32 %v8929_v10, %v227_v49  ;;  %v229_v52 = vpop.f32.mrb[7].mxu0  ;;  %873 = vmatmul.mubr.bf16.vlgmr.msra.gmra.mrb[64].mxu1 %v673_v32  ;;  %v613_v60 = vmax.f32 %v549_v43, 0.0  ;;  %v645_v12 = vmax.f32 %v581_v62, 0.0  ;;  %v583_v13 = vadd.f32 %v8929_v10, %v307_v5  ;;  %v309_v14 = vpop.f32.mrb[7].mxu1 }
 0x10c   :  { %v552_v55 = vadd.f32 %v8932_v11, %v229_v52  ;;  %1531 = vmatpush1.bf16.msra.mxu1 %v7922_v41  ;;  %v614_v2 = vmax.f32 %v550_v48, 0.0  ;;  %v646_v17 = vmax.f32 %v582_v4, 0.0  ;;  %v584_v18 = vadd.f32 %v8932_v11, %v309_v14  ;;  %v7951_v41 = vld [vmem:[#allocation6 + $0xcc] ss:$24 sps:$4 sm:$0xff]   ;;  %1346 = vmatpush1.bf16.msra.mxu0 %v7946_v36 }
 0x10d   :  { %v615_v61 = vmax.f32 %v551_v51, 0.0  ;;  %1532 = vmatprep.subr.bf16.mxu1 %v7927_v46  ;;  %v647_v23 = vmax.f32 %v583_v13, 0.0 }
 0x10e   :  { %v616_v3 = vmax.f32 %v552_v55, 0.0  ;;  %v648_v28 = vmax.f32 %v584_v18, 0.0  ;;  %v7949_v55 = vld [vmem:[#allocation6 + $0xc8] ss:$24 sps:$4 sm:$0xff]  }
 0x10f   :  { %v675_v8 = vpack.c.bf16 %v615_v61, %v613_v60  ;;  %v8957_v31 = vpack.c.bf16 %v647_v23, %v645_v12 }
 0x110   :  { %v233_v15 = vpop.f32.mrb[8].mxu0  ;;  %v676_v16 = vpack.c.bf16 %v616_v3, %v614_v2  ;;  %1533 = vmatpush1.bf16.msra.mxu1 %v7925_v54  ;;  %v313_v33 = vpop.f32.mrb[8].mxu1  ;;  %v8960_v34 = vpack.c.bf16 %v648_v28, %v646_v17 }
 0x111   :  { %v553_v21 = vadd.f32 %v8929_v10, %v233_v15  ;;  %v235_v22 = vpop.f32.mrb[9].mxu0  ;;  %1534 = vmatprep.subr.bf16.mxu1 %v7933_v58  ;;  %v585_v39 = vadd.f32 %v8929_v10, %v313_v33  ;;  %v315_v40 = vpop.f32.mrb[9].mxu1 }
 0x112   :  { %v554_v26 = vadd.f32 %v8932_v11, %v235_v22  ;;  %v237_v27 = vpop.f32.mrb[10].mxu0  ;;  %880 = vmatprep.mubr.bf16.mxu1 %v676_v16  ;;  %v586_v44 = vadd.f32 %v8932_v11, %v315_v40  ;;  %v317_v45 = vpop.f32.mrb[10].mxu1 }
 0x113   :  { %v555_v29 = vadd.f32 %v8929_v10, %v237_v27  ;;  %v239_v30 = vpop.f32.mrb[11].mxu0  ;;  %881 = vmatmul.mubr.bf16.gmra.mrb[68].mxu1 %v675_v8  ;;  %v617_v37 = vmax.f32 %v553_v21, 0.0  ;;  %v649_v47 = vmax.f32 %v585_v39, 0.0  ;;  %v587_v48 = vadd.f32 %v8929_v10, %v317_v45  ;;  %v319_v49 = vpop.f32.mrb[11].mxu1 }
 0x114   :  { %v556_v32 = vadd.f32 %v8932_v11, %v239_v30  ;;  %1535 = vmatpush1.bf16.msra.mxu1 %v7931_v19  ;;  %v618_v42 = vmax.f32 %v554_v26, 0.0  ;;  %v650_v52 = vmax.f32 %v586_v44, 0.0  ;;  %v588_v54 = vadd.f32 %v8932_v11, %v319_v49 }
 0x115   :  { %v619_v38 = vmax.f32 %v555_v29, 0.0  ;;  %1536 = vmatprep.subr.bf16.mxu1 %v7945_v24  ;;  %v651_v59 = vmax.f32 %v587_v48, 0.0 }
 0x116   :  { %v620_v43 = vmax.f32 %v556_v32, 0.0  ;;  %v652_v62 = vmax.f32 %v588_v54, 0.0 }
 0x117   :  { %v677_v46 = vpack.c.bf16 %v619_v38, %v617_v37  ;;  %v8969_v2 = vpack.c.bf16 %v651_v59, %v649_v47 }
 0x118   :  { %v243_v50 = vpop.f32.mrb[12].mxu0  ;;  %v678_v51 = vpack.c.bf16 %v620_v43, %v618_v42  ;;  %1537 = vmatpush1.bf16.msra.mxu1 %v7943_v35  ;;  %v323_v4 = vpop.f32.mrb[12].mxu1  ;;  %v8972_v5 = vpack.c.bf16 %v652_v62, %v650_v52 }
 0x119   :  { %v557_v56 = vadd.f32 %v8929_v10, %v243_v50  ;;  %v245_v58 = vpop.f32.mrb[13].mxu0  ;;  %1538 = vmatprep.subr.bf16.mxu1 %v7951_v41  ;;  %v589_v13 = vadd.f32 %v8929_v10, %v323_v4  ;;  %v325_v14 = vpop.f32.mrb[13].mxu1 }
 0x11a   :  { %v558_v60 = vadd.f32 %v8932_v11, %v245_v58  ;;  %v247_v61 = vpop.f32.mrb[14].mxu0  ;;  %888 = vmatprep.mubr.bf16.mxu1 %v678_v51  ;;  %v590_v17 = vadd.f32 %v8932_v11, %v325_v14  ;;  %v327_v18 = vpop.f32.mrb[14].mxu1 }
 0x11b   :  { %v559_v63 = vadd.f32 %v8929_v10, %v247_v61  ;;  %v249_v1 = vpop.f32.mrb[15].mxu0  ;;  %889 = vmatmul.mubr.bf16.gmra.mrb[72].mxu1 %v677_v46  ;;  %v621_v8 = vmax.f32 %v557_v56, 0.0  ;;  %v653_v20 = vmax.f32 %v589_v13, 0.0  ;;  %v591_v21 = vadd.f32 %v8929_v10, %v327_v18  ;;  %v329_v22 = vpop.f32.mrb[15].mxu1 }
 0x11c   :  { %v560_v3 = vadd.f32 %v8932_v11, %v249_v1  ;;  %1539 = vmatpush1.bf16.msra.mxu1 %v7949_v55  ;;  %v622_v15 = vmax.f32 %v558_v60, 0.0  ;;  %v654_v25 = vmax.f32 %v590_v17, 0.0  ;;  %v592_v26 = vadd.f32 %v8932_v11, %v329_v22 }
 0x11d   :  { %v623_v12 = vmax.f32 %v559_v63, 0.0  ;;  %v655_v29 = vmax.f32 %v591_v21, 0.0 }
 0x11e   :  { %v624_v16 = vmax.f32 %v560_v3, 0.0  ;;  %v656_v33 = vmax.f32 %v592_v26, 0.0 }
 0x11f   :  { %v679_v19 = vpack.c.bf16 %v623_v12, %v621_v8  ;;  %v8981_v37 = vpack.c.bf16 %v655_v29, %v653_v20 }
 0x120   :  { %v253_v23 = vpop.f32.mrb[16].mxu0  ;;  %v680_v24 = vpack.c.bf16 %v624_v16, %v622_v15  ;;  %v333_v39 = vpop.f32.mrb[16].mxu1  ;;  %v8984_v40 = vpack.c.bf16 %v656_v33, %v654_v25 }
 0x121   :  { %v561_v27 = vadd.f32 %v8929_v10, %v253_v23  ;;  %v255_v28 = vpop.f32.mrb[17].mxu0  ;;  %v593_v43 = vadd.f32 %v8929_v10, %v333_v39  ;;  %v335_v44 = vpop.f32.mrb[17].mxu1 }
 0x122   :  { %v562_v30 = vadd.f32 %v8932_v11, %v255_v28  ;;  %v257_v32 = vpop.f32.mrb[18].mxu0  ;;  %896 = vmatprep.mubr.bf16.mxu1 %v680_v24  ;;  %v594_v47 = vadd.f32 %v8932_v11, %v335_v44  ;;  %v337_v48 = vpop.f32.mrb[18].mxu1 }
 0x123   :  { %v563_v35 = vadd.f32 %v8929_v10, %v257_v32  ;;  %v259_v36 = vpop.f32.mrb[19].mxu0  ;;  %897 = vmatmul.mubr.bf16.gmra.mrb[76].mxu1 %v679_v19  ;;  %v625_v41 = vmax.f32 %v561_v27, 0.0  ;;  %v657_v50 = vmax.f32 %v593_v43, 0.0  ;;  %v595_v51 = vadd.f32 %v8929_v10, %v337_v48  ;;  %v339_v52 = vpop.f32.mrb[19].mxu1 }
 0x124   :  { %v564_v38 = vadd.f32 %v8932_v11, %v259_v36  ;;  %v626_v45 = vmax.f32 %v562_v30, 0.0  ;;  %v658_v56 = vmax.f32 %v594_v47, 0.0  ;;  %v596_v58 = vadd.f32 %v8932_v11, %v339_v52 }
 0x125   :  { %v627_v42 = vmax.f32 %v563_v35, 0.0  ;;  %v659_v61 = vmax.f32 %v595_v51, 0.0 }
 0x126   :  { %v628_v46 = vmax.f32 %v564_v38, 0.0  ;;  %v660_v1 = vmax.f32 %v596_v58, 0.0 }
 0x127   :  { %v681_v49 = vpack.c.bf16 %v627_v42, %v625_v41  ;;  %v8993_v8 = vpack.c.bf16 %v659_v61, %v657_v50 }
 0x128   :  { %v263_v54 = vpop.f32.mrb[20].mxu0  ;;  %v682_v55 = vpack.c.bf16 %v628_v46, %v626_v45  ;;  %v343_v13 = vpop.f32.mrb[20].mxu1  ;;  %v8996_v14 = vpack.c.bf16 %v660_v1, %v658_v56 }
 0x129   :  { %v565_v59 = vadd.f32 %v8929_v10, %v263_v54  ;;  %v265_v60 = vpop.f32.mrb[21].mxu0  ;;  %v597_v17 = vadd.f32 %v8929_v10, %v343_v13  ;;  %v345_v18 = vpop.f32.mrb[21].mxu1 }
 0x12a   :  { %v566_v62 = vadd.f32 %v8932_v11, %v265_v60  ;;  %v267_v63 = vpop.f32.mrb[22].mxu0  ;;  %904 = vmatprep.mubr.bf16.mxu1 %v682_v55  ;;  %v598_v21 = vadd.f32 %v8932_v11, %v345_v18  ;;  %v347_v22 = vpop.f32.mrb[22].mxu1 }
 0x12b   :  { %v567_v3 = vadd.f32 %v8929_v10, %v267_v63  ;;  %v269_v4 = vpop.f32.mrb[23].mxu0  ;;  %905 = vmatmul.mubr.bf16.gmra.mrb[80].mxu1 %v681_v49  ;;  %v629_v15 = vmax.f32 %v565_v59, 0.0  ;;  %v661_v24 = vmax.f32 %v597_v17, 0.0  ;;  %v599_v25 = vadd.f32 %v8929_v10, %v347_v22  ;;  %v349_v26 = vpop.f32.mrb[23].mxu1 }
 0x12c   :  { %v568_v12 = vadd.f32 %v8932_v11, %v269_v4  ;;  %v630_v19 = vmax.f32 %v566_v62, 0.0  ;;  %v662_v29 = vmax.f32 %v598_v21, 0.0  ;;  %v600_v30 = vadd.f32 %v8932_v11, %v349_v26 }
 0x12d   :  { %v631_v16 = vmax.f32 %v567_v3, 0.0  ;;  %v663_v35 = vmax.f32 %v599_v25, 0.0 }
 0x12e   :  { %v632_v20 = vmax.f32 %v568_v12, 0.0  ;;  %v664_v39 = vmax.f32 %v600_v30, 0.0 }
 0x12f   :  { %v683_v23 = vpack.c.bf16 %v631_v16, %v629_v15  ;;  %v9005_v43 = vpack.c.bf16 %v663_v35, %v661_v24 }
 0x130   :  { %v273_v27 = vpop.f32.mrb[24].mxu0  ;;  %v684_v28 = vpack.c.bf16 %v632_v20, %v630_v19  ;;  %v353_v45 = vpop.f32.mrb[24].mxu1  ;;  %v9008_v46 = vpack.c.bf16 %v664_v39, %v662_v29 }
 0x131   :  { %v569_v32 = vadd.f32 %v8929_v10, %v273_v27  ;;  %v275_v33 = vpop.f32.mrb[25].mxu0  ;;  %v601_v49 = vadd.f32 %v8929_v10, %v353_v45  ;;  %v355_v50 = vpop.f32.mrb[25].mxu1 }
 0x132   :  { %v570_v36 = vadd.f32 %v8932_v11, %v275_v33  ;;  %v277_v38 = vpop.f32.mrb[26].mxu0  ;;  %912 = vmatprep.mubr.bf16.mxu1 %v684_v28  ;;  %v602_v54 = vadd.f32 %v8932_v11, %v355_v50  ;;  %v357_v55 = vpop.f32.mrb[26].mxu1 }
 0x133   :  { %v571_v41 = vadd.f32 %v8929_v10, %v277_v38  ;;  %v279_v42 = vpop.f32.mrb[27].mxu0  ;;  %913 = vmatmul.mubr.bf16.gmra.mrb[84].mxu1 %v683_v23  ;;  %v633_v47 = vmax.f32 %v569_v32, 0.0  ;;  %v665_v58 = vmax.f32 %v601_v49, 0.0  ;;  %v603_v59 = vadd.f32 %v8929_v10, %v357_v55  ;;  %v359_v60 = vpop.f32.mrb[27].mxu1 }
 0x134   :  { %v572_v44 = vadd.f32 %v8932_v11, %v279_v42  ;;  %v634_v51 = vmax.f32 %v570_v36, 0.0  ;;  %v666_v63 = vmax.f32 %v602_v54, 0.0  ;;  %v604_v1 = vadd.f32 %v8932_v11, %v359_v60 }
 0x135   :  { %v635_v48 = vmax.f32 %v571_v41, 0.0  ;;  %v667_v12 = vmax.f32 %v603_v59, 0.0  ;;  %v7957_v59 = vld [vmem:[#allocation6 + $0xfc] ss:$24 sps:$4 sm:$0xff]  }
 0x136   :  { %v636_v52 = vmax.f32 %v572_v44, 0.0  ;;  %v668_v16 = vmax.f32 %v604_v1, 0.0  ;;  %1540 = vmatprep.subr.bf16.mxu1 %v7957_v59  ;;  %v7958_v1 = vld [vmem:[#allocation6 + $0x120] ss:$24 sps:$4 sm:$0xff]   ;;  %v7970_v59 = vld [vmem:[#allocation6 + $0x10] ss:$24 sps:$4 sm:$0xff]  }
 0x137   :  { %v685_v56 = vpack.c.bf16 %v635_v48, %v633_v47  ;;  %v9017_v19 = vpack.c.bf16 %v667_v12, %v665_v58  ;;  %v7954_v58 = vld [vmem:[#allocation6 + $0xf4] ss:$24 sps:$4 sm:$0xff]  }
 0x138   :  { %v283_v61 = vpop.f32.mrb[28].mxu0  ;;  %v686_v62 = vpack.c.bf16 %v636_v52, %v634_v51  ;;  %v363_v21 = vpop.f32.mrb[28].mxu1  ;;  %v9020_v22 = vpack.c.bf16 %v668_v16, %v666_v63  ;;  %1347 = vmatprep.subr.bf16.mxu0 %v7954_v58  ;;  %v7960_v63 = vld [vmem:[#allocation6 + $0x124] ss:$24 sps:$4 sm:$0xff]   ;;  %v7967_v16 = vld [vmem:[#allocation6 + $0x158] ss:$24 sps:$4 sm:$0xff]  }
 0x139   :  { %v573_v3 = vadd.f32 %v8929_v10, %v283_v61  ;;  %v285_v4 = vpop.f32.mrb[29].mxu0  ;;  %v605_v25 = vadd.f32 %v8929_v10, %v363_v21  ;;  %v365_v26 = vpop.f32.mrb[29].mxu1  ;;  %v7969_v12 = vld [vmem:[#allocation6 + $0x15c] ss:$24 sps:$4 sm:$0xff]  }
 0x13a   :  { %v574_v13 = vadd.f32 %v8932_v11, %v285_v4  ;;  %v287_v15 = vpop.f32.mrb[30].mxu0  ;;  %920 = vmatprep.mubr.bf16.mxu1 %v686_v62  ;;  %v606_v29 = vadd.f32 %v8932_v11, %v365_v26  ;;  %v367_v30 = vpop.f32.mrb[30].mxu1  ;;  %v7966_v4 = vld [vmem:[#allocation6 + $0x154] ss:$24 sps:$4 sm:$0xff]  }
 0x13b   :  { %v575_v17 = vadd.f32 %v8929_v10, %v287_v15  ;;  %v289_v18 = vpop.f32.mrb[31].mxu0  ;;  %921 = vmatmul.mubr.bf16.gmra.mrb[88].mxu1 %v685_v56  ;;  %v637_v23 = vmax.f32 %v573_v3, 0.0  ;;  %v669_v33 = vmax.f32 %v605_v25, 0.0  ;;  %v607_v35 = vadd.f32 %v8929_v10, %v367_v30  ;;  %v369_v36 = vpop.f32.mrb[31].mxu1  ;;  %v7964_v15 = vld [vmem:[#allocation6 + $0x150] ss:$24 sps:$4 sm:$0xff]  }
 0x13c   :  { %v576_v20 = vadd.f32 %v8932_v11, %v289_v18  ;;  %v638_v27 = vmax.f32 %v574_v13, 0.0  ;;  %v670_v39 = vmax.f32 %v606_v29, 0.0  ;;  %v608_v41 = vadd.f32 %v8932_v11, %v369_v36 }
 0x13d   :  { %v639_v24 = vmax.f32 %v575_v17, 0.0  ;;  %v671_v42 = vmax.f32 %v607_v35, 0.0 }
 0x13e   :  { %v640_v28 = vmax.f32 %v576_v20, 0.0  ;;  %v672_v44 = vmax.f32 %v608_v41, 0.0 }
 0x13f   :  { %v687_v32 = vpack.c.bf16 %v639_v24, %v637_v23  ;;  %v9026_v45 = vpack.c.bf16 %v671_v42, %v669_v33 }
 0x140   :  { %v688_v38 = vpack.c.bf16 %v640_v28, %v638_v27  ;;  %v9029_v47 = vpack.c.bf16 %v672_v44, %v670_v39  ;;  %v9031_v48 = vpop.f32.mrb[32].mxu1 }
 0x141   :  { %11715 = vst [vmem:[#allocation12_spill] sm:$0xff] %v9031_v48  ;;  %v9033_v49 = vpop.f32.mrb[33].mxu1 }
 0x142   :  { %928 = vmatprep.mubr.bf16.mxu1 %v688_v38  ;;  %11716 = vst [vmem:[#allocation13_spill] sm:$0xff] %v9033_v49  ;;  %v9035_v10 = vpop.f32.mrb[34].mxu1 }
 0x143   :  { %929 = vmatmul.mubr.bf16.gmra.mrb[92].mxu1 %v687_v32  ;;  %11717 = vst [vmem:[#allocation14_spill] sm:$0xff] %v9035_v10  ;;  %v9037_v50 = vpop.f32.mrb[35].mxu1 }
 0x144   :  { %936 = vmatprep.mubr.bf16.mxu1 %v8948_v57  ;;  %11718 = vst [vmem:[#allocation15_spill] sm:$0xff] %v9037_v50 }
 0x148   :  { %v9041_v11 = vpop.f32.mrb[36].mxu1 }
 0x149   :  { %11719 = vst [vmem:[#allocation16_spill] sm:$0xff] %v9041_v11  ;;  %v9043_v51 = vpop.f32.mrb[37].mxu1 }
 0x14a   :  { %11720 = vst [vmem:[#allocation17_spill] sm:$0xff] %v9043_v51  ;;  %v9045_v52 = vpop.f32.mrb[38].mxu1 }
 0x14b   :  { %937 = vmatmul.mubr.bf16.gmra.mrb[96].mxu1 %v8945_v53  ;;  %11721 = vst [vmem:[#allocation18_spill] sm:$0xff] %v9045_v52  ;;  %v9047_v57 = vpop.f32.mrb[39].mxu1 }
 0x14c   :  { %944 = vmatprep.mubr.bf16.mxu1 %v8960_v34  ;;  %11722 = vst [vmem:[#allocation19_spill] sm:$0xff] %v9047_v57 }
 0x150   :  { %v9051_v54 = vpop.f32.mrb[40].mxu1 }
 0x151   :  { %11723 = vst [vmem:[#allocation20_spill] sm:$0xff] %v9051_v54  ;;  %v9053_v55 = vpop.f32.mrb[41].mxu1 }
 0x152   :  { %11724 = vst [vmem:[#allocation21_spill] sm:$0xff] %v9053_v55  ;;  %v9055_v56 = vpop.f32.mrb[42].mxu1 }
 0x153   :  { %945 = vmatmul.mubr.bf16.gmra.mrb[100].mxu1 %v8957_v31  ;;  %11725 = vst [vmem:[#allocation22_spill] sm:$0xff] %v9055_v56  ;;  %v9057_v53 = vpop.f32.mrb[43].mxu1  ;;  %v7952_v31 = vld [vmem:[#allocation6 + $0xf0] ss:$24 sps:$4 sm:$0xff]  }
 0x154   :  { %952 = vmatprep.mubr.bf16.mxu1 %v8972_v5  ;;  %11726 = vst [vmem:[#allocation23_spill] sm:$0xff] %v9057_v53  ;;  %v7955_v5 = vld [vmem:[#allocation6 + $0xf8] ss:$24 sps:$4 sm:$0xff]   ;;  %1348 = vmatpush1.bf16.msra.mxu0 %v7952_v31 }
 0x155   :  { %1541 = vmatpush1.bf16.msra.mxu1 %v7955_v5  ;;  %1349 = vmatprep.subr.bf16.mxu0 %v7960_v63  ;;  %v7975_v5 = vld [vmem:[#allocation6 + $0x44] ss:$24 sps:$4 sm:$0xff]  }
 0x158   :  { %v9061_v34 = vpop.f32.mrb[44].mxu1  ;;  %1350 = vmatpush1.bf16.msra.mxu0 %v7958_v1 }
 0x159   :  { %11727 = vst [vmem:[#allocation24_spill] sm:$0xff] %v9061_v34  ;;  %v9063_v60 = vpop.f32.mrb[45].mxu1  ;;  %1351 = vmatprep.subr.bf16.mxu0 %v7966_v4  ;;  %v7978_v4 = vld [vmem:[#allocation6 + $0x74] ss:$24 sps:$4 sm:$0xff]  }
 0x15a   :  { %11728 = vst [vmem:[#allocation25_spill] sm:$0xff] %v9063_v60  ;;  %v9065_v61 = vpop.f32.mrb[46].mxu1 }
 0x15b   :  { %953 = vmatmul.mubr.bf16.gmra.mrb[104].mxu1 %v8969_v2  ;;  %11729 = vst [vmem:[#allocation26_spill] sm:$0xff] %v9065_v61  ;;  %v9067_v62 = vpop.f32.mrb[47].mxu1  ;;  %v7963_v2 = vld [vmem:[#allocation6 + $0x12c] ss:$24 sps:$4 sm:$0xff]  }
 0x15c   :  { %960 = vmatprep.mubr.bf16.mxu1 %v8984_v40  ;;  %11730 = vst [vmem:[#allocation27_spill] sm:$0xff] %v9067_v62  ;;  %v7961_v40 = vld [vmem:[#allocation6 + $0x128] ss:$24 sps:$4 sm:$0xff]   ;;  %1542 = vmatprep.subr.bf16.mxu1 %v7963_v2 }
 0x15d   :  { %1543 = vmatpush1.bf16.msra.mxu1 %v7961_v40  ;;  %1352 = vmatpush1.bf16.msra.mxu0 %v7964_v15  ;;  %v7973_v40 = vld [vmem:[#allocation6 + $0x40] ss:$24 sps:$4 sm:$0xff]  }
 0x15e   :  { %1544 = vmatprep.subr.bf16.mxu1 %v7969_v12 }
 0x160   :  { %v9071_v3 = vpop.f32.mrb[48].mxu1 }
 0x161   :  { %11731 = vst [vmem:[#allocation28_spill] sm:$0xff] %v9071_v3  ;;  %v9073_v13 = vpop.f32.mrb[49].mxu1  ;;  %1545 = vmatpush1.bf16.msra.mxu1 %v7967_v16 }
 0x162   :  { %11732 = vst [vmem:[#allocation29_spill] sm:$0xff] %v9073_v13  ;;  %v9075_v17 = vpop.f32.mrb[50].mxu1 }
 0x163   :  { %961 = vmatmul.mubr.bf16.gmra.mrb[108].mxu1 %v8981_v37  ;;  %11733 = vst [vmem:[#allocation30_spill] sm:$0xff] %v9075_v17  ;;  %v9077_v18 = vpop.f32.mrb[51].mxu1 }
 0x164   :  { %968 = vmatprep.mubr.bf16.mxu1 %v8996_v14  ;;  %11734 = vst [vmem:[#allocation31_spill] sm:$0xff] %v9077_v18 }
 0x168   :  { %v9081_v37 = vpop.f32.mrb[52].mxu1 }
 0x169   :  { %11735 = vst [vmem:[#allocation32_spill] sm:$0xff] %v9081_v37  ;;  %v9083_v14 = vpop.f32.mrb[53].mxu1 }
 0x16a   :  { %11736 = vst [vmem:[#allocation33_spill] sm:$0xff] %v9083_v14  ;;  %v9085_v20 = vpop.f32.mrb[54].mxu1 }
 0x16b   :  { %969 = vmatmul.mubr.bf16.gmra.mrb[112].mxu1 %v8993_v8  ;;  %11737 = vst [vmem:[#allocation34_spill] sm:$0xff] %v9085_v20  ;;  %v9087_v21 = vpop.f32.mrb[55].mxu1 }
 0x16c   :  { %976 = vmatprep.mubr.bf16.mxu1 %v9008_v46  ;;  %11738 = vst [vmem:[#allocation35_spill] sm:$0xff] %v9087_v21 }
 0x170   :  { %v9091_v23 = vpop.f32.mrb[56].mxu1 }
 0x171   :  { %11739 = vst [vmem:[#allocation36_spill] sm:$0xff] %v9091_v23  ;;  %v9093_v24 = vpop.f32.mrb[57].mxu1 }
 0x172   :  { %11740 = vst [vmem:[#allocation37_spill] sm:$0xff] %v9093_v24  ;;  %v9095_v25 = vpop.f32.mrb[58].mxu1 }
 0x173   :  { %977 = vmatmul.mubr.bf16.gmra.mrb[116].mxu1 %v9005_v43  ;;  %11741 = vst [vmem:[#allocation38_spill] sm:$0xff] %v9095_v25  ;;  %v9097_v8 = vpop.f32.mrb[59].mxu1 }
 0x174   :  { %984 = vmatprep.mubr.bf16.mxu1 %v9020_v22  ;;  %11742 = vst [vmem:[#allocation39_spill] sm:$0xff] %v9097_v8  ;;  %v7972_v22 = vld [vmem:[#allocation6 + $0x14] ss:$24 sps:$4 sm:$0xff]  }
 0x175   :  { %1723 = vmatprep.subr.bf16.mxu0 %v7972_v22 }
 0x178   :  { %v9101_v46 = vpop.f32.mrb[60].mxu1 }
 0x179   :  { %11743 = vst [vmem:[#allocation40_spill] sm:$0xff] %v9101_v46  ;;  %v9103_v26 = vpop.f32.mrb[61].mxu1 }
 0x17a   :  { %11744 = vst [vmem:[#allocation41_spill] sm:$0xff] %v9103_v26  ;;  %v9105_v27 = vpop.f32.mrb[62].mxu1 }
 0x17b   :  { %985 = vmatmul.mubr.bf16.gmra.mrb[120].mxu1 %v9017_v19  ;;  %11745 = vst [vmem:[#allocation42_spill] sm:$0xff] %v9105_v27  ;;  %v9107_v43 = vpop.f32.mrb[63].mxu1  ;;  %v9114_v19 = vld [vmem:[%s11623_s5] ss:$0 sm:$0xff]  ;;  %s8601_s5 = smov 64  }
 0x17c   :  { %992 = vmatprep.mubr.bf16.mxu1 %v9029_v47  ;;  %11746 = vst [vmem:[#allocation43_spill] sm:$0xff] %v9107_v43 }
 0x183   :  { %993 = vmatmul.mubr.bf16.gmra.mrb[124].mxu1 %v9026_v45 }
 0x184   :  { %1562 = vmatprep.mubr.bf16.mxu1 %v11630_v0 }
 0x1de   :  { %v6815_v28 = vpop.f32.mrb[64].mxu1 }
 0x1df   :  { %v6816_v29 = vpop.f32.mrb[65].mxu1 }
 0x1e0   :  { %v6817_v30 = vadd.f32 %v6816_v29, %v6815_v28  ;;  %v6818_v32 = vpop.f32.mrb[66].mxu1 }
 0x1e1   :  { %v6819_v33 = vpop.f32.mrb[67].mxu1 }
 0x1e2   :  { %v875_v35 = vadd.f32 %v6817_v30, %v9114_v19  ;;  %v6820_v36 = vadd.f32 %v6819_v33, %v6818_v32  ;;  %v7976_v32 = vld [vmem:[#allocation6 + $0x70] ss:$24 sps:$4 sm:$0xff]  }
 0x1e4   :  { %v878_v38 = vadd.f32 %v6820_v36, %v9114_v19  ;;  %v1001_v39 = vmax.f32 %v875_v35, 0.0  ;;  %v7981_v35 = vld [vmem:[#allocation6 + $0xa4] ss:$24 sps:$4 sm:$0xff]  }
 0x1e6   :  { %v1002_v41 = vmax.f32 %v878_v38, 0.0  ;;  %v6821_v42 = vpop.f32.mrb[68].mxu1 }
 0x1e7   :  { %v6822_v44 = vpop.f32.mrb[69].mxu1 }
 0x1e8   :  { %v9118_v45 = vpack.c.bf16 %v1002_v41, %v1001_v39  ;;  %v6823_v47 = vadd.f32 %v6822_v44, %v6821_v42  ;;  %v6824_v58 = vpop.f32.mrb[70].mxu1  ;;  %v7979_v41 = vld [vmem:[#allocation6 + $0xa0] ss:$24 sps:$4 sm:$0xff]   ;;  %v7984_v42 = vld [vmem:[#allocation6 + $0xd4] ss:$24 sps:$4 sm:$0xff]  }
 0x1e9   :  { %v6825_v31 = vpop.f32.mrb[71].mxu1 }
 0x1ea   :  { %v883_v63 = vadd.f32 %v6823_v47, %v9114_v19  ;;  %v6826_v2 = vadd.f32 %v6825_v31, %v6824_v58  ;;  %1370 = vmatmul.mubr.bf16.vlgmr.msra.gmra.mrb[32].mxu0 %v9118_v45  ;;  %1563 = vmatmul.mubr.bf16.vlgmr.msra.gmra.mrb[128].mxu1 %v9118_v45 }
 0x1eb   :  { %1379 = vmatprep.mubr.bf16.mxu0 %v11630_v0  ;;  %1572 = vmatprep.mubr.bf16.mxu1 %v11630_v0 }
 0x1ec   :  { %v886_v1 = vadd.f32 %v6826_v2, %v9114_v19  ;;  %1724 = vmatpush1.bf16.msra.mxu0 %v7970_v59  ;;  %v1003_v15 = vmax.f32 %v883_v63, 0.0  ;;  %v7982_v2 = vld [vmem:[#allocation6 + $0xd0] ss:$24 sps:$4 sm:$0xff]  }
 0x1ed   :  { %1725 = vmatprep.subr.bf16.mxu0 %v7975_v5 }
 0x1ee   :  { %v6827_v12 = vpop.f32.mrb[72].mxu1  ;;  %v1004_v16 = vmax.f32 %v886_v1, 0.0 }
 0x1ef   :  { %v6828_v22 = vpop.f32.mrb[73].mxu1 }
 0x1f0   :  { %v6829_v28 = vadd.f32 %v6828_v22, %v6827_v12  ;;  %v6830_v29 = vpop.f32.mrb[74].mxu1  ;;  %v9126_v30 = vpack.c.bf16 %v1004_v16, %v1003_v15  ;;  %1726 = vmatpush1.bf16.msra.mxu0 %v7973_v40  ;;  %v7987_v40 = vld [vmem:[#allocation6 + $0x104] ss:$24 sps:$4 sm:$0xff]   ;;  %v7985_v16 = vld [vmem:[#allocation6 + $0x100] ss:$24 sps:$4 sm:$0xff]  }
 0x1f1   :  { %v6831_v33 = vpop.f32.mrb[75].mxu1  ;;  %1727 = vmatprep.subr.bf16.mxu0 %v7978_v4  ;;  %v7990_v22 = vld [vmem:[#allocation6 + $0x134] ss:$24 sps:$4 sm:$0xff]  }
 0x1f2   :  { %v891_v36 = vadd.f32 %v6829_v28, %v9114_v19  ;;  %v6832_v38 = vadd.f32 %v6831_v33, %v6830_v29  ;;  %1380 = vmatmul.mubr.bf16.gmra.mrb[36].mxu0 %v9126_v30  ;;  %1573 = vmatmul.mubr.bf16.gmra.mrb[132].mxu1 %v9126_v30 }
 0x1f3   :  { %1389 = vmatprep.mubr.bf16.mxu0 %v11630_v0  ;;  %1582 = vmatprep.mubr.bf16.mxu1 %v11630_v0 }
 0x1f4   :  { %v894_v39 = vadd.f32 %v6832_v38, %v9114_v19  ;;  %1728 = vmatpush1.bf16.msra.mxu0 %v7976_v32  ;;  %v1005_v47 = vmax.f32 %v891_v36, 0.0 }
 0x1f5   :  { %1729 = vmatprep.subr.bf16.mxu0 %v7981_v35 }
 0x1f6   :  { %v6833_v44 = vpop.f32.mrb[76].mxu1  ;;  %v1006_v58 = vmax.f32 %v894_v39, 0.0  ;;  %v7988_v39 = vld [vmem:[#allocation6 + $0x130] ss:$24 sps:$4 sm:$0xff]  }
 0x1f7   :  { %v6834_v59 = vpop.f32.mrb[77].mxu1 }
 0x1f8   :  { %v6835_v31 = vadd.f32 %v6834_v59, %v6833_v44  ;;  %v6836_v5 = vpop.f32.mrb[78].mxu1  ;;  %v9134_v63 = vpack.c.bf16 %v1006_v58, %v1005_v47  ;;  %1730 = vmatpush1.bf16.msra.mxu0 %v7979_v41  ;;  %v7991_v59 = vld [vmem:[#allocation6 + $0x160] ss:$24 sps:$4 sm:$0xff]  }
 0x1f9   :  { %v6837_v1 = vpop.f32.mrb[79].mxu1  ;;  %1731 = vmatprep.subr.bf16.mxu0 %v7984_v42  ;;  %v7993_v42 = vld [vmem:[#allocation6 + $0x164] ss:$24 sps:$4 sm:$0xff]  }
 0x1fa   :  { %v899_v4 = vadd.f32 %v6835_v31, %v9114_v19  ;;  %v6838_v12 = vadd.f32 %v6837_v1, %v6836_v5  ;;  %1390 = vmatmul.mubr.bf16.gmra.mrb[40].mxu0 %v9134_v63  ;;  %1583 = vmatmul.mubr.bf16.gmra.mrb[136].mxu1 %v9134_v63 }
 0x1fb   :  { %1399 = vmatprep.mubr.bf16.mxu0 %v11630_v0  ;;  %1592 = vmatprep.mubr.bf16.mxu1 %v11630_v0 }
 0x1fc   :  { %v902_v15 = vadd.f32 %v6838_v12, %v9114_v19  ;;  %1732 = vmatpush1.bf16.msra.mxu0 %v7982_v2  ;;  %v1007_v29 = vmax.f32 %v899_v4, 0.0 }
 0x1fd   :  { %1733 = vmatprep.subr.bf16.mxu0 %v7987_v40 }
 0x1fe   :  { %v6839_v28 = vpop.f32.mrb[80].mxu1  ;;  %v1008_v32 = vmax.f32 %v902_v15, 0.0 }
 0x1ff   :  { %v6840_v33 = vpop.f32.mrb[81].mxu1 }
 0x200   :  { %v6841_v35 = vadd.f32 %v6840_v33, %v6839_v28  ;;  %v6842_v36 = vpop.f32.mrb[82].mxu1  ;;  %v9142_v38 = vpack.c.bf16 %v1008_v32, %v1007_v29  ;;  %1734 = vmatpush1.bf16.msra.mxu0 %v7985_v16 }
 0x201   :  { %v6843_v41 = vpop.f32.mrb[83].mxu1  ;;  %1735 = vmatprep.subr.bf16.mxu0 %v7990_v22 }
 0x202   :  { %v907_v44 = vadd.f32 %v6841_v35, %v9114_v19  ;;  %v6844_v47 = vadd.f32 %v6843_v41, %v6842_v36  ;;  %1400 = vmatmul.mubr.bf16.gmra.mrb[44].mxu0 %v9142_v38  ;;  %1593 = vmatmul.mubr.bf16.gmra.mrb[140].mxu1 %v9142_v38 }
 0x203   :  { %1409 = vmatprep.mubr.bf16.mxu0 %v11630_v0  ;;  %1602 = vmatprep.mubr.bf16.mxu1 %v11630_v0 }
 0x204   :  { %v910_v58 = vadd.f32 %v6844_v47, %v9114_v19  ;;  %1736 = vmatpush1.bf16.msra.mxu0 %v7988_v39  ;;  %v1009_v31 = vmax.f32 %v907_v44, 0.0 }
 0x205   :  { %1737 = vmatprep.subr.bf16.mxu0 %v7993_v42 }
 0x206   :  { %v1010_v5 = vmax.f32 %v910_v58, 0.0  ;;  %v6845_v2 = vpop.f32.mrb[84].mxu1 }
 0x207   :  { %v6846_v1 = vpop.f32.mrb[85].mxu1 }
 0x208   :  { %v6847_v40 = vadd.f32 %v6846_v1, %v6845_v2  ;;  %v6848_v4 = vpop.f32.mrb[86].mxu1  ;;  %v9150_v12 = vpack.c.bf16 %v1010_v5, %v1009_v31  ;;  %1738 = vmatpush1.bf16.msra.mxu0 %v7991_v59 }
 0x209   :  { %v6849_v15 = vpop.f32.mrb[87].mxu1 }
 0x20a   :  { %v915_v16 = vadd.f32 %v6847_v40, %v9114_v19  ;;  %v6850_v22 = vadd.f32 %v6849_v15, %v6848_v4  ;;  %1410 = vmatmul.mubr.bf16.gmra.mrb[48].mxu0 %v9150_v12  ;;  %1603 = vmatmul.mubr.bf16.gmra.mrb[144].mxu1 %v9150_v12 }
 0x20b   :  { %1419 = vmatprep.mubr.bf16.mxu0 %v11630_v0  ;;  %1612 = vmatprep.mubr.bf16.mxu1 %v11630_v0 }
 0x20c   :  { %v918_v28 = vadd.f32 %v6850_v22, %v9114_v19  ;;  %v1011_v29 = vmax.f32 %v915_v16, 0.0 }
 0x20e   :  { %v1012_v32 = vmax.f32 %v918_v28, 0.0  ;;  %v6851_v33 = vpop.f32.mrb[88].mxu1 }
 0x20f   :  { %v6852_v35 = vpop.f32.mrb[89].mxu1 }
 0x210   :  { %v6853_v36 = vadd.f32 %v6852_v35, %v6851_v33  ;;  %v6854_v39 = vpop.f32.mrb[90].mxu1  ;;  %v9158_v41 = vpack.c.bf16 %v1012_v32, %v1011_v29 }
 0x211   :  { %v6855_v42 = vpop.f32.mrb[91].mxu1 }
 0x212   :  { %v923_v44 = vadd.f32 %v6853_v36, %v9114_v19  ;;  %v6856_v47 = vadd.f32 %v6855_v42, %v6854_v39  ;;  %1420 = vmatmul.mubr.bf16.gmra.mrb[52].mxu0 %v9158_v41  ;;  %1613 = vmatmul.mubr.bf16.gmra.mrb[148].mxu1 %v9158_v41 }
 0x213   :  { %1429 = vmatprep.mubr.bf16.mxu0 %v11630_v0  ;;  %1622 = vmatprep.mubr.bf16.mxu1 %v11630_v0 }
 0x214   :  { %v926_v58 = vadd.f32 %v6856_v47, %v9114_v19  ;;  %v1013_v59 = vmax.f32 %v923_v44, 0.0 }
 0x216   :  { %v1014_v31 = vmax.f32 %v926_v58, 0.0  ;;  %v6857_v5 = vpop.f32.mrb[92].mxu1 }
 0x217   :  { %v6858_v2 = vpop.f32.mrb[93].mxu1 }
 0x218   :  { %v6859_v1 = vadd.f32 %v6858_v2, %v6857_v5  ;;  %v6860_v40 = vpop.f32.mrb[94].mxu1  ;;  %v9166_v4 = vpack.c.bf16 %v1014_v31, %v1013_v59 }
 0x219   :  { %v6861_v15 = vpop.f32.mrb[95].mxu1 }
 0x21a   :  { %v931_v16 = vadd.f32 %v6859_v1, %v9114_v19  ;;  %v6862_v22 = vadd.f32 %v6861_v15, %v6860_v40  ;;  %1430 = vmatmul.mubr.bf16.gmra.mrb[56].mxu0 %v9166_v4  ;;  %1623 = vmatmul.mubr.bf16.gmra.mrb[152].mxu1 %v9166_v4 }
 0x21b   :  { %1439 = vmatprep.mubr.bf16.mxu0 %v11630_v0  ;;  %1632 = vmatprep.mubr.bf16.mxu1 %v11630_v0 }
 0x21c   :  { %v934_v28 = vadd.f32 %v6862_v22, %v9114_v19  ;;  %v1015_v29 = vmax.f32 %v931_v16, 0.0 }
 0x21e   :  { %v1016_v32 = vmax.f32 %v934_v28, 0.0  ;;  %v6863_v33 = vpop.f32.mrb[96].mxu1 }
 0x21f   :  { %v6864_v35 = vpop.f32.mrb[97].mxu1 }
 0x220   :  { %v6865_v36 = vadd.f32 %v6864_v35, %v6863_v33  ;;  %v6866_v39 = vpop.f32.mrb[98].mxu1  ;;  %v9174_v42 = vpack.c.bf16 %v1016_v32, %v1015_v29 }
 0x221   :  { %v6867_v44 = vpop.f32.mrb[99].mxu1 }
 0x222   :  { %v939_v47 = vadd.f32 %v6865_v36, %v9114_v19  ;;  %v6868_v58 = vadd.f32 %v6867_v44, %v6866_v39  ;;  %1440 = vmatmul.mubr.bf16.gmra.mrb[60].mxu0 %v9174_v42  ;;  %1633 = vmatmul.mubr.bf16.gmra.mrb[156].mxu1 %v9174_v42 }
 0x223   :  { %1449 = vmatprep.mubr.bf16.mxu0 %v11630_v0  ;;  %1642 = vmatprep.mubr.bf16.mxu1 %v11630_v0 }
 0x224   :  { %v1017_v59 = vmax.f32 %v939_v47, 0.0  ;;  %v942_v31 = vadd.f32 %v6868_v58, %v9114_v19 }
 0x226   :  { %v1018_v5 = vmax.f32 %v942_v31, 0.0  ;;  %v6869_v2 = vpop.f32.mrb[100].mxu1 }
 0x227   :  { %v6870_v1 = vpop.f32.mrb[101].mxu1 }
 0x228   :  { %v6871_v40 = vadd.f32 %v6870_v1, %v6869_v2  ;;  %v6872_v15 = vpop.f32.mrb[102].mxu1  ;;  %v9182_v16 = vpack.c.bf16 %v1018_v5, %v1017_v59 }
 0x229   :  { %v6873_v22 = vpop.f32.mrb[103].mxu1 }
 0x22a   :  { %v947_v28 = vadd.f32 %v6871_v40, %v9114_v19  ;;  %v6874_v29 = vadd.f32 %v6873_v22, %v6872_v15  ;;  %1450 = vmatmul.mubr.bf16.gmra.mrb[64].mxu0 %v9182_v16  ;;  %1643 = vmatmul.mubr.bf16.gmra.mrb[160].mxu1 %v9182_v16 }
 0x22b   :  { %1459 = vmatprep.mubr.bf16.mxu0 %v11630_v0  ;;  %1652 = vmatprep.mubr.bf16.mxu1 %v11630_v0 }
 0x22c   :  { %v1019_v32 = vmax.f32 %v947_v28, 0.0  ;;  %v950_v33 = vadd.f32 %v6874_v29, %v9114_v19 }
 0x22e   :  { %v1020_v35 = vmax.f32 %v950_v33, 0.0  ;;  %v6875_v36 = vpop.f32.mrb[104].mxu1 }
 0x22f   :  { %v6876_v39 = vpop.f32.mrb[105].mxu1 }
 0x230   :  { %v6877_v44 = vadd.f32 %v6876_v39, %v6875_v36  ;;  %v6878_v47 = vpop.f32.mrb[106].mxu1  ;;  %v9190_v58 = vpack.c.bf16 %v1020_v35, %v1019_v32 }
 0x231   :  { %v6879_v59 = vpop.f32.mrb[107].mxu1 }
 0x232   :  { %v955_v31 = vadd.f32 %v6877_v44, %v9114_v19  ;;  %v6880_v5 = vadd.f32 %v6879_v59, %v6878_v47  ;;  %1460 = vmatmul.mubr.bf16.gmra.mrb[68].mxu0 %v9190_v58  ;;  %1653 = vmatmul.mubr.bf16.gmra.mrb[164].mxu1 %v9190_v58 }
 0x233   :  { %1469 = vmatprep.mubr.bf16.mxu0 %v11630_v0  ;;  %1662 = vmatprep.mubr.bf16.mxu1 %v11630_v0 }
 0x234   :  { %v1021_v2 = vmax.f32 %v955_v31, 0.0  ;;  %v958_v1 = vadd.f32 %v6880_v5, %v9114_v19 }
 0x236   :  { %v1022_v40 = vmax.f32 %v958_v1, 0.0  ;;  %v6881_v15 = vpop.f32.mrb[108].mxu1 }
 0x237   :  { %v6882_v22 = vpop.f32.mrb[109].mxu1 }
 0x238   :  { %v6883_v28 = vadd.f32 %v6882_v22, %v6881_v15  ;;  %v6884_v29 = vpop.f32.mrb[110].mxu1  ;;  %v9198_v32 = vpack.c.bf16 %v1022_v40, %v1021_v2 }
 0x239   :  { %v6885_v33 = vpop.f32.mrb[111].mxu1 }
 0x23a   :  { %v963_v35 = vadd.f32 %v6883_v28, %v9114_v19  ;;  %v6886_v36 = vadd.f32 %v6885_v33, %v6884_v29  ;;  %1470 = vmatmul.mubr.bf16.gmra.mrb[72].mxu0 %v9198_v32  ;;  %1663 = vmatmul.mubr.bf16.gmra.mrb[168].mxu1 %v9198_v32 }
 0x23b   :  { %1479 = vmatprep.mubr.bf16.mxu0 %v11630_v0  ;;  %1672 = vmatprep.mubr.bf16.mxu1 %v11630_v0 }
 0x23c   :  { %v1023_v39 = vmax.f32 %v963_v35, 0.0  ;;  %v966_v44 = vadd.f32 %v6886_v36, %v9114_v19 }
 0x23e   :  { %v1024_v47 = vmax.f32 %v966_v44, 0.0  ;;  %v6887_v59 = vpop.f32.mrb[112].mxu1 }
 0x23f   :  { %v6888_v31 = vpop.f32.mrb[113].mxu1 }
 0x240   :  { %v6889_v5 = vadd.f32 %v6888_v31, %v6887_v59  ;;  %v6890_v2 = vpop.f32.mrb[114].mxu1  ;;  %v9206_v1 = vpack.c.bf16 %v1024_v47, %v1023_v39 }
 0x241   :  { %v6891_v40 = vpop.f32.mrb[115].mxu1 }
 0x242   :  { %v971_v15 = vadd.f32 %v6889_v5, %v9114_v19  ;;  %v6892_v22 = vadd.f32 %v6891_v40, %v6890_v2  ;;  %1480 = vmatmul.mubr.bf16.gmra.mrb[76].mxu0 %v9206_v1  ;;  %1673 = vmatmul.mubr.bf16.gmra.mrb[172].mxu1 %v9206_v1 }
 0x243   :  { %1489 = vmatprep.mubr.bf16.mxu0 %v11630_v0  ;;  %1682 = vmatprep.mubr.bf16.mxu1 %v11630_v0 }
 0x244   :  { %v1025_v28 = vmax.f32 %v971_v15, 0.0  ;;  %v974_v29 = vadd.f32 %v6892_v22, %v9114_v19 }
 0x246   :  { %v1026_v33 = vmax.f32 %v974_v29, 0.0  ;;  %v6893_v35 = vpop.f32.mrb[116].mxu1 }
 0x247   :  { %v6894_v36 = vpop.f32.mrb[117].mxu1 }
 0x248   :  { %v6895_v39 = vadd.f32 %v6894_v36, %v6893_v35  ;;  %v6896_v44 = vpop.f32.mrb[118].mxu1  ;;  %v9214_v47 = vpack.c.bf16 %v1026_v33, %v1025_v28 }
 0x249   :  { %v6897_v59 = vpop.f32.mrb[119].mxu1 }
 0x24a   :  { %v979_v31 = vadd.f32 %v6895_v39, %v9114_v19  ;;  %v6898_v5 = vadd.f32 %v6897_v59, %v6896_v44  ;;  %1490 = vmatmul.mubr.bf16.gmra.mrb[80].mxu0 %v9214_v47  ;;  %1683 = vmatmul.mubr.bf16.gmra.mrb[176].mxu1 %v9214_v47 }
 0x24b   :  { %1499 = vmatprep.mubr.bf16.mxu0 %v11630_v0  ;;  %1692 = vmatprep.mubr.bf16.mxu1 %v11630_v0 }
 0x24c   :  { %v1027_v2 = vmax.f32 %v979_v31, 0.0  ;;  %v982_v40 = vadd.f32 %v6898_v5, %v9114_v19 }
 0x24e   :  { %v1028_v15 = vmax.f32 %v982_v40, 0.0  ;;  %v6899_v22 = vpop.f32.mrb[120].mxu1 }
 0x24f   :  { %v6900_v29 = vpop.f32.mrb[121].mxu1 }
 0x250   :  { %v6901_v28 = vadd.f32 %v6900_v29, %v6899_v22  ;;  %v6902_v33 = vpop.f32.mrb[122].mxu1  ;;  %v9222_v35 = vpack.c.bf16 %v1028_v15, %v1027_v2 }
 0x251   :  { %v6903_v36 = vpop.f32.mrb[123].mxu1 }
 0x252   :  { %v987_v39 = vadd.f32 %v6901_v28, %v9114_v19  ;;  %v6904_v44 = vadd.f32 %v6903_v36, %v6902_v33  ;;  %1500 = vmatmul.mubr.bf16.gmra.mrb[84].mxu0 %v9222_v35  ;;  %1693 = vmatmul.mubr.bf16.gmra.mrb[180].mxu1 %v9222_v35 }
 0x253   :  { %1509 = vmatprep.mubr.bf16.mxu0 %v11630_v0  ;;  %1702 = vmatprep.mubr.bf16.mxu1 %v11630_v0 }
 0x254   :  { %v1029_v59 = vmax.f32 %v987_v39, 0.0  ;;  %v990_v31 = vadd.f32 %v6904_v44, %v9114_v19 }
 0x256   :  { %v1030_v5 = vmax.f32 %v990_v31, 0.0  ;;  %v6905_v40 = vpop.f32.mrb[124].mxu1 }
 0x257   :  { %v6906_v22 = vpop.f32.mrb[125].mxu1 }
 0x258   :  { %v6907_v2 = vadd.f32 %v6906_v22, %v6905_v40  ;;  %v6908_v15 = vpop.f32.mrb[126].mxu1  ;;  %v9230_v29 = vpack.c.bf16 %v1030_v5, %v1029_v59 }
 0x259   :  { %v6909_v28 = vpop.f32.mrb[127].mxu1 }
 0x25a   :  { %v995_v33 = vadd.f32 %v6907_v2, %v9114_v19  ;;  %v6910_v36 = vadd.f32 %v6909_v28, %v6908_v15  ;;  %1510 = vmatmul.mubr.bf16.gmra.mrb[88].mxu0 %v9230_v29  ;;  %1703 = vmatmul.mubr.bf16.gmra.mrb[184].mxu1 %v9230_v29 }
 0x25b   :  { %1519 = vmatprep.mubr.bf16.mxu0 %v11630_v0  ;;  %1712 = vmatprep.mubr.bf16.mxu1 %v11630_v0 }
 0x25c   :  { %v1031_v39 = vmax.f32 %v995_v33, 0.0  ;;  %v998_v44 = vadd.f32 %v6910_v36, %v9114_v19  ;;  %v11629_v19 = vsub.s32 2, %v8917_v6 }
 0x25e   :  { %v1032_v31 = vmax.f32 %v998_v44, 0.0 }
 0x260   :  { %v9238_v40 = vpack.c.bf16 %v1032_v31, %v1031_v39 }
 0x262   :  { %1520 = vmatmul.mubr.bf16.gmra.mrb[92].mxu0 %v9238_v40  ;;  %1713 = vmatmul.mubr.bf16.gmra.mrb[188].mxu1 %v9238_v40 }
 0x263   :  { %1755 = vmatprep.mubr.bf16.mxu0 %v11630_v0 }
 0x26a   :  { %1756 = vmatmul.mubr.bf16.vlgmr.msra.gmra.mrb[96].mxu0 %v9118_v45  ;;  %v9264_v45 = vld [vmem:[#allocation3] sm:$0x3f] }
 0x26b   :  { %1765 = vmatprep.mubr.bf16.mxu0 %v11630_v0 }
 0x272   :  { %1766 = vmatmul.mubr.bf16.gmra.mrb[100].mxu0 %v9126_v30  ;;  %v11628_v30 = vsub.s32 3, %v8917_v6 }
 0x273   :  { %1775 = vmatprep.mubr.bf16.mxu0 %v11630_v0 }
 0x27a   :  { %1776 = vmatmul.mubr.bf16.gmra.mrb[104].mxu0 %v9134_v63  ;;  %v9271_v63 = vrot.slane %v9264_v45, %v8920_v7 }
 0x27b   :  { %1785 = vmatprep.mubr.bf16.mxu0 %v11630_v0 }
 0x282   :  { %1786 = vmatmul.mubr.bf16.gmra.mrb[108].mxu0 %v9142_v38  ;;  %v9276_v38 = vrot.slane %v9264_v45, %v11629_v19 }
 0x283   :  { %1795 = vmatprep.mubr.bf16.mxu0 %v11630_v0 }
 0x28a   :  { %1796 = vmatmul.mubr.bf16.gmra.mrb[112].mxu0 %v9150_v12 }
 0x28b   :  { %1805 = vmatprep.mubr.bf16.mxu0 %v11630_v0 }
 0x292   :  { %1806 = vmatmul.mubr.bf16.gmra.mrb[116].mxu0 %v9158_v41 }
 0x293   :  { %1815 = vmatprep.mubr.bf16.mxu0 %v11630_v0 }
 0x29a   :  { %1816 = vmatmul.mubr.bf16.gmra.mrb[120].mxu0 %v9166_v4  ;;  %v9280_v4 = vrot.slane %v9264_v45, %v8926_v9 }
 0x29b   :  { %1825 = vmatprep.mubr.bf16.mxu0 %v11630_v0 }
 0x2a2   :  { %1826 = vmatmul.mubr.bf16.gmra.mrb[124].mxu0 %v9174_v42  ;;  %v9285_v42 = vrot.slane %v9264_v45, %v11628_v30 }
 0x2a3   :  { %1835 = vmatprep.mubr.bf16.mxu0 %v11630_v0 }
 0x2aa   :  { %1836 = vmatmul.mubr.bf16.gmra.mrb[128].mxu0 %v9182_v16 }
 0x2ab   :  { %1845 = vmatprep.mubr.bf16.mxu0 %v11630_v0 }
 0x2b2   :  { %1846 = vmatmul.mubr.bf16.gmra.mrb[132].mxu0 %v9190_v58 }
 0x2b3   :  { %1855 = vmatprep.mubr.bf16.mxu0 %v11630_v0 }
 0x2ba   :  { %1856 = vmatmul.mubr.bf16.gmra.mrb[136].mxu0 %v9198_v32 }
 0x2bb   :  { %1865 = vmatprep.mubr.bf16.mxu0 %v11630_v0 }
 0x2bd   :  { %v1371_v12 = vpop.f32.mrb[32].mxu0  ;;  %v1564_v41 = vpop.f32.mrb[128].mxu1 }
 0x2be   :  { %v1373_v16 = vpop.f32.mrb[33].mxu0  ;;  %v1566_v58 = vpop.f32.mrb[129].mxu1  ;;  %v1948_v5 = vadd.f32 %v9271_v63, %v1371_v12  ;;  %v1950_v22 = vadd.f32 %v9276_v38, %v1564_v41 }
 0x2bf   :  { %v1375_v32 = vpop.f32.mrb[34].mxu0  ;;  %v1568_v59 = vpop.f32.mrb[130].mxu1  ;;  %v1949_v36 = vadd.f32 %v9280_v4, %v1373_v16  ;;  %v1951_v39 = vadd.f32 %v9285_v42, %v1566_v58 }
 0x2c0   :  { %v1954_v2 = vadd.f32 %v9271_v63, %v1375_v32  ;;  %v1956_v15 = vadd.f32 %v9276_v38, %v1568_v59  ;;  %v1377_v28 = vpop.f32.mrb[35].mxu0  ;;  %v1570_v33 = vpop.f32.mrb[131].mxu1 }
 0x2c1   :  { %v1955_v44 = vadd.f32 %v9280_v4, %v1377_v28  ;;  %v1957_v31 = vadd.f32 %v9285_v42, %v1570_v33 }
 0x2c2   :  { %v9295_v30 = vpack.c.bf16 %v1954_v2, %v1948_v5  ;;  %v2052_v19 = vpack.c.bf16 %v1956_v15, %v1950_v22  ;;  %1866 = vmatmul.mubr.bf16.gmra.mrb[140].mxu0 %v9206_v1 }
 0x2c3   :  { %v9298_v12 = vpack.c.bf16 %v1955_v44, %v1949_v36  ;;  %v9300_v41 = vpack.c.bf16 %v1957_v31, %v1951_v39  ;;  %1875 = vmatprep.mubr.bf16.mxu0 %v11630_v0 }
 0x2c4   :  { %2511 = vrot.lane.b32.xlu0 %v2052_v19, %s8601_s5  ;;  %7827 = vmatprep.subr.msk.bf16.mxu1 %vm2068_vm1, %v2052_v19  ;;  %v2094_v16 = vsel %vm2068_vm1, %v2052_v19, 0 }
 0x2c5   :  { %11747 = vst [vmem:[#allocation44_spill] sm:$0xff] %v9298_v12  ;;  %7329 = vmatprep.mubr.msk.bf16.mxu1 %vm2068_vm1, %v9295_v30  ;;  %v1381_v58 = vpop.f32.mrb[36].mxu0  ;;  %v1574_v32 = vpop.f32.mrb[132].mxu1  ;;  %7314 = vmatpush3.bf16.xpose.msra.mxu1 %v2094_v16 }
 0x2c6   :  { %v1383_v1 = vpop.f32.mrb[37].mxu0  ;;  %v1576_v59 = vpop.f32.mrb[133].mxu1  ;;  %v1960_v2 = vadd.f32 %v9271_v63, %v1381_v58  ;;  %v1962_v15 = vadd.f32 %v9276_v38, %v1574_v32 }
 0x2c7   :  { %v1385_v5 = vpop.f32.mrb[38].mxu0  ;;  %v1578_v22 = vpop.f32.mrb[134].mxu1  ;;  %v1961_v39 = vadd.f32 %v9280_v4, %v1383_v1  ;;  %v1963_v44 = vadd.f32 %v9285_v42, %v1576_v59 }
 0x2c8   :  { %v1966_v28 = vadd.f32 %v9271_v63, %v1385_v5  ;;  %v1968_v33 = vadd.f32 %v9276_v38, %v1578_v22  ;;  %v1387_v36 = vpop.f32.mrb[39].mxu0  ;;  %v1580_v19 = vpop.f32.mrb[135].mxu1  ;;  %v11749_v22 = vmov 0  }
 0x2c9   :  { %v1967_v31 = vadd.f32 %v9280_v4, %v1387_v36  ;;  %v1969_v16 = vadd.f32 %v9285_v42, %v1580_v19 }
 0x2ca   :  { %v2053_v0 = vpack.c.bf16 %v1968_v33, %v1962_v15  ;;  %1876 = vmatmul.mubr.bf16.gmra.mrb[144].mxu0 %v9214_v47  ;;  %v9317_v58 = vpack.c.bf16 %v1966_v28, %v1960_v2 }
 0x2cb   :  { %v9319_v32 = vpack.c.bf16 %v1967_v31, %v1961_v39  ;;  %v9321_v5 = vpack.c.bf16 %v1969_v16, %v1963_v44  ;;  %1885 = vmatprep.mubr.bf16.mxu0 %v11749_v22 }
 0x2cc   :  { %2513 = vrot.lane.b32.xlu0 %v2053_v0, %s8601_s5  ;;  %7828 = vmatprep.subr.msk.bf16.mxu1 %vm2068_vm1, %v2053_v0  ;;  %v2097_v1 = vsel %vm2068_vm1, %v2053_v0, 0 }
 0x2cd   :  { %11748 = vst [vmem:[#allocation45_spill] sm:$0xff] %v9319_v32  ;;  %v1584_v59 = vpop.f32.mrb[136].mxu1  ;;  %7316 = vmatpush3.bf16.xpose.msra.mxu1 %v2097_v1  ;;  %v1391_v36 = vpop.f32.mrb[40].mxu0 }
 0x2ce   :  { %v1586_v15 = vpop.f32.mrb[137].mxu1  ;;  %v1393_v33 = vpop.f32.mrb[41].mxu0  ;;  %v1974_v28 = vadd.f32 %v9276_v38, %v1584_v59  ;;  %v1972_v39 = vadd.f32 %v9271_v63, %v1391_v36 }
 0x2cf   :  { %v1588_v47 = vpop.f32.mrb[138].mxu1  ;;  %v1395_v2 = vpop.f32.mrb[42].mxu0  ;;  %v1975_v27 = vadd.f32 %v9285_v42, %v1586_v15  ;;  %v1973_v0 = vadd.f32 %v9280_v4, %v1393_v33 }
 0x2d0   :  { %v1980_v19 = vadd.f32 %v9276_v38, %v1588_v47  ;;  %v1590_v44 = vpop.f32.mrb[139].mxu1  ;;  %v1978_v31 = vadd.f32 %v9271_v63, %v1395_v2  ;;  %v1397_v16 = vpop.f32.mrb[43].mxu0 }
 0x2d1   :  { %v1981_v1 = vadd.f32 %v9285_v42, %v1590_v44  ;;  %v1979_v46 = vadd.f32 %v9280_v4, %v1397_v16 }
 0x2d2   :  { %v2054_v43 = vpack.c.bf16 %v1980_v19, %v1974_v28  ;;  %1886 = vmatmul.mubr.bf16.gmra.mrb[148].mxu0 %v9222_v35  ;;  %v9336_v59 = vpack.c.bf16 %v1978_v31, %v1972_v39 }
 0x2d3   :  { %v9338_v47 = vpack.c.bf16 %v1981_v1, %v1975_v27  ;;  %v9340_v36 = vpack.c.bf16 %v1979_v46, %v1973_v0  ;;  %1895 = vmatprep.mubr.bf16.mxu0 %v11749_v22 }
 0x2d4   :  { %2515 = vrot.lane.b32.xlu1 %v2054_v43, %s8601_s5  ;;  %7829 = vmatprep.subr.msk.bf16.mxu1 %vm2068_vm1, %v2054_v43  ;;  %v2100_v15 = vsel %vm2068_vm1, %v2054_v43, 0 }
 0x2d5   :  { %11750 = vst [vmem:[#allocation46_spill] sm:$0xff] %v9340_v36  ;;  %v1594_v33 = vpop.f32.mrb[140].mxu1  ;;  %7318 = vmatpush3.bf16.xpose.msra.mxu1 %v2100_v15  ;;  %v1401_v2 = vpop.f32.mrb[44].mxu0 }
 0x2d6   :  { %v1596_v28 = vpop.f32.mrb[141].mxu1  ;;  %v1984_v35 = vadd.f32 %v9271_v63, %v1401_v2  ;;  %v1403_v19 = vpop.f32.mrb[45].mxu0  ;;  %v1986_v44 = vadd.f32 %v9276_v38, %v1594_v33 }
 0x2d7   :  { %v1987_v27 = vadd.f32 %v9285_v42, %v1596_v28  ;;  %v1598_v39 = vpop.f32.mrb[142].mxu1  ;;  %v1405_v46 = vpop.f32.mrb[46].mxu0  ;;  %v1985_v15 = vadd.f32 %v9280_v4, %v1403_v19 }
 0x2d8   :  { %v1992_v31 = vadd.f32 %v9276_v38, %v1598_v39  ;;  %v1600_v16 = vpop.f32.mrb[143].mxu1  ;;  %v1990_v0 = vadd.f32 %v9271_v63, %v1405_v46  ;;  %v1407_v1 = vpop.f32.mrb[47].mxu0 }
 0x2d9   :  { %v1993_v43 = vadd.f32 %v9285_v42, %v1600_v16  ;;  %v1991_v26 = vadd.f32 %v9280_v4, %v1407_v1 }
 0x2da   :  { %v2055_v2 = vpack.c.bf16 %v1992_v31, %v1986_v44  ;;  %1896 = vmatmul.mubr.bf16.gmra.mrb[152].mxu0 %v9230_v29  ;;  %v9355_v28 = vpack.c.bf16 %v1990_v0, %v1984_v35 }
 0x2db   :  { %v9357_v25 = vpack.c.bf16 %v1993_v43, %v1987_v27  ;;  %1905 = vmatprep.mubr.bf16.mxu0 %v11749_v22  ;;  %v9360_v33 = vpack.c.bf16 %v1991_v26, %v1985_v15 }
 0x2dc   :  { %2517 = vrot.lane.b32.xlu1 %v2055_v2, %s8601_s5  ;;  %7830 = vmatprep.subr.msk.bf16.mxu1 %vm2068_vm1, %v2055_v2  ;;  %v2103_v39 = vsel %vm2068_vm1, %v2055_v2, 0 }
 0x2dd   :  { %11751 = vst [vmem:[#allocation47_spill] sm:$0xff] %v9360_v33  ;;  %v1604_v19 = vpop.f32.mrb[144].mxu1  ;;  %7320 = vmatpush3.bf16.xpose.msra.mxu1 %v2103_v39  ;;  %v1411_v46 = vpop.f32.mrb[48].mxu0 }
 0x2de   :  { %v1606_v44 = vpop.f32.mrb[145].mxu1  ;;  %v1413_v31 = vpop.f32.mrb[49].mxu0  ;;  %v1998_v16 = vadd.f32 %v9276_v38, %v1604_v19  ;;  %v1996_v0 = vadd.f32 %v9271_v63, %v1411_v46 }
 0x2df   :  { %v1999_v29 = vadd.f32 %v9285_v42, %v1606_v44  ;;  %v1608_v35 = vpop.f32.mrb[146].mxu1  ;;  %v1415_v27 = vpop.f32.mrb[50].mxu0  ;;  %v1997_v2 = vadd.f32 %v9280_v4, %v1413_v31 }
 0x2e0   :  { %v2004_v26 = vadd.f32 %v9276_v38, %v1608_v35  ;;  %v1610_v22 = vpop.f32.mrb[147].mxu1  ;;  %v2002_v1 = vadd.f32 %v9271_v63, %v1415_v27  ;;  %v1417_v43 = vpop.f32.mrb[51].mxu0 }
 0x2e1   :  { %v2005_v15 = vadd.f32 %v9285_v42, %v1610_v22  ;;  %v2003_v39 = vadd.f32 %v9280_v4, %v1417_v43 }
 0x2e2   :  { %v2056_v23 = vpack.c.bf16 %v2004_v26, %v1998_v16  ;;  %1906 = vmatmul.mubr.bf16.gmra.mrb[156].mxu0 %v9238_v40  ;;  %v9374_v44 = vpack.c.bf16 %v2002_v1, %v1996_v0 }
 0x2e3   :  { %v9376_v19 = vpack.c.bf16 %v2005_v15, %v1999_v29  ;;  %v9378_v35 = vpack.c.bf16 %v2003_v39, %v1997_v2 }
 0x2e4   :  { %2519 = vrot.lane.b32.xlu0 %v2056_v23, %s8601_s5  ;;  %7831 = vmatprep.subr.msk.bf16.mxu1 %vm2068_vm1, %v2056_v23  ;;  %v2106_v46 = vsel %vm2068_vm1, %v2056_v23, 0 }
 0x2e5   :  { %11752 = vst [vmem:[#allocation48_spill] sm:$0xff] %v9376_v19  ;;  %11753 = vst [vmem:[#allocation49_spill] sm:$0xff] %v9378_v35  ;;  %v1614_v27 = vpop.f32.mrb[148].mxu1  ;;  %7322 = vmatpush3.bf16.xpose.msra.mxu1 %v2106_v46  ;;  %v1421_v31 = vpop.f32.mrb[52].mxu0 }
 0x2e6   :  { %v1616_v22 = vpop.f32.mrb[149].mxu1  ;;  %v2008_v16 = vadd.f32 %v9271_v63, %v1421_v31  ;;  %v1423_v26 = vpop.f32.mrb[53].mxu0  ;;  %v2010_v1 = vadd.f32 %v9276_v38, %v1614_v27 }
 0x2e7   :  { %v2011_v40 = vadd.f32 %v9285_v42, %v1616_v22  ;;  %v1618_v0 = vpop.f32.mrb[150].mxu1  ;;  %v1425_v29 = vpop.f32.mrb[54].mxu0  ;;  %v2009_v46 = vadd.f32 %v9280_v4, %v1423_v26 }
 0x2e8   :  { %v2016_v43 = vadd.f32 %v9276_v38, %v1618_v0  ;;  %v1620_v15 = vpop.f32.mrb[151].mxu1  ;;  %v2014_v2 = vadd.f32 %v9271_v63, %v1425_v29  ;;  %v1427_v39 = vpop.f32.mrb[55].mxu0 }
 0x2e9   :  { %v2017_v23 = vadd.f32 %v9285_v42, %v1620_v15  ;;  %v2015_v8 = vadd.f32 %v9280_v4, %v1427_v39 }
 0x2ea   :  { %v2057_v31 = vpack.c.bf16 %v2016_v43, %v2010_v1  ;;  %v9391_v24 = vpack.c.bf16 %v2014_v2, %v2008_v16 }
 0x2eb   :  { %v9393_v22 = vpack.c.bf16 %v2017_v23, %v2011_v40  ;;  %v9395_v20 = vpack.c.bf16 %v2015_v8, %v2009_v46 }
 0x2ec   :  { %2521 = vrot.lane.b32.xlu1 %v2057_v31, %s8601_s5  ;;  %7832 = vmatprep.subr.msk.bf16.mxu1 %vm2068_vm1, %v2057_v31  ;;  %v2109_v27 = vsel %vm2068_vm1, %v2057_v31, 0 }
 0x2ed   :  { %11754 = vst [vmem:[#allocation50_spill] sm:$0xff] %v9393_v22  ;;  %11755 = vst [vmem:[#allocation51_spill] sm:$0xff] %v9395_v20  ;;  %v1624_v0 = vpop.f32.mrb[152].mxu1  ;;  %7324 = vmatpush3.bf16.xpose.msra.mxu1 %v2109_v27  ;;  %v1431_v29 = vpop.f32.mrb[56].mxu0 }
 0x2ee   :  { %v1626_v15 = vpop.f32.mrb[153].mxu1  ;;  %v2020_v26 = vadd.f32 %v9271_v63, %v1431_v29  ;;  %v1433_v39 = vpop.f32.mrb[57].mxu0  ;;  %v2022_v8 = vadd.f32 %v9276_v38, %v1624_v0 }
 0x2ef   :  { %v2023_v16 = vadd.f32 %v9285_v42, %v1626_v15  ;;  %v1628_v1 = vpop.f32.mrb[154].mxu1  ;;  %v1435_v40 = vpop.f32.mrb[58].mxu0  ;;  %v2021_v27 = vadd.f32 %v9280_v4, %v1433_v39 }
 0x2f0   :  { %v2028_v43 = vadd.f32 %v9276_v38, %v1628_v1  ;;  %v1630_v2 = vpop.f32.mrb[155].mxu1  ;;  %v2026_v23 = vadd.f32 %v9271_v63, %v1435_v40  ;;  %v1437_v46 = vpop.f32.mrb[59].mxu0 }
 0x2f1   :  { %v2029_v31 = vadd.f32 %v9285_v42, %v1630_v2  ;;  %v2027_v37 = vadd.f32 %v9280_v4, %v1437_v46 }
 0x2f2   :  { %v2058_v29 = vpack.c.bf16 %v2028_v43, %v2022_v8  ;;  %v9408_v21 = vpack.c.bf16 %v2026_v23, %v2020_v26  ;;  %v9420_v43 = vld [vmem:[#allocation3 + $0x6] sm:$0x3f] }
 0x2f3   :  { %v9410_v15 = vpack.c.bf16 %v2029_v31, %v2023_v16  ;;  %v9412_v14 = vpack.c.bf16 %v2027_v37, %v2021_v27  ;;  %v9433_v3 = vrot.slane %v9420_v43, %v8920_v7 }
 0x2f4   :  { %2523 = vrot.lane.b32.xlu0 %v2058_v29, %s8601_s5  ;;  %7833 = vmatprep.subr.msk.bf16.mxu1 %vm2068_vm1, %v2058_v29  ;;  %v2112_v0 = vsel %vm2068_vm1, %v2058_v29, 0 }
 0x2f5   :  { %11756 = vst [vmem:[#allocation52_spill] sm:$0xff] %v9410_v15  ;;  %11757 = vst [vmem:[#allocation53_spill] sm:$0xff] %v9412_v14  ;;  %v1634_v1 = vpop.f32.mrb[156].mxu1  ;;  %7326 = vmatpush3.bf16.xpose.msra.mxu1 %v2112_v0  ;;  %v1441_v40 = vpop.f32.mrb[60].mxu0 }
 0x2f6   :  { %v1636_v2 = vpop.f32.mrb[157].mxu1  ;;  %v2032_v39 = vadd.f32 %v9271_v63, %v1441_v40  ;;  %v1443_v46 = vpop.f32.mrb[61].mxu0  ;;  %v2034_v23 = vadd.f32 %v9276_v38, %v1634_v1 }
 0x2f7   :  { %v2035_v26 = vadd.f32 %v9285_v42, %v1636_v2  ;;  %v1638_v8 = vpop.f32.mrb[158].mxu1  ;;  %v2033_v16 = vadd.f32 %v9280_v4, %v1443_v46  ;;  %v1445_v37 = vpop.f32.mrb[62].mxu0 }
 0x2f8   :  { %v2040_v31 = vadd.f32 %v9276_v38, %v1638_v8  ;;  %2487 = vrot.lane.b32.xlu0 %v9295_v30, %s8601_s5  ;;  %v2038_v27 = vadd.f32 %v9271_v63, %v1445_v37  ;;  %v1640_v29 = vpop.f32.mrb[159].mxu1  ;;  %v1447_v0 = vpop.f32.mrb[63].mxu0  ;;  %v11758_v38 = vsub.s32 2, %v8917_v6 }
 0x2f9   :  { %v2041_v40 = vadd.f32 %v9285_v42, %v1640_v29  ;;  %v2039_v2 = vadd.f32 %v9280_v4, %v1447_v0  ;;  %v9446_v42 = vrot.slane %v9420_v43, %v8926_v9  ;;  %v11761_v4 = vsub.s32 3, %v8917_v6 }
 0x2fa   :  { %v2059_v17 = vpack.c.bf16 %v2040_v31, %v2034_v23  ;;  %v9429_v46 = vpack.c.bf16 %v2038_v27, %v2032_v39  ;;  %v9438_v1 = vrot.slane %v9420_v43, %v11758_v38 }
 0x2fb   :  { %v9440_v30 = vpack.c.bf16 %v2041_v40, %v2035_v26  ;;  %v9442_v63 = vpack.c.bf16 %v2039_v2, %v2033_v16  ;;  %v9451_v39 = vrot.slane %v9420_v43, %v11761_v4 }
 0x2fc   :  { %2491 = vrot.lane.b32.xlu0 %v9336_v59, %s8601_s5  ;;  %2525 = vrot.lane.b32.xlu1 %v2059_v17, %s8601_s5  ;;  %v2115_v7 = vsel %vm2068_vm1, %v2059_v17, 0 }
 0x2fd   :  { %11759 = vst [vmem:[#allocation54_spill] sm:$0xff] %v9440_v30  ;;  %11760 = vst [vmem:[#allocation55_spill] sm:$0xff] %v9442_v63  ;;  %7834 = vmatprep.subr.msk.bf16.mxu1 %vm2068_vm1, %v2059_v17  ;;  %v1451_v26 = vpop.f32.mrb[64].mxu0  ;;  %v1644_v8 = vpop.f32.mrb[160].mxu1 }
 0x2fe   :  { %7328 = vmatpush3.bf16.xpose.msra.mxu1 %v2115_v7  ;;  %v4055_v9 = vadd.f32 %v9433_v3, %v1451_v26  ;;  %v4057_v16 = vadd.f32 %v9438_v1, %v1644_v8  ;;  %v1453_v37 = vpop.f32.mrb[65].mxu0  ;;  %v1646_v23 = vpop.f32.mrb[161].mxu1 }
 0x2ff   :  { %v4056_v31 = vadd.f32 %v9446_v42, %v1453_v37  ;;  %v4058_v27 = vadd.f32 %v9451_v39, %v1646_v23  ;;  %v1455_v29 = vpop.f32.mrb[66].mxu0  ;;  %v1648_v0 = vpop.f32.mrb[162].mxu1 }
 0x300   :  { %2495 = vrot.lane.b32.xlu0 %v9374_v44, %s8601_s5  ;;  %2489 = vrot.lane.b32.xlu1 %v9317_v58, %s8601_s5  ;;  %v4061_v17 = vadd.f32 %v9433_v3, %v1455_v29  ;;  %v4063_v40 = vadd.f32 %v9438_v1, %v1648_v0  ;;  %v1457_v2 = vpop.f32.mrb[67].mxu0  ;;  %v1650_v38 = vpop.f32.mrb[163].mxu1 }
 0x301   :  { %v4062_v4 = vadd.f32 %v9446_v42, %v1457_v2  ;;  %v4064_v7 = vadd.f32 %v9451_v39, %v1650_v38 }
 0x302   :  { %v9470_v26 = vpack.c.bf16 %v4061_v17, %v4055_v9  ;;  %v9472_v8 = vpack.c.bf16 %v4063_v40, %v4057_v16 }
 0x303   :  { %v9474_v37 = vpack.c.bf16 %v4062_v4, %v4056_v31  ;;  %v9476_v23 = vpack.c.bf16 %v4064_v7, %v4058_v27 }
 0x304   :  { %11762 = vst [vmem:[#allocation56_spill] sm:$0xff] %v9470_v26  ;;  %11763 = vst [vmem:[#allocation57_spill] sm:$0xff] %v9472_v8  ;;  %2499 = vrot.lane.b32.xlu0 %v9408_v21, %s8601_s5  ;;  %2493 = vrot.lane.b32.xlu1 %v9355_v28, %s8601_s5 }
 0x305   :  { %11764 = vst [vmem:[#allocation58_spill] sm:$0xff] %v9474_v37  ;;  %11765 = vst [vmem:[#allocation59_spill] sm:$0xff] %v9476_v23  ;;  %7330 = vmatmul.mubr.msk.bf16.vlgmr.msra.gmra.mrb[192].mxu1 %vm2068_vm1, %v9317_v58  ;;  %v1461_v29 = vpop.f32.mrb[68].mxu0  ;;  %v1654_v0 = vpop.f32.mrb[164].mxu1 }
 0x306   :  { %7333 = vmatprep.mubr.msk.bf16.mxu1 %vm2068_vm1, %v9336_v59  ;;  %v4067_v9 = vadd.f32 %v9433_v3, %v1461_v29  ;;  %v4069_v16 = vadd.f32 %v9438_v1, %v1654_v0  ;;  %v1463_v31 = vpop.f32.mrb[69].mxu0  ;;  %v1656_v27 = vpop.f32.mrb[165].mxu1 }
 0x307   :  { %v4068_v17 = vadd.f32 %v9446_v42, %v1463_v31  ;;  %v4070_v40 = vadd.f32 %v9451_v39, %v1656_v27  ;;  %v1465_v2 = vpop.f32.mrb[70].mxu0  ;;  %v1658_v38 = vpop.f32.mrb[166].mxu1 }
 0x308   :  { %3500 = vrot.lane.b32.xlu0 %v9300_v41, %s8601_s5  ;;  %2497 = vrot.lane.b32.xlu1 %v9391_v24, %s8601_s5  ;;  %v4073_v58 = vadd.f32 %v9433_v3, %v1465_v2  ;;  %v4075_v59 = vadd.f32 %v9438_v1, %v1658_v38  ;;  %v1467_v4 = vpop.f32.mrb[71].mxu0  ;;  %v1660_v7 = vpop.f32.mrb[167].mxu1 }
 0x309   :  { %v4074_v29 = vadd.f32 %v9446_v42, %v1467_v4  ;;  %v4076_v0 = vadd.f32 %v9451_v39, %v1660_v7 }
 0x30a   :  { %v9498_v31 = vpack.c.bf16 %v4073_v58, %v4067_v9  ;;  %v9500_v27 = vpack.c.bf16 %v4075_v59, %v4069_v16 }
 0x30b   :  { %v9502_v18 = vpack.c.bf16 %v4074_v29, %v4068_v17  ;;  %v9504_v13 = vpack.c.bf16 %v4076_v0, %v4070_v40 }
 0x30c   :  { %11766 = vst [vmem:[#allocation60_spill] sm:$0xff] %v9498_v31  ;;  %11767 = vst [vmem:[#allocation61_spill] sm:$0xff] %v9500_v27  ;;  %3504 = vrot.lane.b32.xlu0 %v9338_v47, %s8601_s5  ;;  %2501 = vrot.lane.b32.xlu1 %v9429_v46, %s8601_s5 }
 0x30d   :  { %11768 = vst [vmem:[#allocation62_spill] sm:$0xff] %v9502_v18  ;;  %11769 = vst [vmem:[#allocation63_spill] sm:$0xff] %v9504_v13  ;;  %7334 = vmatmul.mubr.msk.bf16.gmra.mrb[196].mxu1 %vm2068_vm1, %v9355_v28  ;;  %v1471_v2 = vpop.f32.mrb[72].mxu0  ;;  %v1664_v38 = vpop.f32.mrb[168].mxu1 }
 0x30e   :  { %7337 = vmatprep.mubr.msk.bf16.mxu1 %vm2068_vm1, %v9374_v44  ;;  %v4079_v9 = vadd.f32 %v9433_v3, %v1471_v2  ;;  %v4081_v16 = vadd.f32 %v9438_v1, %v1664_v38  ;;  %v1473_v17 = vpop.f32.mrb[73].mxu0  ;;  %v1666_v40 = vpop.f32.mrb[169].mxu1 }
 0x30f   :  { %v4080_v58 = vadd.f32 %v9446_v42, %v1473_v17  ;;  %v4082_v59 = vadd.f32 %v9451_v39, %v1666_v40  ;;  %v1475_v4 = vpop.f32.mrb[74].mxu0  ;;  %v1668_v7 = vpop.f32.mrb[170].mxu1 }
 0x310   :  { %3502 = vrot.lane.b32.xlu1 %v9321_v5, %s8601_s5  ;;  %v4085_v28 = vadd.f32 %v9433_v3, %v1475_v4  ;;  %v4087_v29 = vadd.f32 %v9438_v1, %v1668_v7  ;;  %v1477_v44 = vpop.f32.mrb[75].mxu0  ;;  %v1670_v0 = vpop.f32.mrb[171].mxu1 }
 0x311   :  { %v4086_v2 = vadd.f32 %v9446_v42, %v1477_v44  ;;  %v4088_v38 = vadd.f32 %v9451_v39, %v1670_v0 }
 0x312   :  { %v9524_v61 = vpack.c.bf16 %v4085_v28, %v4079_v9  ;;  %v9526_v17 = vpack.c.bf16 %v4087_v29, %v4081_v16 }
 0x313   :  { %v9528_v40 = vpack.c.bf16 %v4086_v2, %v4080_v58  ;;  %v9530_v34 = vpack.c.bf16 %v4088_v38, %v4082_v59 }
 0x314   :  { %11770 = vst [vmem:[#allocation64_spill] sm:$0xff] %v9524_v61  ;;  %11771 = vst [vmem:[#allocation65_spill] sm:$0xff] %v9526_v17 }
 0x315   :  { %11772 = vst [vmem:[#allocation66_spill] sm:$0xff] %v9528_v40  ;;  %11773 = vst [vmem:[#allocation67_spill] sm:$0xff] %v9530_v34  ;;  %7338 = vmatmul.mubr.msk.bf16.gmra.mrb[200].mxu1 %vm2068_vm1, %v9391_v24  ;;  %v1481_v4 = vpop.f32.mrb[76].mxu0  ;;  %v1674_v62 = vpop.f32.mrb[172].mxu1 }
 0x316   :  { %7341 = vmatprep.mubr.msk.bf16.mxu1 %vm2068_vm1, %v9408_v21  ;;  %v4091_v7 = vadd.f32 %v9433_v3, %v1481_v4  ;;  %v4093_v44 = vadd.f32 %v9438_v1, %v1674_v62  ;;  %v1483_v9 = vpop.f32.mrb[77].mxu0  ;;  %v1676_v28 = vpop.f32.mrb[173].mxu1 }
 0x317   :  { %v4092_v16 = vadd.f32 %v9446_v42, %v1483_v9  ;;  %v4094_v58 = vadd.f32 %v9451_v39, %v1676_v28  ;;  %v1485_v59 = vpop.f32.mrb[78].mxu0  ;;  %v1678_v29 = vpop.f32.mrb[174].mxu1 }
 0x318   :  { %v4097_v0 = vadd.f32 %v9433_v3, %v1485_v59  ;;  %v4099_v24 = vadd.f32 %v9438_v1, %v1678_v29  ;;  %v1487_v2 = vpop.f32.mrb[79].mxu0  ;;  %v1680_v38 = vpop.f32.mrb[175].mxu1 }
 0x319   :  { %v4098_v21 = vadd.f32 %v9446_v42, %v1487_v2  ;;  %v4100_v4 = vadd.f32 %v9451_v39, %v1680_v38 }
 0x31a   :  { %v9544_v60 = vpack.c.bf16 %v4097_v0, %v4091_v7  ;;  %v9546_v62 = vpack.c.bf16 %v4099_v24, %v4093_v44 }
 0x31b   :  { %v9548_v56 = vpack.c.bf16 %v4098_v21, %v4092_v16  ;;  %v9550_v9 = vpack.c.bf16 %v4100_v4, %v4094_v58 }
 0x31c   :  { %11774 = vst [vmem:[#allocation68_spill] sm:$0xff] %v9544_v60  ;;  %11775 = vst [vmem:[#allocation69_spill] sm:$0xff] %v9546_v62 }
 0x31d   :  { %11776 = vst [vmem:[#allocation70_spill] sm:$0xff] %v9548_v56  ;;  %11777 = vst [vmem:[#allocation71_spill] sm:$0xff] %v9550_v9  ;;  %7342 = vmatmul.mubr.msk.bf16.gmra.mrb[204].mxu1 %vm2068_vm1, %v9429_v46  ;;  %v1491_v28 = vpop.f32.mrb[80].mxu0  ;;  %v1684_v59 = vpop.f32.mrb[176].mxu1 }
 0x31e   :  { %v4103_v29 = vadd.f32 %v9433_v3, %v1491_v28  ;;  %v1493_v54 = vpop.f32.mrb[81].mxu0  ;;  %v4105_v2 = vadd.f32 %v9438_v1, %v1684_v59  ;;  %v1686_v53 = vpop.f32.mrb[177].mxu1 }
 0x31f   :  { %v4104_v7 = vadd.f32 %v9446_v42, %v1493_v54  ;;  %v1495_v0 = vpop.f32.mrb[82].mxu0  ;;  %v4106_v44 = vadd.f32 %v9451_v39, %v1686_v53  ;;  %v1688_v16 = vpop.f32.mrb[178].mxu1 }
 0x320   :  { %v4109_v58 = vadd.f32 %v9433_v3, %v1495_v0  ;;  %v1497_v24 = vpop.f32.mrb[83].mxu0  ;;  %v4111_v38 = vadd.f32 %v9438_v1, %v1688_v16  ;;  %v1690_v46 = vpop.f32.mrb[179].mxu1 }
 0x321   :  { %v4110_v21 = vadd.f32 %v9446_v42, %v1497_v24  ;;  %v4112_v4 = vadd.f32 %v9451_v39, %v1690_v46 }
 0x322   :  { %v9562_v28 = vpack.c.bf16 %v4109_v58, %v4103_v29  ;;  %v9564_v59 = vpack.c.bf16 %v4111_v38, %v4105_v2 }
 0x323   :  { %v9566_v55 = vpack.c.bf16 %v4110_v21, %v4104_v7  ;;  %v9568_v54 = vpack.c.bf16 %v4112_v4, %v4106_v44 }
 0x324   :  { %11778 = vst [vmem:[#allocation72_spill] sm:$0xff] %v9562_v28  ;;  %11779 = vst [vmem:[#allocation73_spill] sm:$0xff] %v9564_v59 }
 0x325   :  { %11780 = vst [vmem:[#allocation74_spill] sm:$0xff] %v9566_v55  ;;  %11781 = vst [vmem:[#allocation75_spill] sm:$0xff] %v9568_v54  ;;  %v1501_v53 = vpop.f32.mrb[84].mxu0  ;;  %v1694_v52 = vpop.f32.mrb[180].mxu1 }
 0x326   :  { %v4115_v0 = vadd.f32 %v9433_v3, %v1501_v53  ;;  %v1503_v11 = vpop.f32.mrb[85].mxu0  ;;  %v4117_v16 = vadd.f32 %v9438_v1, %v1694_v52  ;;  %v1696_v57 = vpop.f32.mrb[181].mxu1 }
 0x327   :  { %v4116_v24 = vadd.f32 %v9446_v42, %v1503_v11  ;;  %v1505_v51 = vpop.f32.mrb[86].mxu0  ;;  %v4118_v29 = vadd.f32 %v9451_v39, %v1696_v57  ;;  %v1698_v58 = vpop.f32.mrb[182].mxu1 }
 0x328   :  { %v4121_v2 = vadd.f32 %v9433_v3, %v1505_v51  ;;  %v1507_v7 = vpop.f32.mrb[87].mxu0  ;;  %v4123_v44 = vadd.f32 %v9438_v1, %v1698_v58  ;;  %v1700_v38 = vpop.f32.mrb[183].mxu1 }
 0x329   :  { %v4122_v46 = vadd.f32 %v9446_v42, %v1507_v7  ;;  %v4124_v21 = vadd.f32 %v9451_v39, %v1700_v38 }
 0x32a   :  { %v9578_v4 = vpack.c.bf16 %v4121_v2, %v4115_v0  ;;  %v9580_v52 = vpack.c.bf16 %v4123_v44, %v4117_v16 }
 0x32b   :  { %v9582_v53 = vpack.c.bf16 %v4122_v46, %v4116_v24  ;;  %v9584_v11 = vpack.c.bf16 %v4124_v21, %v4118_v29 }
 0x32c   :  { %11782 = vst [vmem:[#allocation76_spill] sm:$0xff] %v9578_v4  ;;  %11783 = vst [vmem:[#allocation77_spill] sm:$0xff] %v9580_v52 }
 0x32d   :  { %11784 = vst [vmem:[#allocation78_spill] sm:$0xff] %v9582_v53  ;;  %11785 = vst [vmem:[#allocation79_spill] sm:$0xff] %v9584_v11  ;;  %v1511_v57 = vpop.f32.mrb[88].mxu0  ;;  %v1704_v10 = vpop.f32.mrb[184].mxu1 }
 0x32e   :  { %v4127_v51 = vadd.f32 %v9433_v3, %v1511_v57  ;;  %v1513_v48 = vpop.f32.mrb[89].mxu0  ;;  %v4129_v58 = vadd.f32 %v9438_v1, %v1704_v10  ;;  %v1706_v50 = vpop.f32.mrb[185].mxu1 }
 0x32f   :  { %v4128_v7 = vadd.f32 %v9446_v42, %v1513_v48  ;;  %v1515_v49 = vpop.f32.mrb[90].mxu0  ;;  %v4130_v0 = vadd.f32 %v9451_v39, %v1706_v50  ;;  %v1708_v2 = vpop.f32.mrb[186].mxu1 }
 0x330   :  { %v4133_v16 = vadd.f32 %v9433_v3, %v1515_v49  ;;  %v1517_v24 = vpop.f32.mrb[91].mxu0  ;;  %v4135_v29 = vadd.f32 %v9438_v1, %v1708_v2  ;;  %v1710_v44 = vpop.f32.mrb[187].mxu1 }
 0x331   :  { %v4134_v38 = vadd.f32 %v9446_v42, %v1517_v24  ;;  %v4136_v46 = vadd.f32 %v9451_v39, %v1710_v44 }
 0x332   :  { %v9594_v21 = vpack.c.bf16 %v4133_v16, %v4127_v51  ;;  %v9596_v10 = vpack.c.bf16 %v4135_v29, %v4129_v58  ;;  %v11637_v29 = vsub.s32 4, %v8917_v6 }
 0x333   :  { %v9598_v57 = vpack.c.bf16 %v4134_v38, %v4128_v7  ;;  %v9600_v48 = vpack.c.bf16 %v4136_v46, %v4130_v0 }
 0x334   :  { %11786 = vst [vmem:[#allocation80_spill] sm:$0xff] %v9594_v21  ;;  %11787 = vst [vmem:[#allocation81_spill] sm:$0xff] %v9596_v10 }
 0x335   :  { %11788 = vst [vmem:[#allocation82_spill] sm:$0xff] %v9598_v57  ;;  %11789 = vst [vmem:[#allocation83_spill] sm:$0xff] %v9600_v48  ;;  %v1521_v50 = vpop.f32.mrb[92].mxu0  ;;  %v1714_v53 = vpop.f32.mrb[188].mxu1 }
 0x336   :  { %v2512_v55 = vpop.permute.xlu0 %2511  ;;  %v4139_v49 = vadd.f32 %v9433_v3, %v1521_v50  ;;  %v1523_v56 = vpop.f32.mrb[93].mxu0  ;;  %v4141_v2 = vadd.f32 %v9438_v1, %v1714_v53  ;;  %v11636_v53 = vsub.s32 5, %v8917_v6 }
 0x337   :  { %7835 = vmatprep.subr.msk.bf16.mxu0 %vm2068_vm1, %v2512_v55  ;;  %v2552_v24 = vsel %vm2068_vm1, %v2512_v55, 0  ;;  %v4140_v51 = vadd.f32 %v9446_v42, %v1523_v56  ;;  %v1525_v58 = vpop.f32.mrb[94].mxu0  ;;  %v1716_v16 = vpop.f32.mrb[189].mxu1 }
 0x338   :  { %7378 = vmatpush3.bf16.xpose.msra.mxu0 %v2552_v24  ;;  %v4145_v7 = vadd.f32 %v9433_v3, %v1525_v58  ;;  %v1527_v0 = vpop.f32.mrb[95].mxu0  ;;  %v4142_v44 = vadd.f32 %v9451_v39, %v1716_v16  ;;  %v1718_v38 = vpop.f32.mrb[190].mxu1  ;;  %v9623_v58 = vrot.slane %v9264_v45, %v11637_v29 }
 0x339   :  { %v4146_v46 = vadd.f32 %v9446_v42, %v1527_v0  ;;  %v4147_v50 = vadd.f32 %v9438_v1, %v1718_v38  ;;  %v1720_v55 = vpop.f32.mrb[191].mxu1  ;;  %v9630_v1 = vrot.slane %v9264_v45, %v11636_v53 }
 0x33a   :  { %v9613_v57 = vpack.c.bf16 %v4145_v7, %v4139_v49  ;;  %v4148_v56 = vadd.f32 %v9451_v39, %v1720_v55 }
 0x33b   :  { %v9616_v24 = vpack.c.bf16 %v4146_v46, %v4140_v51  ;;  %v9618_v3 = vpack.c.bf16 %v4147_v50, %v4141_v2 }
 0x33c   :  { %11790 = vst [vmem:[#allocation84_spill] sm:$0xff] %v9613_v57  ;;  %v9625_v16 = vpack.c.bf16 %v4148_v56, %v4142_v44 }
 0x33d   :  { %11791 = vst [vmem:[#allocation85_spill] sm:$0xff] %v9616_v24  ;;  %11792 = vst [vmem:[#allocation86_spill] sm:$0xff] %v9618_v3  ;;  %v1757_v42 = vpop.f32.mrb[96].mxu0 }
 0x33e   :  { %11793 = vst [vmem:[#allocation87_spill] sm:$0xff] %v9625_v16  ;;  %v2514_v49 = vpop.permute.xlu0 %2513  ;;  %v1759_v7 = vpop.f32.mrb[97].mxu0  ;;  %v1952_v51 = vadd.f32 %v9623_v58, %v1757_v42 }
 0x33f   :  { %v1761_v39 = vpop.f32.mrb[98].mxu0  ;;  %7836 = vmatprep.subr.msk.bf16.mxu0 %vm2068_vm1, %v2514_v49  ;;  %v2555_v2 = vsel %vm2068_vm1, %v2514_v49, 0  ;;  %v1953_v44 = vadd.f32 %v9630_v1, %v1759_v7 }
 0x340   :  { %v1958_v0 = vadd.f32 %v9623_v58, %v1761_v39  ;;  %v1763_v38 = vpop.f32.mrb[99].mxu0  ;;  %7380 = vmatpush3.bf16.xpose.msra.mxu0 %v2555_v2 }
 0x341   :  { %v1959_v46 = vadd.f32 %v9630_v1, %v1763_v38 }
 0x342   :  { %v2060_v50 = vpack.c.bf16 %v1958_v0, %v1952_v51 }
 0x343   :  { %v9638_v45 = vpack.c.bf16 %v1959_v46, %v1953_v44 }
 0x344   :  { %2832 = vrot.lane.b32.xlu1 %v2060_v50, %s8601_s5  ;;  %7345 = vmatprep.subr.bf16.mxu1 %v2060_v50 }
 0x345   :  { %v1767_v55 = vpop.f32.mrb[100].mxu0  ;;  %7346 = vmatpush3.bf16.msra.mxu1 %v2060_v50 }
 0x346   :  { %v2516_v56 = vpop.permute.xlu1 %2515  ;;  %v1769_v49 = vpop.f32.mrb[101].mxu0  ;;  %v1964_v7 = vadd.f32 %v9623_v58, %v1767_v55 }
 0x347   :  { %v1965_v42 = vadd.f32 %v9630_v1, %v1769_v49  ;;  %v1771_v53 = vpop.f32.mrb[102].mxu0  ;;  %7837 = vmatprep.subr.msk.bf16.mxu0 %vm2068_vm1, %v2516_v56  ;;  %v2558_v39 = vsel %vm2068_vm1, %v2516_v56, 0 }
 0x348   :  { %v1970_v2 = vadd.f32 %v9623_v58, %v1771_v53  ;;  %v1773_v51 = vpop.f32.mrb[103].mxu0  ;;  %7382 = vmatpush3.bf16.xpose.msra.mxu0 %v2558_v39 }
 0x349   :  { %v1971_v0 = vadd.f32 %v9630_v1, %v1773_v51 }
 0x34a   :  { %v2061_v38 = vpack.c.bf16 %v1970_v2, %v1964_v7 }
 0x34b   :  { %v9647_v44 = vpack.c.bf16 %v1971_v0, %v1965_v42 }
 0x34c   :  { %2834 = vrot.lane.b32.xlu0 %v2061_v38, %s8601_s5  ;;  %7347 = vmatprep.subr.bf16.mxu1 %v2061_v38 }
 0x34d   :  { %11794 = vst [vmem:[#allocation88_spill] sm:$0xff] %v9647_v44  ;;  %v1777_v46 = vpop.f32.mrb[104].mxu0  ;;  %7348 = vmatpush3.bf16.msra.mxu1 %v2061_v38 }
 0x34e   :  { %v2518_v50 = vpop.permute.xlu1 %2517  ;;  %v1779_v49 = vpop.f32.mrb[105].mxu0  ;;  %v1976_v55 = vadd.f32 %v9623_v58, %v1777_v46 }
 0x34f   :  { %v1977_v56 = vadd.f32 %v9630_v1, %v1779_v49  ;;  %v1781_v29 = vpop.f32.mrb[106].mxu0  ;;  %7838 = vmatprep.subr.msk.bf16.mxu0 %vm2068_vm1, %v2518_v50  ;;  %v2561_v53 = vsel %vm2068_vm1, %v2518_v50, 0 }
 0x350   :  { %v1982_v39 = vadd.f32 %v9623_v58, %v1781_v29  ;;  %v1783_v42 = vpop.f32.mrb[107].mxu0  ;;  %7384 = vmatpush3.bf16.xpose.msra.mxu0 %v2561_v53 }
 0x351   :  { %v1983_v7 = vadd.f32 %v9630_v1, %v1783_v42 }
 0x352   :  { %v2062_v2 = vpack.c.bf16 %v1982_v39, %v1976_v55 }
 0x353   :  { %v9656_v51 = vpack.c.bf16 %v1983_v7, %v1977_v56 }
 0x354   :  { %2836 = vrot.lane.b32.xlu0 %v2062_v2, %s8601_s5  ;;  %7349 = vmatprep.subr.bf16.mxu1 %v2062_v2 }
 0x355   :  { %11795 = vst [vmem:[#allocation89_spill] sm:$0xff] %v9656_v51  ;;  %v1787_v0 = vpop.f32.mrb[108].mxu0  ;;  %7350 = vmatpush3.bf16.msra.mxu1 %v2062_v2 }
 0x356   :  { %v2520_v38 = vpop.permute.xlu0 %2519  ;;  %v1789_v49 = vpop.f32.mrb[109].mxu0  ;;  %v1988_v46 = vadd.f32 %v9623_v58, %v1787_v0 }
 0x357   :  { %v1989_v50 = vadd.f32 %v9630_v1, %v1789_v49  ;;  %v1791_v24 = vpop.f32.mrb[110].mxu0  ;;  %7839 = vmatprep.subr.msk.bf16.mxu0 %vm2068_vm1, %v2520_v38  ;;  %v2564_v29 = vsel %vm2068_vm1, %v2520_v38, 0 }
 0x358   :  { %v1994_v53 = vadd.f32 %v9623_v58, %v1791_v24  ;;  %v1793_v56 = vpop.f32.mrb[111].mxu0  ;;  %7386 = vmatpush3.bf16.xpose.msra.mxu0 %v2564_v29 }
 0x359   :  { %v1995_v55 = vadd.f32 %v9630_v1, %v1793_v56 }
 0x35a   :  { %v2063_v39 = vpack.c.bf16 %v1994_v53, %v1988_v46 }
 0x35b   :  { %v9665_v42 = vpack.c.bf16 %v1995_v55, %v1989_v50 }
 0x35c   :  { %2838 = vrot.lane.b32.xlu1 %v2063_v39, %s8601_s5  ;;  %7351 = vmatprep.subr.bf16.mxu1 %v2063_v39 }
 0x35d   :  { %11796 = vst [vmem:[#allocation90_spill] sm:$0xff] %v9665_v42  ;;  %v1797_v7 = vpop.f32.mrb[112].mxu0  ;;  %7352 = vmatpush3.bf16.msra.mxu1 %v2063_v39 }
 0x35e   :  { %v2522_v2 = vpop.permute.xlu1 %2521  ;;  %v1799_v49 = vpop.f32.mrb[113].mxu0  ;;  %v2000_v0 = vadd.f32 %v9623_v58, %v1797_v7 }
 0x35f   :  { %v2001_v38 = vadd.f32 %v9630_v1, %v1799_v49  ;;  %v1801_v40 = vpop.f32.mrb[114].mxu0  ;;  %7840 = vmatprep.subr.msk.bf16.mxu0 %vm2068_vm1, %v2522_v2  ;;  %v2567_v24 = vsel %vm2068_vm1, %v2522_v2, 0 }
 0x360   :  { %v2006_v29 = vadd.f32 %v9623_v58, %v1801_v40  ;;  %v1803_v50 = vpop.f32.mrb[115].mxu0  ;;  %7388 = vmatpush3.bf16.xpose.msra.mxu0 %v2567_v24 }
 0x361   :  { %v2007_v46 = vadd.f32 %v9630_v1, %v1803_v50 }
 0x362   :  { %v2064_v53 = vpack.c.bf16 %v2006_v29, %v2000_v0 }
 0x363   :  { %v9674_v56 = vpack.c.bf16 %v2007_v46, %v2001_v38 }
 0x364   :  { %2840 = vrot.lane.b32.xlu0 %v2064_v53, %s8601_s5  ;;  %7353 = vmatprep.subr.bf16.mxu1 %v2064_v53 }
 0x365   :  { %11797 = vst [vmem:[#allocation91_spill] sm:$0xff] %v9674_v56  ;;  %v1807_v55 = vpop.f32.mrb[116].mxu0  ;;  %7354 = vmatpush3.bf16.msra.mxu1 %v2064_v53 }
 0x366   :  { %v2524_v39 = vpop.permute.xlu0 %2523  ;;  %v1809_v49 = vpop.f32.mrb[117].mxu0  ;;  %v2012_v7 = vadd.f32 %v9623_v58, %v1807_v55 }
 0x367   :  { %v2013_v2 = vadd.f32 %v9630_v1, %v1809_v49  ;;  %v1811_v18 = vpop.f32.mrb[118].mxu0  ;;  %7841 = vmatprep.subr.msk.bf16.mxu0 %vm2068_vm1, %v2524_v39  ;;  %v2570_v40 = vsel %vm2068_vm1, %v2524_v39, 0 }
 0x368   :  { %v2018_v24 = vadd.f32 %v9623_v58, %v1811_v18  ;;  %v1813_v38 = vpop.f32.mrb[119].mxu0  ;;  %7390 = vmatpush3.bf16.xpose.msra.mxu0 %v2570_v40 }
 0x369   :  { %v2019_v0 = vadd.f32 %v9630_v1, %v1813_v38 }
 0x36a   :  { %v2065_v29 = vpack.c.bf16 %v2018_v24, %v2012_v7  ;;  %v2488_v50 = vpop.permute.xlu0 %2487 }
 0x36b   :  { %v9683_v46 = vpack.c.bf16 %v2019_v0, %v2013_v2  ;;  %7393 = vmatprep.mubr.msk.bf16.mxu0 %vm2068_vm1, %v2488_v50 }
 0x36c   :  { %2842 = vrot.lane.b32.xlu1 %v2065_v29, %s8601_s5  ;;  %7355 = vmatprep.subr.bf16.mxu1 %v2065_v29 }
 0x36d   :  { %11798 = vst [vmem:[#allocation92_spill] sm:$0xff] %v9683_v46  ;;  %v1817_v53 = vpop.f32.mrb[120].mxu0  ;;  %7356 = vmatpush3.bf16.msra.mxu1 %v2065_v29 }
 0x36e   :  { %v2526_v39 = vpop.permute.xlu1 %2525  ;;  %v1819_v49 = vpop.f32.mrb[121].mxu0  ;;  %v2024_v2 = vadd.f32 %v9623_v58, %v1817_v53  ;;  %v3083_v53 = vsel %vm2068_vm1, %v9300_v41, 0 }
 0x36f   :  { %7842 = vmatprep.subr.msk.bf16.mxu0 %vm2068_vm1, %v2526_v39  ;;  %v2573_v18 = vsel %vm2068_vm1, %v2526_v39, 0  ;;  %v2025_v55 = vadd.f32 %v9630_v1, %v1819_v49  ;;  %v1821_v40 = vpop.f32.mrb[122].mxu0  ;;  %v2492_v49 = vpop.permute.xlu0 %2491 }
 0x370   :  { %7392 = vmatpush3.bf16.xpose.msra.mxu0 %v2573_v18  ;;  %v2030_v7 = vadd.f32 %v9623_v58, %v1821_v40  ;;  %v1823_v24 = vpop.f32.mrb[123].mxu0 }
 0x371   :  { %7843 = vmatprep.subr.msk.bf16.mxu0 %vm2068_vm1, %v9300_v41  ;;  %v2031_v38 = vadd.f32 %v9630_v1, %v1823_v24 }
 0x372   :  { %v2066_v0 = vpack.c.bf16 %v2030_v7, %v2024_v2  ;;  %v2490_v39 = vpop.permute.xlu1 %2489 }
 0x373   :  { %v9695_v29 = vpack.c.bf16 %v2031_v38, %v2025_v55  ;;  %v11800_v38 = vsub.s32 4, %v8917_v6 }
 0x374   :  { %2844 = vrot.lane.b32.xlu0 %v2066_v0, %s8601_s5  ;;  %7357 = vmatprep.subr.bf16.mxu1 %v2066_v0 }
 0x375   :  { %11799 = vst [vmem:[#allocation93_spill] sm:$0xff] %v9695_v29  ;;  %v1827_v50 = vpop.f32.mrb[124].mxu0  ;;  %7358 = vmatpush3.bf16.msra.mxu1 %v2066_v0  ;;  %v9711_v41 = vrot.slane %v9420_v43, %v11800_v38 }
 0x376   :  { %v1829_v18 = vpop.f32.mrb[125].mxu0  ;;  %v2036_v55 = vadd.f32 %v9623_v58, %v1827_v50 }
 0x377   :  { %7394 = vmatmul.mubr.msk.bf16.vlgmr.msra.gmra.mrb[160].mxu0 %vm2068_vm1, %v2490_v39  ;;  %v2037_v40 = vadd.f32 %v9630_v1, %v1829_v18  ;;  %v1831_v37 = vpop.f32.mrb[126].mxu0  ;;  %v2496_v18 = vpop.permute.xlu0 %2495 }
 0x378   :  { %7397 = vmatprep.mubr.msk.bf16.mxu0 %vm2068_vm1, %v2492_v49  ;;  %7442 = vmatpush3.bf16.xpose.msra.mxu0 %v3083_v53  ;;  %v2042_v2 = vadd.f32 %v9623_v58, %v1831_v37  ;;  %v1833_v7 = vpop.f32.mrb[127].mxu0  ;;  %v11802_v49 = vsub.s32 5, %v8917_v6  ;;  %v2494_v58 = vpop.permute.xlu1 %2493 }
 0x379   :  { %7844 = vmatprep.subr.msk.bf16.mxu0 %vm2068_vm1, %v9321_v5  ;;  %v2043_v24 = vadd.f32 %v9630_v1, %v1833_v7 }
 0x37a   :  { %v2067_v0 = vpack.c.bf16 %v2042_v2, %v2036_v55  ;;  %v9718_v50 = vrot.slane %v9420_v43, %v11802_v49 }
 0x37b   :  { %v9713_v39 = vpack.c.bf16 %v2043_v24, %v2037_v40  ;;  %v3086_v40 = vsel %vm2068_vm1, %v9321_v5, 0 }
 0x37c   :  { %2846 = vrot.lane.b32.xlu1 %v2067_v0, %s8601_s5  ;;  %7359 = vmatprep.subr.bf16.mxu1 %v2067_v0  ;;  %v2498_v5 = vpop.permute.xlu1 %2497 }
 0x37d   :  { %11801 = vst [vmem:[#allocation94_spill] sm:$0xff] %v9713_v39  ;;  %v1837_v37 = vpop.f32.mrb[128].mxu0  ;;  %7360 = vmatpush3.bf16.msra.mxu1 %v2067_v0 }
 0x37e   :  { %v4059_v1 = vadd.f32 %v9711_v41, %v1837_v37  ;;  %v1839_v53 = vpop.f32.mrb[129].mxu0 }
 0x37f   :  { %7398 = vmatmul.mubr.msk.bf16.gmra.mrb[164].mxu0 %vm2068_vm1, %v2494_v58  ;;  %v4060_v6 = vadd.f32 %v9718_v50, %v1839_v53  ;;  %v1841_v55 = vpop.f32.mrb[130].mxu0  ;;  %v2500_v58 = vpop.permute.xlu0 %2499 }
 0x380   :  { %7401 = vmatprep.mubr.msk.bf16.mxu0 %vm2068_vm1, %v2496_v18  ;;  %7444 = vmatpush3.bf16.xpose.msra.mxu0 %v3086_v40  ;;  %v4065_v43 = vadd.f32 %v9711_v41, %v1841_v55  ;;  %v1843_v2 = vpop.f32.mrb[131].mxu0  ;;  %v3089_v40 = vsel %vm2068_vm1, %v9338_v47, 0 }
 0x381   :  { %7845 = vmatprep.subr.msk.bf16.mxu0 %vm2068_vm1, %v9338_v47  ;;  %v4066_v7 = vadd.f32 %v9718_v50, %v1843_v2 }
 0x382   :  { %v9731_v24 = vpack.c.bf16 %v4065_v43, %v4059_v1 }
 0x383   :  { %v9733_v38 = vpack.c.bf16 %v4066_v7, %v4060_v6  ;;  %v9890_v21 = vpop.permute.xlu0 %3500 }
 0x384   :  { %11803 = vst [vmem:[#allocation95_spill] sm:$0xff] %v9731_v24  ;;  %11820 = vst [vmem:[#allocation112_spill] sm:$0xff] %v9890_v21 }
 0x385   :  { %11804 = vst [vmem:[#allocation96_spill] sm:$0xff] %v9733_v38  ;;  %v1847_v0 = vpop.f32.mrb[132].mxu0 }
 0x386   :  { %v4071_v49 = vadd.f32 %v9711_v41, %v1847_v0  ;;  %v1849_v37 = vpop.f32.mrb[133].mxu0  ;;  %v2502_v0 = vpop.permute.xlu1 %2501 }
 0x387   :  { %v4072_v18 = vadd.f32 %v9718_v50, %v1849_v37  ;;  %v1851_v53 = vpop.f32.mrb[134].mxu0  ;;  %7402 = vmatmul.mubr.msk.bf16.gmra.mrb[168].mxu0 %vm2068_vm1, %v2498_v5  ;;  %v9899_v60 = vpop.permute.xlu0 %3504 }
 0x388   :  { %v4077_v55 = vadd.f32 %v9711_v41, %v1851_v53  ;;  %v1853_v1 = vpop.f32.mrb[135].mxu0  ;;  %7446 = vmatpush3.bf16.xpose.msra.mxu0 %v3089_v40  ;;  %7405 = vmatprep.mubr.msk.bf16.mxu0 %vm2068_vm1, %v2500_v58  ;;  %v3092_v58 = vsel %vm2068_vm1, %v9357_v25, 0  ;;  %11821 = vst [vmem:[#allocation113_spill] sm:$0xff] %v9899_v60 }
 0x389   :  { %v4078_v6 = vadd.f32 %v9718_v50, %v1853_v1  ;;  %7846 = vmatprep.subr.msk.bf16.mxu0 %vm2068_vm1, %v9357_v25 }
 0x38a   :  { %v9745_v43 = vpack.c.bf16 %v4077_v55, %v4071_v49 }
 0x38b   :  { %v9747_v2 = vpack.c.bf16 %v4078_v6, %v4072_v18 }
 0x38c   :  { %11805 = vst [vmem:[#allocation97_spill] sm:$0xff] %v9745_v43 }
 0x38d   :  { %11806 = vst [vmem:[#allocation98_spill] sm:$0xff] %v9747_v2  ;;  %v1857_v7 = vpop.f32.mrb[136].mxu0 }
 0x38e   :  { %v4083_v5 = vadd.f32 %v9711_v41, %v1857_v7  ;;  %v1859_v47 = vpop.f32.mrb[137].mxu0 }
 0x38f   :  { %v4084_v37 = vadd.f32 %v9718_v50, %v1859_v47  ;;  %v1861_v53 = vpop.f32.mrb[138].mxu0  ;;  %7406 = vmatmul.mubr.msk.bf16.gmra.mrb[172].mxu0 %vm2068_vm1, %v2502_v0 }
 0x390   :  { %v4089_v40 = vadd.f32 %v9711_v41, %v1861_v53  ;;  %v1863_v1 = vpop.f32.mrb[139].mxu0  ;;  %7448 = vmatpush3.bf16.xpose.msra.mxu0 %v3092_v58  ;;  %7457 = vmatprep.mubr.msk.bf16.mxu0 %vm2068_vm1, %v9298_v12  ;;  %v3095_v58 = vsel %vm2068_vm1, %v9376_v19, 0 }
 0x391   :  { %v4090_v49 = vadd.f32 %v9718_v50, %v1863_v1  ;;  %7847 = vmatprep.subr.msk.bf16.mxu0 %vm2068_vm1, %v9376_v19 }
 0x392   :  { %v9760_v18 = vpack.c.bf16 %v4089_v40, %v4083_v5 }
 0x393   :  { %v9762_v55 = vpack.c.bf16 %v4090_v49, %v4084_v37 }
 0x394   :  { %11807 = vst [vmem:[#allocation99_spill] sm:$0xff] %v9760_v18 }
 0x395   :  { %11808 = vst [vmem:[#allocation100_spill] sm:$0xff] %v9762_v55  ;;  %v1867_v6 = vpop.f32.mrb[140].mxu0 }
 0x396   :  { %v4095_v7 = vadd.f32 %v9711_v41, %v1867_v6  ;;  %v1869_v0 = vpop.f32.mrb[141].mxu0 }
 0x397   :  { %v4096_v47 = vadd.f32 %v9718_v50, %v1869_v0  ;;  %v1871_v53 = vpop.f32.mrb[142].mxu0 }
 0x398   :  { %v4101_v16 = vadd.f32 %v9711_v41, %v1871_v53  ;;  %v1873_v1 = vpop.f32.mrb[143].mxu0  ;;  %7450 = vmatpush3.bf16.xpose.msra.mxu0 %v3095_v58  ;;  %v3098_v53 = vsel %vm2068_vm1, %v9393_v22, 0 }
 0x399   :  { %v4102_v48 = vadd.f32 %v9718_v50, %v1873_v1  ;;  %7848 = vmatprep.subr.msk.bf16.mxu0 %vm2068_vm1, %v9393_v22 }
 0x39a   :  { %v9772_v5 = vpack.c.bf16 %v4101_v16, %v4095_v7 }
 0x39b   :  { %v9774_v37 = vpack.c.bf16 %v4102_v48, %v4096_v47 }
 0x39c   :  { %11809 = vst [vmem:[#allocation101_spill] sm:$0xff] %v9772_v5 }
 0x39d   :  { %11810 = vst [vmem:[#allocation102_spill] sm:$0xff] %v9774_v37  ;;  %v1877_v40 = vpop.f32.mrb[144].mxu0 }
 0x39e   :  { %v4107_v49 = vadd.f32 %v9711_v41, %v1877_v40  ;;  %v1879_v6 = vpop.f32.mrb[145].mxu0 }
 0x39f   :  { %v4108_v0 = vadd.f32 %v9718_v50, %v1879_v6  ;;  %v1881_v11 = vpop.f32.mrb[146].mxu0 }
 0x3a0   :  { %v4113_v58 = vadd.f32 %v9711_v41, %v1881_v11  ;;  %v1883_v1 = vpop.f32.mrb[147].mxu0  ;;  %7452 = vmatpush3.bf16.xpose.msra.mxu0 %v3098_v53  ;;  %v3101_v11 = vsel %vm2068_vm1, %v9410_v15, 0 }
 0x3a1   :  { %v4114_v54 = vadd.f32 %v9718_v50, %v1883_v1  ;;  %7849 = vmatprep.subr.msk.bf16.mxu0 %vm2068_vm1, %v9410_v15 }
 0x3a2   :  { %v9784_v48 = vpack.c.bf16 %v4113_v58, %v4107_v49 }
 0x3a3   :  { %v9786_v16 = vpack.c.bf16 %v4114_v54, %v4108_v0 }
 0x3a4   :  { %11811 = vst [vmem:[#allocation103_spill] sm:$0xff] %v9784_v48 }
 0x3a5   :  { %11812 = vst [vmem:[#allocation104_spill] sm:$0xff] %v9786_v16  ;;  %v1887_v7 = vpop.f32.mrb[148].mxu0 }
 0x3a6   :  { %v4119_v47 = vadd.f32 %v9711_v41, %v1887_v7  ;;  %v1889_v40 = vpop.f32.mrb[149].mxu0 }
 0x3a7   :  { %v4120_v6 = vadd.f32 %v9718_v50, %v1889_v40  ;;  %v1891_v9 = vpop.f32.mrb[150].mxu0 }
 0x3a8   :  { %v4125_v53 = vadd.f32 %v9711_v41, %v1891_v9  ;;  %v1893_v1 = vpop.f32.mrb[151].mxu0  ;;  %7454 = vmatpush3.bf16.xpose.msra.mxu0 %v3101_v11  ;;  %v3104_v9 = vsel %vm2068_vm1, %v9440_v30, 0 }
 0x3a9   :  { %v4126_v34 = vadd.f32 %v9718_v50, %v1893_v1  ;;  %7850 = vmatprep.subr.msk.bf16.mxu0 %vm2068_vm1, %v9440_v30 }
 0x3aa   :  { %v9796_v54 = vpack.c.bf16 %v4125_v53, %v4119_v47  ;;  %v9806_v47 = vpop.permute.xlu1 %3502 }
 0x3ab   :  { %v9798_v49 = vpack.c.bf16 %v4126_v34, %v4120_v6  ;;  %11815 = vst [vmem:[#allocation107_spill] sm:$0xff] %v9806_v47 }
 0x3ac   :  { %11813 = vst [vmem:[#allocation105_spill] sm:$0xff] %v9796_v54 }
 0x3ad   :  { %11814 = vst [vmem:[#allocation106_spill] sm:$0xff] %v9798_v49  ;;  %v1897_v0 = vpop.f32.mrb[152].mxu0 }
 0x3ae   :  { %v4131_v58 = vadd.f32 %v9711_v41, %v1897_v0  ;;  %v1899_v7 = vpop.f32.mrb[153].mxu0 }
 0x3af   :  { %v4132_v40 = vadd.f32 %v9718_v50, %v1899_v7  ;;  %v1901_v13 = vpop.f32.mrb[154].mxu0 }
 0x3b0   :  { %v4137_v11 = vadd.f32 %v9711_v41, %v1901_v13  ;;  %v1903_v1 = vpop.f32.mrb[155].mxu0  ;;  %7456 = vmatpush3.bf16.xpose.msra.mxu0 %v3104_v9 }
 0x3b1   :  { %v4138_v23 = vadd.f32 %v9718_v50, %v1903_v1 }
 0x3b2   :  { %v9808_v34 = vpack.c.bf16 %v4137_v11, %v4131_v58 }
 0x3b3   :  { %v9810_v6 = vpack.c.bf16 %v4138_v23, %v4132_v40 }
 0x3b4   :  { %11816 = vst [vmem:[#allocation108_spill] sm:$0xff] %v9808_v34 }
 0x3b5   :  { %11817 = vst [vmem:[#allocation109_spill] sm:$0xff] %v9810_v6  ;;  %v1907_v53 = vpop.f32.mrb[156].mxu0 }
 0x3b6   :  { %v4143_v0 = vadd.f32 %v9711_v41, %v1907_v53  ;;  %v9813_v7 = vpop.permute.xlu1 %2832  ;;  %v1909_v49 = vpop.f32.mrb[157].mxu0 }
 0x3b7   :  { %v4144_v16 = vadd.f32 %v9718_v50, %v1909_v49  ;;  %v1911_v37 = vpop.f32.mrb[158].mxu0  ;;  %7409 = vmatprep.subr.bf16.mxu1 %v9813_v7  ;;  %7458 = vmatmul.mubr.msk.bf16.vlgmr.msra.gmra.mrb[176].mxu0 %vm2068_vm1, %v9319_v32 }
 0x3b8   :  { %v4149_v13 = vadd.f32 %v9711_v41, %v1911_v37  ;;  %v1913_v58 = vpop.f32.mrb[159].mxu0  ;;  %7461 = vmatprep.mubr.msk.bf16.mxu0 %vm2068_vm1, %v9340_v36 }
 0x3b9   :  { %v4150_v23 = vadd.f32 %v9718_v50, %v1913_v58 }
 0x3ba   :  { %v9823_v40 = vpack.c.bf16 %v4149_v13, %v4143_v0 }
 0x3bb   :  { %v9825_v9 = vpack.c.bf16 %v4150_v23, %v4144_v16 }
 0x3bc   :  { %11818 = vst [vmem:[#allocation110_spill] sm:$0xff] %v9823_v40 }
 0x3bd   :  { %11819 = vst [vmem:[#allocation111_spill] sm:$0xff] %v9825_v9 }
 0x3be   :  { %v9911_v10 = vpop.permute.xlu0 %2834 }
 0x3bf   :  { %7462 = vmatmul.mubr.msk.bf16.gmra.mrb[180].mxu0 %vm2068_vm1, %v9360_v33 }
 0x3c0   :  { %7465 = vmatprep.mubr.msk.bf16.mxu0 %vm2068_vm1, %v9378_v35 }
 0x3c6   :  { %v9915_v52 = vpop.permute.xlu0 %2836 }
 0x3c7   :  { %7466 = vmatmul.mubr.msk.bf16.gmra.mrb[184].mxu0 %vm2068_vm1, %v9395_v20 }
 0x3c8   :  { %7469 = vmatprep.mubr.msk.bf16.mxu0 %vm2068_vm1, %v9412_v14 }
 0x3ce   :  { %v9924_v27 = vpop.permute.xlu1 %2838 }
 0x3cf   :  { %7470 = vmatmul.mubr.msk.bf16.gmra.mrb[188].mxu0 %vm2068_vm1, %v9442_v63 }
 0x3d6   :  { %v9929_v40 = vpop.permute.xlu0 %2840 }
 0x3d8   :  { %v9837_v41 = vpop.f32.mrb[192].mxu1 }
 0x3d9   :  { %v9839_v50 = vpop.f32.mrb[193].mxu1  ;;  %2218 = vmax.xlane.f32.xlu0 %v9837_v41 }
 0x3da   :  { %v9842_v37 = vpop.f32.mrb[194].mxu1 }
 0x3db   :  { %v9844_v16 = vpop.f32.mrb[195].mxu1 }
 0x3dc   :  { %2216 = vmax.xlane.f32.xlu1 %v9844_v16 }
 0x3dd   :  { %2214 = vmax.xlane.f32.xlu0 %v9839_v50 }
 0x3de   :  { %v9932_v34 = vpop.permute.xlu1 %2842 }
 0x3e0   :  { %v9848_v49 = vpop.f32.mrb[196].mxu1 }
 0x3e1   :  { %v9850_v11 = vpop.f32.mrb[197].mxu1  ;;  %2220 = vmax.xlane.f32.xlu0 %v9842_v37  ;;  %2226 = vmax.xlane.f32.xlu1 %v9848_v49 }
 0x3e2   :  { %v9854_v1 = vpop.f32.mrb[198].mxu1 }
 0x3e3   :  { %v9856_v53 = vpop.f32.mrb[199].mxu1 }
 0x3e5   :  { %2228 = vmax.xlane.f32.xlu0 %v9854_v1  ;;  %2222 = vmax.xlane.f32.xlu1 %v9850_v11 }
 0x3e6   :  { %v9935_v54 = vpop.permute.xlu0 %2844 }
 0x3e8   :  { %v9860_v0 = vpop.f32.mrb[200].mxu1 }
 0x3e9   :  { %v9862_v13 = vpop.f32.mrb[201].mxu1  ;;  %2224 = vmax.xlane.f32.xlu0 %v9856_v53  ;;  %2234 = vmax.xlane.f32.xlu1 %v9860_v0 }
 0x3ea   :  { %v9866_v58 = vpop.f32.mrb[202].mxu1 }
 0x3eb   :  { %v9868_v23 = vpop.f32.mrb[203].mxu1 }
 0x3ed   :  { %2236 = vmax.xlane.f32.xlu0 %v9866_v58  ;;  %2230 = vmax.xlane.f32.xlu1 %v9862_v13 }
 0x3ee   :  { %v9944_v43 = vpop.permute.xlu1 %2846 }
 0x3f0   :  { %v9872_v9 = vpop.f32.mrb[204].mxu1 }
 0x3f1   :  { %2232 = vmax.xlane.f32.xlu0 %v9868_v23  ;;  %2242 = vmax.xlane.f32.xlu1 %v9872_v9  ;;  %v9876_v6 = vpop.f32.mrb[205].mxu1 }
 0x3f2   :  { %v9878_v55 = vpop.f32.mrb[206].mxu1 }
 0x3f3   :  { %v9880_v2 = vpop.f32.mrb[207].mxu1 }
 0x3f5   :  { %2244 = vmax.xlane.f32.xlu0 %v9878_v55  ;;  %2238 = vmax.xlane.f32.xlu1 %v9876_v6 }
 0x3f9   :  { %2240 = vmax.xlane.f32.xlu0 %v9880_v2 }
 0x44a   :  { %v9885_v38 = vpop.f32.mrb[160].mxu0 }
 0x44b   :  { %2676 = vmax.xlane.f32.xlu1 %v9885_v38  ;;  %v9888_v57 = vpop.f32.mrb[161].mxu0 }
 0x44c   :  { %v9892_v4 = vpop.f32.mrb[162].mxu0 }
 0x44d   :  { %2678 = vmax.xlane.f32.xlu0 %v9892_v4  ;;  %v9895_v28 = vpop.f32.mrb[163].mxu0 }
 0x44f   :  { %2672 = vmax.xlane.f32.xlu1 %v9888_v57 }
 0x451   :  { %2674 = vmax.xlane.f32.xlu0 %v9895_v28 }
 0x452   :  { %v9901_v61 = vpop.f32.mrb[164].mxu0 }
 0x453   :  { %2684 = vmax.xlane.f32.xlu1 %v9901_v61  ;;  %v9904_v31 = vpop.f32.mrb[165].mxu0 }
 0x454   :  { %v9906_v26 = vpop.f32.mrb[166].mxu0 }
 0x455   :  { %2686 = vmax.xlane.f32.xlu0 %v9906_v26  ;;  %v9909_v3 = vpop.f32.mrb[167].mxu0 }
 0x457   :  { %2680 = vmax.xlane.f32.xlu1 %v9904_v31 }
 0x459   :  { %2682 = vmax.xlane.f32.xlu0 %v9909_v3 }
 0x45a   :  { %v9917_v59 = vpop.f32.mrb[168].mxu0 }
 0x45b   :  { %2692 = vmax.xlane.f32.xlu1 %v9917_v59  ;;  %v9920_v62 = vpop.f32.mrb[169].mxu0 }
 0x45c   :  { %v9922_v17 = vpop.f32.mrb[170].mxu0 }
 0x45d   :  { %2694 = vmax.xlane.f32.xlu0 %v9922_v17  ;;  %v9927_v8 = vpop.f32.mrb[171].mxu0 }
 0x45f   :  { %2688 = vmax.xlane.f32.xlu1 %v9920_v62 }
 0x461   :  { %2690 = vmax.xlane.f32.xlu0 %v9927_v8 }
 0x462   :  { %v9937_v48 = vpop.f32.mrb[172].mxu0 }
 0x463   :  { %2700 = vmax.xlane.f32.xlu1 %v9937_v48  ;;  %v9940_v5 = vpop.f32.mrb[173].mxu0 }
 0x464   :  { %v9942_v18 = vpop.f32.mrb[174].mxu0 }
 0x465   :  { %2702 = vmax.xlane.f32.xlu0 %v9942_v18  ;;  %v9947_v24 = vpop.f32.mrb[175].mxu0 }
 0x466   :  { %v2219_v60 = vpop.xlane.xlu0 %2218 }
 0x467   :  { %v2248_v47 = vsub.f32 %v9837_v41, %v2219_v60  ;;  %2696 = vmax.xlane.f32.xlu1 %v9940_v5 }
 0x469   :  { %v2266_v21 = vmul.f32 1.442695, %v2248_v47  ;;  %v2217_v39 = vpop.xlane.xlu1 %2216  ;;  %2698 = vmax.xlane.f32.xlu0 %v9947_v24 }
 0x46a   :  { %v2215_v63 = vpop.xlane.xlu0 %2214  ;;  %v2247_v56 = vsub.f32 %v9844_v16, %v2217_v39 }
 0x46b   :  { %8010 = vpow2.f32 %v2266_v21  ;;  %v2246_v29 = vsub.f32 %v9839_v50, %v2215_v63 }
 0x46c   :  { %v2264_v51 = vmul.f32 1.442695, %v2247_v56 }
 0x46d   :  { %v2262_v20 = vmul.f32 1.442695, %v2246_v29 }
 0x46e   :  { %v2221_v46 = vpop.xlane.xlu0 %2220  ;;  %v2227_v33 = vpop.xlane.xlu1 %2226 }
 0x46f   :  { %8012 = vpow2.f32 %v2262_v20  ;;  %v2249_v32 = vsub.f32 %v9842_v37, %v2221_v46  ;;  %v2252_v60 = vsub.f32 %v9848_v49, %v2227_v33 }
 0x471   :  { %v2268_v41 = vmul.f32 1.442695, %v2249_v32  ;;  %v2274_v42 = vmul.f32 1.442695, %v2252_v60 }
 0x472   :  { %v2229_v47 = vpop.xlane.xlu0 %2228  ;;  %v2223_v30 = vpop.xlane.xlu1 %2222 }
 0x473   :  { %8014 = vpow2.f32 %v2268_v41  ;;  %v2253_v21 = vsub.f32 %v9854_v1, %v2229_v47  ;;  %v2250_v63 = vsub.f32 %v9850_v11, %v2223_v30 }
 0x474   :  { %8016 = vpow2.f32 %v2274_v42 }
 0x475   :  { %v9958_v29 = vpop.eup %8010  ;;  %v2270_v50 = vmul.f32 1.442695, %v2250_v63  ;;  %8018 = vpow2.f32 %v2264_v51  ;;  %v2276_v33 = vmul.f32 1.442695, %v2253_v21 }
 0x476   :  { %v2225_v39 = vpop.xlane.xlu0 %2224  ;;  %v2235_v20 = vpop.xlane.xlu1 %2234  ;;  %2298 = vadd.xlane.f32.xlu1 %v9958_v29 }
 0x477   :  { %v2251_v32 = vsub.f32 %v9856_v53, %v2225_v39  ;;  %v2256_v46 = vsub.f32 %v9860_v0, %v2235_v20  ;;  %8020 = vpow2.f32 %v2270_v50 }
 0x478   :  { %8022 = vpow2.f32 %v2276_v33 }
 0x479   :  { %v9963_v56 = vpop.eup %8012  ;;  %v2282_v37 = vmul.f32 1.442695, %v2256_v46  ;;  %v2272_v42 = vmul.f32 1.442695, %v2251_v32 }
 0x47a   :  { %v2237_v16 = vpop.xlane.xlu0 %2236  ;;  %v2231_v30 = vpop.xlane.xlu1 %2230  ;;  %2294 = vadd.xlane.f32.xlu1 %v9963_v56 }
 0x47b   :  { %v2257_v49 = vsub.f32 %v9866_v58, %v2237_v16  ;;  %v2254_v11 = vsub.f32 %v9862_v13, %v2231_v30  ;;  %8024 = vpow2.f32 %v2282_v37 }
 0x47c   :  { %8026 = vpow2.f32 %v2272_v42 }
 0x47d   :  { %v9968_v51 = vpop.eup %8014  ;;  %v2278_v1 = vmul.f32 1.442695, %v2254_v11  ;;  %v2284_v60 = vmul.f32 1.442695, %v2257_v49 }
 0x47e   :  { %v9970_v53 = vpop.eup %8016  ;;  %v2233_v0 = vpop.xlane.xlu0 %2232  ;;  %2300 = vadd.xlane.f32.xlu0 %v9968_v51 }
 0x47f   :  { %v2255_v41 = vsub.f32 %v9868_v23, %v2233_v0  ;;  %v2243_v47 = vpop.xlane.xlu1 %2242  ;;  %2306 = vadd.xlane.f32.xlu1 %v9970_v53  ;;  %8028 = vpow2.f32 %v2278_v1  ;;  %v9975_v58 = vpop.eup %8018 }
 0x480   :  { %8030 = vpow2.f32 %v2284_v60  ;;  %v2260_v63 = vsub.f32 %v9872_v9, %v2243_v47 }
 0x481   :  { %v9977_v13 = vpop.eup %8020  ;;  %v2280_v21 = vmul.f32 1.442695, %v2255_v41 }
 0x482   :  { %2296 = vadd.xlane.f32.xlu0 %v9975_v58  ;;  %v9982_v50 = vpop.eup %8022  ;;  %v2245_v20 = vpop.xlane.xlu0 %2244  ;;  %v2290_v33 = vmul.f32 1.442695, %v2260_v63 }
 0x483   :  { %2302 = vadd.xlane.f32.xlu1 %v9977_v13  ;;  %v2239_v39 = vpop.xlane.xlu1 %2238  ;;  %8032 = vpow2.f32 %v2280_v21  ;;  %v2261_v16 = vsub.f32 %v9878_v55, %v2245_v20 }
 0x484   :  { %v2258_v32 = vsub.f32 %v9876_v6, %v2239_v39  ;;  %8034 = vpow2.f32 %v2290_v33 }
 0x485   :  { %v9984_v23 = vpop.eup %8024  ;;  %v2292_v0 = vmul.f32 1.442695, %v2261_v16 }
 0x486   :  { %2308 = vadd.xlane.f32.xlu0 %v9982_v50  ;;  %v9989_v46 = vpop.eup %8026  ;;  %v2286_v42 = vmul.f32 1.442695, %v2258_v32  ;;  %v2241_v49 = vpop.xlane.xlu0 %2240 }
 0x487   :  { %2314 = vadd.xlane.f32.xlu1 %v9984_v23  ;;  %v2259_v60 = vsub.f32 %v9880_v2, %v2241_v49 }
 0x488   :  { %8036 = vpow2.f32 %v2286_v42 }
 0x489   :  { %v9991_v37 = vpop.eup %8028  ;;  %8038 = vpow2.f32 %v2292_v0  ;;  %v2288_v47 = vmul.f32 1.442695, %v2259_v60 }
 0x48a   :  { %2304 = vadd.xlane.f32.xlu0 %v9989_v46  ;;  %v9994_v9 = vpop.f32.mrb[176].mxu0  ;;  %v10002_v6 = vpop.eup %8030 }
 0x48b   :  { %2310 = vadd.xlane.f32.xlu1 %v9991_v37  ;;  %v9998_v30 = vpop.f32.mrb[177].mxu0  ;;  %8040 = vpow2.f32 %v2288_v47 }
 0x48c   :  { %v10000_v11 = vpop.f32.mrb[178].mxu0 }
 0x48d   :  { %v10004_v1 = vpop.f32.mrb[179].mxu0  ;;  %v10009_v55 = vpop.eup %8032 }
 0x48e   :  { %2316 = vadd.xlane.f32.xlu0 %v10002_v6  ;;  %v10021_v2 = vpop.eup %8034 }
 0x48f   :  { %3207 = vmax.xlane.f32.xlu1 %v9994_v9 }
 0x492   :  { %2312 = vadd.xlane.f32.xlu0 %v10009_v55  ;;  %v10012_v41 = vpop.f32.mrb[180].mxu0  ;;  %v10025_v20 = vpop.eup %8036 }
 0x493   :  { %11822 = vst [vmem:[#allocation114_spill] sm:$0xff] %v10012_v41  ;;  %3203 = vmax.xlane.f32.xlu1 %v9998_v30  ;;  %v10015_v21 = vpop.f32.mrb[181].mxu0  ;;  %v10035_v42 = vpop.eup %8038 }
 0x494   :  { %v10017_v63 = vpop.f32.mrb[182].mxu0 }
 0x495   :  { %v10019_v39 = vpop.f32.mrb[183].mxu0  ;;  %v10041_v0 = vpop.eup %8040 }
 0x496   :  { %11823 = vst [vmem:[#allocation115_spill] sm:$0xff] %v10019_v39  ;;  %3209 = vmax.xlane.f32.xlu0 %v10000_v11 }
 0x497   :  { %2322 = vadd.xlane.f32.xlu1 %v10021_v2 }
 0x49a   :  { %3205 = vmax.xlane.f32.xlu0 %v10004_v1  ;;  %v10028_v33 = vpop.f32.mrb[184].mxu0 }
 0x49b   :  { %2318 = vadd.xlane.f32.xlu1 %v10025_v20  ;;  %v10031_v32 = vpop.f32.mrb[185].mxu0 }
 0x49c   :  { %v10033_v16 = vpop.f32.mrb[186].mxu0 }
 0x49d   :  { %11824 = vst [vmem:[#allocation116_spill] sm:$0xff] %v10033_v16  ;;  %v10037_v49 = vpop.f32.mrb[187].mxu0 }
 0x49e   :  { %11825 = vst [vmem:[#allocation117_spill] sm:$0xff] %v10037_v49  ;;  %2324 = vadd.xlane.f32.xlu0 %v10035_v42 }
 0x49f   :  { %3215 = vmax.xlane.f32.xlu1 %v10012_v41 }
 0x4a2   :  { %2320 = vadd.xlane.f32.xlu0 %v10041_v0  ;;  %v10044_v60 = vpop.f32.mrb[188].mxu0 }
 0x4a3   :  { %11826 = vst [vmem:[#allocation118_spill] sm:$0xff] %v10044_v60  ;;  %3211 = vmax.xlane.f32.xlu1 %v10015_v21  ;;  %v10047_v47 = vpop.f32.mrb[189].mxu0 }
 0x4a4   :  { %11827 = vst [vmem:[#allocation119_spill] sm:$0xff] %v10047_v47  ;;  %v10049_v15 = vpop.f32.mrb[190].mxu0 }
 0x4a5   :  { %11828 = vst [vmem:[#allocation120_spill] sm:$0xff] %v10049_v15  ;;  %v10051_v44 = vpop.f32.mrb[191].mxu0 }
 0x4a6   :  { %11829 = vst [vmem:[#allocation121_spill] sm:$0xff] %v10051_v44  ;;  %3217 = vmax.xlane.f32.xlu0 %v10017_v63 }
 0x4a7   :  { %3231 = vmax.xlane.f32.xlu1 %v10044_v60 }
 0x4aa   :  { %3213 = vmax.xlane.f32.xlu0 %v10019_v39 }
 0x4ab   :  { %3227 = vmax.xlane.f32.xlu1 %v10047_v47 }
 0x4ae   :  { %3223 = vmax.xlane.f32.xlu0 %v10028_v33 }
 0x4af   :  { %3233 = vmax.xlane.f32.xlu1 %v10049_v15 }
 0x4b2   :  { %3219 = vmax.xlane.f32.xlu0 %v10031_v32 }
 0x4b6   :  { %3225 = vmax.xlane.f32.xlu0 %v10033_v16 }
 0x4ba   :  { %3221 = vmax.xlane.f32.xlu0 %v10037_v49 }
 0x4be   :  { %3229 = vmax.xlane.f32.xlu0 %v10051_v44 }
 0x4d8   :  { %v2677_v14 = vpop.xlane.xlu1 %2676 }
 0x4d9   :  { %v2706_v35 = vsub.f32 %v9885_v38, %v2677_v14 }
 0x4da   :  { %v2679_v36 = vpop.xlane.xlu0 %2678 }
 0x4db   :  { %v2724_v12 = vmul.f32 1.442695, %v2706_v35  ;;  %v2707_v22 = vsub.f32 %v9892_v4, %v2679_v36 }
 0x4dc   :  { %v2673_v47 = vpop.xlane.xlu1 %2672 }
 0x4dd   :  { %8042 = vpow2.f32 %v2724_v12  ;;  %v2726_v60 = vmul.f32 1.442695, %v2707_v22  ;;  %v2704_v15 = vsub.f32 %v9888_v57, %v2673_v47 }
 0x4de   :  { %v2675_v39 = vpop.xlane.xlu0 %2674 }
 0x4df   :  { %v2720_v41 = vmul.f32 1.442695, %v2704_v15  ;;  %v2705_v19 = vsub.f32 %v9895_v28, %v2675_v39  ;;  %8044 = vpow2.f32 %v2726_v60 }
 0x4e0   :  { %v2685_v49 = vpop.xlane.xlu1 %2684 }
 0x4e1   :  { %8046 = vpow2.f32 %v2720_v41  ;;  %v2722_v44 = vmul.f32 1.442695, %v2705_v19  ;;  %v2710_v16 = vsub.f32 %v9901_v61, %v2685_v49 }
 0x4e2   :  { %v2687_v14 = vpop.xlane.xlu0 %2686 }
 0x4e3   :  { %v2732_v38 = vmul.f32 1.442695, %v2710_v16  ;;  %v2711_v35 = vsub.f32 %v9906_v26, %v2687_v14  ;;  %8048 = vpow2.f32 %v2722_v44 }
 0x4e4   :  { %v2681_v36 = vpop.xlane.xlu1 %2680 }
 0x4e5   :  { %v2708_v12 = vsub.f32 %v9904_v31, %v2681_v36  ;;  %8050 = vpow2.f32 %v2732_v38  ;;  %v2734_v57 = vmul.f32 1.442695, %v2711_v35 }
 0x4e6   :  { %v2683_v22 = vpop.xlane.xlu0 %2682 }
 0x4e7   :  { %v10070_v4 = vpop.eup %8042  ;;  %v2728_v15 = vmul.f32 1.442695, %v2708_v12  ;;  %v2709_v28 = vsub.f32 %v9909_v3, %v2683_v22 }
 0x4e8   :  { %v2693_v41 = vpop.xlane.xlu1 %2692  ;;  %2756 = vadd.xlane.f32.xlu0 %v10070_v4 }
 0x4e9   :  { %8052 = vpow2.f32 %v2728_v15  ;;  %v2730_v61 = vmul.f32 1.442695, %v2709_v28  ;;  %v2714_v19 = vsub.f32 %v9917_v59, %v2693_v41  ;;  %v10075_v26 = vpop.eup %8044 }
 0x4ea   :  { %v2695_v44 = vpop.xlane.xlu0 %2694  ;;  %8054 = vpow2.f32 %v2734_v57 }
 0x4eb   :  { %v10077_v39 = vpop.eup %8046  ;;  %v2740_v31 = vmul.f32 1.442695, %v2714_v19  ;;  %v2715_v16 = vsub.f32 %v9922_v17, %v2695_v44  ;;  %8056 = vpow2.f32 %v2730_v61 }
 0x4ec   :  { %v2689_v49 = vpop.xlane.xlu1 %2688  ;;  %2752 = vadd.xlane.f32.xlu1 %v10077_v39  ;;  %2758 = vadd.xlane.f32.xlu0 %v10075_v26 }
 0x4ed   :  { %v2712_v3 = vsub.f32 %v9920_v62, %v2689_v49  ;;  %v10083_v47 = vpop.eup %8048  ;;  %8058 = vpow2.f32 %v2740_v31  ;;  %v2742_v38 = vmul.f32 1.442695, %v2715_v16 }
 0x4ee   :  { %v2691_v60 = vpop.xlane.xlu0 %2690 }
 0x4ef   :  { %v2736_v59 = vmul.f32 1.442695, %v2712_v3  ;;  %v2713_v14 = vsub.f32 %v9927_v8, %v2691_v60  ;;  %v10088_v12 = vpop.eup %8050 }
 0x4f0   :  { %v2701_v35 = vpop.xlane.xlu1 %2700  ;;  %2754 = vadd.xlane.f32.xlu0 %v10083_v47 }
 0x4f1   :  { %8060 = vpow2.f32 %v2736_v59  ;;  %v2738_v17 = vmul.f32 1.442695, %v2713_v14  ;;  %v2718_v36 = vsub.f32 %v9937_v48, %v2701_v35 }
 0x4f2   :  { %v2703_v22 = vpop.xlane.xlu0 %2702  ;;  %8062 = vpow2.f32 %v2742_v38 }
 0x4f3   :  { %v10090_v15 = vpop.eup %8052  ;;  %v2748_v62 = vmul.f32 1.442695, %v2718_v36  ;;  %8064 = vpow2.f32 %v2738_v17  ;;  %v2719_v8 = vsub.f32 %v9942_v18, %v2703_v22 }
 0x4f4   :  { %v2697_v28 = vpop.xlane.xlu1 %2696  ;;  %2760 = vadd.xlane.f32.xlu1 %v10090_v15  ;;  %2764 = vadd.xlane.f32.xlu0 %v10088_v12  ;;  %v10096_v41 = vpop.eup %8054 }
 0x4f5   :  { %v2716_v57 = vsub.f32 %v9940_v5, %v2697_v28  ;;  %v10098_v61 = vpop.eup %8056  ;;  %8066 = vpow2.f32 %v2748_v62  ;;  %v2750_v44 = vmul.f32 1.442695, %v2719_v8 }
 0x4f6   :  { %v2699_v48 = vpop.xlane.xlu0 %2698 }
 0x4f7   :  { %v2744_v19 = vmul.f32 1.442695, %v2716_v57  ;;  %v2717_v31 = vsub.f32 %v9947_v24, %v2699_v48  ;;  %v10103_v16 = vpop.eup %8058 }
 0x4f8   :  { %2766 = vadd.xlane.f32.xlu1 %v10096_v41  ;;  %2762 = vadd.xlane.f32.xlu0 %v10098_v61 }
 0x4f9   :  { %8068 = vpow2.f32 %v2744_v19  ;;  %v2746_v5 = vmul.f32 1.442695, %v2717_v31 }
 0x4fa   :  { %8070 = vpow2.f32 %v2750_v44 }
 0x4fb   :  { %v10105_v18 = vpop.eup %8060  ;;  %8072 = vpow2.f32 %v2746_v5 }
 0x4fc   :  { %2768 = vadd.xlane.f32.xlu1 %v10105_v18  ;;  %2772 = vadd.xlane.f32.xlu0 %v10103_v16  ;;  %v10109_v49 = vpop.eup %8062 }
 0x4fd   :  { %v10111_v3 = vpop.eup %8064 }
 0x4ff   :  { %v10115_v24 = vpop.eup %8066 }
 0x500   :  { %2774 = vadd.xlane.f32.xlu1 %v10109_v49  ;;  %2770 = vadd.xlane.f32.xlu0 %v10111_v3  ;;  %11830 = vst [vmem:[#allocation122_spill] sm:$0xff] %v10115_v24 }
 0x503   :  { %v10117_v60 = vpop.eup %8068  ;;  %v2299_v59 = vpop.xlane.xlu1 %2298 }
 0x504   :  { %11831 = vst [vmem:[#allocation123_spill] sm:$0xff] %v10117_v60  ;;  %2776 = vadd.xlane.f32.xlu1 %v10117_v60  ;;  %2780 = vadd.xlane.f32.xlu0 %v10115_v24  ;;  %v10121_v14 = vpop.eup %8070 }
 0x505   :  { %v10124_v35 = vpop.eup %8072 }
 0x506   :  { %11832 = vst [vmem:[#allocation124_spill] sm:$0xff] %v10124_v35 }
 0x507   :  { %v2295_v38 = vpop.xlane.xlu1 %2294 }
 0x508   :  { %2782 = vadd.xlane.f32.xlu0 %v10121_v14 }
 0x50b   :  { %v2301_v17 = vpop.xlane.xlu0 %2300 }
 0x50c   :  { %v2307_v36 = vpop.xlane.xlu1 %2306  ;;  %2778 = vadd.xlane.f32.xlu0 %v10124_v35  ;;  %8074 = vrcp.f32 %v2301_v17 }
 0x50d   :  { %8076 = vrcp.f32 %v2295_v38 }
 0x50e   :  { %8078 = vrcp.f32 %v2299_v59 }
 0x50f   :  { %v2297_v22 = vpop.xlane.xlu0 %2296 }
 0x510   :  { %v2303_v62 = vpop.xlane.xlu1 %2302  ;;  %8080 = vrcp.f32 %v2297_v22 }
 0x513   :  { %v2309_v28 = vpop.xlane.xlu0 %2308 }
 0x514   :  { %v2315_v8 = vpop.xlane.xlu1 %2314  ;;  %8082 = vrcp.f32 %v2309_v28 }
 0x515   :  { %3506 = vrot.lane.b32.xlu1 %v9357_v25, %s8601_s5  ;;  %8084 = vrcp.f32 %v2303_v62 }
 0x516   :  { %v8075_v57 = vpop.eup %8074  ;;  %8086 = vrcp.f32 %v2307_v36 }
 0x517   :  { %v2305_v48 = vpop.xlane.xlu0 %2304  ;;  %v8077_v19 = vpop.eup %8076  ;;  %v2345_v59 = vmul.f32 %v8075_v57, %v9968_v51 }
 0x518   :  { %v2311_v44 = vpop.xlane.xlu1 %2310  ;;  %8088 = vrcp.f32 %v2305_v48  ;;  %v8079_v31 = vpop.eup %8078  ;;  %v2342_v17 = vmul.f32 %v8077_v19, %v9963_v56 }
 0x519   :  { %v2344_v28 = vmul.f32 %v8079_v31, %v9958_v29 }
 0x51a   :  { %v8081_v5 = vpop.eup %8080 }
 0x51b   :  { %v2317_v38 = vpop.xlane.xlu0 %2316  ;;  %v2343_v22 = vmul.f32 %v8081_v5, %v9975_v58  ;;  %v2359_v62 = vpack.c.bf16 %v2345_v59, %v2344_v28 }
 0x51c   :  { %v3208_v24 = vpop.xlane.xlu1 %3207  ;;  %8090 = vrcp.f32 %v2317_v38 }
 0x51d   :  { %v3237_v25 = vsub.f32 %v9994_v9, %v3208_v24  ;;  %v2358_v36 = vpack.c.bf16 %v2343_v22, %v2342_v17  ;;  %8092 = vrcp.f32 %v2311_v44 }
 0x51e   :  { %v8083_v35 = vpop.eup %8082  ;;  %8094 = vrcp.f32 %v2315_v8 }
 0x51f   :  { %v3255_v48 = vmul.f32 1.442695, %v3237_v25  ;;  %7361 = vmatprep.mubr.bf16.mxu1 %v2358_v36  ;;  %v2313_v60 = vpop.xlane.xlu0 %2312  ;;  %v8085_v51 = vpop.eup %8084  ;;  %v2349_v9 = vmul.f32 %v8083_v35, %v9982_v50 }
 0x520   :  { %8096 = vrcp.f32 %v2313_v60  ;;  %v3204_v57 = vpop.xlane.xlu1 %3203  ;;  %7362 = vmatmul.mubr.bf16.vlgmr.msra.gmra.mrb[208].mxu1 %v2359_v62  ;;  %v8087_v56 = vpop.eup %8086  ;;  %v2346_v19 = vmul.f32 %v8085_v51, %v9977_v13 }
 0x521   :  { %8098 = vpow2.f32 %v3255_v48  ;;  %v3235_v29 = vsub.f32 %v9998_v30, %v3204_v57  ;;  %7410 = vmatpush3.bf16.msra.mxu1 %v9813_v7  ;;  %v2348_v5 = vmul.f32 %v8087_v56, %v9970_v53 }
 0x522   :  { %v8089_v58 = vpop.eup %8088  ;;  %7411 = vmatprep.subr.bf16.mxu1 %v9911_v10 }
 0x523   :  { %v3251_v24 = vmul.f32 1.442695, %v3235_v29  ;;  %v3210_v8 = vpop.xlane.xlu0 %3209  ;;  %v2347_v44 = vmul.f32 %v8089_v58, %v9989_v46  ;;  %v2361_v59 = vpack.c.bf16 %v2349_v9, %v2348_v5 }
 0x524   :  { %v2323_v60 = vpop.xlane.xlu1 %2322  ;;  %v3238_v31 = vsub.f32 %v10000_v11, %v3210_v8 }
 0x525   :  { %8100 = vpow2.f32 %v3251_v24  ;;  %7412 = vmatpush3.bf16.msra.mxu1 %v9911_v10  ;;  %v2360_v7 = vpack.c.bf16 %v2347_v44, %v2346_v19 }
 0x526   :  { %v3257_v30 = vmul.f32 1.442695, %v3238_v31  ;;  %7413 = vmatprep.subr.bf16.mxu1 %v9915_v52  ;;  %v8091_v50 = vpop.eup %8090 }
 0x527   :  { %7365 = vmatprep.mubr.bf16.mxu1 %v2360_v7  ;;  %v3206_v35 = vpop.xlane.xlu0 %3205  ;;  %v8093_v38 = vpop.eup %8092  ;;  %v2353_v10 = vmul.f32 %v8091_v50, %v10002_v6 }
 0x528   :  { %8102 = vpow2.f32 %v3257_v30  ;;  %v2319_v13 = vpop.xlane.xlu1 %2318  ;;  %v3236_v46 = vsub.f32 %v10004_v1, %v3206_v35  ;;  %7366 = vmatmul.mubr.bf16.gmra.mrb[212].mxu1 %v2361_v59  ;;  %v8095_v11 = vpop.eup %8094  ;;  %v2350_v25 = vmul.f32 %v8093_v38, %v9991_v37  ;;  %v11834_v38 = vld [vmem:[#allocation117_spill] sm:$0xff] }
 0x529   :  { %7414 = vmatpush3.bf16.msra.mxu1 %v9915_v52  ;;  %v2352_v52 = vmul.f32 %v8095_v11, %v9984_v23 }
 0x52a   :  { %v8097_v53 = vpop.eup %8096  ;;  %v3253_v17 = vmul.f32 1.442695, %v3236_v46  ;;  %7415 = vmatprep.subr.bf16.mxu1 %v9924_v27 }
 0x52b   :  { %v10148_v22 = vpop.eup %8098  ;;  %v2325_v28 = vpop.xlane.xlu0 %2324  ;;  %v2351_v36 = vmul.f32 %v8097_v53, %v10009_v55  ;;  %v2363_v6 = vpack.c.bf16 %v2353_v10, %v2352_v52  ;;  %v11835_v53 = vld [vmem:[#allocation121_spill] sm:$0xff] }
 0x52c   :  { %8104 = vpow2.f32 %v3253_v17  ;;  %v10152_v62 = vpop.xlane.xlu1 %3215  ;;  %3287 = vadd.xlane.f32.xlu0 %v10148_v22 }
 0x52d   :  { %8106 = vrcp.f32 %v2325_v28  ;;  %7416 = vmatpush3.bf16.msra.mxu1 %v9924_v27  ;;  %v2362_v1 = vpack.c.bf16 %v2351_v36, %v2350_v25  ;;  %v11836_v25 = vld [vmem:[#allocation48_spill] sm:$0xff] }
 0x52e   :  { %8108 = vrcp.f32 %v2319_v13  ;;  %7417 = vmatprep.subr.bf16.mxu1 %v9929_v40 }
 0x52f   :  { %v10158_v48 = vpop.eup %8100  ;;  %8110 = vrcp.f32 %v2323_v60  ;;  %7369 = vmatprep.mubr.bf16.mxu1 %v2362_v1  ;;  %v2321_v37 = vpop.xlane.xlu0 %2320 }
 0x530   :  { %8112 = vrcp.f32 %v2321_v37  ;;  %v3212_v55 = vpop.xlane.xlu1 %3211  ;;  %3283 = vadd.xlane.f32.xlu0 %v10158_v48  ;;  %7370 = vmatmul.mubr.bf16.gmra.mrb[216].mxu1 %v2363_v6  ;;  %v11837_v6 = vld [vmem:[#allocation114_spill] sm:$0xff] }
 0x531   :  { %v3239_v23 = vsub.f32 %v10015_v21, %v3212_v55  ;;  %7418 = vmatpush3.bf16.msra.mxu1 %v9929_v40  ;;  %v3241_v37 = vsub.f32 %v11837_v6, %v10152_v62 }
 0x532   :  { %v10163_v27 = vpop.eup %8102  ;;  %7419 = vmatprep.subr.bf16.mxu1 %v9932_v34 }
 0x533   :  { %v3259_v51 = vmul.f32 1.442695, %v3239_v23  ;;  %v3218_v57 = vpop.xlane.xlu0 %3217  ;;  %v3263_v23 = vmul.f32 1.442695, %v3241_v37 }
 0x534   :  { %v3242_v56 = vsub.f32 %v10017_v63, %v3218_v57  ;;  %3289 = vadd.xlane.f32.xlu0 %v10163_v27  ;;  %v3232_v55 = vpop.xlane.xlu1 %3231 }
 0x535   :  { %8114 = vpow2.f32 %v3259_v51  ;;  %7420 = vmatpush3.bf16.msra.mxu1 %v9932_v34  ;;  %v11838_v51 = vld [vmem:[#allocation115_spill] sm:$0xff] }
 0x536   :  { %v10169_v29 = vpop.eup %8104  ;;  %v3265_v58 = vmul.f32 1.442695, %v3242_v56  ;;  %7421 = vmatprep.subr.bf16.mxu1 %v9935_v54 }
 0x537   :  { %v8107_v21 = vpop.eup %8106  ;;  %v3214_v40 = vpop.xlane.xlu0 %3213 }
 0x538   :  { %v8109_v9 = vpop.eup %8108  ;;  %8116 = vpow2.f32 %v3265_v58  ;;  %3285 = vadd.xlane.f32.xlu0 %v10169_v29  ;;  %v2357_v8 = vmul.f32 %v8107_v21, %v10035_v42  ;;  %v3240_v57 = vsub.f32 %v11838_v51, %v3214_v40  ;;  %v3228_v56 = vpop.xlane.xlu1 %3227  ;;  %v11839_v58 = vld [vmem:[#allocation118_spill] sm:$0xff] }
 0x539   :  { %v8111_v24 = vpop.eup %8110  ;;  %7422 = vmatpush3.bf16.msra.mxu1 %v9935_v54  ;;  %v2354_v19 = vmul.f32 %v8109_v9, %v10025_v20  ;;  %v3249_v21 = vsub.f32 %v11839_v58, %v3232_v55 }
 0x53a   :  { %v8113_v63 = vpop.eup %8112  ;;  %7423 = vmatprep.subr.bf16.mxu1 %v9944_v43  ;;  %v2356_v31 = vmul.f32 %v8111_v24, %v10021_v2  ;;  %v3261_v9 = vmul.f32 1.442695, %v3240_v57 }
 0x53b   :  { %v3224_v34 = vpop.xlane.xlu0 %3223  ;;  %v2355_v44 = vmul.f32 %v8113_v63, %v10041_v0  ;;  %v3279_v24 = vmul.f32 1.442695, %v3249_v21  ;;  %v11840_v63 = vld [vmem:[#allocation119_spill] sm:$0xff] }
 0x53c   :  { %v3245_v60 = vsub.f32 %v10028_v33, %v3224_v34  ;;  %v2365_v54 = vpack.c.bf16 %v2357_v8, %v2356_v31  ;;  %v3247_v8 = vsub.f32 %v11840_v63, %v3228_v56  ;;  %v3234_v34 = vpop.xlane.xlu1 %3233  ;;  %v11842_v31 = vld [vmem:[#allocation50_spill] sm:$0xff] }
 0x53d   :  { %7424 = vmatpush3.bf16.msra.mxu1 %v9944_v43  ;;  %v2364_v5 = vpack.c.bf16 %v2355_v44, %v2354_v19  ;;  %v11833_v43 = vld [vmem:[#allocation116_spill] sm:$0xff] }
 0x53e   :  { %v3271_v7 = vmul.f32 1.442695, %v3245_v60  ;;  %7473 = vmatprep.subr.bf16.mxu1 %v9638_v45  ;;  %v3275_v19 = vmul.f32 1.442695, %v3247_v8  ;;  %v11841_v44 = vld [vmem:[#allocation120_spill] sm:$0xff] }
 0x53f   :  { %v10182_v30 = vpop.eup %8114  ;;  %7373 = vmatprep.mubr.bf16.mxu1 %v2364_v5  ;;  %v3220_v42 = vpop.xlane.xlu0 %3219  ;;  %v3250_v62 = vsub.f32 %v11841_v44, %v3234_v34 }
 0x540   :  { %8118 = vpow2.f32 %v3271_v7  ;;  %v3243_v20 = vsub.f32 %v10031_v32, %v3220_v42  ;;  %3291 = vadd.xlane.f32.xlu1 %v10182_v30  ;;  %7374 = vmatmul.mubr.bf16.gmra.mrb[220].mxu1 %v2365_v54  ;;  %v11843_v7 = vld [vmem:[#allocation44_spill] sm:$0xff]  ;;  %v11844_v42 = vld [vmem:[#allocation46_spill] sm:$0xff] }
 0x541   :  { %v3281_v40 = vmul.f32 1.442695, %v3250_v62 }
 0x542   :  { %v10186_v33 = vpop.eup %8116  ;;  %v3267_v2 = vmul.f32 1.442695, %v3243_v20 }
 0x543   :  { %v3226_v0 = vpop.xlane.xlu0 %3225 }
 0x544   :  { %8120 = vpow2.f32 %v3267_v2  ;;  %v3246_v59 = vsub.f32 %v11833_v43, %v3226_v0  ;;  %3297 = vadd.xlane.f32.xlu1 %v10186_v33  ;;  %v11845_v0 = vld [vmem:[#allocation49_spill] sm:$0xff] }
 0x546   :  { %v3273_v50 = vmul.f32 1.442695, %v3246_v59 }
 0x547   :  { %v3222_v35 = vpop.xlane.xlu0 %3221 }
 0x548   :  { %8122 = vpow2.f32 %v3273_v50  ;;  %v3244_v13 = vsub.f32 %v11834_v38, %v3222_v35  ;;  %v11846_v35 = vld [vmem:[#allocation53_spill] sm:$0xff] }
 0x54a   :  { %v10191_v46 = vpop.eup %8118  ;;  %v3269_v32 = vmul.f32 1.442695, %v3244_v13  ;;  %v11847_v13 = vld [vmem:[#allocation88_spill] sm:$0xff] }
 0x54b   :  { %3303 = vadd.xlane.f32.xlu1 %v10191_v46  ;;  %v3230_v11 = vpop.xlane.xlu0 %3229 }
 0x54c   :  { %8124 = vpow2.f32 %v3269_v32  ;;  %v3248_v17 = vsub.f32 %v11835_v53, %v3230_v11 }
 0x54e   :  { %v10195_v10 = vpop.eup %8120  ;;  %v3277_v28 = vmul.f32 1.442695, %v3248_v17  ;;  %3508 = vrot.lane.b32.xlu0 %v11836_v25, %s8601_s5 }
 0x54f   :  { %3299 = vadd.xlane.f32.xlu1 %v10195_v10 }
 0x550   :  { %8126 = vpow2.f32 %v3277_v28 }
 0x551   :  { %8128 = vpow2.f32 %v3263_v23 }
 0x552   :  { %v10200_v36 = vpop.eup %8122  ;;  %8130 = vpow2.f32 %v3261_v9 }
 0x553   :  { %3305 = vadd.xlane.f32.xlu1 %v10200_v36  ;;  %8132 = vpow2.f32 %v3279_v24 }
 0x554   :  { %8134 = vpow2.f32 %v3275_v19 }
 0x555   :  { %8136 = vpow2.f32 %v3281_v40 }
 0x556   :  { %v10203_v52 = vpop.eup %8124 }
 0x557   :  { %3301 = vadd.xlane.f32.xlu1 %v10203_v52 }
 0x55a   :  { %v10206_v1 = vpop.eup %8126 }
 0x55b   :  { %3309 = vadd.xlane.f32.xlu1 %v10206_v1  ;;  %v10215_v60 = vpop.eup %8128 }
 0x55c   :  { %v10220_v5 = vpop.eup %8130 }
 0x55d   :  { %v10225_v54 = vpop.eup %8132 }
 0x55e   :  { %v10230_v2 = vpop.eup %8134 }
 0x55f   :  { %v10235_v50 = vpop.eup %8136 }
 0x56c   :  { %3510 = vrot.lane.b32.xlu1 %v11842_v31, %s8601_s5  ;;  %v11848_v31 = vld [vmem:[#allocation52_spill] sm:$0xff] }
 0x56d   :  { %3295 = vadd.xlane.f32.xlu0 %v10215_v60 }
 0x570   :  { %3476 = vrot.lane.b32.xlu1 %v11843_v7, %s8601_s5  ;;  %v11849_v7 = vld [vmem:[#allocation89_spill] sm:$0xff] }
 0x571   :  { %3293 = vadd.xlane.f32.xlu0 %v10220_v5 }
 0x574   :  { %3480 = vrot.lane.b32.xlu1 %v11844_v42, %s8601_s5 }
 0x575   :  { %3311 = vadd.xlane.f32.xlu0 %v10225_v54  ;;  %v2757_v20 = vpop.xlane.xlu0 %2756 }
 0x578   :  { %3484 = vrot.lane.b32.xlu1 %v11845_v0, %s8601_s5 }
 0x579   :  { %3307 = vadd.xlane.f32.xlu0 %v10230_v2  ;;  %v2753_v43 = vpop.xlane.xlu1 %2752  ;;  %v2759_v59 = vpop.xlane.xlu0 %2758 }
 0x57a   :  { %8138 = vrcp.f32 %v2759_v59  ;;  %v11851_v59 = vld [vmem:[#allocation90_spill] sm:$0xff] }
 0x57b   :  { %8140 = vrcp.f32 %v2753_v43 }
 0x57c   :  { %3488 = vrot.lane.b32.xlu1 %v11846_v35, %s8601_s5  ;;  %8142 = vrcp.f32 %v2757_v20 }
 0x57d   :  { %3313 = vadd.xlane.f32.xlu0 %v10235_v50  ;;  %v2755_v38 = vpop.xlane.xlu0 %2754 }
 0x57e   :  { %8144 = vrcp.f32 %v2755_v38 }
 0x580   :  { %3823 = vrot.lane.b32.xlu1 %v11847_v13, %s8601_s5 }
 0x581   :  { %v2761_v32 = vpop.xlane.xlu1 %2760  ;;  %v2765_v11 = vpop.xlane.xlu0 %2764 }
 0x582   :  { %8146 = vrcp.f32 %v2765_v11 }
 0x583   :  { %8148 = vrcp.f32 %v2761_v32 }
 0x584   :  { %v8139_v53 = vpop.eup %8138 }
 0x585   :  { %v2767_v17 = vpop.xlane.xlu1 %2766  ;;  %v2763_v28 = vpop.xlane.xlu0 %2762  ;;  %v2803_v55 = vmul.f32 %v8139_v53, %v10075_v26  ;;  %v11852_v53 = vld [vmem:[#allocation45_spill] sm:$0xff] }
 0x586   :  { %v8141_v25 = vpop.eup %8140  ;;  %8150 = vrcp.f32 %v2767_v17 }
 0x587   :  { %v8143_v6 = vpop.eup %8142  ;;  %8152 = vrcp.f32 %v2763_v28  ;;  %v2800_v57 = vmul.f32 %v8141_v25, %v10077_v39  ;;  %v11853_v25 = vld [vmem:[#allocation91_spill] sm:$0xff] }
 0x588   :  { %v8145_v37 = vpop.eup %8144  ;;  %v2802_v58 = vmul.f32 %v8143_v6, %v10070_v4  ;;  %v11854_v6 = vld [vmem:[#allocation47_spill] sm:$0xff] }
 0x589   :  { %v2769_v23 = vpop.xlane.xlu1 %2768  ;;  %v2773_v51 = vpop.xlane.xlu0 %2772  ;;  %v2801_v56 = vmul.f32 %v8145_v37, %v10083_v47  ;;  %v11856_v37 = vld [vmem:[#allocation51_spill] sm:$0xff] }
 0x58a   :  { %8154 = vrcp.f32 %v2773_v51  ;;  %v2817_v9 = vpack.c.bf16 %v2803_v55, %v2802_v58  ;;  %v11857_v51 = vld [vmem:[#allocation93_spill] sm:$0xff]  ;;  %v11859_v58 = vld [vmem:[#allocation124_spill] sm:$0xff] }
 0x58b   :  { %v2816_v21 = vpack.c.bf16 %v2801_v56, %v2800_v57  ;;  %8156 = vrcp.f32 %v2769_v23  ;;  %v11858_v57 = vld [vmem:[#allocation123_spill] sm:$0xff] }
 0x58c   :  { %v8147_v8 = vpop.eup %8146 }
 0x58d   :  { %v2775_v24 = vpop.xlane.xlu1 %2774  ;;  %7425 = vmatprep.mubr.bf16.mxu1 %v2816_v21  ;;  %v2771_v63 = vpop.xlane.xlu0 %2770  ;;  %v2806_v4 = vmul.f32 %v8147_v8, %v10088_v12 }
 0x58e   :  { %8158 = vrcp.f32 %v2775_v24  ;;  %7426 = vmatmul.mubr.bf16.vlgmr.msra.gmra.mrb[224].mxu1 %v2817_v9  ;;  %v8149_v34 = vpop.eup %8148  ;;  %v11860_v9 = vld [vmem:[#allocation122_spill] sm:$0xff] }
 0x58f   :  { %8160 = vrcp.f32 %v2771_v63  ;;  %7474 = vmatpush3.bf16.msra.mxu1 %v9638_v45  ;;  %v2804_v44 = vmul.f32 %v8149_v34, %v10090_v15  ;;  %v11861_v63 = vld [vmem:[#allocation55_spill] sm:$0xff] }
 0x590   :  { %v8151_v26 = vpop.eup %8150  ;;  %7475 = vmatprep.subr.bf16.mxu1 %v11847_v13 }
 0x591   :  { %v8153_v39 = vpop.eup %8152  ;;  %v2781_v47 = vpop.xlane.xlu0 %2780  ;;  %v2807_v19 = vmul.f32 %v8151_v26, %v10096_v41  ;;  %v11850_v41 = vld [vmem:[#allocation54_spill] sm:$0xff] }
 0x592   :  { %v2805_v62 = vmul.f32 %v8153_v39, %v10098_v61  ;;  %v2777_v20 = vpop.xlane.xlu1 %2776  ;;  %v11862_v26 = vld [vmem:[#allocation94_spill] sm:$0xff] }
 0x593   :  { %3512 = vrot.lane.b32.xlu0 %v11848_v31, %s8601_s5  ;;  %7476 = vmatpush3.bf16.msra.mxu1 %v11847_v13  ;;  %v2819_v40 = vpack.c.bf16 %v2807_v19, %v2806_v4 }
 0x594   :  { %7477 = vmatprep.subr.bf16.mxu1 %v11849_v7  ;;  %v2818_v42 = vpack.c.bf16 %v2805_v62, %v2804_v44  ;;  %v8155_v43 = vpop.eup %8154 }
 0x595   :  { %v2783_v0 = vpop.xlane.xlu0 %2782  ;;  %v8157_v12 = vpop.eup %8156  ;;  %v2810_v38 = vmul.f32 %v8155_v43, %v10103_v16 }
 0x596   :  { %7429 = vmatprep.mubr.bf16.mxu1 %v2818_v42  ;;  %8162 = vrcp.f32 %v2783_v0  ;;  %v2808_v32 = vmul.f32 %v8157_v12, %v10105_v18  ;;  %v11855_v18 = vld [vmem:[#allocation92_spill] sm:$0xff]  ;;  %v3507_v44 = vpop.permute.xlu1 %3506 }
 0x597   :  { %3514 = vrot.lane.b32.xlu0 %v11850_v41, %s8601_s5  ;;  %7430 = vmatmul.mubr.bf16.gmra.mrb[228].mxu1 %v2819_v40  ;;  %8164 = vrcp.f32 %v2777_v20 }
 0x598   :  { %v8159_v15 = vpop.eup %8158  ;;  %7478 = vmatpush3.bf16.msra.mxu1 %v11849_v7  ;;  %8166 = vrcp.f32 %v2781_v47 }
 0x599   :  { %v8161_v61 = vpop.eup %8160  ;;  %7479 = vmatprep.subr.bf16.mxu1 %v11851_v59  ;;  %v2779_v35 = vpop.xlane.xlu0 %2778  ;;  %v2811_v13 = vmul.f32 %v8159_v15, %v10109_v49 }
 0x59a   :  { %8168 = vrcp.f32 %v2779_v35  ;;  %v2809_v11 = vmul.f32 %v8161_v61, %v10111_v3  ;;  %v11864_v35 = vld [vmem:[#allocation107_spill] sm:$0xff] }
 0x59b   :  { %3478 = vrot.lane.b32.xlu0 %v11852_v53, %s8601_s5  ;;  %v2821_v17 = vpack.c.bf16 %v2811_v13, %v2810_v38 }
 0x59c   :  { %7480 = vmatpush3.bf16.msra.mxu1 %v11851_v59  ;;  %v2820_v28 = vpack.c.bf16 %v2809_v11, %v2808_v32  ;;  %v3550_v11 = vsel %vm2068_vm1, %v3507_v44, 0 }
 0x59d   :  { %7481 = vmatprep.subr.bf16.mxu1 %v11853_v25 }
 0x59e   :  { %7433 = vmatprep.mubr.bf16.mxu1 %v2820_v28 }
 0x59f   :  { %3482 = vrot.lane.b32.xlu0 %v11854_v6, %s8601_s5  ;;  %7434 = vmatmul.mubr.bf16.gmra.mrb[232].mxu1 %v2821_v17 }
 0x5a0   :  { %7482 = vmatpush3.bf16.msra.mxu1 %v11853_v25  ;;  %v8163_v16 = vpop.eup %8162 }
 0x5a1   :  { %7483 = vmatprep.subr.bf16.mxu1 %v11855_v18  ;;  %v8165_v49 = vpop.eup %8164  ;;  %v2815_v23 = vmul.f32 %v8163_v16, %v10121_v14  ;;  %v11863_v14 = vld [vmem:[#allocation112_spill] sm:$0xff] }
 0x5a2   :  { %v8167_v3 = vpop.eup %8166  ;;  %v2812_v56 = vmul.f32 %v8165_v49, %v11858_v57  ;;  %v3541_v61 = vsel %vm2068_vm1, %v11863_v14, 0 }
 0x5a3   :  { %3486 = vrot.lane.b32.xlu0 %v11856_v37, %s8601_s5  ;;  %v2814_v24 = vmul.f32 %v8167_v3, %v11860_v9 }
 0x5a4   :  { %v8169_v55 = vpop.eup %8168  ;;  %7484 = vmatpush3.bf16.msra.mxu1 %v11855_v18 }
 0x5a5   :  { %7485 = vmatprep.subr.bf16.mxu1 %v11857_v51  ;;  %v2813_v21 = vmul.f32 %v8169_v55, %v11859_v58  ;;  %v2823_v34 = vpack.c.bf16 %v2815_v23, %v2814_v24 }
 0x5a7   :  { %3490 = vrot.lane.b32.xlu0 %v11861_v63, %s8601_s5  ;;  %v2822_v8 = vpack.c.bf16 %v2813_v21, %v2812_v56 }
 0x5a8   :  { %7486 = vmatpush3.bf16.msra.mxu1 %v11857_v51 }
 0x5a9   :  { %7487 = vmatprep.subr.bf16.mxu1 %v11862_v26  ;;  %7437 = vmatprep.mubr.bf16.mxu1 %v2822_v8 }
 0x5aa   :  { %7438 = vmatmul.mubr.bf16.gmra.mrb[236].mxu1 %v2823_v34 }
 0x5ab   :  { %3821 = vrot.lane.b32.xlu0 %v9638_v45, %s8601_s5 }
 0x5ac   :  { %7488 = vmatpush3.bf16.msra.mxu1 %v11862_v26 }
 0x5ad   :  { %7851 = vmatprep.subr.msk.bf16.mxu1 %vm2068_vm1, %v11863_v14 }
 0x5af   :  { %3825 = vrot.lane.b32.xlu0 %v11849_v7, %s8601_s5 }
 0x5b9   :  { %v3288_v39 = vpop.xlane.xlu0 %3287 }
 0x5bd   :  { %v3284_v47 = vpop.xlane.xlu0 %3283 }
 0x5c1   :  { %v3290_v4 = vpop.xlane.xlu0 %3289 }
 0x5c2   :  { %8170 = vrcp.f32 %v3290_v4 }
 0x5c3   :  { %8172 = vrcp.f32 %v3284_v47 }
 0x5c4   :  { %8174 = vrcp.f32 %v3288_v39 }
 0x5c5   :  { %v3286_v19 = vpop.xlane.xlu0 %3285 }
 0x5c6   :  { %8176 = vrcp.f32 %v3286_v19 }
 0x5c9   :  { %v3509_v53 = vpop.permute.xlu0 %3508 }
 0x5ca   :  { %v3553_v49 = vsel %vm2068_vm1, %v3509_v53, 0 }
 0x5cc   :  { %v8171_v62 = vpop.eup %8170 }
 0x5cd   :  { %v8173_v31 = vpop.eup %8172  ;;  %v3292_v40 = vpop.xlane.xlu1 %3291  ;;  %v3334_v20 = vmul.f32 %v8171_v62, %v10163_v27 }
 0x5ce   :  { %v8175_v45 = vpop.eup %8174  ;;  %v3331_v0 = vmul.f32 %v8173_v31, %v10158_v48  ;;  %v3544_v48 = vsel %vm2068_vm1, %v11864_v35, 0  ;;  %8178 = vrcp.f32 %v3292_v40 }
 0x5cf   :  { %v3333_v43 = vmul.f32 %v8175_v45, %v10148_v22 }
 0x5d0   :  { %v8177_v42 = vpop.eup %8176 }
 0x5d1   :  { %v3332_v7 = vmul.f32 %v8177_v42, %v10169_v29  ;;  %v3348_v41 = vpack.c.bf16 %v3334_v20, %v3333_v43  ;;  %v3298_v15 = vpop.xlane.xlu1 %3297  ;;  %v11865_v29 = vld [vmem:[#allocation113_spill] sm:$0xff] }
 0x5d2   :  { %v3547_v13 = vsel %vm2068_vm1, %v11865_v29, 0  ;;  %8180 = vrcp.f32 %v3298_v15 }
 0x5d3   :  { %v3347_v12 = vpack.c.bf16 %v3332_v7, %v3331_v0 }
 0x5d5   :  { %7489 = vmatprep.mubr.bf16.mxu1 %v3347_v12 }
 0x5d6   :  { %7490 = vmatmul.mubr.bf16.vlgmr.msra.gmra.mrb[240].mxu1 %v3348_v41 }
 0x5d7   :  { %7506 = vmatpush3.bf16.xpose.msra.mxu1 %v3541_v61 }
 0x5d8   :  { %7852 = vmatprep.subr.msk.bf16.mxu1 %vm2068_vm1, %v11864_v35  ;;  %v3304_v38 = vpop.xlane.xlu1 %3303  ;;  %v8179_v8 = vpop.eup %8178 }
 0x5d9   :  { %v3335_v42 = vmul.f32 %v8179_v8, %v10182_v30  ;;  %v11871_v8 = vld [vmem:[#allocation105_spill] sm:$0xff] }
 0x5dc   :  { %v3300_v27 = vpop.xlane.xlu1 %3299  ;;  %v8181_v14 = vpop.eup %8180 }
 0x5dd   :  { %v3338_v7 = vmul.f32 %v8181_v14, %v10186_v33  ;;  %v11873_v14 = vld [vmem:[#allocation110_spill] sm:$0xff] }
 0x5df   :  { %7508 = vmatpush3.bf16.xpose.msra.mxu1 %v3544_v48 }
 0x5e0   :  { %7853 = vmatprep.subr.msk.bf16.mxu1 %vm2068_vm1, %v11865_v29  ;;  %v3306_v22 = vpop.xlane.xlu1 %3305 }
 0x5e4   :  { %v3302_v32 = vpop.xlane.xlu1 %3301 }
 0x5e7   :  { %7510 = vmatpush3.bf16.xpose.msra.mxu1 %v3547_v13 }
 0x5e8   :  { %7854 = vmatprep.subr.msk.bf16.mxu1 %vm2068_vm1, %v3507_v44  ;;  %v3310_v17 = vpop.xlane.xlu1 %3309 }
 0x5ec   :  { %v3511_v37 = vpop.permute.xlu1 %3510 }
 0x5ed   :  { %v3556_v58 = vsel %vm2068_vm1, %v3511_v37, 0 }
 0x5ef   :  { %7512 = vmatpush3.bf16.xpose.msra.mxu1 %v3550_v11 }
 0x5f0   :  { %7855 = vmatprep.subr.msk.bf16.mxu1 %vm2068_vm1, %v3509_v53 }
 0x5f3   :  { %v7363_v28 = vpop.f32.mrb[208].mxu1 }
 0x5f4   :  { %2465 = vst.msk [vmem:[#allocation2 + $0x20] sm:$0xff] %vm2068_vm1, %v7363_v28  ;;  %v2400_v6 = vpop.f32.mrb[209].mxu1 }
 0x5f5   :  { %2463 = vst.msk [vmem:[#allocation2] sm:$0xff] %vm2068_vm1, %v2400_v6  ;;  %v7364_v16 = vpop.f32.mrb[210].mxu1 }
 0x5f6   :  { %2466 = vst.msk [vmem:[#allocation2 + $0x30] sm:$0xff] %vm2068_vm1, %v7364_v16  ;;  %v2403_v3 = vpop.f32.mrb[211].mxu1 }
 0x5f7   :  { %7514 = vmatpush3.bf16.xpose.msra.mxu1 %v3553_v49  ;;  %2464 = vst.msk [vmem:[#allocation2 + $0x10] sm:$0xff] %vm2068_vm1, %v2403_v3 }
 0x5f8   :  { %7856 = vmatprep.subr.msk.bf16.mxu1 %vm2068_vm1, %v3511_v37 }
 0x5fa   :  { %v3296_v55 = vpop.xlane.xlu0 %3295 }
 0x5fb   :  { %v7367_v23 = vpop.f32.mrb[212].mxu1  ;;  %8182 = vrcp.f32 %v3296_v55 }
 0x5fc   :  { %2469 = vst.msk [vmem:[#allocation2 + $0x60] sm:$0xff] %vm2068_vm1, %v7367_v23  ;;  %v2416_v57 = vpop.f32.mrb[213].mxu1  ;;  %8184 = vrcp.f32 %v3302_v32 }
 0x5fd   :  { %2467 = vst.msk [vmem:[#allocation2 + $0x40] sm:$0xff] %vm2068_vm1, %v2416_v57  ;;  %v7368_v56 = vpop.f32.mrb[214].mxu1  ;;  %8186 = vrcp.f32 %v3300_v27 }
 0x5fe   :  { %2470 = vst.msk [vmem:[#allocation2 + $0x70] sm:$0xff] %vm2068_vm1, %v7368_v56  ;;  %v3294_v21 = vpop.xlane.xlu0 %3293  ;;  %v2419_v9 = vpop.f32.mrb[215].mxu1 }
 0x5ff   :  { %7516 = vmatpush3.bf16.xpose.msra.mxu1 %v3556_v58  ;;  %8188 = vrcp.f32 %v3294_v21  ;;  %2468 = vst.msk [vmem:[#allocation2 + $0x50] sm:$0xff] %vm2068_vm1, %v2419_v9  ;;  %v11867_v21 = vld [vmem:[#allocation97_spill] sm:$0xff]  ;;  %v11868_v9 = vld [vmem:[#allocation99_spill] sm:$0xff] }
 0x600   :  { %8190 = vrcp.f32 %v3306_v22 }
 0x601   :  { %8192 = vrcp.f32 %v3304_v38 }
 0x602   :  { %v3312_v24 = vpop.xlane.xlu0 %3311  ;;  %8194 = vrcp.f32 %v3310_v17 }
 0x603   :  { %v7371_v63 = vpop.f32.mrb[216].mxu1 }
 0x604   :  { %2473 = vst.msk [vmem:[#allocation2 + $0xa0] sm:$0xff] %vm2068_vm1, %v7371_v63  ;;  %v2432_v34 = vpop.f32.mrb[217].mxu1  ;;  %v11870_v63 = vld [vmem:[#allocation103_spill] sm:$0xff] }
 0x605   :  { %2471 = vst.msk [vmem:[#allocation2 + $0x80] sm:$0xff] %vm2068_vm1, %v2432_v34  ;;  %v7372_v39 = vpop.f32.mrb[218].mxu1  ;;  %v8183_v47 = vpop.eup %8182  ;;  %v11872_v34 = vld [vmem:[#allocation108_spill] sm:$0xff] }
 0x606   :  { %2474 = vst.msk [vmem:[#allocation2 + $0xb0] sm:$0xff] %vm2068_vm1, %v7372_v39  ;;  %v3308_v4 = vpop.xlane.xlu0 %3307  ;;  %v2435_v19 = vpop.f32.mrb[219].mxu1  ;;  %v3337_v45 = vmul.f32 %v8183_v47, %v10215_v60 }
 0x607   :  { %v8185_v44 = vpop.eup %8184  ;;  %8196 = vrcp.f32 %v3308_v4  ;;  %2472 = vst.msk [vmem:[#allocation2 + $0x90] sm:$0xff] %vm2068_vm1, %v2435_v19 }
 0x608   :  { %v8187_v62 = vpop.eup %8186  ;;  %v3340_v0 = vmul.f32 %v8185_v44, %v10203_v52  ;;  %v3350_v41 = vpack.c.bf16 %v3338_v7, %v3337_v45  ;;  %v3477_v52 = vpop.permute.xlu1 %3476 }
 0x609   :  { %v8189_v31 = vpop.eup %8188  ;;  %v3339_v12 = vmul.f32 %v8187_v62, %v10195_v10 }
 0x60a   :  { %v3314_v40 = vpop.xlane.xlu0 %3313  ;;  %v3336_v20 = vmul.f32 %v8189_v31, %v10220_v5  ;;  %v8191_v15 = vpop.eup %8190 }
 0x60b   :  { %8198 = vrcp.f32 %v3314_v40  ;;  %v3351_v35 = vpack.c.bf16 %v3340_v0, %v3339_v12  ;;  %v8193_v60 = vpop.eup %8192  ;;  %v3342_v38 = vmul.f32 %v8191_v15, %v10200_v36 }
 0x60c   :  { %v3349_v43 = vpack.c.bf16 %v3336_v20, %v3335_v42  ;;  %8200 = vrcp.f32 %v3312_v24  ;;  %v8195_v5 = vpop.eup %8194  ;;  %v3341_v29 = vmul.f32 %v8193_v60, %v10191_v46  ;;  %v3481_v28 = vpop.permute.xlu1 %3480  ;;  %v11869_v24 = vld [vmem:[#allocation101_spill] sm:$0xff] }
 0x60d   :  { %v3344_v13 = vmul.f32 %v8195_v5, %v10206_v1  ;;  %v11866_v1 = vld [vmem:[#allocation95_spill] sm:$0xff] }
 0x60e   :  { %7493 = vmatprep.mubr.bf16.mxu1 %v3349_v43  ;;  %v3513_v61 = vpop.permute.xlu0 %3512  ;;  %v3352_v11 = vpack.c.bf16 %v3342_v38, %v3341_v29 }
 0x60f   :  { %7494 = vmatmul.mubr.bf16.gmra.mrb[244].mxu1 %v3350_v41  ;;  %7857 = vmatprep.subr.msk.bf16.mxu1 %vm2068_vm1, %v3513_v61  ;;  %v3559_v30 = vsel %vm2068_vm1, %v3513_v61, 0 }
 0x610   :  { %7497 = vmatprep.mubr.bf16.mxu1 %v3351_v35  ;;  %7518 = vmatpush3.bf16.xpose.msra.mxu1 %v3559_v30  ;;  %v3485_v37 = vpop.permute.xlu1 %3484 }
 0x611   :  { %v8197_v33 = vpop.eup %8196 }
 0x612   :  { %v3515_v10 = vpop.permute.xlu0 %3514  ;;  %v3343_v48 = vmul.f32 %v8197_v33, %v10230_v2 }
 0x613   :  { %7858 = vmatprep.subr.msk.bf16.mxu1 %vm2068_vm1, %v3515_v10  ;;  %v7375_v27 = vpop.f32.mrb[220].mxu1  ;;  %v3562_v46 = vsel %vm2068_vm1, %v3515_v10, 0 }
 0x614   :  { %2477 = vst.msk [vmem:[#allocation2 + $0xe0] sm:$0xff] %vm2068_vm1, %v7375_v27  ;;  %v2448_v22 = vpop.f32.mrb[221].mxu1  ;;  %v3353_v2 = vpack.c.bf16 %v3344_v13, %v3343_v48  ;;  %v3489_v56 = vpop.permute.xlu1 %3488 }
 0x615   :  { %2475 = vst.msk [vmem:[#allocation2 + $0xc0] sm:$0xff] %vm2068_vm1, %v2448_v22  ;;  %v7376_v32 = vpop.f32.mrb[222].mxu1  ;;  %v8199_v53 = vpop.eup %8198 }
 0x616   :  { %2478 = vst.msk [vmem:[#allocation2 + $0xf0] sm:$0xff] %vm2068_vm1, %v7376_v32  ;;  %v3479_v36 = vpop.permute.xlu0 %3478  ;;  %v2451_v17 = vpop.f32.mrb[223].mxu1  ;;  %v3346_v16 = vmul.f32 %v8199_v53, %v10235_v50 }
 0x617   :  { %2476 = vst.msk [vmem:[#allocation2 + $0xd0] sm:$0xff] %vm2068_vm1, %v2451_v17  ;;  %7498 = vmatmul.mubr.bf16.gmra.mrb[248].mxu1 %v3352_v11  ;;  %v8201_v6 = vpop.eup %8200 }
 0x618   :  { %7501 = vmatprep.mubr.bf16.mxu1 %v3353_v2  ;;  %7520 = vmatpush3.bf16.xpose.msra.mxu1 %v3562_v46  ;;  %v3345_v3 = vmul.f32 %v8201_v6, %v10225_v54  ;;  %v3824_v50 = vpop.permute.xlu1 %3823 }
 0x619   :  { %7601 = vmatprep.subr.bf16.mxu1 %v11866_v1 }
 0x61a   :  { %v3483_v49 = vpop.permute.xlu0 %3482  ;;  %v3354_v55 = vpack.c.bf16 %v3346_v16, %v3345_v3 }
 0x61e   :  { %v3487_v23 = vpop.permute.xlu0 %3486 }
 0x61f   :  { %7502 = vmatmul.mubr.bf16.gmra.mrb[252].mxu1 %v3354_v55 }
 0x620   :  { %7521 = vmatprep.mubr.msk.bf16.mxu1 %vm2068_vm1, %v3477_v52 }
 0x622   :  { %v3491_v57 = vpop.permute.xlu0 %3490 }
 0x626   :  { %v3822_v58 = vpop.permute.xlu0 %3821 }
 0x627   :  { %7522 = vmatmul.mubr.msk.bf16.vlgmr.msra.gmra.mrb[0].mxu1 %vm2068_vm1, %v3479_v36  ;;  %7537 = vmatprep.subr.bf16.mxu0 %v3822_v58 }
 0x628   :  { %7602 = vmatpush3.bf16.msra.mxu1 %v11866_v1  ;;  %7525 = vmatprep.mubr.msk.bf16.mxu1 %vm2068_vm1, %v3481_v28 }
 0x629   :  { %7538 = vmatpush3.bf16.msra.mxu0 %v3822_v58  ;;  %7603 = vmatprep.subr.bf16.mxu1 %v11867_v21 }
 0x62a   :  { %7539 = vmatprep.subr.bf16.mxu0 %v3824_v50  ;;  %v3826_v54 = vpop.permute.xlu0 %3825 }
 0x62c   :  { %7604 = vmatpush3.bf16.msra.mxu1 %v11867_v21 }
 0x62d   :  { %7540 = vmatpush3.bf16.msra.mxu0 %v3824_v50  ;;  %7605 = vmatprep.subr.bf16.mxu1 %v11868_v9 }
 0x62e   :  { %7541 = vmatprep.subr.bf16.mxu0 %v3826_v54 }
 0x62f   :  { %7526 = vmatmul.mubr.msk.bf16.gmra.mrb[4].mxu1 %vm2068_vm1, %v3483_v49 }
 0x630   :  { %7606 = vmatpush3.bf16.msra.mxu1 %v11868_v9  ;;  %7529 = vmatprep.mubr.msk.bf16.mxu1 %vm2068_vm1, %v3485_v37 }
 0x631   :  { %7542 = vmatpush3.bf16.msra.mxu0 %v3826_v54  ;;  %7607 = vmatprep.subr.bf16.mxu1 %v11869_v24 }
 0x634   :  { %7608 = vmatpush3.bf16.msra.mxu1 %v11869_v24 }
 0x635   :  { %7609 = vmatprep.subr.bf16.mxu1 %v11870_v63 }
 0x637   :  { %7530 = vmatmul.mubr.msk.bf16.gmra.mrb[8].mxu1 %vm2068_vm1, %v3487_v23 }
 0x638   :  { %7610 = vmatpush3.bf16.msra.mxu1 %v11870_v63  ;;  %7533 = vmatprep.mubr.msk.bf16.mxu1 %vm2068_vm1, %v3489_v56 }
 0x639   :  { %7611 = vmatprep.subr.bf16.mxu1 %v11871_v8 }
 0x63c   :  { %7612 = vmatpush3.bf16.msra.mxu1 %v11871_v8 }
 0x63d   :  { %7613 = vmatprep.subr.bf16.mxu1 %v11872_v34 }
 0x63f   :  { %7534 = vmatmul.mubr.msk.bf16.gmra.mrb[12].mxu1 %vm2068_vm1, %v3491_v57 }
 0x640   :  { %7614 = vmatpush3.bf16.msra.mxu1 %v11872_v34 }
 0x641   :  { %7615 = vmatprep.subr.bf16.mxu1 %v11873_v14 }
 0x644   :  { %7616 = vmatpush3.bf16.msra.mxu1 %v11873_v14 }
 0x661   :  { %v10367_v39 = vpop.f32.mrb[224].mxu1 }
 0x662   :  { %v10369_v47 = vpop.f32.mrb[225].mxu1 }
 0x663   :  { %v10371_v4 = vpop.f32.mrb[226].mxu1 }
 0x664   :  { %v10373_v19 = vpop.f32.mrb[227].mxu1 }
 0x66a   :  { %v10375_v44 = vpop.f32.mrb[228].mxu1 }
 0x66b   :  { %11874 = vst [vmem:[#allocation116_spill] sm:$0xff] %v10375_v44  ;;  %v10377_v62 = vpop.f32.mrb[229].mxu1 }
 0x66c   :  { %11875 = vst [vmem:[#allocation117_spill] sm:$0xff] %v10377_v62  ;;  %v10379_v31 = vpop.f32.mrb[230].mxu1 }
 0x66d   :  { %11876 = vst [vmem:[#allocation121_spill] sm:$0xff] %v10379_v31  ;;  %v10381_v45 = vpop.f32.mrb[231].mxu1 }
 0x66e   :  { %11877 = vst [vmem:[#allocation48_spill] sm:$0xff] %v10381_v45 }
 0x672   :  { %v10383_v40 = vpop.f32.mrb[232].mxu1 }
 0x673   :  { %11878 = vst [vmem:[#allocation114_spill] sm:$0xff] %v10383_v40  ;;  %v10385_v42 = vpop.f32.mrb[233].mxu1 }
 0x674   :  { %11879 = vst [vmem:[#allocation115_spill] sm:$0xff] %v10385_v42  ;;  %v10387_v20 = vpop.f32.mrb[234].mxu1 }
 0x675   :  { %11880 = vst [vmem:[#allocation118_spill] sm:$0xff] %v10387_v20  ;;  %v10389_v0 = vpop.f32.mrb[235].mxu1 }
 0x676   :  { %11881 = vst [vmem:[#allocation119_spill] sm:$0xff] %v10389_v0 }
 0x67d   :  { %v10391_v7 = vpop.f32.mrb[236].mxu1 }
 0x67e   :  { %11882 = vst [vmem:[#allocation120_spill] sm:$0xff] %v10391_v7  ;;  %v10393_v43 = vpop.f32.mrb[237].mxu1 }
 0x67f   :  { %11883 = vst [vmem:[#allocation50_spill] sm:$0xff] %v10393_v43  ;;  %v10395_v12 = vpop.f32.mrb[238].mxu1 }
 0x680   :  { %11884 = vst [vmem:[#allocation44_spill] sm:$0xff] %v10395_v12  ;;  %v10397_v41 = vpop.f32.mrb[239].mxu1 }
 0x681   :  { %11885 = vst [vmem:[#allocation46_spill] sm:$0xff] %v10397_v41 }
 0x6a9   :  { %v7491_v15 = vpop.f32.mrb[240].mxu1 }
 0x6aa   :  { %3454 = vst.msk [vmem:[#allocation2 + $0x28] sm:$0xff] %vm2068_vm1, %v7491_v15  ;;  %v3389_v61 = vpop.f32.mrb[241].mxu1 }
 0x6ab   :  { %3452 = vst.msk [vmem:[#allocation2 + $0x8] sm:$0xff] %vm2068_vm1, %v3389_v61  ;;  %v7492_v35 = vpop.f32.mrb[242].mxu1 }
 0x6ac   :  { %3455 = vst.msk [vmem:[#allocation2 + $0x38] sm:$0xff] %vm2068_vm1, %v7492_v35  ;;  %v3392_v60 = vpop.f32.mrb[243].mxu1 }
 0x6ad   :  { %3453 = vst.msk [vmem:[#allocation2 + $0x18] sm:$0xff] %vm2068_vm1, %v3392_v60 }
 0x6e2   :  { %v7495_v30 = vpop.f32.mrb[244].mxu1 }
 0x6e3   :  { %3458 = vst.msk [vmem:[#allocation2 + $0x68] sm:$0xff] %vm2068_vm1, %v7495_v30  ;;  %v3405_v5 = vpop.f32.mrb[245].mxu1 }
 0x6e4   :  { %3456 = vst.msk [vmem:[#allocation2 + $0x48] sm:$0xff] %vm2068_vm1, %v3405_v5  ;;  %v7496_v33 = vpop.f32.mrb[246].mxu1 }
 0x6e5   :  { %3459 = vst.msk [vmem:[#allocation2 + $0x78] sm:$0xff] %vm2068_vm1, %v7496_v33  ;;  %v3408_v52 = vpop.f32.mrb[247].mxu1 }
 0x6e6   :  { %3457 = vst.msk [vmem:[#allocation2 + $0x58] sm:$0xff] %vm2068_vm1, %v3408_v52 }
 0x6ea   :  { %v7499_v38 = vpop.f32.mrb[248].mxu1 }
 0x6eb   :  { %3462 = vst.msk [vmem:[#allocation2 + $0xa8] sm:$0xff] %vm2068_vm1, %v7499_v38  ;;  %v3421_v10 = vpop.f32.mrb[249].mxu1 }
 0x6ec   :  { %3460 = vst.msk [vmem:[#allocation2 + $0x88] sm:$0xff] %vm2068_vm1, %v3421_v10  ;;  %v7500_v48 = vpop.f32.mrb[250].mxu1 }
 0x6ed   :  { %3463 = vst.msk [vmem:[#allocation2 + $0xb8] sm:$0xff] %vm2068_vm1, %v7500_v48  ;;  %v3424_v27 = vpop.f32.mrb[251].mxu1 }
 0x6ee   :  { %3461 = vst.msk [vmem:[#allocation2 + $0x98] sm:$0xff] %vm2068_vm1, %v3424_v27 }
 0x6f2   :  { %v7503_v29 = vpop.f32.mrb[252].mxu1 }
 0x6f3   :  { %3466 = vst.msk [vmem:[#allocation2 + $0xe8] sm:$0xff] %vm2068_vm1, %v7503_v29  ;;  %v3437_v22 = vpop.f32.mrb[253].mxu1 }
 0x6f4   :  { %3464 = vst.msk [vmem:[#allocation2 + $0xc8] sm:$0xff] %vm2068_vm1, %v3437_v22  ;;  %v7504_v13 = vpop.f32.mrb[254].mxu1 }
 0x6f5   :  { %3467 = vst.msk [vmem:[#allocation2 + $0xf8] sm:$0xff] %vm2068_vm1, %v7504_v13  ;;  %v3440_v32 = vpop.f32.mrb[255].mxu1 }
 0x6f6   :  { %3465 = vst.msk [vmem:[#allocation2 + $0xd8] sm:$0xff] %vm2068_vm1, %v3440_v32 }
 0x6fa   :  { %v7523_v11 = vpop.f32.mrb[0].mxu1 }
 0x6fb   :  { %3665 = vmax.xlane.f32.xlu0 %v7523_v11  ;;  %v3598_v53 = vpop.f32.mrb[1].mxu1 }
 0x6fc   :  { %3661 = vmax.xlane.f32.xlu1 %v3598_v53  ;;  %v7524_v36 = vpop.f32.mrb[2].mxu1 }
 0x6fd   :  { %v3601_v17 = vpop.f32.mrb[3].mxu1 }
 0x700   :  { %3667 = vmax.xlane.f32.xlu1 %v7524_v36 }
 0x702   :  { %v10415_v2 = vpop.f32.mrb[4].mxu1 }
 0x703   :  { %v3614_v28 = vpop.f32.mrb[5].mxu1 }
 0x704   :  { %v10417_v46 = vpop.f32.mrb[6].mxu1 }
 0x705   :  { %v10419_v6 = vpop.f32.mrb[7].mxu1 }
 0x70a   :  { %v10421_v16 = vpop.f32.mrb[8].mxu1 }
 0x70b   :  { %v10423_v49 = vpop.f32.mrb[9].mxu1 }
 0x70c   :  { %v10425_v3 = vpop.f32.mrb[10].mxu1 }
 0x70d   :  { %v10427_v37 = vpop.f32.mrb[11].mxu1 }
 0x711   :  { %3829 = vrot.lane.b32.xlu0 %v11853_v25, %s8601_s5  ;;  %3827 = vrot.lane.b32.xlu1 %v11851_v59, %s8601_s5 }
 0x712   :  { %v10433_v55 = vpop.f32.mrb[12].mxu1 }
 0x713   :  { %v10435_v23 = vpop.f32.mrb[13].mxu1 }
 0x714   :  { %v10437_v57 = vpop.f32.mrb[14].mxu1 }
 0x715   :  { %v10439_v56 = vpop.f32.mrb[15].mxu1 }
 0x730   :  { %3663 = vmax.xlane.f32.xlu0 %v3601_v17 }
 0x734   :  { %3673 = vmax.xlane.f32.xlu0 %v10415_v2 }
 0x735   :  { %3675 = vmax.xlane.f32.xlu1 %v10417_v46 }
 0x738   :  { %3669 = vmax.xlane.f32.xlu0 %v3614_v28 }
 0x739   :  { %3671 = vmax.xlane.f32.xlu1 %v10419_v6 }
 0x73c   :  { %3681 = vmax.xlane.f32.xlu0 %v10421_v16 }
 0x73d   :  { %3683 = vmax.xlane.f32.xlu1 %v10425_v3 }
 0x740   :  { %3677 = vmax.xlane.f32.xlu0 %v10423_v49 }
 0x741   :  { %3679 = vmax.xlane.f32.xlu1 %v10427_v37 }
 0x744   :  { %3689 = vmax.xlane.f32.xlu0 %v10433_v55 }
 0x745   :  { %3691 = vmax.xlane.f32.xlu1 %v10437_v57 }
 0x748   :  { %3685 = vmax.xlane.f32.xlu0 %v10435_v23 }
 0x749   :  { %3687 = vmax.xlane.f32.xlu1 %v10439_v56 }
 0x75e   :  { %3831 = vrot.lane.b32.xlu0 %v11855_v18, %s8601_s5 }
 0x788   :  { %v3666_v59 = vpop.xlane.xlu0 %3665 }
 0x789   :  { %v3695_v25 = vsub.f32 %v7523_v11, %v3666_v59  ;;  %v3662_v58 = vpop.xlane.xlu1 %3661 }
 0x78a   :  { %v3693_v50 = vsub.f32 %v3598_v53, %v3662_v58 }
 0x78b   :  { %v3713_v54 = vmul.f32 1.442695, %v3695_v25 }
 0x78c   :  { %v3709_v15 = vmul.f32 1.442695, %v3693_v50  ;;  %v3830_v5 = vpop.permute.xlu0 %3829 }
 0x78d   :  { %8202 = vpow2.f32 %v3713_v54  ;;  %v3668_v61 = vpop.xlane.xlu1 %3667 }
 0x78e   :  { %v3696_v35 = vsub.f32 %v7524_v36, %v3668_v61  ;;  %8204 = vpow2.f32 %v3709_v15 }
 0x790   :  { %v3715_v60 = vmul.f32 1.442695, %v3696_v35 }
 0x791   :  { %v3828_v30 = vpop.permute.xlu1 %3827 }
 0x792   :  { %7543 = vmatprep.subr.bf16.mxu0 %v3828_v30  ;;  %8206 = vpow2.f32 %v3715_v60 }
 0x793   :  { %7544 = vmatpush3.bf16.msra.mxu0 %v3828_v30 }
 0x794   :  { %7545 = vmatprep.subr.bf16.mxu0 %v3830_v5 }
 0x797   :  { %v10454_v33 = vpop.eup %8202  ;;  %7546 = vmatpush3.bf16.msra.mxu0 %v3830_v5 }
 0x798   :  { %3745 = vadd.xlane.f32.xlu1 %v10454_v33  ;;  %v10457_v18 = vpop.eup %8204 }
 0x79c   :  { %3741 = vadd.xlane.f32.xlu1 %v10457_v18  ;;  %v10460_v52 = vpop.eup %8206 }
 0x7a0   :  { %3747 = vadd.xlane.f32.xlu1 %v10460_v52 }
 0x7b1   :  { %3833 = vrot.lane.b32.xlu1 %v11857_v51, %s8601_s5 }
 0x7bd   :  { %v3664_v38 = vpop.xlane.xlu0 %3663 }
 0x7be   :  { %v3694_v10 = vsub.f32 %v3601_v17, %v3664_v38 }
 0x7c0   :  { %v3711_v48 = vmul.f32 1.442695, %v3694_v10 }
 0x7c1   :  { %v3674_v27 = vpop.xlane.xlu0 %3673 }
 0x7c2   :  { %8208 = vpow2.f32 %v3711_v48  ;;  %v3676_v29 = vpop.xlane.xlu1 %3675 }
 0x7c3   :  { %v3700_v13 = vsub.f32 %v10417_v46, %v3676_v29 }
 0x7c5   :  { %v3670_v22 = vpop.xlane.xlu0 %3669  ;;  %v3723_v59 = vmul.f32 1.442695, %v3700_v13 }
 0x7c6   :  { %v3697_v32 = vsub.f32 %v3614_v28, %v3670_v22  ;;  %v3672_v11 = vpop.xlane.xlu1 %3671 }
 0x7c7   :  { %v3698_v13 = vsub.f32 %v10419_v6, %v3672_v11 }
 0x7c8   :  { %v3717_v53 = vmul.f32 1.442695, %v3697_v32  ;;  %v3699_v32 = vsub.f32 %v10415_v2, %v3674_v27 }
 0x7c9   :  { %v3682_v36 = vpop.xlane.xlu0 %3681 }
 0x7ca   :  { %8210 = vpow2.f32 %v3717_v53  ;;  %v3684_v25 = vpop.xlane.xlu1 %3683  ;;  %v3719_v53 = vmul.f32 1.442695, %v3698_v13 }
 0x7cb   :  { %8212 = vpow2.f32 %v3723_v59  ;;  %v3704_v50 = vsub.f32 %v10425_v3, %v3684_v25  ;;  %v3721_v59 = vmul.f32 1.442695, %v3699_v32 }
 0x7cc   :  { %v10466_v58 = vpop.eup %8208 }
 0x7cd   :  { %3743 = vadd.xlane.f32.xlu0 %v10466_v58  ;;  %v3678_v51 = vpop.xlane.xlu0 %3677  ;;  %v3731_v61 = vmul.f32 1.442695, %v3704_v50 }
 0x7ce   :  { %v3680_v17 = vpop.xlane.xlu1 %3679  ;;  %v3701_v25 = vsub.f32 %v10423_v49, %v3678_v51 }
 0x7cf   :  { %v3702_v54 = vsub.f32 %v10427_v37, %v3680_v17 }
 0x7d0   :  { %v3725_v17 = vmul.f32 1.442695, %v3701_v25 }
 0x7d1   :  { %v3727_v15 = vmul.f32 1.442695, %v3702_v54  ;;  %v3690_v46 = vpop.xlane.xlu0 %3689 }
 0x7d2   :  { %v3692_v28 = vpop.xlane.xlu1 %3691  ;;  %v3707_v2 = vsub.f32 %v10433_v55, %v3690_v46  ;;  %v11886_v46 = vld [vmem:[#allocation57_spill] sm:$0xff] }
 0x7d3   :  { %8214 = vpow2.f32 %v3727_v15  ;;  %v3708_v5 = vsub.f32 %v10437_v57, %v3692_v28 }
 0x7d4   :  { %v10471_v35 = vpop.eup %8210  ;;  %8216 = vpow2.f32 %v3731_v61  ;;  %v3737_v49 = vmul.f32 1.442695, %v3707_v2  ;;  %v11890_v2 = vld [vmem:[#allocation73_spill] sm:$0xff] }
 0x7d5   :  { %3749 = vadd.xlane.f32.xlu1 %v10471_v35  ;;  %v3686_v60 = vpop.xlane.xlu0 %3685  ;;  %v10476_v10 = vpop.eup %8212  ;;  %v3739_v48 = vmul.f32 1.442695, %v3708_v5 }
 0x7d6   :  { %v3688_v30 = vpop.xlane.xlu1 %3687  ;;  %v3705_v54 = vsub.f32 %v10435_v23, %v3686_v60 }
 0x7d7   :  { %v3706_v38 = vsub.f32 %v10439_v56, %v3688_v30 }
 0x7d8   :  { %v3733_v6 = vmul.f32 1.442695, %v3705_v54 }
 0x7d9   :  { %v3735_v3 = vmul.f32 1.442695, %v3706_v38  ;;  %3755 = vadd.xlane.f32.xlu1 %v10476_v10  ;;  %v3832_v37 = vpop.permute.xlu0 %3831 }
 0x7da   :  { %7547 = vmatprep.subr.bf16.mxu0 %v3832_v37 }
 0x7db   :  { %8218 = vpow2.f32 %v3735_v3  ;;  %7548 = vmatpush3.bf16.msra.mxu0 %v3832_v37 }
 0x7dc   :  { %8220 = vpow2.f32 %v3739_v48 }
 0x7dd   :  { %v10479_v29 = vpop.eup %8214  ;;  %8222 = vpow2.f32 %v3719_v53 }
 0x7de   :  { %3759 = vadd.xlane.f32.xlu1 %v10479_v29  ;;  %v10482_v22 = vpop.eup %8216  ;;  %8224 = vpow2.f32 %v3721_v59 }
 0x7df   :  { %8226 = vpow2.f32 %v3725_v17  ;;  %v11887_v17 = vld [vmem:[#allocation61_spill] sm:$0xff] }
 0x7e2   :  { %3763 = vadd.xlane.f32.xlu1 %v10482_v22 }
 0x7e3   :  { %3835 = vrot.lane.b32.xlu0 %v11862_v26, %s8601_s5  ;;  %v3703_v26 = vsub.f32 %v10421_v16, %v3682_v36 }
 0x7e5   :  { %v10487_v57 = vpop.eup %8218  ;;  %v3729_v50 = vmul.f32 1.442695, %v3703_v26  ;;  %v4200_v26 = vsel %vm2068_vm1, %v11886_v46, 0 }
 0x7e6   :  { %3767 = vadd.xlane.f32.xlu1 %v10487_v57  ;;  %v10490_v56 = vpop.eup %8220 }
 0x7e7   :  { %v10498_v15 = vpop.eup %8222  ;;  %8228 = vpow2.f32 %v3729_v50 }
 0x7e8   :  { %v10502_v27 = vpop.eup %8224  ;;  %8230 = vpow2.f32 %v3733_v6 }
 0x7e9   :  { %v10505_v16 = vpop.eup %8226  ;;  %8232 = vpow2.f32 %v3737_v49  ;;  %v4212_v49 = vsel %vm2068_vm1, %v11890_v2, 0 }
 0x7ea   :  { %3771 = vadd.xlane.f32.xlu1 %v10490_v56 }
 0x7f1   :  { %v10508_v23 = vpop.eup %8228 }
 0x7f2   :  { %v10511_v11 = vpop.eup %8230 }
 0x7f3   :  { %v10514_v55 = vpop.eup %8232 }
 0x802   :  { %3751 = vadd.xlane.f32.xlu0 %v10498_v15 }
 0x806   :  { %3753 = vadd.xlane.f32.xlu0 %v10502_v27 }
 0x80a   :  { %3757 = vadd.xlane.f32.xlu0 %v10505_v16 }
 0x80e   :  { %3761 = vadd.xlane.f32.xlu0 %v10508_v23 }
 0x812   :  { %3765 = vadd.xlane.f32.xlu0 %v10511_v11 }
 0x816   :  { %3769 = vadd.xlane.f32.xlu0 %v10514_v55 }
 0x825   :  { %v3746_v36 = vpop.xlane.xlu1 %3745 }
 0x829   :  { %v3742_v51 = vpop.xlane.xlu1 %3741 }
 0x82c   :  { %4617 = vrot.lane.b32.xlu0 %v11886_v46, %s8601_s5 }
 0x82d   :  { %v3748_v28 = vpop.xlane.xlu1 %3747 }
 0x82e   :  { %8234 = vrcp.f32 %v3748_v28 }
 0x82f   :  { %8236 = vrcp.f32 %v3742_v51  ;;  %v11891_v51 = vld [vmem:[#allocation77_spill] sm:$0xff] }
 0x830   :  { %8238 = vrcp.f32 %v3746_v36 }
 0x831   :  { %v3834_v61 = vpop.permute.xlu1 %3833 }
 0x832   :  { %7549 = vmatprep.subr.bf16.mxu0 %v3834_v61 }
 0x833   :  { %7550 = vmatpush3.bf16.msra.mxu0 %v3834_v61  ;;  %v4215_v61 = vsel %vm2068_vm1, %v11891_v51, 0 }
 0x838   :  { %v8235_v5 = vpop.eup %8234 }
 0x839   :  { %v8237_v38 = vpop.eup %8236  ;;  %v3792_v48 = vmul.f32 %v8235_v5, %v10460_v52  ;;  %v4203_v52 = vsel %vm2068_vm1, %v11887_v17, 0 }
 0x83a   :  { %v8239_v3 = vpop.eup %8238  ;;  %v3789_v13 = vmul.f32 %v8237_v38, %v10457_v18  ;;  %v11888_v18 = vld [vmem:[#allocation65_spill] sm:$0xff] }
 0x83b   :  { %v3791_v53 = vmul.f32 %v8239_v3, %v10454_v33  ;;  %v4206_v33 = vsel %vm2068_vm1, %v11888_v18, 0 }
 0x83d   :  { %v3806_v25 = vpack.c.bf16 %v3792_v48, %v3791_v53 }
 0x85a   :  { %v3744_v60 = vpop.xlane.xlu0 %3743 }
 0x85b   :  { %8240 = vrcp.f32 %v3744_v60 }
 0x85e   :  { %v3836_v30 = vpop.permute.xlu0 %3835 }
 0x85f   :  { %7551 = vmatprep.subr.bf16.mxu0 %v3836_v30 }
 0x860   :  { %7552 = vmatpush3.bf16.msra.mxu0 %v3836_v30  ;;  %v11892_v30 = vld [vmem:[#allocation81_spill] sm:$0xff] }
 0x861   :  { %7859 = vmatprep.subr.msk.bf16.mxu0 %vm2068_vm1, %v11886_v46  ;;  %v4218_v48 = vsel %vm2068_vm1, %v11892_v30, 0 }
 0x862   :  { %v3750_v50 = vpop.xlane.xlu1 %3749 }
 0x863   :  { %8242 = vrcp.f32 %v3750_v50 }
 0x865   :  { %v8241_v37 = vpop.eup %8240 }
 0x866   :  { %v3790_v32 = vmul.f32 %v8241_v37, %v10466_v58  ;;  %v11889_v58 = vld [vmem:[#allocation69_spill] sm:$0xff]  ;;  %v3756_v6 = vpop.xlane.xlu1 %3755 }
 0x867   :  { %v4209_v54 = vsel %vm2068_vm1, %v11889_v58, 0 }
 0x868   :  { %v3805_v59 = vpack.c.bf16 %v3790_v32, %v3789_v13 }
 0x86a   :  { %7553 = vmatprep.mubr.bf16.mxu0 %v3805_v59 }
 0x86b   :  { %7554 = vmatmul.mubr.bf16.vlgmr.msra.gmra.mrb[192].mxu0 %v3806_v25  ;;  %v3760_v36 = vpop.xlane.xlu1 %3759  ;;  %v11893_v25 = vld [vmem:[#allocation86_spill] sm:$0xff] }
 0x86c   :  { %7570 = vmatpush3.bf16.xpose.msra.mxu0 %v4200_v26 }
 0x86d   :  { %7860 = vmatprep.subr.msk.bf16.mxu0 %vm2068_vm1, %v11887_v17  ;;  %v8243_v38 = vpop.eup %8242 }
 0x86e   :  { %v3793_v32 = vmul.f32 %v8243_v38, %v10471_v35 }
 0x86f   :  { %v3764_v28 = vpop.xlane.xlu1 %3763 }
 0x873   :  { %v3768_v3 = vpop.xlane.xlu1 %3767 }
 0x874   :  { %7572 = vmatpush3.bf16.xpose.msra.mxu0 %v4203_v52 }
 0x875   :  { %7861 = vmatprep.subr.msk.bf16.mxu0 %vm2068_vm1, %v11888_v18 }
 0x87c   :  { %7574 = vmatpush3.bf16.xpose.msra.mxu0 %v4206_v33  ;;  %v3772_v33 = vpop.xlane.xlu1 %3771 }
 0x87d   :  { %7862 = vmatprep.subr.msk.bf16.mxu0 %vm2068_vm1, %v11889_v58 }
 0x884   :  { %7576 = vmatpush3.bf16.xpose.msra.mxu0 %v4209_v54 }
 0x885   :  { %7863 = vmatprep.subr.msk.bf16.mxu0 %vm2068_vm1, %v11890_v2 }
 0x88c   :  { %7578 = vmatpush3.bf16.xpose.msra.mxu0 %v4212_v49 }
 0x88d   :  { %7864 = vmatprep.subr.msk.bf16.mxu0 %vm2068_vm1, %v11891_v51 }
 0x88f   :  { %v3752_v46 = vpop.xlane.xlu0 %3751 }
 0x890   :  { %8244 = vrcp.f32 %v3752_v46 }
 0x891   :  { %8246 = vrcp.f32 %v3756_v6 }
 0x893   :  { %v3754_v60 = vpop.xlane.xlu0 %3753 }
 0x894   :  { %7580 = vmatpush3.bf16.xpose.msra.mxu0 %v4215_v61  ;;  %8248 = vrcp.f32 %v3754_v60 }
 0x895   :  { %7865 = vmatprep.subr.msk.bf16.mxu0 %vm2068_vm1, %v11892_v30  ;;  %8250 = vrcp.f32 %v3760_v36  ;;  %v4221_v36 = vsel %vm2068_vm1, %v11893_v25, 0 }
 0x897   :  { %v3758_v5 = vpop.xlane.xlu0 %3757 }
 0x898   :  { %8252 = vrcp.f32 %v3758_v5 }
 0x899   :  { %8254 = vrcp.f32 %v3764_v28 }
 0x89a   :  { %v8245_v37 = vpop.eup %8244 }
 0x89b   :  { %v3762_v13 = vpop.xlane.xlu0 %3761  ;;  %v3794_v53 = vmul.f32 %v8245_v37, %v10498_v15  ;;  %v8247_v59 = vpop.eup %8246 }
 0x89c   :  { %7582 = vmatpush3.bf16.xpose.msra.mxu0 %v4218_v48  ;;  %8256 = vrcp.f32 %v3762_v13  ;;  %v3796_v6 = vmul.f32 %v8247_v59, %v10476_v10 }
 0x89d   :  { %7866 = vmatprep.subr.msk.bf16.mxu0 %vm2068_vm1, %v11893_v25  ;;  %v3807_v26 = vpack.c.bf16 %v3794_v53, %v3793_v32  ;;  %8258 = vrcp.f32 %v3768_v3 }
 0x89e   :  { %v8249_v52 = vpop.eup %8248 }
 0x89f   :  { %7557 = vmatprep.mubr.bf16.mxu0 %v3807_v26  ;;  %v3766_v50 = vpop.xlane.xlu0 %3765  ;;  %v3795_v54 = vmul.f32 %v8249_v52, %v10502_v27  ;;  %v8251_v49 = vpop.eup %8250  ;;  %v11894_v52 = vld [vmem:[#allocation56_spill] sm:$0xff] }
 0x8a0   :  { %8260 = vrcp.f32 %v3766_v50  ;;  %v3798_v61 = vmul.f32 %v8251_v49, %v10479_v29  ;;  %v11896_v50 = vld [vmem:[#allocation64_spill] sm:$0xff] }
 0x8a1   :  { %v3808_v35 = vpack.c.bf16 %v3796_v6, %v3795_v54  ;;  %8262 = vrcp.f32 %v3772_v33  ;;  %v11895_v33 = vld [vmem:[#allocation60_spill] sm:$0xff] }
 0x8a2   :  { %v8253_v15 = vpop.eup %8252  ;;  %v11901_v54 = vld [vmem:[#allocation84_spill] sm:$0xff] }
 0x8a3   :  { %7558 = vmatmul.mubr.bf16.gmra.mrb[196].mxu0 %v3808_v35  ;;  %v3770_v46 = vpop.xlane.xlu0 %3769  ;;  %v3797_v28 = vmul.f32 %v8253_v15, %v10505_v16  ;;  %v8255_v60 = vpop.eup %8254 }
 0x8a4   :  { %7584 = vmatpush3.bf16.xpose.msra.mxu0 %v4221_v36  ;;  %8264 = vrcp.f32 %v3770_v46  ;;  %v3800_v3 = vmul.f32 %v8255_v60, %v10482_v22 }
 0x8a5   :  { %v3809_v27 = vpack.c.bf16 %v3798_v61, %v3797_v28 }
 0x8a6   :  { %v8257_v5 = vpop.eup %8256 }
 0x8a7   :  { %7561 = vmatprep.mubr.bf16.mxu0 %v3809_v27  ;;  %v10561_v10 = vpop.permute.xlu0 %4617  ;;  %v3799_v38 = vmul.f32 %v8257_v5, %v10508_v23  ;;  %v8259_v37 = vpop.eup %8258 }
 0x8a8   :  { %7867 = vmatprep.subr.msk.bf16.mxu1 %vm2068_vm1, %v10561_v10  ;;  %v3802_v13 = vmul.f32 %v8259_v37, %v10487_v57  ;;  %v11897_v57 = vld [vmem:[#allocation68_spill] sm:$0xff] }
 0x8a9   :  { %v3810_v48 = vpack.c.bf16 %v3800_v3, %v3799_v38 }
 0x8aa   :  { %v8261_v16 = vpop.eup %8260 }
 0x8ab   :  { %7562 = vmatmul.mubr.bf16.gmra.mrb[200].mxu0 %v3810_v48  ;;  %v3801_v29 = vmul.f32 %v8261_v16, %v10511_v11  ;;  %v8263_v32 = vpop.eup %8262  ;;  %v11898_v11 = vld [vmem:[#allocation72_spill] sm:$0xff] }
 0x8ac   :  { %v3804_v23 = vmul.f32 %v8263_v32, %v10490_v56  ;;  %v11900_v56 = vld [vmem:[#allocation80_spill] sm:$0xff] }
 0x8ad   :  { %v3811_v53 = vpack.c.bf16 %v3802_v13, %v3801_v29 }
 0x8ae   :  { %v8265_v59 = vpop.eup %8264 }
 0x8af   :  { %7565 = vmatprep.mubr.bf16.mxu0 %v3811_v53  ;;  %v3803_v26 = vmul.f32 %v8265_v59, %v10514_v55  ;;  %v11899_v55 = vld [vmem:[#allocation76_spill] sm:$0xff] }
 0x8b1   :  { %v3812_v22 = vpack.c.bf16 %v3804_v23, %v3803_v26 }
 0x8b3   :  { %7566 = vmatmul.mubr.bf16.gmra.mrb[204].mxu0 %v3812_v22 }
 0x8b4   :  { %7585 = vmatprep.mubr.msk.bf16.mxu0 %vm2068_vm1, %v11894_v52 }
 0x8bb   :  { %7586 = vmatmul.mubr.msk.bf16.vlgmr.msra.gmra.mrb[208].mxu0 %vm2068_vm1, %v11895_v33 }
 0x8bc   :  { %7589 = vmatprep.mubr.msk.bf16.mxu0 %vm2068_vm1, %v11896_v50 }
 0x8c3   :  { %7590 = vmatmul.mubr.msk.bf16.gmra.mrb[212].mxu0 %vm2068_vm1, %v11897_v57 }
 0x8c4   :  { %7593 = vmatprep.mubr.msk.bf16.mxu0 %vm2068_vm1, %v11898_v11 }
 0x8cb   :  { %7594 = vmatmul.mubr.msk.bf16.gmra.mrb[216].mxu0 %vm2068_vm1, %v11899_v55 }
 0x8cc   :  { %7597 = vmatprep.mubr.msk.bf16.mxu0 %vm2068_vm1, %v11900_v56 }
 0x8d3   :  { %7598 = vmatmul.mubr.msk.bf16.gmra.mrb[220].mxu0 %vm2068_vm1, %v11901_v54 }
 0x93e   :  { %v10587_v6 = vpop.f32.mrb[192].mxu0 }
 0x93f   :  { %v10589_v49 = vpop.f32.mrb[193].mxu0 }
 0x940   :  { %v10591_v35 = vpop.f32.mrb[194].mxu0 }
 0x941   :  { %v10593_v15 = vpop.f32.mrb[195].mxu0 }
 0x976   :  { %v10595_v36 = vpop.f32.mrb[196].mxu0 }
 0x977   :  { %11902 = vst [vmem:[#allocation49_spill] sm:$0xff] %v10595_v36  ;;  %v10597_v46 = vpop.f32.mrb[197].mxu0 }
 0x978   :  { %v10599_v28 = vpop.f32.mrb[198].mxu0 }
 0x979   :  { %11903 = vst [vmem:[#allocation53_spill] sm:$0xff] %v10599_v28  ;;  %v10601_v61 = vpop.f32.mrb[199].mxu0 }
 0x97e   :  { %v10603_v60 = vpop.f32.mrb[200].mxu0 }
 0x97f   :  { %11904 = vst [vmem:[#allocation88_spill] sm:$0xff] %v10603_v60  ;;  %v10605_v27 = vpop.f32.mrb[201].mxu0 }
 0x980   :  { %11905 = vst [vmem:[#allocation52_spill] sm:$0xff] %v10605_v27  ;;  %v10607_v5 = vpop.f32.mrb[202].mxu0 }
 0x981   :  { %11906 = vst [vmem:[#allocation89_spill] sm:$0xff] %v10607_v5  ;;  %v10609_v38 = vpop.f32.mrb[203].mxu0 }
 0x982   :  { %11907 = vst [vmem:[#allocation54_spill] sm:$0xff] %v10609_v38 }
 0x986   :  { %v10611_v3 = vpop.f32.mrb[204].mxu0 }
 0x987   :  { %11908 = vst [vmem:[#allocation90_spill] sm:$0xff] %v10611_v3  ;;  %v10613_v37 = vpop.f32.mrb[205].mxu0 }
 0x988   :  { %11909 = vst [vmem:[#allocation45_spill] sm:$0xff] %v10613_v37  ;;  %v10615_v48 = vpop.f32.mrb[206].mxu0 }
 0x989   :  { %11910 = vst [vmem:[#allocation91_spill] sm:$0xff] %v10615_v48  ;;  %v10617_v16 = vpop.f32.mrb[207].mxu0 }
 0x98a   :  { %11911 = vst [vmem:[#allocation47_spill] sm:$0xff] %v10617_v16 }
 0x98e   :  { %v7587_v29 = vpop.f32.mrb[208].mxu0 }
 0x98f   :  { %4324 = vmax.xlane.f32.xlu0 %v7587_v29  ;;  %v4257_v13 = vpop.f32.mrb[209].mxu0 }
 0x990   :  { %v7588_v32 = vpop.f32.mrb[210].mxu0 }
 0x991   :  { %4326 = vmax.xlane.f32.xlu1 %v7588_v32  ;;  %v4260_v53 = vpop.f32.mrb[211].mxu0 }
 0x993   :  { %4320 = vmax.xlane.f32.xlu0 %v4257_v13 }
 0x995   :  { %4322 = vmax.xlane.f32.xlu1 %v4260_v53 }
 0x996   :  { %v7591_v59 = vpop.f32.mrb[212].mxu0 }
 0x997   :  { %4332 = vmax.xlane.f32.xlu0 %v7591_v59  ;;  %v4273_v26 = vpop.f32.mrb[213].mxu0 }
 0x998   :  { %v10619_v23 = vpop.f32.mrb[214].mxu0 }
 0x999   :  { %v10621_v22 = vpop.f32.mrb[215].mxu0 }
 0x99b   :  { %4328 = vmax.xlane.f32.xlu0 %v4273_v26 }
 0x99e   :  { %v10623_v12 = vpop.f32.mrb[216].mxu0 }
 0x99f   :  { %4340 = vmax.xlane.f32.xlu0 %v10623_v12  ;;  %v10626_v7 = vpop.f32.mrb[217].mxu0 }
 0x9a0   :  { %v10628_v48 = vpop.f32.mrb[218].mxu0 }
 0x9a1   :  { %v10630_v3 = vpop.f32.mrb[219].mxu0 }
 0x9a3   :  { %4336 = vmax.xlane.f32.xlu0 %v10626_v7 }
 0x9a6   :  { %4619 = vrot.lane.b32.xlu1 %v11887_v17, %s8601_s5  ;;  %v10635_v41 = vpop.f32.mrb[220].mxu0 }
 0x9a7   :  { %4348 = vmax.xlane.f32.xlu0 %v10635_v41  ;;  %v10638_v43 = vpop.f32.mrb[221].mxu0 }
 0x9a8   :  { %v10640_v16 = vpop.f32.mrb[222].mxu0 }
 0x9a9   :  { %v10642_v37 = vpop.f32.mrb[223].mxu0 }
 0x9ab   :  { %4344 = vmax.xlane.f32.xlu0 %v10638_v43 }
 0x9c1   :  { %4621 = vrot.lane.b32.xlu0 %v11888_v18, %s8601_s5 }
 0x9ca   :  { %4334 = vmax.xlane.f32.xlu1 %v10619_v23 }
 0x9ce   :  { %4330 = vmax.xlane.f32.xlu1 %v10621_v22 }
 0x9d2   :  { %4342 = vmax.xlane.f32.xlu1 %v10628_v48 }
 0x9d6   :  { %4338 = vmax.xlane.f32.xlu1 %v10630_v3 }
 0x9da   :  { %4350 = vmax.xlane.f32.xlu1 %v10640_v16 }
 0x9de   :  { %4346 = vmax.xlane.f32.xlu1 %v10642_v37 }
 0xa1c   :  { %v4325_v17 = vpop.xlane.xlu0 %4324 }
 0xa1d   :  { %v4354_v20 = vsub.f32 %v7587_v29, %v4325_v17 }
 0xa1e   :  { %v4327_v40 = vpop.xlane.xlu1 %4326 }
 0xa1f   :  { %v4372_v5 = vmul.f32 1.442695, %v4354_v20  ;;  %v4355_v60 = vsub.f32 %v7588_v32, %v4327_v40 }
 0xa20   :  { %v4321_v0 = vpop.xlane.xlu0 %4320 }
 0xa21   :  { %8266 = vpow2.f32 %v4372_v5  ;;  %v4374_v18 = vmul.f32 1.442695, %v4355_v60  ;;  %v4352_v42 = vsub.f32 %v4257_v13, %v4321_v0 }
 0xa22   :  { %v4323_v38 = vpop.xlane.xlu1 %4322 }
 0xa23   :  { %8268 = vpow2.f32 %v4374_v18  ;;  %v4368_v27 = vmul.f32 1.442695, %v4352_v42  ;;  %v4353_v31 = vsub.f32 %v4260_v53, %v4323_v38 }
 0xa24   :  { %v4333_v42 = vpop.xlane.xlu0 %4332 }
 0xa25   :  { %8270 = vpow2.f32 %v4368_v27  ;;  %v4370_v44 = vmul.f32 1.442695, %v4353_v31  ;;  %v4358_v60 = vsub.f32 %v7591_v59, %v4333_v42 }
 0xa26   :  { %v10669_v27 = vpop.permute.xlu1 %4619 }
 0xa27   :  { %8272 = vpow2.f32 %v4370_v44  ;;  %v4380_v38 = vmul.f32 1.442695, %v4358_v60 }
 0xa28   :  { %v4329_v44 = vpop.xlane.xlu0 %4328 }
 0xa29   :  { %v4356_v5 = vsub.f32 %v4273_v26, %v4329_v44  ;;  %8274 = vpow2.f32 %v4380_v38 }
 0xa2b   :  { %v10653_v28 = vpop.eup %8266  ;;  %v4376_v32 = vmul.f32 1.442695, %v4356_v5 }
 0xa2c   :  { %4404 = vadd.xlane.f32.xlu0 %v10653_v28  ;;  %v4341_v31 = vpop.xlane.xlu0 %4340 }
 0xa2d   :  { %v10656_v36 = vpop.eup %8268  ;;  %v4362_v17 = vsub.f32 %v10623_v12, %v4341_v31  ;;  %8276 = vpow2.f32 %v4376_v32 }
 0xa2e   :  { %4406 = vadd.xlane.f32.xlu1 %v10656_v36 }
 0xa2f   :  { %v10659_v40 = vpop.eup %8270  ;;  %v4388_v62 = vmul.f32 1.442695, %v4362_v17 }
 0xa30   :  { %4400 = vadd.xlane.f32.xlu0 %v10659_v40  ;;  %v4337_v0 = vpop.xlane.xlu0 %4336 }
 0xa31   :  { %v10662_v20 = vpop.eup %8272  ;;  %v4360_v26 = vsub.f32 %v10626_v7, %v4337_v0 }
 0xa32   :  { %4402 = vadd.xlane.f32.xlu1 %v10662_v20 }
 0xa33   :  { %v4384_v12 = vmul.f32 1.442695, %v4360_v26  ;;  %v10678_v38 = vpop.eup %8274 }
 0xa34   :  { %v4349_v29 = vpop.xlane.xlu0 %4348 }
 0xa38   :  { %v4345_v59 = vpop.xlane.xlu0 %4344 }
 0xa43   :  { %4623 = vrot.lane.b32.xlu1 %v11889_v58, %s8601_s5 }
 0xa46   :  { %4625 = vrot.lane.b32.xlu0 %v11890_v2, %s8601_s5  ;;  %v4366_v2 = vsub.f32 %v10635_v41, %v4349_v29 }
 0xa48   :  { %v4396_v60 = vmul.f32 1.442695, %v4366_v2 }
 0xa57   :  { %v4335_v13 = vpop.xlane.xlu1 %4334 }
 0xa58   :  { %v4359_v53 = vsub.f32 %v10619_v23, %v4335_v13  ;;  %v4364_v23 = vsub.f32 %v10638_v43, %v4345_v59 }
 0xa5a   :  { %v4382_v58 = vmul.f32 1.442695, %v4359_v53  ;;  %v4392_v41 = vmul.f32 1.442695, %v4364_v23 }
 0xa5b   :  { %v4331_v18 = vpop.xlane.xlu1 %4330 }
 0xa5c   :  { %v4357_v45 = vsub.f32 %v10621_v22, %v4331_v18  ;;  %8278 = vpow2.f32 %v4382_v58 }
 0xa5e   :  { %v4378_v42 = vmul.f32 1.442695, %v4357_v45  ;;  %v10681_v45 = vpop.eup %8276 }
 0xa5f   :  { %v4343_v44 = vpop.xlane.xlu1 %4342 }
 0xa60   :  { %8280 = vpow2.f32 %v4378_v42  ;;  %v4363_v31 = vsub.f32 %v10628_v48, %v4343_v44  ;;  %v4658_v44 = vsel %vm2068_vm1, %v10561_v10, 0 }
 0xa61   :  { %8282 = vpow2.f32 %v4388_v62 }
 0xa62   :  { %8284 = vpow2.f32 %v4396_v60  ;;  %v4390_v7 = vmul.f32 1.442695, %v4363_v31 }
 0xa63   :  { %v4339_v5 = vpop.xlane.xlu1 %4338  ;;  %8286 = vpow2.f32 %v4384_v12 }
 0xa64   :  { %8288 = vpow2.f32 %v4392_v41  ;;  %v4361_v62 = vsub.f32 %v10630_v3, %v4339_v5 }
 0xa65   :  { %4412 = vadd.xlane.f32.xlu0 %v10678_v38  ;;  %8290 = vpow2.f32 %v4390_v7 }
 0xa66   :  { %v10686_v48 = vpop.eup %8278  ;;  %v4386_v32 = vmul.f32 1.442695, %v4361_v62 }
 0xa67   :  { %v4351_v22 = vpop.xlane.xlu1 %4350  ;;  %4408 = vadd.xlane.f32.xlu1 %v10681_v45 }
 0xa68   :  { %v4367_v43 = vsub.f32 %v10640_v16, %v4351_v22 }
 0xa6a   :  { %v10688_v0 = vpop.eup %8280  ;;  %v4398_v29 = vmul.f32 1.442695, %v4367_v43 }
 0xa6b   :  { %v4347_v13 = vpop.xlane.xlu1 %4346  ;;  %4410 = vadd.xlane.f32.xlu0 %v10688_v0  ;;  %4414 = vadd.xlane.f32.xlu1 %v10686_v48  ;;  %v10693_v17 = vpop.eup %8282 }
 0xa6c   :  { %8292 = vpow2.f32 %v4398_v29  ;;  %v4365_v53 = vsub.f32 %v10642_v37, %v4347_v13  ;;  %v10695_v3 = vpop.eup %8284 }
 0xa6d   :  { %8294 = vpow2.f32 %v4386_v32  ;;  %v10699_v58 = vpop.eup %8286 }
 0xa6e   :  { %v4394_v16 = vmul.f32 1.442695, %v4365_v53  ;;  %v10701_v18 = vpop.eup %8288 }
 0xa6f   :  { %4420 = vadd.xlane.f32.xlu1 %v10693_v17  ;;  %4428 = vadd.xlane.f32.xlu0 %v10695_v3  ;;  %v10705_v37 = vpop.eup %8290 }
 0xa70   :  { %8296 = vpow2.f32 %v4394_v16 }
 0xa73   :  { %4416 = vadd.xlane.f32.xlu1 %v10699_v58  ;;  %4424 = vadd.xlane.f32.xlu0 %v10701_v18 }
 0xa76   :  { %v10707_v2 = vpop.eup %8292 }
 0xa77   :  { %4422 = vadd.xlane.f32.xlu1 %v10705_v37  ;;  %4430 = vadd.xlane.f32.xlu0 %v10707_v2  ;;  %v10711_v59 = vpop.eup %8294 }
 0xa7a   :  { %v10714_v42 = vpop.eup %8296 }
 0xa7b   :  { %4418 = vadd.xlane.f32.xlu1 %v10711_v59 }
 0xa7f   :  { %4426 = vadd.xlane.f32.xlu1 %v10714_v42 }
 0xa8d   :  { %4629 = vrot.lane.b32.xlu0 %v11892_v30, %s8601_s5 }
 0xa90   :  { %4627 = vrot.lane.b32.xlu1 %v11891_v51, %s8601_s5  ;;  %v4622_v51 = vpop.permute.xlu0 %4621 }
 0xa91   :  { %4631 = vrot.lane.b32.xlu0 %v11893_v25, %s8601_s5 }
 0xa94   :  { %4593 = vrot.lane.b32.xlu1 %v11894_v52, %s8601_s5 }
 0xa95   :  { %4595 = vrot.lane.b32.xlu0 %v11895_v33, %s8601_s5 }
 0xa98   :  { %4597 = vrot.lane.b32.xlu1 %v11896_v50, %s8601_s5 }
 0xa99   :  { %4599 = vrot.lane.b32.xlu0 %v11897_v57, %s8601_s5 }
 0xa9c   :  { %4601 = vrot.lane.b32.xlu1 %v11898_v11, %s8601_s5 }
 0xa9d   :  { %4603 = vrot.lane.b32.xlu0 %v11899_v55, %s8601_s5 }
 0xaa0   :  { %4605 = vrot.lane.b32.xlu1 %v11900_v56, %s8601_s5 }
 0xaa1   :  { %4607 = vrot.lane.b32.xlu0 %v11901_v54, %s8601_s5 }
 0xaa4   :  { %4940 = vrot.lane.b32.xlu1 %v11867_v21, %s8601_s5 }
 0xaa5   :  { %4938 = vrot.lane.b32.xlu0 %v11866_v1, %s8601_s5 }
 0xaa9   :  { %4942 = vrot.lane.b32.xlu0 %v11868_v9, %s8601_s5 }
 0xab9   :  { %v4405_v30 = vpop.xlane.xlu0 %4404 }
 0xabb   :  { %v4407_v25 = vpop.xlane.xlu1 %4406 }
 0xabc   :  { %8298 = vrcp.f32 %v4407_v25 }
 0xabd   :  { %v4401_v52 = vpop.xlane.xlu0 %4400 }
 0xabe   :  { %8300 = vrcp.f32 %v4401_v52 }
 0xabf   :  { %8302 = vrcp.f32 %v4405_v30  ;;  %v4403_v33 = vpop.xlane.xlu1 %4402 }
 0xac0   :  { %8304 = vrcp.f32 %v4403_v33 }
 0xac1   :  { %v4626_v60 = vpop.permute.xlu0 %4625 }
 0xac2   :  { %v4670_v10 = vsel %vm2068_vm1, %v4626_v60, 0 }
 0xac6   :  { %v8299_v50 = vpop.eup %8298 }
 0xac7   :  { %v4451_v21 = vmul.f32 %v8299_v50, %v10656_v36  ;;  %v4661_v36 = vsel %vm2068_vm1, %v10669_v27, 0 }
 0xac8   :  { %v8301_v57 = vpop.eup %8300 }
 0xac9   :  { %v8303_v11 = vpop.eup %8302  ;;  %v4448_v1 = vmul.f32 %v8301_v57, %v10659_v40  ;;  %v4664_v40 = vsel %vm2068_vm1, %v4622_v51, 0 }
 0xaca   :  { %v8305_v55 = vpop.eup %8304  ;;  %v4450_v9 = vmul.f32 %v8303_v11, %v10653_v28  ;;  %v4624_v28 = vpop.permute.xlu1 %4623 }
 0xacb   :  { %v4449_v56 = vmul.f32 %v8305_v55, %v10662_v20  ;;  %v4667_v20 = vsel %vm2068_vm1, %v4624_v28, 0 }
 0xacc   :  { %v4465_v26 = vpack.c.bf16 %v4451_v21, %v4450_v9 }
 0xacd   :  { %v4464_v54 = vpack.c.bf16 %v4449_v56, %v4448_v1 }
 0xacf   :  { %7617 = vmatprep.mubr.bf16.mxu1 %v4464_v54 }
 0xad0   :  { %7618 = vmatmul.mubr.bf16.vlgmr.msra.gmra.mrb[16].mxu1 %v4465_v26 }
 0xad1   :  { %7634 = vmatpush3.bf16.xpose.msra.mxu1 %v4658_v44 }
 0xad2   :  { %7868 = vmatprep.subr.msk.bf16.mxu1 %vm2068_vm1, %v10669_v27 }
 0xad9   :  { %7636 = vmatpush3.bf16.xpose.msra.mxu1 %v4661_v36 }
 0xada   :  { %7869 = vmatprep.subr.msk.bf16.mxu1 %vm2068_vm1, %v4622_v51 }
 0xae1   :  { %7638 = vmatpush3.bf16.xpose.msra.mxu1 %v4664_v40 }
 0xae2   :  { %7870 = vmatprep.subr.msk.bf16.mxu1 %vm2068_vm1, %v4624_v28 }
 0xae9   :  { %7640 = vmatpush3.bf16.xpose.msra.mxu1 %v4667_v20 }
 0xaea   :  { %7871 = vmatprep.subr.msk.bf16.mxu1 %vm2068_vm1, %v4626_v60 }
 0xaf1   :  { %7642 = vmatpush3.bf16.xpose.msra.mxu1 %v4670_v10 }
 0xaf2   :  { %v4413_v23 = vpop.xlane.xlu0 %4412 }
 0xaf3   :  { %8306 = vrcp.f32 %v4413_v23 }
 0xaf4   :  { %v4409_v27 = vpop.xlane.xlu1 %4408 }
 0xaf5   :  { %8308 = vrcp.f32 %v4409_v27 }
 0xaf8   :  { %v4415_v12 = vpop.xlane.xlu1 %4414  ;;  %v4411_v31 = vpop.xlane.xlu0 %4410 }
 0xaf9   :  { %8310 = vrcp.f32 %v4415_v12 }
 0xafa   :  { %8312 = vrcp.f32 %v4411_v31 }
 0xafc   :  { %v4421_v5 = vpop.xlane.xlu1 %4420  ;;  %v4429_v41 = vpop.xlane.xlu0 %4428 }
 0xafd   :  { %v8307_v62 = vpop.eup %8306 }
 0xafe   :  { %v4454_v32 = vmul.f32 %v8307_v62, %v10678_v38 }
 0xaff   :  { %v8309_v43 = vpop.eup %8308 }
 0xb00   :  { %v4417_v7 = vpop.xlane.xlu1 %4416  ;;  %v4425_v22 = vpop.xlane.xlu0 %4424  ;;  %v4452_v30 = vmul.f32 %v8309_v43, %v10681_v45 }
 0xb03   :  { %v8311_v29 = vpop.eup %8310 }
 0xb04   :  { %v8313_v13 = vpop.eup %8312  ;;  %v4455_v53 = vmul.f32 %v8311_v29, %v10686_v48  ;;  %v4423_v16 = vpop.xlane.xlu1 %4422  ;;  %v11912_v29 = vld [vmem:[#allocation96_spill] sm:$0xff] }
 0xb05   :  { %v4431_v51 = vpop.xlane.xlu0 %4430  ;;  %v4453_v25 = vmul.f32 %v8313_v13, %v10688_v0  ;;  %8314 = vrcp.f32 %v4423_v16  ;;  %v11916_v16 = vld [vmem:[#allocation104_spill] sm:$0xff] }
 0xb06   :  { %v4467_v52 = vpack.c.bf16 %v4455_v53, %v4454_v32  ;;  %8316 = vrcp.f32 %v4417_v7  ;;  %v11914_v32 = vld [vmem:[#allocation100_spill] sm:$0xff]  ;;  %v11915_v53 = vld [vmem:[#allocation102_spill] sm:$0xff] }
 0xb07   :  { %v4466_v33 = vpack.c.bf16 %v4453_v25, %v4452_v30  ;;  %8318 = vrcp.f32 %v4421_v5  ;;  %v11918_v30 = vld [vmem:[#allocation109_spill] sm:$0xff]  ;;  %v11919_v25 = vld [vmem:[#allocation111_spill] sm:$0xff] }
 0xb08   :  { %v4419_v50 = vpop.xlane.xlu1 %4418 }
 0xb09   :  { %v4630_v57 = vpop.permute.xlu0 %4629  ;;  %8320 = vrcp.f32 %v4419_v50  ;;  %7621 = vmatprep.mubr.bf16.mxu1 %v4466_v33 }
 0xb0a   :  { %7622 = vmatmul.mubr.bf16.gmra.mrb[20].mxu1 %v4467_v52  ;;  %8322 = vrcp.f32 %v4425_v22  ;;  %v4676_v5 = vsel %vm2068_vm1, %v4630_v57, 0 }
 0xb0c   :  { %v4427_v38 = vpop.xlane.xlu1 %4426 }
 0xb0d   :  { %v4632_v11 = vpop.permute.xlu0 %4631  ;;  %8324 = vrcp.f32 %v4427_v38 }
 0xb0e   :  { %8326 = vrcp.f32 %v4431_v51  ;;  %v11917_v51 = vld [vmem:[#allocation106_spill] sm:$0xff] }
 0xb0f   :  { %v8315_v48 = vpop.eup %8314  ;;  %8328 = vrcp.f32 %v4429_v41 }
 0xb10   :  { %v4628_v45 = vpop.permute.xlu1 %4627  ;;  %v8317_v0 = vpop.eup %8316  ;;  %v4459_v9 = vmul.f32 %v8315_v48, %v10705_v37 }
 0xb11   :  { %v4596_v55 = vpop.permute.xlu0 %4595  ;;  %7872 = vmatprep.subr.msk.bf16.mxu1 %vm2068_vm1, %v4628_v45  ;;  %v4673_v21 = vsel %vm2068_vm1, %v4628_v45, 0  ;;  %v8319_v1 = vpop.eup %8318  ;;  %v4456_v44 = vmul.f32 %v8317_v0, %v10699_v58 }
 0xb12   :  { %7644 = vmatpush3.bf16.xpose.msra.mxu1 %v4673_v21  ;;  %v4458_v28 = vmul.f32 %v8319_v1, %v10693_v17 }
 0xb13   :  { %v8321_v56 = vpop.eup %8320  ;;  %7873 = vmatprep.subr.msk.bf16.mxu1 %vm2068_vm1, %v4630_v57 }
 0xb14   :  { %v4594_v54 = vpop.permute.xlu1 %4593  ;;  %v4457_v36 = vmul.f32 %v8321_v56, %v10711_v59  ;;  %v8323_v40 = vpop.eup %8322  ;;  %v4469_v10 = vpack.c.bf16 %v4459_v9, %v4458_v28 }
 0xb15   :  { %v4600_v26 = vpop.permute.xlu0 %4599  ;;  %v4460_v37 = vmul.f32 %v8323_v40, %v10701_v18 }
 0xb16   :  { %v4468_v20 = vpack.c.bf16 %v4457_v36, %v4456_v44 }
 0xb17   :  { %v8325_v60 = vpop.eup %8324 }
 0xb18   :  { %v8327_v23 = vpop.eup %8326  ;;  %v4598_v27 = vpop.permute.xlu1 %4597  ;;  %7625 = vmatprep.mubr.bf16.mxu1 %v4468_v20  ;;  %v4461_v31 = vmul.f32 %v8325_v60, %v10714_v42  ;;  %v4679_v42 = vsel %vm2068_vm1, %v4632_v11, 0 }
 0xb19   :  { %v4604_v12 = vpop.permute.xlu0 %4603  ;;  %7626 = vmatmul.mubr.bf16.gmra.mrb[24].mxu1 %v4469_v10  ;;  %v8329_v58 = vpop.eup %8328  ;;  %v4463_v41 = vmul.f32 %v8327_v23, %v10707_v2 }
 0xb1a   :  { %7646 = vmatpush3.bf16.xpose.msra.mxu1 %v4676_v5  ;;  %v4470_v59 = vpack.c.bf16 %v4461_v31, %v4460_v37  ;;  %v4462_v22 = vmul.f32 %v8329_v58, %v10695_v3  ;;  %v11913_v3 = vld [vmem:[#allocation98_spill] sm:$0xff] }
 0xb1b   :  { %7874 = vmatprep.subr.msk.bf16.mxu1 %vm2068_vm1, %v4632_v11 }
 0xb1c   :  { %v4602_v17 = vpop.permute.xlu1 %4601  ;;  %7629 = vmatprep.mubr.bf16.mxu1 %v4470_v59  ;;  %v4471_v62 = vpack.c.bf16 %v4463_v41, %v4462_v22 }
 0xb1d   :  { %v4608_v7 = vpop.permute.xlu0 %4607 }
 0xb20   :  { %v4606_v43 = vpop.permute.xlu1 %4605 }
 0xb21   :  { %v4939_v18 = vpop.permute.xlu0 %4938  ;;  %7630 = vmatmul.mubr.bf16.gmra.mrb[28].mxu1 %v4471_v62 }
 0xb22   :  { %7665 = vmatprep.subr.bf16.mxu0 %v4939_v18  ;;  %7648 = vmatpush3.bf16.xpose.msra.mxu1 %v4679_v42 }
 0xb23   :  { %7649 = vmatprep.mubr.msk.bf16.mxu1 %vm2068_vm1, %v4594_v54  ;;  %7666 = vmatpush3.bf16.msra.mxu0 %v4939_v18 }
 0xb24   :  { %7729 = vmatprep.subr.bf16.mxu1 %v11912_v29  ;;  %v4941_v2 = vpop.permute.xlu1 %4940 }
 0xb25   :  { %7667 = vmatprep.subr.bf16.mxu0 %v4941_v2  ;;  %v4943_v13 = vpop.permute.xlu0 %4942 }
 0xb27   :  { %7668 = vmatpush3.bf16.msra.mxu0 %v4941_v2 }
 0xb28   :  { %7669 = vmatprep.subr.bf16.mxu0 %v4943_v13 }
 0xb29   :  { %7650 = vmatmul.mubr.msk.bf16.vlgmr.msra.gmra.mrb[32].mxu1 %vm2068_vm1, %v4596_v55 }
 0xb2a   :  { %7653 = vmatprep.mubr.msk.bf16.mxu1 %vm2068_vm1, %v4598_v27  ;;  %7730 = vmatpush3.bf16.msra.mxu1 %v11912_v29 }
 0xb2b   :  { %7670 = vmatpush3.bf16.msra.mxu0 %v4943_v13  ;;  %7731 = vmatprep.subr.bf16.mxu1 %v11913_v3 }
 0xb2e   :  { %7732 = vmatpush3.bf16.msra.mxu1 %v11913_v3 }
 0xb2f   :  { %7733 = vmatprep.subr.bf16.mxu1 %v11914_v32 }
 0xb31   :  { %7654 = vmatmul.mubr.msk.bf16.gmra.mrb[36].mxu1 %vm2068_vm1, %v4600_v26 }
 0xb32   :  { %7657 = vmatprep.mubr.msk.bf16.mxu1 %vm2068_vm1, %v4602_v17  ;;  %7734 = vmatpush3.bf16.msra.mxu1 %v11914_v32 }
 0xb33   :  { %7735 = vmatprep.subr.bf16.mxu1 %v11915_v53 }
 0xb36   :  { %7736 = vmatpush3.bf16.msra.mxu1 %v11915_v53 }
 0xb37   :  { %7737 = vmatprep.subr.bf16.mxu1 %v11916_v16 }
 0xb39   :  { %7658 = vmatmul.mubr.msk.bf16.gmra.mrb[40].mxu1 %vm2068_vm1, %v4604_v12 }
 0xb3a   :  { %7661 = vmatprep.mubr.msk.bf16.mxu1 %vm2068_vm1, %v4606_v43  ;;  %7738 = vmatpush3.bf16.msra.mxu1 %v11916_v16 }
 0xb3b   :  { %7739 = vmatprep.subr.bf16.mxu1 %v11917_v51 }
 0xb3e   :  { %7740 = vmatpush3.bf16.msra.mxu1 %v11917_v51 }
 0xb3f   :  { %7741 = vmatprep.subr.bf16.mxu1 %v11918_v30 }
 0xb41   :  { %7662 = vmatmul.mubr.msk.bf16.gmra.mrb[44].mxu1 %vm2068_vm1, %v4608_v7 }
 0xb42   :  { %7742 = vmatpush3.bf16.msra.mxu1 %v11918_v30 }
 0xb43   :  { %7743 = vmatprep.subr.bf16.mxu1 %v11919_v25 }
 0xb46   :  { %7744 = vmatpush3.bf16.msra.mxu1 %v11919_v25 }
 0xba3   :  { %v7619_v52 = vpop.f32.mrb[16].mxu1 }
 0xba4   :  { %4571 = vst.msk [vmem:[#allocation2 + $0x120] sm:$0xff] %vm2068_vm1, %v7619_v52  ;;  %v4506_v33 = vpop.f32.mrb[17].mxu1 }
 0xba5   :  { %4569 = vst.msk [vmem:[#allocation2 + $0x100] sm:$0xff] %vm2068_vm1, %v4506_v33  ;;  %v7620_v50 = vpop.f32.mrb[18].mxu1 }
 0xba6   :  { %4572 = vst.msk [vmem:[#allocation2 + $0x130] sm:$0xff] %vm2068_vm1, %v7620_v50  ;;  %v4509_v57 = vpop.f32.mrb[19].mxu1 }
 0xba7   :  { %4570 = vst.msk [vmem:[#allocation2 + $0x110] sm:$0xff] %vm2068_vm1, %v4509_v57 }
 0xbdd   :  { %v7623_v38 = vpop.f32.mrb[20].mxu1 }
 0xbde   :  { %4575 = vst.msk [vmem:[#allocation2 + $0x160] sm:$0xff] %vm2068_vm1, %v7623_v38  ;;  %v4522_v11 = vpop.f32.mrb[21].mxu1 }
 0xbdf   :  { %4573 = vst.msk [vmem:[#allocation2 + $0x140] sm:$0xff] %vm2068_vm1, %v4522_v11  ;;  %v7624_v48 = vpop.f32.mrb[22].mxu1 }
 0xbe0   :  { %4576 = vst.msk [vmem:[#allocation2 + $0x170] sm:$0xff] %vm2068_vm1, %v7624_v48  ;;  %v4525_v45 = vpop.f32.mrb[23].mxu1 }
 0xbe1   :  { %4574 = vst.msk [vmem:[#allocation2 + $0x150] sm:$0xff] %vm2068_vm1, %v4525_v45 }
 0xbec   :  { %v7627_v55 = vpop.f32.mrb[24].mxu1 }
 0xbed   :  { %4579 = vst.msk [vmem:[#allocation2 + $0x1a0] sm:$0xff] %vm2068_vm1, %v7627_v55  ;;  %v4538_v0 = vpop.f32.mrb[25].mxu1 }
 0xbee   :  { %4577 = vst.msk [vmem:[#allocation2 + $0x180] sm:$0xff] %vm2068_vm1, %v4538_v0  ;;  %v7628_v21 = vpop.f32.mrb[26].mxu1 }
 0xbef   :  { %4580 = vst.msk [vmem:[#allocation2 + $0x1b0] sm:$0xff] %vm2068_vm1, %v7628_v21  ;;  %v4541_v1 = vpop.f32.mrb[27].mxu1 }
 0xbf0   :  { %4578 = vst.msk [vmem:[#allocation2 + $0x190] sm:$0xff] %vm2068_vm1, %v4541_v1 }
 0xbf4   :  { %v7631_v56 = vpop.f32.mrb[28].mxu1 }
 0xbf5   :  { %4583 = vst.msk [vmem:[#allocation2 + $0x1e0] sm:$0xff] %vm2068_vm1, %v7631_v56  ;;  %v4554_v9 = vpop.f32.mrb[29].mxu1 }
 0xbf6   :  { %4581 = vst.msk [vmem:[#allocation2 + $0x1c0] sm:$0xff] %vm2068_vm1, %v4554_v9  ;;  %v7632_v54 = vpop.f32.mrb[30].mxu1 }
 0xbf7   :  { %4584 = vst.msk [vmem:[#allocation2 + $0x1f0] sm:$0xff] %vm2068_vm1, %v7632_v54  ;;  %v4557_v26 = vpop.f32.mrb[31].mxu1 }
 0xbf8   :  { %4582 = vst.msk [vmem:[#allocation2 + $0x1d0] sm:$0xff] %vm2068_vm1, %v4557_v26 }
 0xbfc   :  { %v7651_v44 = vpop.f32.mrb[32].mxu1 }
 0xbfd   :  { %4782 = vmax.xlane.f32.xlu0 %v7651_v44  ;;  %v4715_v36 = vpop.f32.mrb[33].mxu1 }
 0xbfe   :  { %4778 = vmax.xlane.f32.xlu1 %v4715_v36  ;;  %v7652_v40 = vpop.f32.mrb[34].mxu1 }
 0xbff   :  { %v4718_v28 = vpop.f32.mrb[35].mxu1 }
 0xc02   :  { %4784 = vmax.xlane.f32.xlu1 %v7652_v40 }
 0xc04   :  { %v10819_v20 = vpop.f32.mrb[36].mxu1 }
 0xc05   :  { %v4731_v60 = vpop.f32.mrb[37].mxu1 }
 0xc06   :  { %v10821_v10 = vpop.f32.mrb[38].mxu1 }
 0xc07   :  { %v10823_v23 = vpop.f32.mrb[39].mxu1 }
 0xc0c   :  { %v10825_v27 = vpop.f32.mrb[40].mxu1 }
 0xc0d   :  { %v10827_v12 = vpop.f32.mrb[41].mxu1 }
 0xc0e   :  { %v10829_v37 = vpop.f32.mrb[42].mxu1 }
 0xc0f   :  { %v10831_v31 = vpop.f32.mrb[43].mxu1 }
 0xc13   :  { %4946 = vrot.lane.b32.xlu0 %v11870_v63, %s8601_s5  ;;  %4944 = vrot.lane.b32.xlu1 %v11869_v24, %s8601_s5 }
 0xc14   :  { %v10837_v5 = vpop.f32.mrb[44].mxu1 }
 0xc15   :  { %v10839_v58 = vpop.f32.mrb[45].mxu1 }
 0xc16   :  { %v10841_v59 = vpop.f32.mrb[46].mxu1 }
 0xc17   :  { %v10843_v41 = vpop.f32.mrb[47].mxu1 }
 0xc32   :  { %4780 = vmax.xlane.f32.xlu0 %v4718_v28 }
 0xc36   :  { %4790 = vmax.xlane.f32.xlu0 %v10819_v20 }
 0xc37   :  { %4792 = vmax.xlane.f32.xlu1 %v10821_v10 }
 0xc3a   :  { %4786 = vmax.xlane.f32.xlu0 %v4731_v60 }
 0xc3b   :  { %4788 = vmax.xlane.f32.xlu1 %v10823_v23 }
 0xc3e   :  { %4798 = vmax.xlane.f32.xlu0 %v10825_v27 }
 0xc3f   :  { %4800 = vmax.xlane.f32.xlu1 %v10829_v37 }
 0xc42   :  { %4794 = vmax.xlane.f32.xlu0 %v10827_v12 }
 0xc43   :  { %4796 = vmax.xlane.f32.xlu1 %v10831_v31 }
 0xc46   :  { %4806 = vmax.xlane.f32.xlu0 %v10837_v5 }
 0xc47   :  { %4808 = vmax.xlane.f32.xlu1 %v10841_v59 }
 0xc4a   :  { %4802 = vmax.xlane.f32.xlu0 %v10839_v58 }
 0xc4b   :  { %4804 = vmax.xlane.f32.xlu1 %v10843_v41 }
 0xc60   :  { %4948 = vrot.lane.b32.xlu0 %v11871_v8, %s8601_s5 }
 0xc8a   :  { %v4783_v24 = vpop.xlane.xlu0 %4782 }
 0xc8b   :  { %v4812_v63 = vsub.f32 %v7651_v44, %v4783_v24  ;;  %v4779_v17 = vpop.xlane.xlu1 %4778 }
 0xc8c   :  { %v4810_v7 = vsub.f32 %v4715_v36, %v4779_v17 }
 0xc8d   :  { %v4830_v22 = vmul.f32 1.442695, %v4812_v63 }
 0xc8e   :  { %v4826_v62 = vmul.f32 1.442695, %v4810_v7  ;;  %v4947_v13 = vpop.permute.xlu0 %4946 }
 0xc8f   :  { %8330 = vpow2.f32 %v4830_v22  ;;  %v4785_v43 = vpop.xlane.xlu1 %4784 }
 0xc90   :  { %v4813_v18 = vsub.f32 %v7652_v40, %v4785_v43  ;;  %8332 = vpow2.f32 %v4826_v62 }
 0xc92   :  { %v4832_v42 = vmul.f32 1.442695, %v4813_v18 }
 0xc93   :  { %v4945_v2 = vpop.permute.xlu1 %4944 }
 0xc94   :  { %7671 = vmatprep.subr.bf16.mxu0 %v4945_v2  ;;  %8334 = vpow2.f32 %v4832_v42 }
 0xc95   :  { %7672 = vmatpush3.bf16.msra.mxu0 %v4945_v2 }
 0xc96   :  { %7673 = vmatprep.subr.bf16.mxu0 %v4947_v13 }
 0xc99   :  { %v10858_v52 = vpop.eup %8330  ;;  %7674 = vmatpush3.bf16.msra.mxu0 %v4947_v13 }
 0xc9a   :  { %4862 = vadd.xlane.f32.xlu1 %v10858_v52  ;;  %v10861_v8 = vpop.eup %8332 }
 0xc9e   :  { %4858 = vadd.xlane.f32.xlu1 %v10861_v8  ;;  %v10864_v33 = vpop.eup %8334 }
 0xca2   :  { %4864 = vadd.xlane.f32.xlu1 %v10864_v33 }
 0xcb3   :  { %4950 = vrot.lane.b32.xlu1 %v11872_v34, %s8601_s5 }
 0xcbf   :  { %v4781_v50 = vpop.xlane.xlu0 %4780 }
 0xcc0   :  { %v4811_v57 = vsub.f32 %v4718_v28, %v4781_v50 }
 0xcc2   :  { %v4828_v38 = vmul.f32 1.442695, %v4811_v57 }
 0xcc3   :  { %v4791_v11 = vpop.xlane.xlu0 %4790 }
 0xcc4   :  { %8336 = vpow2.f32 %v4828_v38  ;;  %v4793_v48 = vpop.xlane.xlu1 %4792  ;;  %v4816_v50 = vsub.f32 %v10819_v20, %v4791_v11 }
 0xcc5   :  { %v4817_v55 = vsub.f32 %v10821_v10, %v4793_v48 }
 0xcc6   :  { %v4838_v38 = vmul.f32 1.442695, %v4816_v50 }
 0xcc7   :  { %v4787_v45 = vpop.xlane.xlu0 %4786  ;;  %v4840_v9 = vmul.f32 1.442695, %v4817_v55 }
 0xcc8   :  { %v4814_v0 = vsub.f32 %v4731_v60, %v4787_v45  ;;  %v4789_v21 = vpop.xlane.xlu1 %4788 }
 0xcc9   :  { %v4815_v13 = vsub.f32 %v10823_v23, %v4789_v21 }
 0xcca   :  { %v4834_v1 = vmul.f32 1.442695, %v4814_v0 }
 0xccb   :  { %v4799_v56 = vpop.xlane.xlu0 %4798  ;;  %v4836_v57 = vmul.f32 1.442695, %v4815_v13  ;;  %v11921_v13 = vld [vmem:[#allocation63_spill] sm:$0xff] }
 0xccc   :  { %8338 = vpow2.f32 %v4834_v1  ;;  %v4801_v54 = vpop.xlane.xlu1 %4800 }
 0xccd   :  { %8340 = vpow2.f32 %v4840_v9  ;;  %v4821_v36 = vsub.f32 %v10829_v37, %v4801_v54  ;;  %v11920_v54 = vld [vmem:[#allocation59_spill] sm:$0xff] }
 0xcce   :  { %v10870_v26 = vpop.eup %8336 }
 0xccf   :  { %4860 = vadd.xlane.f32.xlu0 %v10870_v26  ;;  %v4795_v34 = vpop.xlane.xlu0 %4794  ;;  %v4848_v24 = vmul.f32 1.442695, %v4821_v36 }
 0xcd0   :  { %v4797_v44 = vpop.xlane.xlu1 %4796  ;;  %v4818_v48 = vsub.f32 %v10827_v12, %v4795_v34 }
 0xcd1   :  { %v4819_v40 = vsub.f32 %v10831_v31, %v4797_v44 }
 0xcd2   :  { %v4842_v45 = vmul.f32 1.442695, %v4818_v48 }
 0xcd3   :  { %v4844_v28 = vmul.f32 1.442695, %v4819_v40  ;;  %v4807_v10 = vpop.xlane.xlu0 %4806 }
 0xcd4   :  { %v4809_v60 = vpop.xlane.xlu1 %4808  ;;  %v4824_v20 = vsub.f32 %v10837_v5, %v4807_v10 }
 0xcd5   :  { %8342 = vpow2.f32 %v4844_v28  ;;  %v4825_v22 = vsub.f32 %v10841_v59, %v4809_v60 }
 0xcd6   :  { %v10875_v63 = vpop.eup %8338  ;;  %8344 = vpow2.f32 %v4848_v24  ;;  %v4854_v12 = vmul.f32 1.442695, %v4824_v20 }
 0xcd7   :  { %4866 = vadd.xlane.f32.xlu1 %v10875_v63  ;;  %v4803_v17 = vpop.xlane.xlu0 %4802  ;;  %v10880_v43 = vpop.eup %8340  ;;  %v4856_v18 = vmul.f32 1.442695, %v4825_v22 }
 0xcd8   :  { %v4805_v7 = vpop.xlane.xlu1 %4804  ;;  %v4822_v0 = vsub.f32 %v10839_v58, %v4803_v17 }
 0xcd9   :  { %v4823_v62 = vsub.f32 %v10843_v41, %v4805_v7 }
 0xcda   :  { %v4850_v23 = vmul.f32 1.442695, %v4822_v0 }
 0xcdb   :  { %v4852_v37 = vmul.f32 1.442695, %v4823_v62  ;;  %4872 = vadd.xlane.f32.xlu1 %v10880_v43  ;;  %v4949_v31 = vpop.permute.xlu0 %4948 }
 0xcdc   :  { %7675 = vmatprep.subr.bf16.mxu0 %v4949_v31 }
 0xcdd   :  { %8346 = vpow2.f32 %v4852_v37  ;;  %7676 = vmatpush3.bf16.msra.mxu0 %v4949_v31 }
 0xcde   :  { %8348 = vpow2.f32 %v4856_v18  ;;  %v5188_v18 = vsel %vm2068_vm1, %v11920_v54, 0 }
 0xcdf   :  { %v10883_v42 = vpop.eup %8342  ;;  %8350 = vpow2.f32 %v4836_v57 }
 0xce0   :  { %4876 = vadd.xlane.f32.xlu1 %v10883_v42  ;;  %v10886_v2 = vpop.eup %8344  ;;  %8352 = vpow2.f32 %v4838_v38  ;;  %v11924_v38 = vld [vmem:[#allocation75_spill] sm:$0xff] }
 0xce1   :  { %8354 = vpow2.f32 %v4842_v45 }
 0xce4   :  { %4880 = vadd.xlane.f32.xlu1 %v10886_v2 }
 0xce5   :  { %4952 = vrot.lane.b32.xlu0 %v11873_v14, %s8601_s5  ;;  %v4820_v14 = vsub.f32 %v10825_v27, %v4799_v56 }
 0xce7   :  { %v10891_v59 = vpop.eup %8346  ;;  %v4846_v55 = vmul.f32 1.442695, %v4820_v14  ;;  %v5200_v14 = vsel %vm2068_vm1, %v11924_v38, 0 }
 0xce8   :  { %4884 = vadd.xlane.f32.xlu1 %v10891_v59  ;;  %v10894_v41 = vpop.eup %8348 }
 0xce9   :  { %v10902_v1 = vpop.eup %8350  ;;  %8356 = vpow2.f32 %v4846_v55  ;;  %v11925_v55 = vld [vmem:[#allocation79_spill] sm:$0xff] }
 0xcea   :  { %v10906_v11 = vpop.eup %8352  ;;  %8358 = vpow2.f32 %v4850_v23  ;;  %v5203_v23 = vsel %vm2068_vm1, %v11925_v55, 0 }
 0xceb   :  { %v10909_v27 = vpop.eup %8354  ;;  %8360 = vpow2.f32 %v4854_v12 }
 0xcec   :  { %4888 = vadd.xlane.f32.xlu1 %v10894_v41 }
 0xcf3   :  { %v10912_v58 = vpop.eup %8356 }
 0xcf4   :  { %v10915_v21 = vpop.eup %8358 }
 0xcf5   :  { %v10918_v5 = vpop.eup %8360 }
 0xd04   :  { %4868 = vadd.xlane.f32.xlu0 %v10902_v1 }
 0xd08   :  { %4870 = vadd.xlane.f32.xlu0 %v10906_v11 }
 0xd0c   :  { %4874 = vadd.xlane.f32.xlu0 %v10909_v27 }
 0xd10   :  { %4878 = vadd.xlane.f32.xlu0 %v10912_v58 }
 0xd14   :  { %4882 = vadd.xlane.f32.xlu0 %v10915_v21 }
 0xd18   :  { %4886 = vadd.xlane.f32.xlu0 %v10918_v5 }
 0xd27   :  { %v4863_v56 = vpop.xlane.xlu1 %4862 }
 0xd2b   :  { %v4859_v9 = vpop.xlane.xlu1 %4858 }
 0xd2e   :  { %5605 = vrot.lane.b32.xlu0 %v11920_v54, %s8601_s5 }
 0xd2f   :  { %v4865_v34 = vpop.xlane.xlu1 %4864 }
 0xd30   :  { %8362 = vrcp.f32 %v4865_v34 }
 0xd31   :  { %8364 = vrcp.f32 %v4859_v9 }
 0xd32   :  { %8366 = vrcp.f32 %v4863_v56  ;;  %v11926_v56 = vld [vmem:[#allocation83_spill] sm:$0xff] }
 0xd33   :  { %v4951_v44 = vpop.permute.xlu1 %4950 }
 0xd34   :  { %7677 = vmatprep.subr.bf16.mxu0 %v4951_v44 }
 0xd35   :  { %7678 = vmatpush3.bf16.msra.mxu0 %v4951_v44 }
 0xd3a   :  { %v8363_v28 = vpop.eup %8362 }
 0xd3b   :  { %v8365_v10 = vpop.eup %8364  ;;  %v4909_v17 = vmul.f32 %v8363_v28, %v10864_v33  ;;  %v5191_v33 = vsel %vm2068_vm1, %v11921_v13, 0 }
 0xd3c   :  { %v8367_v60 = vpop.eup %8366  ;;  %v4906_v7 = vmul.f32 %v8365_v10, %v10861_v8  ;;  %v11922_v8 = vld [vmem:[#allocation67_spill] sm:$0xff] }
 0xd3d   :  { %v4908_v62 = vmul.f32 %v8367_v60, %v10858_v52  ;;  %v5194_v52 = vsel %vm2068_vm1, %v11922_v8, 0 }
 0xd3f   :  { %v4923_v31 = vpack.c.bf16 %v4909_v17, %v4908_v62 }
 0xd5c   :  { %v4861_v36 = vpop.xlane.xlu0 %4860 }
 0xd5d   :  { %8368 = vrcp.f32 %v4861_v36  ;;  %v5206_v36 = vsel %vm2068_vm1, %v11926_v56, 0 }
 0xd60   :  { %v4953_v40 = vpop.permute.xlu0 %4952 }
 0xd61   :  { %7679 = vmatprep.subr.bf16.mxu0 %v4953_v40 }
 0xd62   :  { %7680 = vmatpush3.bf16.msra.mxu0 %v4953_v40 }
 0xd63   :  { %7875 = vmatprep.subr.msk.bf16.mxu0 %vm2068_vm1, %v11920_v54 }
 0xd64   :  { %v4867_v50 = vpop.xlane.xlu1 %4866 }
 0xd65   :  { %8370 = vrcp.f32 %v4867_v50 }
 0xd67   :  { %v8369_v24 = vpop.eup %8368 }
 0xd68   :  { %v4907_v22 = vmul.f32 %v8369_v24, %v10870_v26  ;;  %v11923_v26 = vld [vmem:[#allocation71_spill] sm:$0xff]  ;;  %v4873_v48 = vpop.xlane.xlu1 %4872 }
 0xd69   :  { %v5197_v57 = vsel %vm2068_vm1, %v11923_v26, 0  ;;  %v11927_v24 = vld [vmem:[#allocation87_spill] sm:$0xff] }
 0xd6a   :  { %v4922_v37 = vpack.c.bf16 %v4907_v22, %v4906_v7 }
 0xd6c   :  { %7681 = vmatprep.mubr.bf16.mxu0 %v4922_v37 }
 0xd6d   :  { %7682 = vmatmul.mubr.bf16.vlgmr.msra.gmra.mrb[224].mxu0 %v4923_v31  ;;  %v4877_v45 = vpop.xlane.xlu1 %4876 }
 0xd6e   :  { %7698 = vmatpush3.bf16.xpose.msra.mxu0 %v5188_v18 }
 0xd6f   :  { %7876 = vmatprep.subr.msk.bf16.mxu0 %vm2068_vm1, %v11921_v13  ;;  %v8371_v54 = vpop.eup %8370 }
 0xd70   :  { %v4910_v28 = vmul.f32 %v8371_v54, %v10875_v63 }
 0xd71   :  { %v4881_v20 = vpop.xlane.xlu1 %4880 }
 0xd75   :  { %v4885_v34 = vpop.xlane.xlu1 %4884 }
 0xd76   :  { %7700 = vmatpush3.bf16.xpose.msra.mxu0 %v5191_v33  ;;  %v5209_v33 = vsel %vm2068_vm1, %v11927_v24, 0 }
 0xd77   :  { %7877 = vmatprep.subr.msk.bf16.mxu0 %vm2068_vm1, %v11922_v8 }
 0xd79   :  { %v4889_v22 = vpop.xlane.xlu1 %4888 }
 0xd7e   :  { %7702 = vmatpush3.bf16.xpose.msra.mxu0 %v5194_v52 }
 0xd7f   :  { %7878 = vmatprep.subr.msk.bf16.mxu0 %vm2068_vm1, %v11923_v26 }
 0xd86   :  { %7704 = vmatpush3.bf16.xpose.msra.mxu0 %v5197_v57 }
 0xd87   :  { %7879 = vmatprep.subr.msk.bf16.mxu0 %vm2068_vm1, %v11924_v38 }
 0xd8e   :  { %7706 = vmatpush3.bf16.xpose.msra.mxu0 %v5200_v14 }
 0xd8f   :  { %7880 = vmatprep.subr.msk.bf16.mxu0 %vm2068_vm1, %v11925_v55 }
 0xd91   :  { %v4869_v0 = vpop.xlane.xlu0 %4868 }
 0xd92   :  { %8372 = vrcp.f32 %v4869_v0 }
 0xd93   :  { %8374 = vrcp.f32 %v4873_v48 }
 0xd95   :  { %v4871_v12 = vpop.xlane.xlu0 %4870 }
 0xd96   :  { %7708 = vmatpush3.bf16.xpose.msra.mxu0 %v5203_v23  ;;  %8376 = vrcp.f32 %v4871_v12 }
 0xd97   :  { %7881 = vmatprep.subr.msk.bf16.mxu0 %vm2068_vm1, %v11926_v56  ;;  %8378 = vrcp.f32 %v4877_v45 }
 0xd99   :  { %v4875_v9 = vpop.xlane.xlu0 %4874 }
 0xd9a   :  { %8380 = vrcp.f32 %v4875_v9 }
 0xd9b   :  { %8382 = vrcp.f32 %v4881_v20 }
 0xd9c   :  { %v8373_v44 = vpop.eup %8372 }
 0xd9d   :  { %v4879_v40 = vpop.xlane.xlu0 %4878  ;;  %v4911_v10 = vmul.f32 %v8373_v44, %v10902_v1  ;;  %v8375_v60 = vpop.eup %8374 }
 0xd9e   :  { %7710 = vmatpush3.bf16.xpose.msra.mxu0 %v5206_v36  ;;  %8384 = vrcp.f32 %v4879_v40  ;;  %v4913_v31 = vmul.f32 %v8375_v60, %v10880_v43  ;;  %v11928_v36 = vld [vmem:[#allocation58_spill] sm:$0xff] }
 0xd9f   :  { %7882 = vmatprep.subr.msk.bf16.mxu0 %vm2068_vm1, %v11927_v24  ;;  %v4924_v17 = vpack.c.bf16 %v4911_v10, %v4910_v28  ;;  %8386 = vrcp.f32 %v4885_v34  ;;  %v11929_v40 = vld [vmem:[#allocation62_spill] sm:$0xff]  ;;  %v11935_v10 = vld [vmem:[#allocation85_spill] sm:$0xff] }
 0xda0   :  { %v8377_v7 = vpop.eup %8376  ;;  %v11930_v28 = vld [vmem:[#allocation66_spill] sm:$0xff] }
 0xda1   :  { %7685 = vmatprep.mubr.bf16.mxu0 %v4924_v17  ;;  %v4883_v62 = vpop.xlane.xlu0 %4882  ;;  %v4912_v37 = vmul.f32 %v8377_v7, %v10906_v11  ;;  %v8379_v18 = vpop.eup %8378 }
 0xda2   :  { %8388 = vrcp.f32 %v4883_v62  ;;  %v4915_v57 = vmul.f32 %v8379_v18, %v10883_v42 }
 0xda3   :  { %v4925_v63 = vpack.c.bf16 %v4913_v31, %v4912_v37  ;;  %8390 = vrcp.f32 %v4889_v22 }
 0xda4   :  { %v8381_v1 = vpop.eup %8380 }
 0xda5   :  { %7686 = vmatmul.mubr.bf16.gmra.mrb[228].mxu0 %v4925_v63  ;;  %v4887_v52 = vpop.xlane.xlu0 %4886  ;;  %v4914_v50 = vmul.f32 %v8381_v1, %v10909_v27  ;;  %v8383_v48 = vpop.eup %8382 }
 0xda6   :  { %7712 = vmatpush3.bf16.xpose.msra.mxu0 %v5209_v33  ;;  %8392 = vrcp.f32 %v4887_v52  ;;  %v4917_v0 = vmul.f32 %v8383_v48, %v10886_v2 }
 0xda7   :  { %v4926_v11 = vpack.c.bf16 %v4915_v57, %v4914_v50 }
 0xda8   :  { %v8385_v14 = vpop.eup %8384 }
 0xda9   :  { %7689 = vmatprep.mubr.bf16.mxu0 %v4926_v11  ;;  %v10965_v43 = vpop.permute.xlu0 %5605  ;;  %v4916_v45 = vmul.f32 %v8385_v14, %v10912_v58  ;;  %v8387_v20 = vpop.eup %8386 }
 0xdaa   :  { %7883 = vmatprep.subr.msk.bf16.mxu1 %vm2068_vm1, %v10965_v43  ;;  %v4919_v12 = vmul.f32 %v8387_v20, %v10891_v59  ;;  %v11931_v59 = vld [vmem:[#allocation70_spill] sm:$0xff] }
 0xdab   :  { %v4927_v23 = vpack.c.bf16 %v4917_v0, %v4916_v45 }
 0xdac   :  { %v8389_v27 = vpop.eup %8388 }
 0xdad   :  { %7690 = vmatmul.mubr.bf16.gmra.mrb[232].mxu0 %v4927_v23  ;;  %v4918_v42 = vmul.f32 %v8389_v27, %v10915_v21  ;;  %v8391_v9 = vpop.eup %8390  ;;  %v11932_v21 = vld [vmem:[#allocation74_spill] sm:$0xff] }
 0xdae   :  { %v4921_v58 = vmul.f32 %v8391_v9, %v10894_v41  ;;  %v11934_v41 = vld [vmem:[#allocation82_spill] sm:$0xff] }
 0xdaf   :  { %v4928_v54 = vpack.c.bf16 %v4919_v12, %v4918_v42 }
 0xdb0   :  { %v8393_v34 = vpop.eup %8392 }
 0xdb1   :  { %7693 = vmatprep.mubr.bf16.mxu0 %v4928_v54  ;;  %v4920_v44 = vmul.f32 %v8393_v34, %v10918_v5  ;;  %v11933_v5 = vld [vmem:[#allocation78_spill] sm:$0xff] }
 0xdb3   :  { %v4929_v2 = vpack.c.bf16 %v4921_v58, %v4920_v44 }
 0xdb5   :  { %7694 = vmatmul.mubr.bf16.gmra.mrb[236].mxu0 %v4929_v2 }
 0xdb6   :  { %7713 = vmatprep.mubr.msk.bf16.mxu0 %vm2068_vm1, %v11928_v36 }
 0xdbd   :  { %7714 = vmatmul.mubr.msk.bf16.vlgmr.msra.gmra.mrb[240].mxu0 %vm2068_vm1, %v11929_v40 }
 0xdbe   :  { %7717 = vmatprep.mubr.msk.bf16.mxu0 %vm2068_vm1, %v11930_v28 }
 0xdc5   :  { %7718 = vmatmul.mubr.msk.bf16.gmra.mrb[244].mxu0 %vm2068_vm1, %v11931_v59 }
 0xdc6   :  { %7721 = vmatprep.mubr.msk.bf16.mxu0 %vm2068_vm1, %v11932_v21 }
 0xdcd   :  { %7722 = vmatmul.mubr.msk.bf16.gmra.mrb[248].mxu0 %vm2068_vm1, %v11933_v5 }
 0xdce   :  { %7725 = vmatprep.mubr.msk.bf16.mxu0 %vm2068_vm1, %v11934_v41 }
 0xdd5   :  { %7726 = vmatmul.mubr.msk.bf16.gmra.mrb[252].mxu0 %vm2068_vm1, %v11935_v10 }
 0xe40   :  { %v10991_v60 = vpop.f32.mrb[224].mxu0 }
 0xe41   :  { %11936 = vst [vmem:[#allocation92_spill] sm:$0xff] %v10991_v60  ;;  %v10993_v17 = vpop.f32.mrb[225].mxu0 }
 0xe42   :  { %11937 = vst [vmem:[#allocation51_spill] sm:$0xff] %v10993_v17  ;;  %v10995_v7 = vpop.f32.mrb[226].mxu0 }
 0xe43   :  { %11938 = vst [vmem:[#allocation93_spill] sm:$0xff] %v10995_v7  ;;  %v10997_v22 = vpop.f32.mrb[227].mxu0 }
 0xe44   :  { %11939 = vst [vmem:[#allocation123_spill] sm:$0xff] %v10997_v22 }
 0xe78   :  { %v10999_v62 = vpop.f32.mrb[228].mxu0 }
 0xe79   :  { %11940 = vst [vmem:[#allocation124_spill] sm:$0xff] %v10999_v62  ;;  %v11001_v37 = vpop.f32.mrb[229].mxu0 }
 0xe7a   :  { %11941 = vst [vmem:[#allocation122_spill] sm:$0xff] %v11001_v37  ;;  %v11003_v31 = vpop.f32.mrb[230].mxu0 }
 0xe7b   :  { %11942 = vst [vmem:[#allocation55_spill] sm:$0xff] %v11003_v31  ;;  %v11005_v18 = vpop.f32.mrb[231].mxu0 }
 0xe7c   :  { %11943 = vst [vmem:[#allocation94_spill] sm:$0xff] %v11005_v18 }
 0xe80   :  { %v11007_v63 = vpop.f32.mrb[232].mxu0 }
 0xe81   :  { %11944 = vst [vmem:[#allocation112_spill] sm:$0xff] %v11007_v63  ;;  %v11009_v1 = vpop.f32.mrb[233].mxu0 }
 0xe82   :  { %11945 = vst [vmem:[#allocation107_spill] sm:$0xff] %v11009_v1  ;;  %v11011_v33 = vpop.f32.mrb[234].mxu0 }
 0xe83   :  { %11946 = vst [vmem:[#allocation113_spill] sm:$0xff] %v11011_v33  ;;  %v11013_v52 = vpop.f32.mrb[235].mxu0 }
 0xe84   :  { %11947 = vst [vmem:[#allocation95_spill] sm:$0xff] %v11013_v52 }
 0xe88   :  { %v11015_v50 = vpop.f32.mrb[236].mxu0 }
 0xe89   :  { %11948 = vst [vmem:[#allocation97_spill] sm:$0xff] %v11015_v50  ;;  %v11017_v57 = vpop.f32.mrb[237].mxu0 }
 0xe8a   :  { %11949 = vst [vmem:[#allocation99_spill] sm:$0xff] %v11017_v57  ;;  %v11019_v48 = vpop.f32.mrb[238].mxu0 }
 0xe8b   :  { %11950 = vst [vmem:[#allocation101_spill] sm:$0xff] %v11019_v48  ;;  %v11021_v11 = vpop.f32.mrb[239].mxu0 }
 0xe8c   :  { %11951 = vst [vmem:[#allocation103_spill] sm:$0xff] %v11021_v11 }
 0xe90   :  { %v7715_v14 = vpop.f32.mrb[240].mxu0 }
 0xe91   :  { %5312 = vmax.xlane.f32.xlu0 %v7715_v14  ;;  %v5245_v45 = vpop.f32.mrb[241].mxu0 }
 0xe92   :  { %v7716_v0 = vpop.f32.mrb[242].mxu0 }
 0xe93   :  { %5314 = vmax.xlane.f32.xlu1 %v7716_v0  ;;  %v5248_v20 = vpop.f32.mrb[243].mxu0 }
 0xe95   :  { %5308 = vmax.xlane.f32.xlu0 %v5245_v45 }
 0xe97   :  { %5310 = vmax.xlane.f32.xlu1 %v5248_v20 }
 0xe98   :  { %v7719_v23 = vpop.f32.mrb[244].mxu0 }
 0xe99   :  { %5320 = vmax.xlane.f32.xlu0 %v7719_v23  ;;  %v5261_v27 = vpop.f32.mrb[245].mxu0 }
 0xe9a   :  { %v11023_v42 = vpop.f32.mrb[246].mxu0 }
 0xe9b   :  { %v11025_v12 = vpop.f32.mrb[247].mxu0 }
 0xe9d   :  { %5316 = vmax.xlane.f32.xlu0 %v5261_v27 }
 0xea0   :  { %v11027_v9 = vpop.f32.mrb[248].mxu0 }
 0xea1   :  { %5328 = vmax.xlane.f32.xlu0 %v11027_v9  ;;  %v11030_v54 = vpop.f32.mrb[249].mxu0 }
 0xea2   :  { %v11032_v34 = vpop.f32.mrb[250].mxu0 }
 0xea3   :  { %v11034_v44 = vpop.f32.mrb[251].mxu0 }
 0xea5   :  { %5324 = vmax.xlane.f32.xlu0 %v11030_v54 }
 0xea8   :  { %5607 = vrot.lane.b32.xlu1 %v11921_v13, %s8601_s5  ;;  %v11039_v58 = vpop.f32.mrb[252].mxu0 }
 0xea9   :  { %5336 = vmax.xlane.f32.xlu0 %v11039_v58  ;;  %v11042_v2 = vpop.f32.mrb[253].mxu0 }
 0xeaa   :  { %v11044_v48 = vpop.f32.mrb[254].mxu0 }
 0xeab   :  { %v11046_v50 = vpop.f32.mrb[255].mxu0 }
 0xead   :  { %5332 = vmax.xlane.f32.xlu0 %v11042_v2 }
 0xec3   :  { %5609 = vrot.lane.b32.xlu0 %v11922_v8, %s8601_s5 }
 0xecc   :  { %5322 = vmax.xlane.f32.xlu1 %v11023_v42 }
 0xed0   :  { %5318 = vmax.xlane.f32.xlu1 %v11025_v12 }
 0xed4   :  { %5330 = vmax.xlane.f32.xlu1 %v11032_v34 }
 0xed8   :  { %5326 = vmax.xlane.f32.xlu1 %v11034_v44 }
 0xedc   :  { %5338 = vmax.xlane.f32.xlu1 %v11044_v48 }
 0xee0   :  { %5334 = vmax.xlane.f32.xlu1 %v11046_v50 }
 0xf1e   :  { %v5313_v13 = vpop.xlane.xlu0 %5312 }
 0xf1f   :  { %v5342_v11 = vsub.f32 %v7715_v14, %v5313_v13 }
 0xf20   :  { %v5315_v57 = vpop.xlane.xlu1 %5314 }
 0xf21   :  { %v5360_v33 = vmul.f32 1.442695, %v5342_v11  ;;  %v5343_v63 = vsub.f32 %v7716_v0, %v5315_v57 }
 0xf22   :  { %v5309_v52 = vpop.xlane.xlu0 %5308 }
 0xf23   :  { %8394 = vpow2.f32 %v5360_v33  ;;  %v5362_v8 = vmul.f32 1.442695, %v5343_v63  ;;  %v5340_v1 = vsub.f32 %v5245_v45, %v5309_v52 }
 0xf24   :  { %v5311_v31 = vpop.xlane.xlu1 %5310 }
 0xf25   :  { %8396 = vpow2.f32 %v5362_v8  ;;  %v5356_v62 = vmul.f32 1.442695, %v5340_v1  ;;  %v5341_v18 = vsub.f32 %v5248_v20, %v5311_v31 }
 0xf26   :  { %v5321_v31 = vpop.xlane.xlu0 %5320 }
 0xf27   :  { %8398 = vpow2.f32 %v5356_v62  ;;  %v5358_v37 = vmul.f32 1.442695, %v5341_v18  ;;  %v5346_v1 = vsub.f32 %v7719_v23, %v5321_v31 }
 0xf28   :  { %v11073_v33 = vpop.permute.xlu1 %5607 }
 0xf29   :  { %8400 = vpow2.f32 %v5358_v37  ;;  %v5368_v11 = vmul.f32 1.442695, %v5346_v1 }
 0xf2a   :  { %v5317_v62 = vpop.xlane.xlu0 %5316 }
 0xf2b   :  { %v5344_v52 = vsub.f32 %v5261_v27, %v5317_v62  ;;  %8402 = vpow2.f32 %v5368_v11 }
 0xf2d   :  { %v11057_v7 = vpop.eup %8394  ;;  %v5364_v0 = vmul.f32 1.442695, %v5344_v52 }
 0xf2e   :  { %5392 = vadd.xlane.f32.xlu0 %v11057_v7  ;;  %v5329_v37 = vpop.xlane.xlu0 %5328 }
 0xf2f   :  { %v11060_v60 = vpop.eup %8396  ;;  %v5350_v13 = vsub.f32 %v11027_v9, %v5329_v37  ;;  %8404 = vpow2.f32 %v5364_v0 }
 0xf30   :  { %5394 = vadd.xlane.f32.xlu1 %v11060_v60 }
 0xf31   :  { %v11063_v57 = vpop.eup %8398  ;;  %v5376_v17 = vmul.f32 1.442695, %v5350_v13 }
 0xf32   :  { %5388 = vadd.xlane.f32.xlu0 %v11063_v57  ;;  %v5325_v18 = vpop.xlane.xlu0 %5324 }
 0xf33   :  { %v11066_v63 = vpop.eup %8400  ;;  %v5348_v27 = vsub.f32 %v11030_v54, %v5325_v18 }
 0xf34   :  { %5390 = vadd.xlane.f32.xlu1 %v11066_v63 }
 0xf35   :  { %v5372_v9 = vmul.f32 1.442695, %v5348_v27  ;;  %v11082_v11 = vpop.eup %8402  ;;  %v5646_v27 = vsel %vm2068_vm1, %v10965_v43, 0 }
 0xf36   :  { %v5337_v14 = vpop.xlane.xlu0 %5336 }
 0xf3a   :  { %v5333_v23 = vpop.xlane.xlu0 %5332 }
 0xf45   :  { %5611 = vrot.lane.b32.xlu1 %v11923_v26, %s8601_s5 }
 0xf48   :  { %5613 = vrot.lane.b32.xlu0 %v11924_v38, %s8601_s5  ;;  %v5354_v38 = vsub.f32 %v11039_v58, %v5337_v14 }
 0xf4a   :  { %v5384_v1 = vmul.f32 1.442695, %v5354_v38 }
 0xf59   :  { %v5323_v45 = vpop.xlane.xlu1 %5322 }
 0xf5a   :  { %v5347_v20 = vsub.f32 %v11023_v42, %v5323_v45  ;;  %v5352_v42 = vsub.f32 %v11042_v2, %v5333_v23 }
 0xf5c   :  { %v5370_v26 = vmul.f32 1.442695, %v5347_v20 }
 0xf5d   :  { %v5319_v8 = vpop.xlane.xlu1 %5318 }
 0xf5e   :  { %v5345_v22 = vsub.f32 %v11025_v12, %v5319_v8  ;;  %8406 = vpow2.f32 %v5370_v26  ;;  %v5380_v12 = vmul.f32 1.442695, %v5352_v42 }
 0xf60   :  { %v5366_v31 = vmul.f32 1.442695, %v5345_v22  ;;  %v11085_v22 = vpop.eup %8404 }
 0xf61   :  { %v5331_v62 = vpop.xlane.xlu1 %5330 }
 0xf62   :  { %8408 = vpow2.f32 %v5366_v31  ;;  %v5351_v37 = vsub.f32 %v11032_v34, %v5331_v62 }
 0xf63   :  { %8410 = vpow2.f32 %v5376_v17 }
 0xf64   :  { %8412 = vpow2.f32 %v5384_v1  ;;  %v5378_v54 = vmul.f32 1.442695, %v5351_v37 }
 0xf65   :  { %v5327_v52 = vpop.xlane.xlu1 %5326  ;;  %8414 = vpow2.f32 %v5372_v9 }
 0xf66   :  { %8416 = vpow2.f32 %v5380_v12  ;;  %v5349_v17 = vsub.f32 %v11034_v44, %v5327_v52 }
 0xf67   :  { %5400 = vadd.xlane.f32.xlu0 %v11082_v11  ;;  %8418 = vpow2.f32 %v5378_v54 }
 0xf68   :  { %v11090_v34 = vpop.eup %8406  ;;  %v5374_v0 = vmul.f32 1.442695, %v5349_v17 }
 0xf69   :  { %v5339_v58 = vpop.xlane.xlu1 %5338  ;;  %5396 = vadd.xlane.f32.xlu1 %v11085_v22 }
 0xf6a   :  { %v5355_v2 = vsub.f32 %v11044_v48, %v5339_v58 }
 0xf6c   :  { %v11092_v18 = vpop.eup %8408  ;;  %v5386_v14 = vmul.f32 1.442695, %v5355_v2 }
 0xf6d   :  { %v5335_v45 = vpop.xlane.xlu1 %5334  ;;  %5398 = vadd.xlane.f32.xlu0 %v11092_v18  ;;  %5402 = vadd.xlane.f32.xlu1 %v11090_v34  ;;  %v11097_v13 = vpop.eup %8410 }
 0xf6e   :  { %8420 = vpow2.f32 %v5386_v14  ;;  %v5353_v20 = vsub.f32 %v11046_v50, %v5335_v45  ;;  %v11099_v44 = vpop.eup %8412 }
 0xf6f   :  { %8422 = vpow2.f32 %v5374_v0  ;;  %v11103_v26 = vpop.eup %8414 }
 0xf70   :  { %v5382_v48 = vmul.f32 1.442695, %v5353_v20  ;;  %v11105_v8 = vpop.eup %8416 }
 0xf71   :  { %5408 = vadd.xlane.f32.xlu1 %v11097_v13  ;;  %5416 = vadd.xlane.f32.xlu0 %v11099_v44  ;;  %v11109_v50 = vpop.eup %8418 }
 0xf72   :  { %8424 = vpow2.f32 %v5382_v48 }
 0xf75   :  { %5404 = vadd.xlane.f32.xlu1 %v11103_v26  ;;  %5412 = vadd.xlane.f32.xlu0 %v11105_v8 }
 0xf78   :  { %v11111_v38 = vpop.eup %8420 }
 0xf79   :  { %5410 = vadd.xlane.f32.xlu1 %v11109_v50  ;;  %5418 = vadd.xlane.f32.xlu0 %v11111_v38  ;;  %v11115_v23 = vpop.eup %8422 }
 0xf7c   :  { %v11118_v31 = vpop.eup %8424 }
 0xf7d   :  { %5406 = vadd.xlane.f32.xlu1 %v11115_v23 }
 0xf81   :  { %5414 = vadd.xlane.f32.xlu1 %v11118_v31 }
 0xf8f   :  { %5617 = vrot.lane.b32.xlu0 %v11926_v56, %s8601_s5 }
 0xf92   :  { %5615 = vrot.lane.b32.xlu1 %v11925_v55, %s8601_s5  ;;  %v5610_v55 = vpop.permute.xlu0 %5609 }
 0xf93   :  { %5619 = vrot.lane.b32.xlu0 %v11927_v24, %s8601_s5 }
 0xf96   :  { %5581 = vrot.lane.b32.xlu1 %v11928_v36, %s8601_s5 }
 0xf97   :  { %5583 = vrot.lane.b32.xlu0 %v11929_v40, %s8601_s5 }
 0xf9a   :  { %5585 = vrot.lane.b32.xlu1 %v11930_v28, %s8601_s5 }
 0xf9b   :  { %5587 = vrot.lane.b32.xlu0 %v11931_v59, %s8601_s5 }
 0xf9e   :  { %5589 = vrot.lane.b32.xlu1 %v11932_v21, %s8601_s5 }
 0xf9f   :  { %5591 = vrot.lane.b32.xlu0 %v11933_v5, %s8601_s5 }
 0xfa2   :  { %5593 = vrot.lane.b32.xlu1 %v11934_v41, %s8601_s5 }
 0xfa3   :  { %5595 = vrot.lane.b32.xlu0 %v11935_v10, %s8601_s5 }
 0xfa6   :  { %5928 = vrot.lane.b32.xlu1 %v11913_v3, %s8601_s5 }
 0xfa7   :  { %5926 = vrot.lane.b32.xlu0 %v11912_v29, %s8601_s5 }
 0xfab   :  { %5930 = vrot.lane.b32.xlu0 %v11914_v32, %s8601_s5 }
 0xfaf   :  { %5932 = vrot.lane.b32.xlu0 %v11915_v53, %s8601_s5 }
 0xfbb   :  { %v5393_v56 = vpop.xlane.xlu0 %5392 }
 0xfbd   :  { %v5395_v24 = vpop.xlane.xlu1 %5394 }
 0xfbe   :  { %8426 = vrcp.f32 %v5395_v24 }
 0xfbf   :  { %v5389_v36 = vpop.xlane.xlu0 %5388 }
 0xfc0   :  { %8428 = vrcp.f32 %v5389_v36 }
 0xfc1   :  { %8430 = vrcp.f32 %v5393_v56  ;;  %v5391_v40 = vpop.xlane.xlu1 %5390 }
 0xfc2   :  { %8432 = vrcp.f32 %v5391_v40 }
 0xfc3   :  { %v5614_v62 = vpop.permute.xlu0 %5613 }
 0xfc4   :  { %v5658_v43 = vsel %vm2068_vm1, %v5614_v62, 0 }
 0xfc8   :  { %v8427_v28 = vpop.eup %8426 }
 0xfc9   :  { %v5439_v29 = vmul.f32 %v8427_v28, %v11060_v60  ;;  %v5649_v60 = vsel %vm2068_vm1, %v11073_v33, 0 }
 0xfca   :  { %v8429_v3 = vpop.eup %8428 }
 0xfcb   :  { %v8431_v59 = vpop.eup %8430  ;;  %v5436_v32 = vmul.f32 %v8429_v3, %v11063_v57  ;;  %v5652_v57 = vsel %vm2068_vm1, %v5610_v55, 0 }
 0xfcc   :  { %v8433_v21 = vpop.eup %8432  ;;  %v5438_v53 = vmul.f32 %v8431_v59, %v11057_v7  ;;  %v5612_v7 = vpop.permute.xlu1 %5611 }
 0xfcd   :  { %v5437_v5 = vmul.f32 %v8433_v21, %v11066_v63  ;;  %v5655_v63 = vsel %vm2068_vm1, %v5612_v7, 0 }
 0xfce   :  { %v5453_v10 = vpack.c.bf16 %v5439_v29, %v5438_v53 }
 0xfcf   :  { %v5452_v41 = vpack.c.bf16 %v5437_v5, %v5436_v32 }
 0xfd1   :  { %7745 = vmatprep.mubr.bf16.mxu1 %v5452_v41 }
 0xfd2   :  { %7746 = vmatmul.mubr.bf16.vlgmr.msra.gmra.mrb[48].mxu1 %v5453_v10 }
 0xfd3   :  { %7762 = vmatpush3.bf16.xpose.msra.mxu1 %v5646_v27 }
 0xfd4   :  { %7884 = vmatprep.subr.msk.bf16.mxu1 %vm2068_vm1, %v11073_v33 }
 0xfdb   :  { %7764 = vmatpush3.bf16.xpose.msra.mxu1 %v5649_v60 }
 0xfdc   :  { %7885 = vmatprep.subr.msk.bf16.mxu1 %vm2068_vm1, %v5610_v55 }
 0xfe3   :  { %7766 = vmatpush3.bf16.xpose.msra.mxu1 %v5652_v57 }
 0xfe4   :  { %7886 = vmatprep.subr.msk.bf16.mxu1 %vm2068_vm1, %v5612_v7 }
 0xfeb   :  { %7768 = vmatpush3.bf16.xpose.msra.mxu1 %v5655_v63 }
 0xfec   :  { %7887 = vmatprep.subr.msk.bf16.mxu1 %vm2068_vm1, %v5614_v62 }
 0xff3   :  { %7770 = vmatpush3.bf16.xpose.msra.mxu1 %v5658_v43 }
 0xff4   :  { %v5401_v1 = vpop.xlane.xlu0 %5400 }
 0xff5   :  { %8434 = vrcp.f32 %v5401_v1 }
 0xff6   :  { %v5397_v33 = vpop.xlane.xlu1 %5396 }
 0xff7   :  { %8436 = vrcp.f32 %v5397_v33 }
 0xffa   :  { %v5403_v42 = vpop.xlane.xlu1 %5402  ;;  %v5399_v9 = vpop.xlane.xlu0 %5398 }
 0xffb   :  { %8438 = vrcp.f32 %v5403_v42 }
 0xffc   :  { %8440 = vrcp.f32 %v5399_v9 }
 0xffe   :  { %v5409_v37 = vpop.xlane.xlu1 %5408  ;;  %v5417_v52 = vpop.xlane.xlu0 %5416 }
 0xfff   :  { %v8435_v58 = vpop.eup %8434 }
0x1000   :  { %v5442_v45 = vmul.f32 %v8435_v58, %v11082_v11 }
0x1001   :  { %v8437_v17 = vpop.eup %8436 }
0x1002   :  { %v5405_v12 = vpop.xlane.xlu1 %5404  ;;  %v5413_v54 = vpop.xlane.xlu0 %5412  ;;  %v5440_v55 = vmul.f32 %v8437_v17, %v11085_v22 }
0x1005   :  { %v8439_v2 = vpop.eup %8438 }
0x1006   :  { %v8441_v14 = vpop.eup %8440  ;;  %v5443_v0 = vmul.f32 %v8439_v2, %v11090_v34  ;;  %v5411_v20 = vpop.xlane.xlu1 %5410 }
0x1007   :  { %v5419_v48 = vpop.xlane.xlu0 %5418  ;;  %v5441_v56 = vmul.f32 %v8441_v14, %v11092_v18  ;;  %8442 = vrcp.f32 %v5411_v20 }
0x1008   :  { %v5455_v24 = vpack.c.bf16 %v5443_v0, %v5442_v45  ;;  %8444 = vrcp.f32 %v5405_v12 }
0x1009   :  { %v5454_v36 = vpack.c.bf16 %v5441_v56, %v5440_v55  ;;  %8446 = vrcp.f32 %v5409_v37 }
0x100a   :  { %v5407_v40 = vpop.xlane.xlu1 %5406 }
0x100b   :  { %v5618_v28 = vpop.permute.xlu0 %5617  ;;  %8448 = vrcp.f32 %v5407_v40  ;;  %7749 = vmatprep.mubr.bf16.mxu1 %v5454_v36 }
0x100c   :  { %7750 = vmatmul.mubr.bf16.gmra.mrb[52].mxu1 %v5455_v24  ;;  %8450 = vrcp.f32 %v5413_v54  ;;  %v5664_v9 = vsel %vm2068_vm1, %v5618_v28, 0 }
0x100e   :  { %v5415_v11 = vpop.xlane.xlu1 %5414 }
0x100f   :  { %v5620_v3 = vpop.permute.xlu0 %5619  ;;  %8452 = vrcp.f32 %v5415_v11 }
0x1010   :  { %8454 = vrcp.f32 %v5419_v48 }
0x1011   :  { %v8443_v34 = vpop.eup %8442  ;;  %8456 = vrcp.f32 %v5417_v52 }
0x1012   :  { %v5616_v22 = vpop.permute.xlu1 %5615  ;;  %v8445_v18 = vpop.eup %8444  ;;  %v5447_v5 = vmul.f32 %v8443_v34, %v11109_v50 }
0x1013   :  { %v5584_v59 = vpop.permute.xlu0 %5583  ;;  %7888 = vmatprep.subr.msk.bf16.mxu1 %vm2068_vm1, %v5616_v22  ;;  %v5661_v21 = vsel %vm2068_vm1, %v5616_v22, 0  ;;  %v8447_v29 = vpop.eup %8446  ;;  %v5444_v10 = vmul.f32 %v8445_v18, %v11103_v26 }
0x1014   :  { %7772 = vmatpush3.bf16.xpose.msra.mxu1 %v5661_v21  ;;  %v5446_v57 = vmul.f32 %v8447_v29, %v11097_v13 }
0x1015   :  { %v8449_v32 = vpop.eup %8448  ;;  %7889 = vmatprep.subr.msk.bf16.mxu1 %vm2068_vm1, %v5618_v28 }
0x1016   :  { %v5582_v53 = vpop.permute.xlu1 %5581  ;;  %v5445_v27 = vmul.f32 %v8449_v32, %v11115_v23  ;;  %v8451_v60 = vpop.eup %8450  ;;  %v5457_v62 = vpack.c.bf16 %v5447_v5, %v5446_v57 }
0x1017   :  { %v5588_v41 = vpop.permute.xlu0 %5587  ;;  %v5448_v50 = vmul.f32 %v8451_v60, %v11105_v8 }
0x1018   :  { %v5456_v7 = vpack.c.bf16 %v5445_v27, %v5444_v10 }
0x1019   :  { %v8453_v63 = vpop.eup %8452 }
0x101a   :  { %v8455_v43 = vpop.eup %8454  ;;  %v5586_v1 = vpop.permute.xlu1 %5585  ;;  %7753 = vmatprep.mubr.bf16.mxu1 %v5456_v7  ;;  %v5449_v42 = vmul.f32 %v8453_v63, %v11118_v31  ;;  %v5667_v31 = vsel %vm2068_vm1, %v5620_v3, 0 }
0x101b   :  { %v5592_v33 = vpop.permute.xlu0 %5591  ;;  %7754 = vmatmul.mubr.bf16.gmra.mrb[56].mxu1 %v5457_v62  ;;  %v8457_v26 = vpop.eup %8456  ;;  %v5451_v37 = vmul.f32 %v8455_v43, %v11111_v38 }
0x101c   :  { %7774 = vmatpush3.bf16.xpose.msra.mxu1 %v5664_v9  ;;  %v5458_v23 = vpack.c.bf16 %v5449_v42, %v5448_v50  ;;  %v5450_v12 = vmul.f32 %v8457_v26, %v11099_v44 }
0x101d   :  { %7890 = vmatprep.subr.msk.bf16.mxu1 %vm2068_vm1, %v5620_v3 }
0x101e   :  { %v5590_v13 = vpop.permute.xlu1 %5589  ;;  %7757 = vmatprep.mubr.bf16.mxu1 %v5458_v23  ;;  %v5459_v54 = vpack.c.bf16 %v5451_v37, %v5450_v12 }
0x101f   :  { %v5596_v52 = vpop.permute.xlu0 %5595 }
0x1022   :  { %v5594_v58 = vpop.permute.xlu1 %5593 }
0x1023   :  { %v5927_v8 = vpop.permute.xlu0 %5926  ;;  %7758 = vmatmul.mubr.bf16.gmra.mrb[60].mxu1 %v5459_v54 }
0x1024   :  { %7793 = vmatprep.subr.bf16.mxu0 %v5927_v8  ;;  %7776 = vmatpush3.bf16.xpose.msra.mxu1 %v5667_v31 }
0x1025   :  { %7777 = vmatprep.mubr.msk.bf16.mxu1 %vm2068_vm1, %v5582_v53  ;;  %7794 = vmatpush3.bf16.msra.mxu0 %v5927_v8 }
0x1026   :  { %v5929_v17 = vpop.permute.xlu1 %5928 }
0x1027   :  { %v5931_v38 = vpop.permute.xlu0 %5930  ;;  %7795 = vmatprep.subr.bf16.mxu0 %v5929_v17 }
0x1029   :  { %7796 = vmatpush3.bf16.msra.mxu0 %v5929_v17 }
0x102a   :  { %7797 = vmatprep.subr.bf16.mxu0 %v5931_v38 }
0x102b   :  { %7778 = vmatmul.mubr.msk.bf16.vlgmr.msra.gmra.mrb[64].mxu1 %vm2068_vm1, %v5584_v59  ;;  %v5933_v44 = vpop.permute.xlu0 %5932 }
0x102c   :  { %7781 = vmatprep.mubr.msk.bf16.mxu1 %vm2068_vm1, %v5586_v1 }
0x102d   :  { %7798 = vmatpush3.bf16.msra.mxu0 %v5931_v38 }
0x102e   :  { %7799 = vmatprep.subr.bf16.mxu0 %v5933_v44 }
0x1031   :  { %7800 = vmatpush3.bf16.msra.mxu0 %v5933_v44 }
0x1033   :  { %7782 = vmatmul.mubr.msk.bf16.gmra.mrb[68].mxu1 %vm2068_vm1, %v5588_v41 }
0x1034   :  { %7785 = vmatprep.mubr.msk.bf16.mxu1 %vm2068_vm1, %v5590_v13 }
0x103b   :  { %7786 = vmatmul.mubr.msk.bf16.gmra.mrb[72].mxu1 %vm2068_vm1, %v5592_v33 }
0x103c   :  { %7789 = vmatprep.mubr.msk.bf16.mxu1 %vm2068_vm1, %v5594_v58 }
0x1043   :  { %7790 = vmatmul.mubr.msk.bf16.gmra.mrb[76].mxu1 %vm2068_vm1, %v5596_v52 }
0x10a5   :  { %v7747_v2 = vpop.f32.mrb[48].mxu1 }
0x10a6   :  { %5559 = vst.msk [vmem:[#allocation2 + $0x128] sm:$0xff] %vm2068_vm1, %v7747_v2  ;;  %v5494_v14 = vpop.f32.mrb[49].mxu1 }
0x10a7   :  { %5557 = vst.msk [vmem:[#allocation2 + $0x108] sm:$0xff] %vm2068_vm1, %v5494_v14  ;;  %v7748_v45 = vpop.f32.mrb[50].mxu1 }
0x10a8   :  { %5560 = vst.msk [vmem:[#allocation2 + $0x138] sm:$0xff] %vm2068_vm1, %v7748_v45  ;;  %v5497_v0 = vpop.f32.mrb[51].mxu1 }
0x10a9   :  { %5558 = vst.msk [vmem:[#allocation2 + $0x118] sm:$0xff] %vm2068_vm1, %v5497_v0 }
0x10df   :  { %v7751_v20 = vpop.f32.mrb[52].mxu1 }
0x10e0   :  { %5563 = vst.msk [vmem:[#allocation2 + $0x168] sm:$0xff] %vm2068_vm1, %v7751_v20  ;;  %v5510_v48 = vpop.f32.mrb[53].mxu1 }
0x10e1   :  { %5561 = vst.msk [vmem:[#allocation2 + $0x148] sm:$0xff] %vm2068_vm1, %v5510_v48  ;;  %v7752_v55 = vpop.f32.mrb[54].mxu1 }
0x10e2   :  { %5564 = vst.msk [vmem:[#allocation2 + $0x178] sm:$0xff] %vm2068_vm1, %v7752_v55  ;;  %v5513_v56 = vpop.f32.mrb[55].mxu1 }
0x10e3   :  { %5562 = vst.msk [vmem:[#allocation2 + $0x158] sm:$0xff] %vm2068_vm1, %v5513_v56 }
0x10ee   :  { %v7755_v24 = vpop.f32.mrb[56].mxu1 }
0x10ef   :  { %5567 = vst.msk [vmem:[#allocation2 + $0x1a8] sm:$0xff] %vm2068_vm1, %v7755_v24  ;;  %v5526_v36 = vpop.f32.mrb[57].mxu1 }
0x10f0   :  { %5565 = vst.msk [vmem:[#allocation2 + $0x188] sm:$0xff] %vm2068_vm1, %v5526_v36  ;;  %v7756_v40 = vpop.f32.mrb[58].mxu1 }
0x10f1   :  { %5568 = vst.msk [vmem:[#allocation2 + $0x1b8] sm:$0xff] %vm2068_vm1, %v7756_v40  ;;  %v5529_v28 = vpop.f32.mrb[59].mxu1 }
0x10f2   :  { %5566 = vst.msk [vmem:[#allocation2 + $0x198] sm:$0xff] %vm2068_vm1, %v5529_v28 }
0x10f6   :  { %v7759_v11 = vpop.f32.mrb[60].mxu1 }
0x10f7   :  { %5571 = vst.msk [vmem:[#allocation2 + $0x1e8] sm:$0xff] %vm2068_vm1, %v7759_v11  ;;  %v5542_v3 = vpop.f32.mrb[61].mxu1 }
0x10f8   :  { %5569 = vst.msk [vmem:[#allocation2 + $0x1c8] sm:$0xff] %vm2068_vm1, %v5542_v3  ;;  %v7760_v34 = vpop.f32.mrb[62].mxu1 }
0x10f9   :  { %5572 = vst.msk [vmem:[#allocation2 + $0x1f8] sm:$0xff] %vm2068_vm1, %v7760_v34  ;;  %v5545_v22 = vpop.f32.mrb[63].mxu1 }
0x10fa   :  { %5570 = vst.msk [vmem:[#allocation2 + $0x1d8] sm:$0xff] %vm2068_vm1, %v5545_v22 }
0x10fe   :  { %v7779_v59 = vpop.f32.mrb[64].mxu1 }
0x10ff   :  { %5770 = vmax.xlane.f32.xlu0 %v7779_v59  ;;  %v5703_v18 = vpop.f32.mrb[65].mxu1 }
0x1100   :  { %5766 = vmax.xlane.f32.xlu1 %v5703_v18  ;;  %v7780_v21 = vpop.f32.mrb[66].mxu1 }
0x1101   :  { %v5706_v29 = vpop.f32.mrb[67].mxu1 }
0x1103   :  { %5768 = vmax.xlane.f32.xlu0 %v5706_v29 }
0x1104   :  { %5772 = vmax.xlane.f32.xlu1 %v7780_v21 }
0x1106   :  { %v7783_v32 = vpop.f32.mrb[68].mxu1 }
0x1107   :  { %5778 = vmax.xlane.f32.xlu0 %v7783_v32  ;;  %v5719_v5 = vpop.f32.mrb[69].mxu1 }
0x1108   :  { %v7784_v53 = vpop.f32.mrb[70].mxu1 }
0x1109   :  { %5780 = vmax.xlane.f32.xlu1 %v7784_v53  ;;  %v5722_v41 = vpop.f32.mrb[71].mxu1 }
0x110b   :  { %5774 = vmax.xlane.f32.xlu0 %v5719_v5 }
0x110d   :  { %5776 = vmax.xlane.f32.xlu1 %v5722_v41 }
0x110e   :  { %v11209_v10 = vpop.f32.mrb[72].mxu1 }
0x110f   :  { %5786 = vmax.xlane.f32.xlu0 %v11209_v10  ;;  %v11212_v27 = vpop.f32.mrb[73].mxu1 }
0x1110   :  { %v11214_v60 = vpop.f32.mrb[74].mxu1 }
0x1111   :  { %5788 = vmax.xlane.f32.xlu1 %v11214_v60  ;;  %v11217_v57 = vpop.f32.mrb[75].mxu1 }
0x1113   :  { %5782 = vmax.xlane.f32.xlu0 %v11212_v27 }
0x1115   :  { %5784 = vmax.xlane.f32.xlu1 %v11217_v57 }
0x1116   :  { %v11221_v7 = vpop.f32.mrb[76].mxu1 }
0x1117   :  { %5794 = vmax.xlane.f32.xlu0 %v11221_v7  ;;  %v11224_v63 = vpop.f32.mrb[77].mxu1 }
0x1118   :  { %v11226_v62 = vpop.f32.mrb[78].mxu1 }
0x1119   :  { %v11228_v43 = vpop.f32.mrb[79].mxu1 }
0x111b   :  { %5790 = vmax.xlane.f32.xlu0 %v11224_v63 }
0x1126   :  { %5936 = vrot.lane.b32.xlu1 %v11917_v51, %s8601_s5 }
0x1131   :  { %5934 = vrot.lane.b32.xlu0 %v11916_v16, %s8601_s5 }
0x114a   :  { %5796 = vmax.xlane.f32.xlu1 %v11226_v62 }
0x114e   :  { %5792 = vmax.xlane.f32.xlu1 %v11228_v43 }
0x118c   :  { %v5771_v1 = vpop.xlane.xlu0 %5770 }
0x118d   :  { %v5800_v33 = vsub.f32 %v7779_v59, %v5771_v1  ;;  %v5767_v50 = vpop.xlane.xlu1 %5766 }
0x118e   :  { %v5798_v42 = vsub.f32 %v5703_v18, %v5767_v50 }
0x118f   :  { %v5818_v9 = vmul.f32 1.442695, %v5800_v33 }
0x1190   :  { %v5769_v26 = vpop.xlane.xlu0 %5768  ;;  %v5814_v23 = vmul.f32 1.442695, %v5798_v42 }
0x1191   :  { %8458 = vpow2.f32 %v5818_v9  ;;  %v5773_v37 = vpop.xlane.xlu1 %5772  ;;  %v5799_v52 = vsub.f32 %v5706_v29, %v5769_v26 }
0x1192   :  { %v5801_v13 = vsub.f32 %v7780_v21, %v5773_v37  ;;  %8460 = vpow2.f32 %v5814_v23 }
0x1193   :  { %v5816_v8 = vmul.f32 1.442695, %v5799_v52 }
0x1194   :  { %v5820_v12 = vmul.f32 1.442695, %v5801_v13  ;;  %v5779_v51 = vpop.xlane.xlu0 %5778 }
0x1195   :  { %v5804_v54 = vsub.f32 %v7783_v32, %v5779_v51 }
0x1196   :  { %v5781_v16 = vpop.xlane.xlu1 %5780  ;;  %8462 = vpow2.f32 %v5820_v12 }
0x1197   :  { %v5826_v58 = vmul.f32 1.442695, %v5804_v54  ;;  %v5805_v31 = vsub.f32 %v7784_v53, %v5781_v16  ;;  %v11962_v54 = vld [vmem:[#allocation88_spill] sm:$0xff] }
0x1198   :  { %v5775_v17 = vpop.xlane.xlu0 %5774 }
0x1199   :  { %8464 = vpow2.f32 %v5826_v58  ;;  %v5802_v38 = vsub.f32 %v5719_v5, %v5775_v17  ;;  %v5828_v0 = vmul.f32 1.442695, %v5805_v31  ;;  %v11963_v58 = vld [vmem:[#allocation89_spill] sm:$0xff]  ;;  %v11965_v17 = vld [vmem:[#allocation118_spill] sm:$0xff] }
0x119a   :  { %v5777_v44 = vpop.xlane.xlu1 %5776  ;;  %8466 = vpow2.f32 %v5816_v8  ;;  %v11964_v8 = vld [vmem:[#allocation114_spill] sm:$0xff] }
0x119b   :  { %v11237_v2 = vpop.eup %8458  ;;  %v5822_v14 = vmul.f32 1.442695, %v5802_v38  ;;  %v5803_v45 = vsub.f32 %v5722_v41, %v5777_v44  ;;  %v11966_v38 = vld [vmem:[#allocation45_spill] sm:$0xff] }
0x119c   :  { %5850 = vadd.xlane.f32.xlu1 %v11237_v2  ;;  %v5787_v20 = vpop.xlane.xlu0 %5786  ;;  %v11240_v55 = vpop.eup %8460 }
0x119d   :  { %8468 = vpow2.f32 %v5822_v14  ;;  %v5824_v48 = vmul.f32 1.442695, %v5803_v45  ;;  %v5808_v53 = vsub.f32 %v11209_v10, %v5787_v20  ;;  %v11967_v45 = vld [vmem:[#allocation47_spill] sm:$0xff] }
0x119e   :  { %8470 = vpow2.f32 %v5828_v0  ;;  %v5789_v36 = vpop.xlane.xlu1 %5788  ;;  %v11968_v0 = vld [vmem:[#allocation50_spill] sm:$0xff] }
0x119f   :  { %8472 = vpow2.f32 %v5824_v48  ;;  %v5809_v1 = vsub.f32 %v11214_v60, %v5789_v36  ;;  %v5834_v50 = vmul.f32 1.442695, %v5808_v53  ;;  %v11970_v36 = vld [vmem:[#allocation90_spill] sm:$0xff] }
0x11a0   :  { %5846 = vadd.xlane.f32.xlu1 %v11240_v55  ;;  %v5783_v56 = vpop.xlane.xlu0 %5782  ;;  %v11243_v24 = vpop.eup %8462 }
0x11a1   :  { %v5806_v32 = vsub.f32 %v11212_v27, %v5783_v56  ;;  %v5836_v42 = vmul.f32 1.442695, %v5809_v1  ;;  %v11969_v56 = vld [vmem:[#allocation46_spill] sm:$0xff]  ;;  %v11973_v1 = vld [vmem:[#allocation44_spill] sm:$0xff] }
0x11a2   :  { %v5785_v34 = vpop.xlane.xlu1 %5784 }
0x11a3   :  { %v11245_v40 = vpop.eup %8464  ;;  %v5807_v5 = vsub.f32 %v11217_v57, %v5785_v34  ;;  %v5830_v41 = vmul.f32 1.442695, %v5806_v32 }
0x11a4   :  { %5852 = vadd.xlane.f32.xlu1 %v11243_v24  ;;  %5858 = vadd.xlane.f32.xlu0 %v11245_v40  ;;  %v5795_v28 = vpop.xlane.xlu0 %5794  ;;  %v11249_v11 = vpop.eup %8466 }
0x11a5   :  { %v5832_v33 = vmul.f32 1.442695, %v5807_v5  ;;  %8474 = vpow2.f32 %v5830_v41 }
0x11a6   :  { %v5937_v29 = vpop.permute.xlu1 %5936 }
0x11a7   :  { %v11251_v3 = vpop.eup %8468  ;;  %8476 = vpow2.f32 %v5832_v33 }
0x11a8   :  { %5848 = vadd.xlane.f32.xlu1 %v11249_v11  ;;  %5854 = vadd.xlane.f32.xlu0 %v11251_v3  ;;  %v5791_v22 = vpop.xlane.xlu0 %5790  ;;  %v11255_v59 = vpop.eup %8470  ;;  %8478 = vpow2.f32 %v5834_v50 }
0x11a9   :  { %v11257_v18 = vpop.eup %8472  ;;  %v5810_v9 = vsub.f32 %v11224_v63, %v5791_v22  ;;  %8480 = vpow2.f32 %v5836_v42  ;;  %v11971_v22 = vld [vmem:[#allocation91_spill] sm:$0xff] }
0x11aa   :  { %v7994_v42 = vld [vmem:[%s11625_s7 + $0x40] sm:$0xff]  }
0x11ab   :  { %v5838_v27 = vmul.f32 1.442695, %v5810_v9 }
0x11ac   :  { %5856 = vadd.xlane.f32.xlu1 %v11257_v18  ;;  %5860 = vadd.xlane.f32.xlu0 %v11255_v59  ;;  %v5935_v21 = vpop.permute.xlu0 %5934 }
0x11ad   :  { %7801 = vmatprep.subr.bf16.mxu0 %v5935_v21  ;;  %8482 = vpow2.f32 %v5838_v27 }
0x11ae   :  { %7802 = vmatpush3.bf16.msra.mxu0 %v5935_v21  ;;  %v11972_v21 = vld [vmem:[#allocation120_spill] sm:$0xff] }
0x11af   :  { %7803 = vmatprep.subr.bf16.mxu0 %v5937_v29  ;;  %v11273_v37 = vpop.eup %8474 }
0x11b1   :  { %v11275_v13 = vpop.eup %8476 }
0x11b2   :  { %7804 = vmatpush3.bf16.msra.mxu0 %v5937_v29 }
0x11bd   :  { %5940 = vrot.lane.b32.xlu1 %v11919_v25, %s8601_s5 }
0x11c2   :  { %5938 = vrot.lane.b32.xlu0 %v11918_v30, %s8601_s5  ;;  %v5812_v30 = vsub.f32 %v11221_v7, %v5795_v28  ;;  %v11279_v7 = vpop.eup %8478 }
0x11c3   :  { %v11281_v63 = vpop.eup %8480 }
0x11c4   :  { %v5842_v23 = vmul.f32 1.442695, %v5812_v30 }
0x11d7   :  { %v5797_v25 = vpop.xlane.xlu1 %5796 }
0x11d8   :  { %v5813_v57 = vsub.f32 %v11226_v62, %v5797_v25  ;;  %v11285_v62 = vpop.eup %8482 }
0x11da   :  { %v5844_v52 = vmul.f32 1.442695, %v5813_v57  ;;  %v7995_v57 = vld [vmem:[%s11625_s7] sm:$0xff]  }
0x11db   :  { %v5793_v26 = vpop.xlane.xlu1 %5792 }
0x11dc   :  { %v5811_v10 = vsub.f32 %v11228_v43, %v5793_v26 }
0x11de   :  { %v5840_v60 = vmul.f32 1.442695, %v5811_v10 }
0x11e0   :  { %8484 = vpow2.f32 %v5840_v60 }
0x11e1   :  { %5864 = vadd.xlane.f32.xlu0 %v11275_v13  ;;  %5862 = vadd.xlane.f32.xlu1 %v11273_v37  ;;  %8486 = vpow2.f32 %v5842_v23  ;;  %v7996_v23 = vld [vmem:[%s11625_s7 + $0x48] sm:$0xff]  }
0x11e2   :  { %8488 = vpow2.f32 %v5844_v52 }
0x11e5   :  { %5866 = vadd.xlane.f32.xlu0 %v11279_v7  ;;  %5868 = vadd.xlane.f32.xlu1 %v11281_v63 }
0x11e9   :  { %5870 = vadd.xlane.f32.xlu0 %v11285_v62 }
0x11ea   :  { %v11288_v43 = vpop.eup %8484 }
0x11eb   :  { %5872 = vadd.xlane.f32.xlu1 %v11288_v43  ;;  %v11291_v12 = vpop.eup %8486 }
0x11ec   :  { %v11294_v51 = vpop.eup %8488 }
0x11ed   :  { %5874 = vadd.xlane.f32.xlu0 %v11291_v12 }
0x11ef   :  { %5876 = vadd.xlane.f32.xlu1 %v11294_v51 }
0x1200   :  { %3960 = vrot.lane.b32.xlu1 %v10593_v15, %s8601_s5  ;;  %v11959_v15 = vld [vmem:[#allocation54_spill] sm:$0xff] }
0x1203   :  { %3958 = vrot.lane.b32.xlu0 %v10589_v49, %s8601_s5  ;;  %v11957_v49 = vld [vmem:[#allocation121_spill] sm:$0xff] }
0x1204   :  { %2969 = vrot.lane.b32.xlu1 %v10369_v47, %s8601_s5  ;;  %v11952_v47 = vld [vmem:[#allocation117_spill] sm:$0xff] }
0x1207   :  { %2971 = vrot.lane.b32.xlu0 %v10373_v19, %s8601_s5  ;;  %v11953_v19 = vld [vmem:[#allocation48_spill] sm:$0xff] }
0x1208   :  { %3962 = vrot.lane.b32.xlu1 %v10587_v6, %s8601_s5  ;;  %v11954_v6 = vld [vmem:[#allocation49_spill] sm:$0xff] }
0x120b   :  { %3964 = vrot.lane.b32.xlu0 %v10591_v35, %s8601_s5  ;;  %v11958_v35 = vld [vmem:[#allocation52_spill] sm:$0xff] }
0x120c   :  { %2973 = vrot.lane.b32.xlu1 %v10367_v39, %s8601_s5  ;;  %v11955_v39 = vld [vmem:[#allocation53_spill] sm:$0xff] }
0x120f   :  { %2975 = vrot.lane.b32.xlu0 %v10371_v4, %s8601_s5  ;;  %v11956_v4 = vld [vmem:[#allocation116_spill] sm:$0xff] }
0x1210   :  { %3966 = vrot.lane.b32.xlu1 %v10597_v46, %s8601_s5  ;;  %v11960_v46 = vld [vmem:[#allocation115_spill] sm:$0xff] }
0x1213   :  { %3968 = vrot.lane.b32.xlu0 %v10601_v61, %s8601_s5  ;;  %v11961_v61 = vld [vmem:[#allocation119_spill] sm:$0xff] }
0x1214   :  { %2977 = vrot.lane.b32.xlu1 %v11952_v47, %s8601_s5  ;;  %v7997_v47 = vld [vmem:[%s11625_s7 + $0x8] sm:$0xff]  }
0x1217   :  { %2979 = vrot.lane.b32.xlu0 %v11953_v19, %s8601_s5 }
0x1218   :  { %3970 = vrot.lane.b32.xlu1 %v11954_v6, %s8601_s5  ;;  %v7998_v6 = vld [vmem:[%s11625_s7 + $0x50] sm:$0xff]  }
0x121b   :  { %3972 = vrot.lane.b32.xlu0 %v11955_v39, %s8601_s5 }
0x121c   :  { %2981 = vrot.lane.b32.xlu1 %v11956_v4, %s8601_s5  ;;  %v8000_v4 = vld [vmem:[%s11625_s7 + $0x58] sm:$0xff]  }
0x121f   :  { %2983 = vrot.lane.b32.xlu0 %v11957_v49, %s8601_s5  ;;  %v8003_v49 = vld [vmem:[%s11625_s7 + $0x20] sm:$0xff]  }
0x1220   :  { %3974 = vrot.lane.b32.xlu1 %v11958_v35, %s8601_s5  ;;  %v8004_v35 = vld [vmem:[%s11625_s7 + $0x68] sm:$0xff]  }
0x1223   :  { %3976 = vrot.lane.b32.xlu0 %v11959_v15, %s8601_s5  ;;  %v8005_v15 = vld [vmem:[%s11625_s7 + $0x28] sm:$0xff]  }
0x1224   :  { %2985 = vrot.lane.b32.xlu1 %v11960_v46, %s8601_s5  ;;  %v8006_v46 = vld [vmem:[%s11625_s7 + $0x70] sm:$0xff]  }
0x1227   :  { %2987 = vrot.lane.b32.xlu0 %v11961_v61, %s8601_s5  ;;  %v8007_v61 = vld [vmem:[%s11625_s7 + $0x30] sm:$0xff]  }
0x1228   :  { %3978 = vrot.lane.b32.xlu1 %v11962_v54, %s8601_s5  ;;  %v8008_v54 = vld [vmem:[%s11625_s7 + $0x78] sm:$0xff]  }
0x1229   :  { %v5851_v16 = vpop.xlane.xlu1 %5850 }
0x122b   :  { %3980 = vrot.lane.b32.xlu0 %v11963_v58, %s8601_s5 }
0x122c   :  { %2989 = vrot.lane.b32.xlu1 %v11964_v8, %s8601_s5 }
0x122d   :  { %v5847_v31 = vpop.xlane.xlu1 %5846 }
0x122f   :  { %2991 = vrot.lane.b32.xlu0 %v11965_v17, %s8601_s5 }
0x1230   :  { %3982 = vrot.lane.b32.xlu1 %v11966_v38, %s8601_s5 }
0x1231   :  { %v5853_v44 = vpop.xlane.xlu1 %5852  ;;  %v5859_v14 = vpop.xlane.xlu0 %5858 }
0x1232   :  { %8490 = vrcp.f32 %v5853_v44 }
0x1233   :  { %3984 = vrot.lane.b32.xlu0 %v11967_v45, %s8601_s5  ;;  %8492 = vrcp.f32 %v5847_v31 }
0x1234   :  { %2993 = vrot.lane.b32.xlu1 %v11968_v0, %s8601_s5  ;;  %8494 = vrcp.f32 %v5851_v16  ;;  %v8009_v16 = vld [vmem:[%s11625_s7 + $0x38] sm:$0xff]  }
0x1235   :  { %v5849_v20 = vpop.xlane.xlu1 %5848  ;;  %v5855_v48 = vpop.xlane.xlu0 %5854 }
0x1236   :  { %8496 = vrcp.f32 %v5849_v20 }
0x1237   :  { %2995 = vrot.lane.b32.xlu0 %v11969_v56, %s8601_s5  ;;  %8498 = vrcp.f32 %v5855_v48 }
0x1238   :  { %3986 = vrot.lane.b32.xlu1 %v11970_v36, %s8601_s5 }
0x1239   :  { %v5857_v28 = vpop.xlane.xlu1 %5856  ;;  %v5861_v34 = vpop.xlane.xlu0 %5860 }
0x123a   :  { %8500 = vrcp.f32 %v5857_v28 }
0x123b   :  { %8502 = vrcp.f32 %v5861_v34  ;;  %3988 = vrot.lane.b32.xlu0 %v11971_v22, %s8601_s5 }
0x123c   :  { %2997 = vrot.lane.b32.xlu1 %v11972_v21, %s8601_s5  ;;  %v8491_v29 = vpop.eup %8490  ;;  %8504 = vrcp.f32 %v5859_v14 }
0x123d   :  { %v5939_v32 = vpop.permute.xlu0 %5938  ;;  %v8493_v5 = vpop.eup %8492  ;;  %v5897_v50 = vmul.f32 %v8491_v29, %v11243_v24 }
0x123e   :  { %7805 = vmatprep.subr.bf16.mxu0 %v5939_v32  ;;  %v8495_v53 = vpop.eup %8494  ;;  %v5941_v41 = vpop.permute.xlu1 %5940  ;;  %v5894_v9 = vmul.f32 %v8493_v5, %v11240_v55 }
0x123f   :  { %2999 = vrot.lane.b32.xlu0 %v11973_v1, %s8601_s5  ;;  %7806 = vmatpush3.bf16.msra.mxu0 %v5939_v32  ;;  %v5896_v27 = vmul.f32 %v8495_v53, %v11237_v2 }
0x1240   :  { %v8497_v33 = vpop.eup %8496  ;;  %7807 = vmatprep.subr.bf16.mxu0 %v5941_v41 }
0x1241   :  { %v5895_v25 = vmul.f32 %v8497_v33, %v11249_v11  ;;  %v8499_v30 = vpop.eup %8498  ;;  %v5911_v24 = vpack.c.bf16 %v5897_v50, %v5896_v27 }
0x1242   :  { %v5898_v55 = vmul.f32 %v8499_v30, %v11251_v3 }
0x1243   :  { %7808 = vmatpush3.bf16.msra.mxu0 %v5941_v41  ;;  %v5910_v26 = vpack.c.bf16 %v5895_v25, %v5894_v9 }
0x1244   :  { %v8501_v10 = vpop.eup %8500  ;;  %7167 = vmatprep.subr.bf16.mxu0 %v7994_v42 }
0x1245   :  { %v8503_v60 = vpop.eup %8502  ;;  %7809 = vmatprep.mubr.bf16.mxu0 %v5910_v26  ;;  %v5899_v11 = vmul.f32 %v8501_v10, %v11257_v18  ;;  %v7999_v18 = vld [vmem:[%s11625_s7 + $0x10] sm:$0xff]  }
0x1246   :  { %7810 = vmatmul.mubr.bf16.vlgmr.msra.gmra.mrb[0].mxu0 %v5911_v24  ;;  %v8505_v2 = vpop.eup %8504  ;;  %v5901_v19 = vmul.f32 %v8503_v60, %v11255_v59  ;;  %v8001_v59 = vld [vmem:[%s11625_s7 + $0x18] sm:$0xff]  }
0x1247   :  { %v5912_v52 = vpack.c.bf16 %v5899_v11, %v5898_v55  ;;  %7168 = vmatpush3.bf16.msra.mxu0 %v7995_v57  ;;  %v5900_v3 = vmul.f32 %v8505_v2, %v11245_v40  ;;  %v8002_v40 = vld [vmem:[%s11625_s7 + $0x60] sm:$0xff]  }
0x1248   :  { %7169 = vmatprep.subr.bf16.mxu0 %v7996_v23 }
0x1249   :  { %7813 = vmatprep.mubr.bf16.mxu0 %v5912_v52  ;;  %v5913_v39 = vpack.c.bf16 %v5901_v19, %v5900_v3 }
0x124b   :  { %7170 = vmatpush3.bf16.msra.mxu0 %v7997_v47 }
0x124c   :  { %7171 = vmatprep.subr.bf16.mxu0 %v7998_v6 }
0x124e   :  { %7814 = vmatmul.mubr.bf16.gmra.mrb[4].mxu0 %v5913_v39 }
0x124f   :  { %7172 = vmatpush3.bf16.msra.mxu0 %v7999_v18 }
0x1250   :  { %7173 = vmatprep.subr.bf16.mxu0 %v8000_v4 }
0x1253   :  { %7174 = vmatpush3.bf16.msra.mxu0 %v8001_v59 }
0x1254   :  { %7175 = vmatprep.subr.bf16.mxu0 %v8002_v40 }
0x1257   :  { %7176 = vmatpush3.bf16.msra.mxu0 %v8003_v49 }
0x1258   :  { %7177 = vmatprep.subr.bf16.mxu0 %v8004_v35 }
0x125b   :  { %7178 = vmatpush3.bf16.msra.mxu0 %v8005_v15 }
0x125c   :  { %7179 = vmatprep.subr.bf16.mxu0 %v8006_v46 }
0x125f   :  { %7180 = vmatpush3.bf16.msra.mxu0 %v8007_v61 }
0x1260   :  { %7181 = vmatprep.subr.bf16.mxu0 %v8008_v54 }
0x1263   :  { %7182 = vmatpush3.bf16.msra.mxu0 %v8009_v16 }
0x126e   :  { %v5863_v58 = vpop.xlane.xlu1 %5862  ;;  %v5865_v8 = vpop.xlane.xlu0 %5864 }
0x126f   :  { %8506 = vrcp.f32 %v5863_v58 }
0x1270   :  { %8508 = vrcp.f32 %v5865_v8 }
0x1272   :  { %v5869_v31 = vpop.xlane.xlu1 %5868  ;;  %v5867_v17 = vpop.xlane.xlu0 %5866 }
0x1273   :  { %8510 = vrcp.f32 %v5869_v31 }
0x1274   :  { %8512 = vrcp.f32 %v5867_v17 }
0x1276   :  { %v5871_v38 = vpop.xlane.xlu0 %5870 }
0x1277   :  { %8514 = vrcp.f32 %v5871_v38 }
0x1278   :  { %v5873_v44 = vpop.xlane.xlu1 %5872 }
0x1279   :  { %v8507_v14 = vpop.eup %8506  ;;  %8516 = vrcp.f32 %v5873_v44 }
0x127a   :  { %v8509_v45 = vpop.eup %8508  ;;  %v5875_v0 = vpop.xlane.xlu0 %5874  ;;  %v5902_v20 = vmul.f32 %v8507_v14, %v11273_v37 }
0x127b   :  { %8518 = vrcp.f32 %v5875_v0  ;;  %v5903_v48 = vmul.f32 %v8509_v45, %v11275_v13 }
0x127c   :  { %v5877_v56 = vpop.xlane.xlu1 %5876 }
0x127d   :  { %v8511_v36 = vpop.eup %8510  ;;  %8520 = vrcp.f32 %v5877_v56  ;;  %v5914_v28 = vpack.c.bf16 %v5903_v48, %v5902_v20 }
0x127e   :  { %v8513_v34 = vpop.eup %8512  ;;  %v5905_v22 = vmul.f32 %v8511_v36, %v11281_v63  ;;  %v3959_v21 = vpop.permute.xlu0 %3958 }
0x127f   :  { %v5904_v29 = vmul.f32 %v8513_v34, %v11279_v7  ;;  %7817 = vmatprep.mubr.bf16.mxu0 %v5914_v28  ;;  %4006 = vst.msk [vmem:[#allocation2 + $0x8] sm:$0xff] %vm3017_vm2, %v3959_v21 }
0x1280   :  { %v3961_v32 = vpop.permute.xlu1 %3960 }
0x1281   :  { %v8515_v5 = vpop.eup %8514  ;;  %v5915_v37 = vpack.c.bf16 %v5905_v22, %v5904_v29  ;;  %4007 = vst.msk [vmem:[#allocation2 + $0x18] sm:$0xff] %vm3017_vm2, %v3961_v32 }
0x1282   :  { %v2972_v13 = vpop.permute.xlu0 %2971  ;;  %v5906_v1 = vmul.f32 %v8515_v5, %v11285_v62 }
0x1283   :  { %v8517_v53 = vpop.eup %8516  ;;  %7818 = vmatmul.mubr.bf16.gmra.mrb[8].mxu0 %v5915_v37  ;;  %3019 = vst.msk [vmem:[#allocation2 + $0x10] sm:$0xff] %vm3017_vm2, %v2972_v13 }
0x1284   :  { %v2970_v41 = vpop.permute.xlu1 %2969  ;;  %v5907_v63 = vmul.f32 %v8517_v53, %v11288_v43 }
0x1285   :  { %v8519_v33 = vpop.eup %8518  ;;  %3018 = vst.msk [vmem:[#allocation2] sm:$0xff] %vm3017_vm2, %v2970_v41 }
0x1286   :  { %v3965_v7 = vpop.permute.xlu0 %3964  ;;  %v5916_v50 = vpack.c.bf16 %v5907_v63, %v5906_v1  ;;  %v5908_v9 = vmul.f32 %v8519_v33, %v11291_v12  ;;  %v6128_v43 = vld [vmem:[#allocation2 + $0x8] sm:$0xff] }
0x1287   :  { %v8521_v42 = vpop.eup %8520  ;;  %4009 = vst.msk [vmem:[#allocation2 + $0x38] sm:$0xff] %vm3017_vm2, %v3965_v7 }
0x1288   :  { %v5909_v25 = vmul.f32 %v8521_v42, %v11294_v51  ;;  %v3963_v30 = vpop.permute.xlu1 %3962  ;;  %7821 = vmatprep.mubr.bf16.mxu0 %v5916_v50  ;;  %v6130_v27 = vld [vmem:[#allocation2 + $0x18] sm:$0xff] }
0x1289   :  { %4008 = vst.msk [vmem:[#allocation2 + $0x28] sm:$0xff] %vm3017_vm2, %v3963_v30  ;;  %v6192_v57 = vpack.c.bf16 %v6130_v27, %v6128_v43 }
0x128a   :  { %v5917_v62 = vpack.c.bf16 %v5909_v25, %v5908_v9  ;;  %v2976_v26 = vpop.permute.xlu0 %2975  ;;  %v6129_v60 = vld [vmem:[#allocation2 + $0x10] sm:$0xff] }
0x128b   :  { %3021 = vst.msk [vmem:[#allocation2 + $0x30] sm:$0xff] %vm3017_vm2, %v2976_v26 }
0x128c   :  { %v2974_v10 = vpop.permute.xlu1 %2973  ;;  %7822 = vmatmul.mubr.bf16.gmra.mrb[12].mxu0 %v5917_v62  ;;  %v6127_v12 = vld [vmem:[#allocation2] sm:$0xff] }
0x128d   :  { %3020 = vst.msk [vmem:[#allocation2 + $0x20] sm:$0xff] %vm3017_vm2, %v2974_v10  ;;  %6383 = vmatprep.mubr.bf16.mxu0 %v6192_v57  ;;  %v6191_v55 = vpack.c.bf16 %v6129_v60, %v6127_v12 }
0x128e   :  { %v3969_v24 = vpop.permute.xlu0 %3968  ;;  %v6134_v2 = vld [vmem:[#allocation2 + $0x38] sm:$0xff] }
0x128f   :  { %4011 = vst.msk [vmem:[#allocation2 + $0x58] sm:$0xff] %vm3017_vm2, %v3969_v24 }
0x1290   :  { %v3967_v51 = vpop.permute.xlu1 %3966  ;;  %v6132_v23 = vld [vmem:[#allocation2 + $0x28] sm:$0xff] }
0x1291   :  { %4010 = vst.msk [vmem:[#allocation2 + $0x48] sm:$0xff] %vm3017_vm2, %v3967_v51  ;;  %v6194_v52 = vpack.c.bf16 %v6134_v2, %v6132_v23 }
0x1292   :  { %v2980_v11 = vpop.permute.xlu0 %2979  ;;  %v6133_v39 = vld [vmem:[#allocation2 + $0x30] sm:$0xff] }
0x1293   :  { %3023 = vst.msk [vmem:[#allocation2 + $0x50] sm:$0xff] %vm3017_vm2, %v2980_v11 }
0x1294   :  { %v2978_v47 = vpop.permute.xlu1 %2977  ;;  %6384 = vmatmul.mubr.bf16.vlgmr.msra.gmra.mrb[16].mxu0 %v6191_v55  ;;  %v6131_v6 = vld [vmem:[#allocation2 + $0x20] sm:$0xff] }
0x1295   :  { %3022 = vst.msk [vmem:[#allocation2 + $0x40] sm:$0xff] %vm3017_vm2, %v2978_v47  ;;  %6391 = vmatprep.mubr.bf16.mxu0 %v6194_v52  ;;  %v6193_v59 = vpack.c.bf16 %v6133_v39, %v6131_v6  ;;  %v11974_v47 = vld [vmem:[#allocation51_spill] sm:$0xff] }
0x1296   :  { %v3973_v19 = vpop.permute.xlu0 %3972  ;;  %v6138_v40 = vld [vmem:[#allocation2 + $0x58] sm:$0xff] }
0x1297   :  { %4013 = vst.msk [vmem:[#allocation2 + $0x78] sm:$0xff] %vm3017_vm2, %v3973_v19  ;;  %v11975_v19 = vld [vmem:[#allocation123_spill] sm:$0xff] }
0x1298   :  { %v3971_v3 = vpop.permute.xlu1 %3970  ;;  %v6136_v18 = vld [vmem:[#allocation2 + $0x48] sm:$0xff] }
0x1299   :  { %4012 = vst.msk [vmem:[#allocation2 + $0x68] sm:$0xff] %vm3017_vm2, %v3971_v3  ;;  %v6196_v49 = vpack.c.bf16 %v6138_v40, %v6136_v18  ;;  %v11978_v40 = vld [vmem:[#allocation122_spill] sm:$0xff] }
0x129a   :  { %v2984_v4 = vpop.permute.xlu0 %2983  ;;  %v6137_v16 = vld [vmem:[#allocation2 + $0x50] sm:$0xff] }
0x129b   :  { %3025 = vst.msk [vmem:[#allocation2 + $0x70] sm:$0xff] %vm3017_vm2, %v2984_v4  ;;  %v11976_v4 = vld [vmem:[#allocation92_spill] sm:$0xff] }
0x129c   :  { %v2982_v35 = vpop.permute.xlu1 %2981  ;;  %6392 = vmatmul.mubr.bf16.gmra.mrb[20].mxu0 %v6193_v59  ;;  %v6135_v46 = vld [vmem:[#allocation2 + $0x40] sm:$0xff]  ;;  %v11977_v59 = vld [vmem:[#allocation93_spill] sm:$0xff] }
0x129d   :  { %3024 = vst.msk [vmem:[#allocation2 + $0x60] sm:$0xff] %vm3017_vm2, %v2982_v35  ;;  %6399 = vmatprep.mubr.bf16.mxu0 %v6196_v49  ;;  %v6195_v8 = vpack.c.bf16 %v6137_v16, %v6135_v46  ;;  %v11979_v49 = vld [vmem:[#allocation94_spill] sm:$0xff]  ;;  %v11980_v35 = vld [vmem:[#allocation124_spill] sm:$0xff] }
0x129e   :  { %v3977_v15 = vpop.permute.xlu0 %3976  ;;  %v6142_v31 = vld [vmem:[#allocation2 + $0x78] sm:$0xff] }
0x129f   :  { %4015 = vst.msk [vmem:[#allocation2 + $0x98] sm:$0xff] %vm3017_vm2, %v3977_v15  ;;  %v11981_v15 = vld [vmem:[#allocation55_spill] sm:$0xff] }
0x12a0   :  { %v3975_v61 = vpop.permute.xlu1 %3974  ;;  %v6140_v54 = vld [vmem:[#allocation2 + $0x68] sm:$0xff] }
0x12a1   :  { %4014 = vst.msk [vmem:[#allocation2 + $0x88] sm:$0xff] %vm3017_vm2, %v3975_v61  ;;  %v6198_v17 = vpack.c.bf16 %v6142_v31, %v6140_v54 }
0x12a2   :  { %v2988_v58 = vpop.permute.xlu0 %2987  ;;  %v6141_v20 = vld [vmem:[#allocation2 + $0x70] sm:$0xff] }
0x12a3   :  { %3027 = vst.msk [vmem:[#allocation2 + $0x90] sm:$0xff] %vm3017_vm2, %v2988_v58  ;;  %v11982_v58 = vld [vmem:[#allocation107_spill] sm:$0xff] }
0x12a4   :  { %v2986_v38 = vpop.permute.xlu1 %2985  ;;  %6400 = vmatmul.mubr.bf16.gmra.mrb[24].mxu0 %v6195_v8  ;;  %v6139_v14 = vld [vmem:[#allocation2 + $0x60] sm:$0xff] }
0x12a5   :  { %3026 = vst.msk [vmem:[#allocation2 + $0x80] sm:$0xff] %vm3017_vm2, %v2986_v38  ;;  %6407 = vmatprep.mubr.bf16.mxu0 %v6198_v17  ;;  %v6197_v56 = vpack.c.bf16 %v6141_v20, %v6139_v14  ;;  %v11983_v8 = vld [vmem:[#allocation95_spill] sm:$0xff]  ;;  %v11984_v14 = vld [vmem:[#allocation112_spill] sm:$0xff] }
0x12a6   :  { %v3981_v44 = vpop.permute.xlu0 %3980  ;;  %v6146_v36 = vld [vmem:[#allocation2 + $0x98] sm:$0xff] }
0x12a7   :  { %4017 = vst.msk [vmem:[#allocation2 + $0xb8] sm:$0xff] %vm3017_vm2, %v3981_v44 }
0x12a8   :  { %v3979_v45 = vpop.permute.xlu1 %3978  ;;  %v6144_v0 = vld [vmem:[#allocation2 + $0x88] sm:$0xff] }
0x12a9   :  { %4016 = vst.msk [vmem:[#allocation2 + $0xa8] sm:$0xff] %vm3017_vm2, %v3979_v45  ;;  %v6200_v28 = vpack.c.bf16 %v6146_v36, %v6144_v0  ;;  %v11985_v45 = vld [vmem:[#allocation113_spill] sm:$0xff]  ;;  %v11497_v36 = vld [vmem:[%s11626_s8] ss:$0 sm:$0xff]  ;;  %s8602_s8 = smov [#allocation8]  }
0x12aa   :  { %v2992_v48 = vpop.permute.xlu0 %2991  ;;  %v6145_v5 = vld [vmem:[#allocation2 + $0x90] sm:$0xff] }
0x12ab   :  { %3029 = vst.msk [vmem:[#allocation2 + $0xb0] sm:$0xff] %vm3017_vm2, %v2992_v48 }
0x12ac   :  { %v2990_v34 = vpop.permute.xlu1 %2989  ;;  %6408 = vmatmul.mubr.bf16.gmra.mrb[28].mxu0 %v6197_v56  ;;  %v6143_v21 = vld [vmem:[#allocation2 + $0x80] sm:$0xff] }
0x12ad   :  { %3028 = vst.msk [vmem:[#allocation2 + $0xa0] sm:$0xff] %vm3017_vm2, %v2990_v34  ;;  %6415 = vmatprep.mubr.bf16.mxu0 %v6200_v28  ;;  %v6199_v13 = vpack.c.bf16 %v6145_v5, %v6143_v21  ;;  %v11986_v34 = vld [vmem:[#allocation13_spill] sm:$0xff]  ;;  %v11988_v5 = vld [vmem:[#allocation15_spill] sm:$0xff] }
0x12ae   :  { %v3985_v22 = vpop.permute.xlu0 %3984  ;;  %v6150_v53 = vld [vmem:[#allocation2 + $0xb8] sm:$0xff] }
0x12af   :  { %4019 = vst.msk [vmem:[#allocation2 + $0xd8] sm:$0xff] %vm3017_vm2, %v3985_v22 }
0x12b0   :  { %v3983_v29 = vpop.permute.xlu1 %3982  ;;  %v6148_v32 = vld [vmem:[#allocation2 + $0xa8] sm:$0xff] }
0x12b1   :  { %4018 = vst.msk [vmem:[#allocation2 + $0xc8] sm:$0xff] %vm3017_vm2, %v3983_v29  ;;  %v6202_v41 = vpack.c.bf16 %v6150_v53, %v6148_v32  ;;  %v11987_v29 = vld [vmem:[#allocation99_spill] sm:$0xff] }
0x12b2   :  { %v2996_v37 = vpop.permute.xlu0 %2995  ;;  %v6149_v42 = vld [vmem:[#allocation2 + $0xb0] sm:$0xff] }
0x12b3   :  { %3031 = vst.msk [vmem:[#allocation2 + $0xd0] sm:$0xff] %vm3017_vm2, %v2996_v37 }
0x12b4   :  { %v2994_v1 = vpop.permute.xlu1 %2993  ;;  %6416 = vmatmul.mubr.bf16.gmra.mrb[32].mxu0 %v6199_v13  ;;  %v6147_v33 = vld [vmem:[#allocation2 + $0xa0] sm:$0xff] }
0x12b5   :  { %3030 = vst.msk [vmem:[#allocation2 + $0xc0] sm:$0xff] %vm3017_vm2, %v2994_v1  ;;  %6423 = vmatprep.mubr.bf16.mxu0 %v6202_v41  ;;  %v6201_v25 = vpack.c.bf16 %v6149_v42, %v6147_v33  ;;  %v11989_v13 = vld [vmem:[#allocation103_spill] sm:$0xff] }
0x12b6   :  { %v3989_v63 = vpop.permute.xlu0 %3988  ;;  %v6154_v30 = vld [vmem:[#allocation2 + $0xd8] sm:$0xff] }
0x12b7   :  { %4021 = vst.msk [vmem:[#allocation2 + $0xf8] sm:$0xff] %vm3017_vm2, %v3989_v63 }
0x12b8   :  { %v3987_v7 = vpop.permute.xlu1 %3986  ;;  %v6152_v50 = vld [vmem:[#allocation2 + $0xc8] sm:$0xff] }
0x12b9   :  { %4020 = vst.msk [vmem:[#allocation2 + $0xe8] sm:$0xff] %vm3017_vm2, %v3987_v7  ;;  %v6204_v27 = vpack.c.bf16 %v6154_v30, %v6152_v50  ;;  %v11990_v50 = vld [vmem:[#allocation12_spill] sm:$0xff] }
0x12ba   :  { %v3000_v9 = vpop.permute.xlu0 %2999  ;;  %v6153_v57 = vld [vmem:[#allocation2 + $0xd0] sm:$0xff] }
0x12bb   :  { %3033 = vst.msk [vmem:[#allocation2 + $0xf0] sm:$0xff] %vm3017_vm2, %v3000_v9 }
0x12bc   :  { %v2998_v62 = vpop.permute.xlu1 %2997  ;;  %6424 = vmatmul.mubr.bf16.gmra.mrb[36].mxu0 %v6201_v25  ;;  %v6151_v26 = vld [vmem:[#allocation2 + $0xc0] sm:$0xff]  ;;  %v11991_v25 = vld [vmem:[#allocation97_spill] sm:$0xff] }
0x12bd   :  { %3032 = vst.msk [vmem:[#allocation2 + $0xe0] sm:$0xff] %vm3017_vm2, %v2998_v62  ;;  %6431 = vmatprep.mubr.bf16.mxu0 %v6204_v27  ;;  %v6203_v10 = vpack.c.bf16 %v6153_v57, %v6151_v26  ;;  %v11992_v27 = vld [vmem:[#allocation14_spill] sm:$0xff]  ;;  %v11993_v26 = vld [vmem:[#allocation101_spill] sm:$0xff] }
0x12be   :  { %v6158_v24 = vld [vmem:[#allocation2 + $0xf8] sm:$0xff] }
0x12c0   :  { %v6156_v43 = vld [vmem:[#allocation2 + $0xe8] sm:$0xff] }
0x12c1   :  { %v6206_v12 = vpack.c.bf16 %v6158_v24, %v6156_v43 }
0x12c2   :  { %v6157_v23 = vld [vmem:[#allocation2 + $0xf0] sm:$0xff] }
0x12c4   :  { %6432 = vmatmul.mubr.bf16.gmra.mrb[40].mxu0 %v6203_v10  ;;  %v6155_v51 = vld [vmem:[#allocation2 + $0xe0] sm:$0xff] }
0x12c5   :  { %6439 = vmatprep.mubr.bf16.mxu0 %v6206_v12  ;;  %v6205_v60 = vpack.c.bf16 %v6157_v23, %v6155_v51  ;;  %v11994_v23 = vld [vmem:[#allocation17_spill] sm:$0xff] }
0x12cc   :  { %6440 = vmatmul.mubr.bf16.gmra.mrb[44].mxu0 %v6205_v60 }
0x1319   :  { %v7811_v55 = vpop.f32.mrb[0].mxu0 }
0x131a   :  { %v5984_v11 = vpop.f32.mrb[1].mxu0 }
0x131b   :  { %6063 = vrot.lane.b32.xlu1 %v5984_v11, %s8601_s5  ;;  %v7812_v2 = vpop.f32.mrb[2].mxu0 }
0x131c   :  { %v5987_v52 = vpop.f32.mrb[3].mxu0 }
0x131d   :  { %6065 = vrot.lane.b32.xlu0 %v5987_v52, %s8601_s5 }
0x131f   :  { %5075 = vrot.lane.b32.xlu1 %v11974_v47, %s8601_s5 }
0x1321   :  { %5077 = vrot.lane.b32.xlu0 %v11975_v19, %s8601_s5  ;;  %v7815_v6 = vpop.f32.mrb[4].mxu0 }
0x1322   :  { %v6000_v3 = vpop.f32.mrb[5].mxu0 }
0x1323   :  { %6067 = vrot.lane.b32.xlu1 %v7811_v55, %s8601_s5  ;;  %v7816_v18 = vpop.f32.mrb[6].mxu0 }
0x1324   :  { %v6003_v39 = vpop.f32.mrb[7].mxu0 }
0x1325   :  { %6069 = vrot.lane.b32.xlu0 %v7812_v2, %s8601_s5  ;;  %v11995_v2 = vld [vmem:[#allocation19_spill] sm:$0xff] }
0x1327   :  { %5079 = vrot.lane.b32.xlu1 %v11976_v4, %s8601_s5  ;;  %v11996_v4 = vld [vmem:[#allocation16_spill] sm:$0xff] }
0x1329   :  { %5081 = vrot.lane.b32.xlu0 %v11977_v59, %s8601_s5 }
0x132b   :  { %6071 = vrot.lane.b32.xlu1 %v6000_v3, %s8601_s5 }
0x132d   :  { %6073 = vrot.lane.b32.xlu0 %v6003_v39, %s8601_s5 }
0x132f   :  { %5083 = vrot.lane.b32.xlu1 %v11978_v40, %s8601_s5 }
0x1331   :  { %5085 = vrot.lane.b32.xlu0 %v11979_v49, %s8601_s5 }
0x1333   :  { %6075 = vrot.lane.b32.xlu1 %v7815_v6, %s8601_s5 }
0x1335   :  { %6077 = vrot.lane.b32.xlu0 %v7816_v18, %s8601_s5 }
0x1337   :  { %5087 = vrot.lane.b32.xlu1 %v11980_v35, %s8601_s5  ;;  %v11997_v35 = vld [vmem:[#allocation18_spill] sm:$0xff] }
0x1339   :  { %5089 = vrot.lane.b32.xlu0 %v11981_v15, %s8601_s5 }
0x1356   :  { %v7819_v46 = vpop.f32.mrb[8].mxu0 }
0x1357   :  { %v6016_v61 = vpop.f32.mrb[9].mxu0 }
0x1358   :  { %6079 = vrot.lane.b32.xlu1 %v6016_v61, %s8601_s5  ;;  %v7820_v54 = vpop.f32.mrb[10].mxu0 }
0x1359   :  { %v6019_v16 = vpop.f32.mrb[11].mxu0 }
0x135a   :  { %6081 = vrot.lane.b32.xlu0 %v6019_v16, %s8601_s5 }
0x135c   :  { %5091 = vrot.lane.b32.xlu1 %v11982_v58, %s8601_s5 }
0x135e   :  { %5093 = vrot.lane.b32.xlu0 %v11983_v8, %s8601_s5 }
0x135f   :  { %v7823_v31 = vpop.f32.mrb[12].mxu0 }
0x1360   :  { %6083 = vrot.lane.b32.xlu1 %v7819_v46, %s8601_s5  ;;  %v6032_v17 = vpop.f32.mrb[13].mxu0 }
0x1361   :  { %v7824_v38 = vpop.f32.mrb[14].mxu0 }
0x1362   :  { %6085 = vrot.lane.b32.xlu0 %v7820_v54, %s8601_s5  ;;  %v6035_v44 = vpop.f32.mrb[15].mxu0 }
0x1364   :  { %5095 = vrot.lane.b32.xlu1 %v11984_v14, %s8601_s5  ;;  %v11999_v14 = vld [vmem:[#allocation23_spill] sm:$0xff] }
0x1366   :  { %5097 = vrot.lane.b32.xlu0 %v11985_v45, %s8601_s5 }
0x1367   :  { %v7183_v0 = vpop.f32.mrb[16].mxu0 }
0x1368   :  { %6087 = vrot.lane.b32.xlu1 %v6032_v17, %s8601_s5  ;;  %v7184_v20 = vpop.f32.mrb[17].mxu0 }
0x1369   :  { %v7185_v48 = vadd.f32 %v7184_v20, %v7183_v0  ;;  %v7186_v56 = vpop.f32.mrb[18].mxu0 }
0x136a   :  { %6089 = vrot.lane.b32.xlu0 %v6035_v44, %s8601_s5  ;;  %v7187_v28 = vpop.f32.mrb[19].mxu0 }
0x136b   :  { %v6386_v22 = vadd.f32 %v7185_v48, %v11986_v34  ;;  %v7188_v21 = vadd.f32 %v7187_v28, %v7186_v56 }
0x136c   :  { %5099 = vrot.lane.b32.xlu1 %v11987_v29, %s8601_s5 }
0x136d   :  { %v6519_v32 = vadd.f32 %v11497_v36, %v6386_v22  ;;  %v6389_v37 = vadd.f32 %v7188_v21, %v11988_v5 }
0x136e   :  { %5101 = vrot.lane.b32.xlu0 %v11989_v13, %s8601_s5 }
0x136f   :  { %6551 = vst [vmem:[#allocation8] sm:$0xff] %v6519_v32  ;;  %v6520_v53 = vadd.f32 %v11497_v36, %v6389_v37  ;;  %v7189_v41 = vpop.f32.mrb[20].mxu0  ;;  %v12000_v32 = vld [vmem:[#allocation20_spill] sm:$0xff] }
0x1370   :  { %6091 = vrot.lane.b32.xlu1 %v7823_v31, %s8601_s5  ;;  %v7190_v1 = vpop.f32.mrb[21].mxu0  ;;  %v11998_v31 = vld [vmem:[#allocation21_spill] sm:$0xff] }
0x1371   :  { %6552 = vst [vmem:[#allocation8 + $0x8] sm:$0xff] %v6520_v53  ;;  %v7191_v63 = vadd.f32 %v7190_v1, %v7189_v41  ;;  %v7192_v33 = vpop.f32.mrb[22].mxu0  ;;  %v12001_v41 = vld [vmem:[#allocation22_spill] sm:$0xff] }
0x1372   :  { %6093 = vrot.lane.b32.xlu0 %v7824_v38, %s8601_s5  ;;  %v7193_v7 = vpop.f32.mrb[23].mxu0 }
0x1373   :  { %v6394_v42 = vadd.f32 %v11990_v50, %v7191_v63  ;;  %v7194_v9 = vadd.f32 %v7193_v7, %v7192_v33 }
0x1374   :  { %5103 = vrot.lane.b32.xlu1 %v11991_v25, %s8601_s5 }
0x1375   :  { %v6521_v30 = vadd.f32 %v11497_v36, %v6394_v42  ;;  %v6397_v62 = vadd.f32 %v11992_v27, %v7194_v9 }
0x1376   :  { %5105 = vrot.lane.b32.xlu0 %v11993_v26, %s8601_s5  ;;  %s6588_s5 = sshll.u32 %s8602_s8, 4  ;;  %s6589_s5 = int_to_ptr.vmem [resolvable:$true] %s6588_s5 }
0x1377   :  { %6553 = vst [vmem:[#allocation8 + $0x10] sm:$0xff] %v6521_v30  ;;  %v6522_v43 = vadd.f32 %v11497_v36, %v6397_v62  ;;  %v7195_v57 = vpop.f32.mrb[24].mxu0  ;;  %s8566_s26 = scalar_lea.vmem %s6589_s5, 4096  ;;  %p8571_p3 = scmp.lt.s32.totalorder %s6589_s5, %s6589_s5 }
0x1378   :  { %v7196_v10 = vpop.f32.mrb[25].mxu0  ;;  %p8567_p2 = scmp.ne.s32.totalorder %s6589_s5, %s8566_s26  ;;  %p8572_p4 = scmp.lt.s32.totalorder %s8566_s26, %s8566_s26 }
0x1379   :  { %6554 = vst [vmem:[#allocation8 + $0x18] sm:$0xff] %v6522_v43  ;;  %v7197_v24 = vadd.f32 %v7196_v10, %v7195_v57  ;;  %v7198_v12 = vpop.f32.mrb[26].mxu0  ;;  %v12002_v57 = vld [vmem:[#allocation25_spill] sm:$0xff] }
0x137a   :  { %v7199_v51 = vpop.f32.mrb[27].mxu0  ;;  %p8573_p5 = por %p8572_p4, %p8571_p3 }
0x137b   :  { %v6402_v60 = vadd.f32 %v7197_v24, %v11994_v23  ;;  %v7200_v55 = vadd.f32 %v7199_v51, %v7198_v12 }
0x137c   :  { %p8574_p6 = pnand %p8573_p5, %p8567_p2 }
0x137d   :  { %v6523_v11 = vadd.f32 %v11497_v36, %v6402_v60  ;;  %v6405_v52 = vadd.f32 %v7200_v55, %v11995_v2 }
0x137f   :  { %6555 = vst [vmem:[#allocation8 + $0x20] sm:$0xff] %v6523_v11  ;;  %v6524_v47 = vadd.f32 %v11497_v36, %v6405_v52  ;;  %v7201_v19 = vpop.f32.mrb[28].mxu0  ;;  %v12003_v11 = vld [vmem:[#allocation27_spill] sm:$0xff] }
0x1380   :  { %v7202_v6 = vpop.f32.mrb[29].mxu0 }
0x1381   :  { %6556 = vst [vmem:[#allocation8 + $0x28] sm:$0xff] %v6524_v47  ;;  %v7203_v3 = vadd.f32 %v7202_v6, %v7201_v19  ;;  %v7204_v18 = vpop.f32.mrb[30].mxu0 }
0x1382   :  { %v7205_v39 = vpop.f32.mrb[31].mxu0 }
0x1383   :  { %v6410_v59 = vadd.f32 %v11996_v4, %v7203_v3  ;;  %v7206_v40 = vadd.f32 %v7205_v39, %v7204_v18 }
0x1385   :  { %v6525_v49 = vadd.f32 %v11497_v36, %v6410_v59  ;;  %v6413_v15 = vadd.f32 %v11997_v35, %v7206_v40 }
0x1387   :  { %6557 = vst [vmem:[#allocation8 + $0x30] sm:$0xff] %v6525_v49  ;;  %v6526_v46 = vadd.f32 %v11497_v36, %v6413_v15  ;;  %v7207_v61 = vpop.f32.mrb[32].mxu0  ;;  %v12004_v15 = vld [vmem:[#allocation24_spill] sm:$0xff] }
0x1388   :  { %v7208_v54 = vpop.f32.mrb[33].mxu0 }
0x1389   :  { %6558 = vst [vmem:[#allocation8 + $0x38] sm:$0xff] %v6526_v46  ;;  %v7209_v16 = vadd.f32 %v7208_v54, %v7207_v61  ;;  %v7210_v58 = vpop.f32.mrb[34].mxu0 }
0x138a   :  { %v7211_v8 = vpop.f32.mrb[35].mxu0 }
0x138b   :  { %v6418_v17 = vadd.f32 %v7209_v16, %v11998_v31  ;;  %v7212_v38 = vadd.f32 %v7211_v8, %v7210_v58 }
0x138d   :  { %v6527_v44 = vadd.f32 %v11497_v36, %v6418_v17  ;;  %v6421_v45 = vadd.f32 %v7212_v38, %v11999_v14  ;;  %v6064_v0 = vpop.permute.xlu1 %6063  ;;  %v12005_v17 = vld [vmem:[#allocation26_spill] sm:$0xff] }
0x138e   :  { %6111 = vst.msk [vmem:[#allocation2 + $0x108] sm:$0xff] %vm3017_vm2, %v6064_v0 }
0x138f   :  { %6559 = vst [vmem:[#allocation8 + $0x40] sm:$0xff] %v6527_v44  ;;  %v6528_v20 = vadd.f32 %v11497_v36, %v6421_v45  ;;  %v7213_v48 = vpop.f32.mrb[36].mxu0  ;;  %v6066_v56 = vpop.permute.xlu0 %6065 }
0x1390   :  { %6112 = vst.msk [vmem:[#allocation2 + $0x118] sm:$0xff] %vm3017_vm2, %v6066_v56  ;;  %v7214_v28 = vpop.f32.mrb[37].mxu0 }
0x1391   :  { %6560 = vst [vmem:[#allocation8 + $0x48] sm:$0xff] %v6528_v20  ;;  %v7215_v34 = vadd.f32 %v7214_v28, %v7213_v48  ;;  %v5076_v22 = vpop.permute.xlu1 %5075  ;;  %v7216_v21 = vpop.f32.mrb[38].mxu0 }
0x1392   :  { %5123 = vst.msk [vmem:[#allocation2 + $0x100] sm:$0xff] %vm3017_vm2, %v5076_v22  ;;  %v7217_v29 = vpop.f32.mrb[39].mxu0 }
0x1393   :  { %v6426_v5 = vadd.f32 %v12000_v32, %v7215_v34  ;;  %v7218_v37 = vadd.f32 %v7217_v29, %v7216_v21  ;;  %v5078_v13 = vpop.permute.xlu0 %5077 }
0x1394   :  { %5124 = vst.msk [vmem:[#allocation2 + $0x110] sm:$0xff] %vm3017_vm2, %v5078_v13 }
0x1395   :  { %v6529_v53 = vadd.f32 %v11497_v36, %v6426_v5  ;;  %v6429_v1 = vadd.f32 %v12001_v41, %v7218_v37  ;;  %v6068_v63 = vpop.permute.xlu1 %6067  ;;  %v6160_v42 = vld [vmem:[#allocation2 + $0x108] sm:$0xff] }
0x1396   :  { %6113 = vst.msk [vmem:[#allocation2 + $0x128] sm:$0xff] %vm3017_vm2, %v6068_v63 }
0x1397   :  { %6561 = vst [vmem:[#allocation8 + $0x50] sm:$0xff] %v6529_v53  ;;  %v6530_v33 = vadd.f32 %v11497_v36, %v6429_v1  ;;  %v7219_v7 = vpop.f32.mrb[40].mxu0  ;;  %v6070_v50 = vpop.permute.xlu0 %6069  ;;  %v6162_v9 = vld [vmem:[#allocation2 + $0x118] sm:$0xff] }
0x1398   :  { %6114 = vst.msk [vmem:[#allocation2 + $0x138] sm:$0xff] %vm3017_vm2, %v6070_v50  ;;  %v7220_v25 = vpop.f32.mrb[41].mxu0  ;;  %v6208_v30 = vpack.c.bf16 %v6162_v9, %v6160_v42 }
0x1399   :  { %6562 = vst [vmem:[#allocation8 + $0x58] sm:$0xff] %v6530_v33  ;;  %v7221_v27 = vadd.f32 %v7220_v25, %v7219_v7  ;;  %v5080_v62 = vpop.permute.xlu1 %5079  ;;  %v7222_v26 = vpop.f32.mrb[42].mxu0  ;;  %v6159_v51 = vld [vmem:[#allocation2 + $0x100] sm:$0xff] }
0x139a   :  { %5125 = vst.msk [vmem:[#allocation2 + $0x120] sm:$0xff] %vm3017_vm2, %v5080_v62  ;;  %v7223_v43 = vpop.f32.mrb[43].mxu0  ;;  %6447 = vmatprep.mubr.bf16.mxu0 %v6208_v30 }
0x139b   :  { %v6434_v10 = vadd.f32 %v7221_v27, %v12002_v57  ;;  %v7224_v24 = vadd.f32 %v7223_v43, %v7222_v26  ;;  %v5082_v12 = vpop.permute.xlu0 %5081  ;;  %v6161_v23 = vld [vmem:[#allocation2 + $0x110] sm:$0xff] }
0x139c   :  { %5126 = vst.msk [vmem:[#allocation2 + $0x130] sm:$0xff] %vm3017_vm2, %v5082_v12  ;;  %v6207_v60 = vpack.c.bf16 %v6161_v23, %v6159_v51 }
0x139d   :  { %v6531_v55 = vadd.f32 %v11497_v36, %v6434_v10  ;;  %v6437_v2 = vadd.f32 %v7224_v24, %v12003_v11  ;;  %v6072_v52 = vpop.permute.xlu1 %6071  ;;  %v6164_v3 = vld [vmem:[#allocation2 + $0x128] sm:$0xff] }
0x139e   :  { %6115 = vst.msk [vmem:[#allocation2 + $0x148] sm:$0xff] %vm3017_vm2, %v6072_v52  ;;  %6448 = vmatmul.mubr.bf16.gmra.mrb[48].mxu0 %v6207_v60 }
0x139f   :  { %6563 = vst [vmem:[#allocation8 + $0x60] sm:$0xff] %v6531_v55  ;;  %v6532_v47 = vadd.f32 %v11497_v36, %v6437_v2  ;;  %v7225_v19 = vpop.f32.mrb[44].mxu0  ;;  %v6074_v6 = vpop.permute.xlu0 %6073  ;;  %v6166_v18 = vld [vmem:[#allocation2 + $0x138] sm:$0xff] }
0x13a0   :  { %6116 = vst.msk [vmem:[#allocation2 + $0x158] sm:$0xff] %vm3017_vm2, %v6074_v6  ;;  %v7226_v39 = vpop.f32.mrb[45].mxu0  ;;  %v6210_v4 = vpack.c.bf16 %v6166_v18, %v6164_v3 }
0x13a1   :  { %6564 = vst [vmem:[#allocation8 + $0x68] sm:$0xff] %v6532_v47  ;;  %v7227_v59 = vadd.f32 %v7226_v39, %v7225_v19  ;;  %v5084_v40 = vpop.permute.xlu1 %5083  ;;  %v7228_v49 = vpop.f32.mrb[46].mxu0  ;;  %v6163_v16 = vld [vmem:[#allocation2 + $0x120] sm:$0xff] }
0x13a2   :  { %5127 = vst.msk [vmem:[#allocation2 + $0x140] sm:$0xff] %vm3017_vm2, %v5084_v40  ;;  %v7229_v35 = vpop.f32.mrb[47].mxu0  ;;  %6455 = vmatprep.mubr.bf16.mxu0 %v6210_v4 }
0x13a3   :  { %v6442_v46 = vadd.f32 %v12004_v15, %v7227_v59  ;;  %v7230_v61 = vadd.f32 %v7229_v35, %v7228_v49  ;;  %v5086_v54 = vpop.permute.xlu0 %5085  ;;  %v6165_v58 = vld [vmem:[#allocation2 + $0x130] sm:$0xff] }
0x13a4   :  { %5128 = vst.msk [vmem:[#allocation2 + $0x150] sm:$0xff] %vm3017_vm2, %v5086_v54  ;;  %v6209_v8 = vpack.c.bf16 %v6165_v58, %v6163_v16 }
0x13a5   :  { %v6533_v31 = vadd.f32 %v11497_v36, %v6442_v46  ;;  %v6445_v38 = vadd.f32 %v12005_v17, %v7230_v61  ;;  %v6076_v44 = vpop.permute.xlu1 %6075  ;;  %v6168_v0 = vld [vmem:[#allocation2 + $0x148] sm:$0xff] }
0x13a6   :  { %6117 = vst.msk [vmem:[#allocation2 + $0x168] sm:$0xff] %vm3017_vm2, %v6076_v44  ;;  %6456 = vmatmul.mubr.bf16.gmra.mrb[52].mxu0 %v6209_v8 }
0x13a7   :  { %6565 = vst [vmem:[#allocation8 + $0x70] sm:$0xff] %v6533_v31  ;;  %v6534_v14 = vadd.f32 %v11497_v36, %v6445_v38  ;;  %v6078_v45 = vpop.permute.xlu0 %6077  ;;  %v6170_v20 = vld [vmem:[#allocation2 + $0x158] sm:$0xff] }
0x13a8   :  { %6118 = vst.msk [vmem:[#allocation2 + $0x178] sm:$0xff] %vm3017_vm2, %v6078_v45  ;;  %v6212_v48 = vpack.c.bf16 %v6170_v20, %v6168_v0  ;;  %v12006_v38 = vld [vmem:[#allocation29_spill] sm:$0xff]  ;;  %v12007_v0 = vld [vmem:[#allocation31_spill] sm:$0xff] }
0x13a9   :  { %6566 = vst [vmem:[#allocation8 + $0x78] sm:$0xff] %v6534_v14  ;;  %v5088_v56 = vpop.permute.xlu1 %5087  ;;  %v6167_v34 = vld [vmem:[#allocation2 + $0x140] sm:$0xff] }
0x13aa   :  { %5129 = vst.msk [vmem:[#allocation2 + $0x160] sm:$0xff] %vm3017_vm2, %v5088_v56  ;;  %6463 = vmatprep.mubr.bf16.mxu0 %v6212_v48 }
0x13ab   :  { %v5090_v28 = vpop.permute.xlu0 %5089  ;;  %v6169_v22 = vld [vmem:[#allocation2 + $0x150] sm:$0xff] }
0x13ac   :  { %5130 = vst.msk [vmem:[#allocation2 + $0x170] sm:$0xff] %vm3017_vm2, %v5090_v28  ;;  %v6211_v21 = vpack.c.bf16 %v6169_v22, %v6167_v34 }
0x13ad   :  { %v6172_v29 = vld [vmem:[#allocation2 + $0x168] sm:$0xff] }
0x13ae   :  { %6464 = vmatmul.mubr.bf16.gmra.mrb[56].mxu0 %v6211_v21 }
0x13af   :  { %v6174_v32 = vld [vmem:[#allocation2 + $0x178] sm:$0xff] }
0x13b0   :  { %v6214_v5 = vpack.c.bf16 %v6174_v32, %v6172_v29  ;;  %v12008_v29 = vld [vmem:[#allocation28_spill] sm:$0xff] }
0x13b1   :  { %v6171_v37 = vld [vmem:[#allocation2 + $0x160] sm:$0xff] }
0x13b2   :  { %6471 = vmatprep.mubr.bf16.mxu0 %v6214_v5 }
0x13b3   :  { %v6173_v13 = vld [vmem:[#allocation2 + $0x170] sm:$0xff] }
0x13b4   :  { %v6213_v53 = vpack.c.bf16 %v6173_v13, %v6171_v37  ;;  %v12009_v13 = vld [vmem:[#allocation30_spill] sm:$0xff] }
0x13b6   :  { %6472 = vmatmul.mubr.bf16.gmra.mrb[60].mxu0 %v6213_v53 }
0x13ca   :  { %v6080_v41 = vpop.permute.xlu1 %6079 }
0x13cb   :  { %6119 = vst.msk [vmem:[#allocation2 + $0x188] sm:$0xff] %vm3017_vm2, %v6080_v41 }
0x13cc   :  { %v6082_v1 = vpop.permute.xlu0 %6081 }
0x13cd   :  { %6120 = vst.msk [vmem:[#allocation2 + $0x198] sm:$0xff] %vm3017_vm2, %v6082_v1 }
0x13ce   :  { %v5092_v63 = vpop.permute.xlu1 %5091 }
0x13cf   :  { %5131 = vst.msk [vmem:[#allocation2 + $0x180] sm:$0xff] %vm3017_vm2, %v5092_v63 }
0x13d0   :  { %v5094_v33 = vpop.permute.xlu0 %5093 }
0x13d1   :  { %5132 = vst.msk [vmem:[#allocation2 + $0x190] sm:$0xff] %vm3017_vm2, %v5094_v33 }
0x13d2   :  { %v6084_v7 = vpop.permute.xlu1 %6083  ;;  %v6176_v42 = vld [vmem:[#allocation2 + $0x188] sm:$0xff] }
0x13d3   :  { %6121 = vst.msk [vmem:[#allocation2 + $0x1a8] sm:$0xff] %vm3017_vm2, %v6084_v7 }
0x13d4   :  { %v6086_v50 = vpop.permute.xlu0 %6085  ;;  %v6178_v9 = vld [vmem:[#allocation2 + $0x198] sm:$0xff] }
0x13d5   :  { %6122 = vst.msk [vmem:[#allocation2 + $0x1b8] sm:$0xff] %vm3017_vm2, %v6086_v50  ;;  %v6216_v25 = vpack.c.bf16 %v6178_v9, %v6176_v42  ;;  %v12010_v42 = vld [vmem:[#allocation33_spill] sm:$0xff] }
0x13d6   :  { %v5096_v30 = vpop.permute.xlu1 %5095  ;;  %v6175_v62 = vld [vmem:[#allocation2 + $0x180] sm:$0xff] }
0x13d7   :  { %5133 = vst.msk [vmem:[#allocation2 + $0x1a0] sm:$0xff] %vm3017_vm2, %v5096_v30  ;;  %6479 = vmatprep.mubr.bf16.mxu0 %v6216_v25 }
0x13d8   :  { %v5098_v27 = vpop.permute.xlu0 %5097  ;;  %v6177_v26 = vld [vmem:[#allocation2 + $0x190] sm:$0xff] }
0x13d9   :  { %5134 = vst.msk [vmem:[#allocation2 + $0x1b0] sm:$0xff] %vm3017_vm2, %v5098_v27  ;;  %v6215_v43 = vpack.c.bf16 %v6177_v26, %v6175_v62  ;;  %v12011_v27 = vld [vmem:[#allocation35_spill] sm:$0xff] }
0x13da   :  { %v6088_v57 = vpop.permute.xlu1 %6087  ;;  %v6180_v24 = vld [vmem:[#allocation2 + $0x1a8] sm:$0xff] }
0x13db   :  { %6123 = vst.msk [vmem:[#allocation2 + $0x1c8] sm:$0xff] %vm3017_vm2, %v6088_v57  ;;  %6480 = vmatmul.mubr.bf16.gmra.mrb[64].mxu0 %v6215_v43 }
0x13dc   :  { %v6090_v10 = vpop.permute.xlu0 %6089  ;;  %v6182_v12 = vld [vmem:[#allocation2 + $0x1b8] sm:$0xff] }
0x13dd   :  { %6124 = vst.msk [vmem:[#allocation2 + $0x1d8] sm:$0xff] %vm3017_vm2, %v6090_v10  ;;  %v6218_v51 = vpack.c.bf16 %v6182_v12, %v6180_v24 }
0x13de   :  { %v5100_v23 = vpop.permute.xlu1 %5099  ;;  %v6179_v55 = vld [vmem:[#allocation2 + $0x1a0] sm:$0xff] }
0x13df   :  { %5135 = vst.msk [vmem:[#allocation2 + $0x1c0] sm:$0xff] %vm3017_vm2, %v5100_v23  ;;  %6487 = vmatprep.mubr.bf16.mxu0 %v6218_v51  ;;  %v12012_v51 = vld [vmem:[#allocation32_spill] sm:$0xff] }
0x13e0   :  { %v5102_v60 = vpop.permute.xlu0 %5101  ;;  %v6181_v11 = vld [vmem:[#allocation2 + $0x1b0] sm:$0xff] }
0x13e1   :  { %5136 = vst.msk [vmem:[#allocation2 + $0x1d0] sm:$0xff] %vm3017_vm2, %v5102_v60  ;;  %v6217_v2 = vpack.c.bf16 %v6181_v11, %v6179_v55  ;;  %v12013_v11 = vld [vmem:[#allocation34_spill] sm:$0xff] }
0x13e2   :  { %v6092_v52 = vpop.permute.xlu1 %6091  ;;  %v6184_v19 = vld [vmem:[#allocation2 + $0x1c8] sm:$0xff] }
0x13e3   :  { %6125 = vst.msk [vmem:[#allocation2 + $0x1e8] sm:$0xff] %vm3017_vm2, %v6092_v52  ;;  %6488 = vmatmul.mubr.bf16.gmra.mrb[68].mxu0 %v6217_v2 }
0x13e4   :  { %v6094_v47 = vpop.permute.xlu0 %6093  ;;  %v6186_v6 = vld [vmem:[#allocation2 + $0x1d8] sm:$0xff] }
0x13e5   :  { %6126 = vst.msk [vmem:[#allocation2 + $0x1f8] sm:$0xff] %vm3017_vm2, %v6094_v47  ;;  %v6220_v3 = vpack.c.bf16 %v6186_v6, %v6184_v19 }
0x13e6   :  { %v5104_v18 = vpop.permute.xlu1 %5103  ;;  %v6183_v4 = vld [vmem:[#allocation2 + $0x1c0] sm:$0xff] }
0x13e7   :  { %5137 = vst.msk [vmem:[#allocation2 + $0x1e0] sm:$0xff] %vm3017_vm2, %v5104_v18  ;;  %6495 = vmatprep.mubr.bf16.mxu0 %v6220_v3 }
0x13e8   :  { %v5106_v39 = vpop.permute.xlu0 %5105  ;;  %v6185_v59 = vld [vmem:[#allocation2 + $0x1d0] sm:$0xff] }
0x13e9   :  { %5138 = vst.msk [vmem:[#allocation2 + $0x1f0] sm:$0xff] %vm3017_vm2, %v5106_v39  ;;  %v6219_v40 = vpack.c.bf16 %v6185_v59, %v6183_v4  ;;  %v12014_v39 = vld [vmem:[#allocation37_spill] sm:$0xff] }
0x13ea   :  { %v6188_v49 = vld [vmem:[#allocation2 + $0x1e8] sm:$0xff] }
0x13eb   :  { %6496 = vmatmul.mubr.bf16.gmra.mrb[72].mxu0 %v6219_v40 }
0x13ec   :  { %v6190_v35 = vld [vmem:[#allocation2 + $0x1f8] sm:$0xff] }
0x13ed   :  { %v6222_v15 = vpack.c.bf16 %v6190_v35, %v6188_v49  ;;  %v12015_v49 = vld [vmem:[#allocation39_spill] sm:$0xff] }
0x13ee   :  { %v6187_v46 = vld [vmem:[#allocation2 + $0x1e0] sm:$0xff] }
0x13ef   :  { %6503 = vmatprep.mubr.bf16.mxu0 %v6222_v15 }
0x13f0   :  { %v6189_v61 = vld [vmem:[#allocation2 + $0x1f0] sm:$0xff] }
0x13f1   :  { %v6221_v54 = vpack.c.bf16 %v6189_v61, %v6187_v46 }
0x13f3   :  { %6504 = vmatmul.mubr.bf16.gmra.mrb[76].mxu0 %v6221_v54 }
0x1471   :  { %v7231_v16 = vpop.f32.mrb[48].mxu0 }
0x1472   :  { %v7232_v58 = vpop.f32.mrb[49].mxu0 }
0x1473   :  { %v7233_v8 = vadd.f32 %v7232_v58, %v7231_v16  ;;  %v7234_v31 = vpop.f32.mrb[50].mxu0 }
0x1474   :  { %v7235_v17 = vpop.f32.mrb[51].mxu0 }
0x1475   :  { %v6450_v44 = vadd.f32 %v7233_v8, %v12006_v38  ;;  %v7236_v14 = vadd.f32 %v7235_v17, %v7234_v31  ;;  %v12016_v8 = vld [vmem:[#allocation36_spill] sm:$0xff] }
0x1477   :  { %v6535_v45 = vadd.f32 %v11497_v36, %v6450_v44  ;;  %v6453_v20 = vadd.f32 %v7236_v14, %v12007_v0  ;;  %v12017_v44 = vld [vmem:[#allocation38_spill] sm:$0xff] }
0x1479   :  { %6567 = vst [vmem:[#allocation8 + $0x80] sm:$0xff] %v6535_v45  ;;  %v6536_v48 = vadd.f32 %v11497_v36, %v6453_v20  ;;  %v7237_v56 = vpop.f32.mrb[52].mxu0 }
0x147a   :  { %v7238_v28 = vpop.f32.mrb[53].mxu0 }
0x147b   :  { %6568 = vst [vmem:[#allocation8 + $0x88] sm:$0xff] %v6536_v48  ;;  %v7239_v34 = vadd.f32 %v7238_v28, %v7237_v56  ;;  %v7240_v22 = vpop.f32.mrb[54].mxu0 }
0x147c   :  { %v7241_v21 = vpop.f32.mrb[55].mxu0 }
0x147d   :  { %v6458_v32 = vadd.f32 %v12008_v29, %v7239_v34  ;;  %v7242_v5 = vadd.f32 %v7241_v21, %v7240_v22  ;;  %v12018_v34 = vld [vmem:[#allocation41_spill] sm:$0xff] }
0x147f   :  { %v6537_v37 = vadd.f32 %v11497_v36, %v6458_v32  ;;  %v6461_v53 = vadd.f32 %v12009_v13, %v7242_v5  ;;  %v12019_v32 = vld [vmem:[#allocation43_spill] sm:$0xff] }
0x1481   :  { %6569 = vst [vmem:[#allocation8 + $0x90] sm:$0xff] %v6537_v37  ;;  %v6538_v41 = vadd.f32 %v11497_v36, %v6461_v53  ;;  %v7243_v1 = vpop.f32.mrb[56].mxu0 }
0x1482   :  { %v7244_v63 = vpop.f32.mrb[57].mxu0 }
0x1483   :  { %6570 = vst [vmem:[#allocation8 + $0x98] sm:$0xff] %v6538_v41  ;;  %v7245_v33 = vadd.f32 %v7244_v63, %v7243_v1  ;;  %v7246_v7 = vpop.f32.mrb[58].mxu0 }
0x1484   :  { %v7247_v50 = vpop.f32.mrb[59].mxu0 }
0x1485   :  { %v6466_v9 = vadd.f32 %v7245_v33, %v12010_v42  ;;  %v7248_v25 = vadd.f32 %v7247_v50, %v7246_v7  ;;  %v12020_v33 = vld [vmem:[#allocation40_spill] sm:$0xff] }
0x1487   :  { %v6539_v30 = vadd.f32 %v11497_v36, %v6466_v9  ;;  %v6469_v62 = vadd.f32 %v7248_v25, %v12011_v27  ;;  %v12021_v9 = vld [vmem:[#allocation42_spill] sm:$0xff] }
0x1489   :  { %6571 = vst [vmem:[#allocation8 + $0xa0] sm:$0xff] %v6539_v30  ;;  %v6540_v26 = vadd.f32 %v11497_v36, %v6469_v62  ;;  %v7249_v43 = vpop.f32.mrb[60].mxu0 }
0x148a   :  { %v7250_v57 = vpop.f32.mrb[61].mxu0 }
0x148b   :  { %6572 = vst [vmem:[#allocation8 + $0xa8] sm:$0xff] %v6540_v26  ;;  %v7251_v10 = vadd.f32 %v7250_v57, %v7249_v43  ;;  %v7252_v24 = vpop.f32.mrb[62].mxu0 }
0x148c   :  { %v7253_v12 = vpop.f32.mrb[63].mxu0 }
0x148d   :  { %v6474_v23 = vadd.f32 %v12012_v51, %v7251_v10  ;;  %v7254_v60 = vadd.f32 %v7253_v12, %v7252_v24 }
0x148f   :  { %v6541_v55 = vadd.f32 %v11497_v36, %v6474_v23  ;;  %v6477_v2 = vadd.f32 %v12013_v11, %v7254_v60 }
0x1491   :  { %6573 = vst [vmem:[#allocation8 + $0xb0] sm:$0xff] %v6541_v55  ;;  %v6542_v52 = vadd.f32 %v11497_v36, %v6477_v2 }
0x1493   :  { %6574 = vst [vmem:[#allocation8 + $0xb8] sm:$0xff] %v6542_v52 }
0x14ae   :  { %v7255_v47 = vpop.f32.mrb[64].mxu0 }
0x14af   :  { %v7256_v19 = vpop.f32.mrb[65].mxu0 }
0x14b0   :  { %v7257_v6 = vadd.f32 %v7256_v19, %v7255_v47  ;;  %v7258_v3 = vpop.f32.mrb[66].mxu0 }
0x14b1   :  { %v7259_v18 = vpop.f32.mrb[67].mxu0 }
0x14b2   :  { %v6482_v4 = vadd.f32 %v7257_v6, %v12014_v39  ;;  %v7260_v59 = vadd.f32 %v7259_v18, %v7258_v3 }
0x14b4   :  { %v6543_v40 = vadd.f32 %v11497_v36, %v6482_v4  ;;  %v6485_v35 = vadd.f32 %v7260_v59, %v12015_v49 }
0x14b6   :  { %6575 = vst [vmem:[#allocation8 + $0xc0] sm:$0xff] %v6543_v40  ;;  %v6544_v15 = vadd.f32 %v11497_v36, %v6485_v35  ;;  %v7261_v46 = vpop.f32.mrb[68].mxu0 }
0x14b7   :  { %v7262_v61 = vpop.f32.mrb[69].mxu0 }
0x14b8   :  { %6576 = vst [vmem:[#allocation8 + $0xc8] sm:$0xff] %v6544_v15  ;;  %v7263_v54 = vadd.f32 %v7262_v61, %v7261_v46  ;;  %v7264_v16 = vpop.f32.mrb[70].mxu0 }
0x14b9   :  { %v7265_v58 = vpop.f32.mrb[71].mxu0 }
0x14ba   :  { %v6490_v31 = vadd.f32 %v12016_v8, %v7263_v54  ;;  %v7266_v17 = vadd.f32 %v7265_v58, %v7264_v16 }
0x14bc   :  { %v6545_v38 = vadd.f32 %v11497_v36, %v6490_v31  ;;  %v6493_v14 = vadd.f32 %v12017_v44, %v7266_v17 }
0x14be   :  { %6577 = vst [vmem:[#allocation8 + $0xd0] sm:$0xff] %v6545_v38  ;;  %v6546_v45 = vadd.f32 %v11497_v36, %v6493_v14  ;;  %v7267_v0 = vpop.f32.mrb[72].mxu0 }
0x14bf   :  { %v7268_v20 = vpop.f32.mrb[73].mxu0 }
0x14c0   :  { %6578 = vst [vmem:[#allocation8 + $0xd8] sm:$0xff] %v6546_v45  ;;  %v7269_v48 = vadd.f32 %v7268_v20, %v7267_v0  ;;  %v7270_v56 = vpop.f32.mrb[74].mxu0 }
0x14c1   :  { %v7271_v28 = vpop.f32.mrb[75].mxu0 }
0x14c2   :  { %v6498_v22 = vadd.f32 %v7269_v48, %v12018_v34  ;;  %v7272_v21 = vadd.f32 %v7271_v28, %v7270_v56 }
0x14c4   :  { %v6547_v29 = vadd.f32 %v11497_v36, %v6498_v22  ;;  %v6501_v5 = vadd.f32 %v7272_v21, %v12019_v32 }
0x14c6   :  { %6579 = vst [vmem:[#allocation8 + $0xe0] sm:$0xff] %v6547_v29  ;;  %v6548_v37 = vadd.f32 %v11497_v36, %v6501_v5  ;;  %v7273_v13 = vpop.f32.mrb[76].mxu0 }
0x14c7   :  { %v7274_v53 = vpop.f32.mrb[77].mxu0 }
0x14c8   :  { %6580 = vst [vmem:[#allocation8 + $0xe8] sm:$0xff] %v6548_v37  ;;  %v7275_v41 = vadd.f32 %v7274_v53, %v7273_v13  ;;  %v7276_v1 = vpop.f32.mrb[78].mxu0 }
0x14c9   :  { %v7277_v63 = vpop.f32.mrb[79].mxu0 }
0x14ca   :  { %v6506_v7 = vadd.f32 %v12020_v33, %v7275_v41  ;;  %v7278_v50 = vadd.f32 %v7277_v63, %v7276_v1 }
0x14cc   :  { %v6549_v42 = vadd.f32 %v11497_v36, %v6506_v7  ;;  %v6509_v25 = vadd.f32 %v12021_v9, %v7278_v50 }
0x14ce   :  { %6581 = vst [vmem:[#allocation8 + $0xf0] sm:$0xff] %v6549_v42  ;;  %v6550_v30 = vadd.f32 %v11497_v36, %v6509_v25 }
0x14d0   :  { %6582 = vst [vmem:[#allocation8 + $0xf8] sm:$0xff] %v6550_v30 }
0x14d1   :  { %8577 = shalt.err (!%p8574_p6)
}
0x14d2   :  { %s8578_s29 = scalar_lea.hbm %s11627_s9, 4096 }
0x14d3   :  { %p8579_p7 = scmp.ne.s32.totalorder %s11627_s9, %s8578_s29  ;;  %p8582_p8 = scmp.lt.u32.totalorder %s8578_s29, %s11627_s9 }
0x14d5   :  { %p8584_p9 = pnand %p8582_p8, %p8579_p7 }
0x14d7   :  { %8587 = shalt.err (!%p8584_p9)
}
0x14d8   :  { %s8603_s10 = smov 128   ;;  %s8604_s13 = smov 8  }
0x14d9   :  { %6594 = dma.vmem_to_hbm [thread:$0]  %s6589_s5, 4096, %s11627_s9, [#allocation5], %s8603_s10, %s8603_s10, %s8604_s13  }
0x14da   :  { %8592 = dma.done.wait [#allocation5], 4096  }
0x14db   :  { %8593 = vsyncadd [#allocation5], 4294963200 }
0x14dc   :  { %6598 = vsyncpa [#allocation4], 1 }
0x14dd   :  { %6599 = vsyncpa [#allocation7], 1 }
0x14de   :  { %6600 = vsyncpa [#allocation5], 1 }

</bundles_post_ra>
